<compile_context>
chip_gen: v5e
topology: v5e:2x2
jax: 0.10.0
libtpu: 0.0.40
codegen_flags: <defaults>
</compile_context>

<pallas_src>
import functools
import math

import jax
import jax.numpy as jnp
import numpy as np
from jax import lax
from jax.experimental import pallas as pl
from jax.experimental.pallas import tpu as pltpu

_LANE = 128       # TPU lane width: channel axis is padded to a multiple of this
_T_PAD = 8        # sublane-aligned left margin for the seq3 input scratch


def _round_up(x, m):
    return (x + m - 1) // m * m


# -----------------------------------------------------------------------------
# Bilinear (half-pixel, align_corners=False) coefficients — static Python values
# -----------------------------------------------------------------------------
def _interp_coeffs(n_in, n_out):
    coeffs = []
    for d in range(n_out):
        src = (d + 0.5) * (n_in / n_out) - 0.5
        src = min(max(src, 0.0), float(n_in - 1))
        lo = int(math.floor(src))
        hi = min(lo + 1, n_in - 1)
        f = src - lo
        coeffs.append((lo, hi, 1.0 - f, f))
    return tuple(coeffs)


def _interp_matrix(n_in, n_out):
    m = np.zeros((n_out, n_in), np.float32)
    for d, (lo, hi, a0, a1) in enumerate(_interp_coeffs(n_in, n_out)):
        m[d, lo] += a0
        m[d, hi] += a1
    return jnp.asarray(m)


# -----------------------------------------------------------------------------
# In-kernel building blocks
# -----------------------------------------------------------------------------
def _row_upsample_into(up_ref, src_ref, rows):
    """Fill up_ref[(HL+2), W+2, C] with the row-bilinear upsample of src_ref[0].

    src_ref[0] is already W-resized and W-zero-padded; rows 0 and HL+1 of the
    scratch are the zero halo.  `rows` are static (lo, hi, w_lo, w_hi) tuples.
    """
    wlp, c = up_ref.shape[1], up_ref.shape[2]
    n_out = up_ref.shape[0] - 2
    zero_row = jnp.zeros((wlp, c), jnp.float32)
    up_ref[0] = zero_row
    up_ref[n_out + 1] = zero_row
    for y, (lo, hi, a0, a1) in enumerate(rows):
        if a1 == 0.0:                       # exact / clamped source row (a0 == 1)
            up_ref[y + 1] = src_ref[0, lo]
        else:
            up_ref[y + 1] = a0 * src_ref[0, lo] + a1 * src_ref[0, hi]


def _conv3x3_bn_relu(xpad, w, b, out_w, x0=0):
    """3x3 'same' conv (+folded BN bias) + ReLU as one wide-K MXU matmul.

    xpad: (H+2, >= x0+out_w+2, C) f32 with a zero border around the valid window
          starting at column x0+1.
    w:    (9*C, Co) bf16 (rows ordered (dy, dx, ci)),  b: (1, Co) f32.
    Returns (H*out_w, Co) f32.
    """
    hp, _, c = xpad.shape
    h = hp - 2
    taps = [xpad[dy:dy + h, x0 + dx:x0 + dx + out_w, :]
            for dy in range(3) for dx in range(3)]
    patches = jnp.concatenate(taps, axis=-1).reshape(h * out_w, 9 * c)
    y = jnp.dot(patches.astype(jnp.bfloat16), w,
                preferred_element_type=jnp.float32) + b
    return jnp.maximum(y, 0.0)


# -----------------------------------------------------------------------------
# Fused kernels (one grid step == one batch element)
# -----------------------------------------------------------------------------
def _gf2_kernel(l_ref, hw_ref, gw_ref, w1_ref, b1_ref, w2_ref, b2_ref,
                w3_ref, b3_ref, o_ref, up_ref, tp_ref, *, rows_h, rows_g):
    _, hl, wl, c = l_ref.shape

    # seq1(up(H)) + seq2(up(G)) — upsampled images exist only in the shared
    # VMEM scratch (the first conv reads it by value before it is reused).
    _row_upsample_into(up_ref, hw_ref, rows_h)
    acc = _conv3x3_bn_relu(up_ref[...], w1_ref[...], b1_ref[...], wl)
    _row_upsample_into(up_ref, gw_ref, rows_g)
    acc = acc + _conv3x3_bn_relu(up_ref[...], w2_ref[...], b2_ref[...], wl)
    acc = acc + l_ref[0].reshape(hl * wl, c)

    # seq3 on T: zero-padded into a VMEM scratch using only aligned stores.
    tp_ref[...] = jnp.zeros(tp_ref.shape, tp_ref.dtype)
    tp_ref[1:hl + 1, _T_PAD:_T_PAD + wl, :] = acc.reshape(hl, wl, c)
    y = _conv3x3_bn_relu(tp_ref[...], w3_ref[...], b3_ref[...], wl, x0=_T_PAD - 1)
    o_ref[0] = y.reshape(hl, wl, c).astype(o_ref.dtype)


def _gf1_kernel(l_ref, gw_ref, w1_ref, b1_ref, w3_ref, b3_ref,
                o_ref, up_ref, tp_ref, *, rows_g):
    _, hl, wl, c = l_ref.shape

    _row_upsample_into(up_ref, gw_ref, rows_g)
    acc = _conv3x3_bn_relu(up_ref[...], w1_ref[...], b1_ref[...], wl)
    acc = acc + l_ref[0].reshape(hl * wl, c)

    tp_ref[...] = jnp.zeros(tp_ref.shape, tp_ref.dtype)
    tp_ref[1:hl + 1, _T_PAD:_T_PAD + wl, :] = acc.reshape(hl, wl, c)
    y = _conv3x3_bn_relu(tp_ref[...], w3_ref[...], b3_ref[...], wl, x0=_T_PAD - 1)
    o_ref[0] = y.reshape(hl, wl, c).astype(o_ref.dtype)


# -----------------------------------------------------------------------------
# pallas_call wrappers
# -----------------------------------------------------------------------------
def _common_params():
    return pltpu.CompilerParams(dimension_semantics=("parallel",),
                                vmem_limit_bytes=32 * 1024 * 1024)


def _gf2(l_n, hw, gw, w1, b1, w2, b2, w3, b3, rows_h, rows_g):
    n, hl, wl, cp = l_n.shape
    hh, hg = hw.shape[1], gw.shape[1]
    wlp = wl + 2

    def img_spec(h_, w_):
        return pl.BlockSpec((1, h_, w_, cp), lambda nn: (nn, 0, 0, 0))

    wspec = pl.BlockSpec((9 * cp, cp), lambda nn: (0, 0))
    bspec = pl.BlockSpec((1, cp), lambda nn: (0, 0))
    kern = functools.partial(_gf2_kernel, rows_h=rows_h, rows_g=rows_g)
    return pl.pallas_call(
        kern,
        out_shape=jax.ShapeDtypeStruct((n, hl, wl, cp), jnp.float32),
        grid=(n,),
        in_specs=[img_spec(hl, wl), img_spec(hh, wlp), img_spec(hg, wlp),
                  wspec, bspec, wspec, bspec, wspec, bspec],
        out_specs=img_spec(hl, wl),
        scratch_shapes=[pltpu.VMEM((hl + 2, wlp, cp), jnp.float32),
                        pltpu.VMEM((hl + 2, wl + 2 * _T_PAD, cp), jnp.float32)],
        compiler_params=_common_params(),
    )(l_n, hw, gw, w1, b1, w2, b2, w3, b3)


def _gf1(l_n, gw, w1, b1, w3, b3, rows_g):
    n, hl, wl, cp = l_n.shape
    hg = gw.shape[1]
    wlp = wl + 2

    def img_spec(h_, w_):
        return pl.BlockSpec((1, h_, w_, cp), lambda nn: (nn, 0, 0, 0))

    wspec = pl.BlockSpec((9 * cp, cp), lambda nn: (0, 0))
    bspec = pl.BlockSpec((1, cp), lambda nn: (0, 0))
    kern = functools.partial(_gf1_kernel, rows_g=rows_g)
    return pl.pallas_call(
        kern,
        out_shape=jax.ShapeDtypeStruct((n, hl, wl, cp), jnp.float32),
        grid=(n,),
        in_specs=[img_spec(hl, wl), img_spec(hg, wlp),
                  wspec, bspec, wspec, bspec],
        out_specs=img_spec(hl, wl),
        scratch_shapes=[pltpu.VMEM((hl + 2, wlp, cp), jnp.float32),
                        pltpu.VMEM((hl + 2, wl + 2 * _T_PAD, cp), jnp.float32)],
        compiler_params=_common_params(),
    )(l_n, gw, w1, b1, w3, b3)


# -----------------------------------------------------------------------------
# Parameter preparation (fold BN into conv; pad channels; bf16 weights)
# -----------------------------------------------------------------------------
def _fold_conv_bn(conv_w, conv_b, gamma, beta, mean, var, eps=1e-5):
    # conv_w: (Co, Ci, 3, 3) PyTorch layout -> (w9: (9, Ci, Co) f32, b: (1, Co) f32)
    scale = gamma * lax.rsqrt(var + eps)
    co, ci = conv_w.shape[0], conv_w.shape[1]
    w9 = jnp.transpose(conv_w, (2, 3, 1, 0)).reshape(9, ci, co) * scale[None, None, :]
    b = ((conv_b - mean) * scale + beta).reshape(1, co)
    return w9, b


def _prep_wb(w9, b, cp):
    c = w9.shape[1]
    if cp != c:
        w9 = jnp.pad(w9, ((0, 0), (0, cp - c), (0, cp - c)))
        b = jnp.pad(b, ((0, 0), (0, cp - c)))
    return w9.reshape(9 * cp, cp).astype(jnp.bfloat16), b.astype(jnp.float32)


def init_gf_params(key, c):
    params = {}
    for i, name in enumerate(('seq1', 'seq2', 'seq3')):
        k = jax.random.fold_in(key, i)
        kw, kb, kg, kbt = jax.random.split(k, 4)
        conv_w = 0.05 * jax.random.normal(kw, (c, c, 3, 3), jnp.float32)
        conv_b = 0.05 * jax.random.normal(kb, (c,), jnp.float32)
        gamma = 1.0 + 0.05 * jax.random.normal(kg, (c,), jnp.float32)
        beta = 0.05 * jax.random.normal(kbt, (c,), jnp.float32)
        mean = jnp.zeros((c,), jnp.float32)
        var = jnp.ones((c,), jnp.float32)
        params[name] = _fold_conv_bn(conv_w, conv_b, gamma, beta, mean, var)
    return params


# -----------------------------------------------------------------------------
# Public forward (NCHW in / NCHW out, matching the PyTorch module)
# -----------------------------------------------------------------------------
def gf_forward(L, H, G, params):
    """L, H, G are NCHW (H may be None). Returns NCHW float32."""
    n, c, hl, wl = L.shape
    cp = _round_up(c, _LANE)

    def to_lane_nhwc(t):
        x = jnp.transpose(t, (0, 2, 3, 1)).astype(jnp.float32)
        if cp != c:
            x = jnp.pad(x, ((0, 0), (0, 0), (0, 0), (0, cp - c)))
        return x

    def w_resize_pad(x):
        # (N, h_in, w_in, Cp) -> (N, h_in, WL+2, Cp): W-bilinear + zero W-halo.
        mx = jnp.pad(_interp_matrix(x.shape[2], wl), ((1, 1), (0, 0)))
        return jnp.einsum('xX,nYXc->nYxc', mx, x)

    w1, b1 = _prep_wb(*params['seq1'], cp)
    w3, b3 = _prep_wb(*params['seq3'], cp)
    l_n = to_lane_nhwc(L)

    if H is not None:
        w2, b2 = _prep_wb(*params['seq2'], cp)
        hw = w_resize_pad(to_lane_nhwc(H))
        gw = w_resize_pad(to_lane_nhwc(G))
        out = _gf2(l_n, hw, gw, w1, b1, w2, b2, w3, b3,
                   _interp_coeffs(H.shape[2], hl), _interp_coeffs(G.shape[2], hl))
    else:
        gw = w_resize_pad(to_lane_nhwc(G))
        out = _gf1(l_n, gw, w1, b1, w3, b3, _interp_coeffs(G.shape[2], hl))

    return jnp.transpose(out[..., :c], (0, 3, 1, 2))


# -----------------------------------------------------------------------------
# Pure-JAX (f32) reference for the correctness check
# -----------------------------------------------------------------------------
def _ref_forward(L, H, G, params):
    hl, wl = L.shape[2], L.shape[3]
    to_nhwc = lambda t: jnp.transpose(t, (0, 2, 3, 1)).astype(jnp.float32)

    def up(x):
        my = _interp_matrix(x.shape[1], hl)
        mx = _interp_matrix(x.shape[2], wl)
        return jnp.einsum('yY,nYXc,xX->nyxc', my, x, mx)

    def cbr(x, w9, b):
        w = w9.reshape(3, 3, w9.shape[1], w9.shape[2])
        y = lax.conv_general_dilated(x, w, (1, 1), 'SAME',
                                     dimension_numbers=('NHWC', 'HWIO', 'NHWC'))
        return jnp.maximum(y + b.reshape(1, 1, 1, -1), 0.0)

    l_n = to_nhwc(L)
    if H is not None:
        t = (l_n + cbr(up(to_nhwc(H)), *params['seq1'])
             + cbr(up(to_nhwc(G)), *params['seq2']))
    else:
        t = l_n + cbr(up(to_nhwc(G)), *params['seq1'])
    return jnp.transpose(cbr(t, *params['seq3']), (0, 3, 1, 2))


if __name__ == "__main__":
    key = jax.random.PRNGKey(0)
    kl, kh, kg, kp = jax.random.split(key, 4)

    n, c = 2, 96                      # channels padded to 128 lanes by the wrapper
    L = jax.random.normal(kl, (n, c, 16, 16), jnp.float32)   # finest level
    Hf = jax.random.normal(kh, (n, c, 8, 8), jnp.float32)    # coarser level
    G = jax.random.normal(kg, (n, c, 4, 4), jnp.float32)     # global guidance
    params = init_gf_params(kp, c)

    fwd = jax.jit(gf_forward)

    def check(name, out, ref):
        assert out.shape == ref.shape, (name, out.shape, ref.shape)
        assert bool(jnp.isfinite(out).all()), name
        max_err = float(jnp.max(jnp.abs(out - ref)))
        rel_rms = float(jnp.sqrt(jnp.mean((out - ref) ** 2))
                        / (jnp.sqrt(jnp.mean(ref ** 2)) + 1e-12))
        # bf16 MXU inputs with f32 accumulation -> small, bounded mismatch vs f32.
        assert max_err < 2e-1 and rel_rms < 2e-2, (name, max_err, rel_rms)

    out1 = jax.block_until_ready(fwd(L, Hf, G, params))       # H != None
    check("branch-H", out1, _ref_forward(L, Hf, G, params))

    out2 = jax.block_until_ready(fwd(L, None, G, params))     # H == None
    check("branch-noH", out2, _ref_forward(L, None, G, params))

    print("KERNEL_OK")
</pallas_src>

<mosaic_0001>
module attributes {stable_mosaic.version = 11 : i64} {
  func.func @_gf2_kernel(%arg0: i32, %arg1: memref<1x16x16x128xf32, #tpu.memory_space<vmem>>, %arg2: memref<1x8x18x128xf32, #tpu.memory_space<vmem>>, %arg3: memref<1x4x18x128xf32, #tpu.memory_space<vmem>>, %arg4: memref<1152x128xbf16, #tpu.memory_space<vmem>>, %arg5: memref<1x128xf32, #tpu.memory_space<vmem>>, %arg6: memref<1152x128xbf16, #tpu.memory_space<vmem>>, %arg7: memref<1x128xf32, #tpu.memory_space<vmem>>, %arg8: memref<1152x128xbf16, #tpu.memory_space<vmem>>, %arg9: memref<1x128xf32, #tpu.memory_space<vmem>>, %arg10: memref<1x16x16x128xf32, #tpu.memory_space<vmem>>, %arg11: memref<18x18x128xf32, #tpu.memory_space<vmem>>, %arg12: memref<18x32x128xf32, #tpu.memory_space<vmem>>) attributes {dimension_semantics = [#tpu.dimension_semantics<parallel>], iteration_bounds = array<i64: 2>, scalar_prefetch = 0 : i64, scratch_operands = 2 : i64, tpu.core_type = #tpu.core_type<tc>, window_params = [{transform_indices = @transform_0, window_bounds = array<i64: 1, 16, 16, 128>}, {transform_indices = @transform_1, window_bounds = array<i64: 1, 8, 18, 128>}, {transform_indices = @transform_2, window_bounds = array<i64: 1, 4, 18, 128>}, {pipeline_mode = #tpu.pipeline_mode<synchronous>, transform_indices = @transform_3, window_bounds = array<i64: 1152, 128>}, {pipeline_mode = #tpu.pipeline_mode<synchronous>, transform_indices = @transform_4, window_bounds = array<i64: 1, 128>}, {pipeline_mode = #tpu.pipeline_mode<synchronous>, transform_indices = @transform_5, window_bounds = array<i64: 1152, 128>}, {pipeline_mode = #tpu.pipeline_mode<synchronous>, transform_indices = @transform_6, window_bounds = array<i64: 1, 128>}, {pipeline_mode = #tpu.pipeline_mode<synchronous>, transform_indices = @transform_7, window_bounds = array<i64: 1152, 128>}, {pipeline_mode = #tpu.pipeline_mode<synchronous>, transform_indices = @transform_8, window_bounds = array<i64: 1, 128>}, {transform_indices = @transform_9, window_bounds = array<i64: 1, 16, 16, 128>}]} {
    %cst = arith.constant 0.000000e+00 : f32
    %0 = vector.broadcast %cst : f32 to vector<18x128xf32>
    %c0 = arith.constant 0 : index
    %c0_0 = arith.constant 0 : index
    %c0_1 = arith.constant 0 : index
    %1 = vector.load %arg11[%c0, %c0_0, %c0_1] : memref<18x18x128xf32, #tpu.memory_space<vmem>>, vector<1x18x128xf32>
    %2 = vector.shape_cast %1 : vector<1x18x128xf32> to vector<18x128xf32>
    %3 = vector.shape_cast %0 : vector<18x128xf32> to vector<1x18x128xf32>
    tpu.vector_store %arg11[%c0, %c0_0, %c0_1], %3 {strides = array<i32>} : memref<18x18x128xf32, #tpu.memory_space<vmem>>, vector<1x18x128xf32>,
    %c17 = arith.constant 17 : index
    %c0_2 = arith.constant 0 : index
    %c0_3 = arith.constant 0 : index
    %4 = vector.load %arg11[%c17, %c0_2, %c0_3] : memref<18x18x128xf32, #tpu.memory_space<vmem>>, vector<1x18x128xf32>
    %5 = vector.shape_cast %4 : vector<1x18x128xf32> to vector<18x128xf32>
    %6 = vector.shape_cast %0 : vector<18x128xf32> to vector<1x18x128xf32>
    tpu.vector_store %arg11[%c17, %c0_2, %c0_3], %6 {strides = array<i32>} : memref<18x18x128xf32, #tpu.memory_space<vmem>>, vector<1x18x128xf32>,
    %c0_4 = arith.constant 0 : index
    %c0_5 = arith.constant 0 : index
    %c0_6 = arith.constant 0 : index
    %c0_7 = arith.constant 0 : index
    %7 = vector.load %arg2[%c0_4, %c0_5, %c0_6, %c0_7] : memref<1x8x18x128xf32, #tpu.memory_space<vmem>>, vector<1x1x18x128xf32>
    %8 = vector.shape_cast %7 : vector<1x1x18x128xf32> to vector<18x128xf32>
    %c1 = arith.constant 1 : index
    %c0_8 = arith.constant 0 : index
    %c0_9 = arith.constant 0 : index
    %9 = vector.load %arg11[%c1, %c0_8, %c0_9] : memref<18x18x128xf32, #tpu.memory_space<vmem>>, vector<1x18x128xf32>
    %10 = vector.shape_cast %9 : vector<1x18x128xf32> to vector<18x128xf32>
    %11 = vector.shape_cast %8 : vector<18x128xf32> to vector<1x18x128xf32>
    tpu.vector_store %arg11[%c1, %c0_8, %c0_9], %11 {strides = array<i32>} : memref<18x18x128xf32, #tpu.memory_space<vmem>>, vector<1x18x128xf32>,
    %c0_10 = arith.constant 0 : index
    %c0_11 = arith.constant 0 : index
    %c0_12 = arith.constant 0 : index
    %c0_13 = arith.constant 0 : index
    %12 = vector.load %arg2[%c0_10, %c0_11, %c0_12, %c0_13] : memref<1x8x18x128xf32, #tpu.memory_space<vmem>>, vector<1x1x18x128xf32>
    %13 = vector.shape_cast %12 : vector<1x1x18x128xf32> to vector<18x128xf32>
    %cst_14 = arith.constant 7.500000e-01 : f32
    %14 = vector.broadcast %cst_14 : f32 to vector<18x128xf32>
    %15 = arith.mulf %14, %13 : vector<18x128xf32>
    %c0_15 = arith.constant 0 : index
    %c1_16 = arith.constant 1 : index
    %c0_17 = arith.constant 0 : index
    %c0_18 = arith.constant 0 : index
    %16 = vector.load %arg2[%c0_15, %c1_16, %c0_17, %c0_18] : memref<1x8x18x128xf32, #tpu.memory_space<vmem>>, vector<1x1x18x128xf32>
    %17 = vector.shape_cast %16 : vector<1x1x18x128xf32> to vector<18x128xf32>
    %cst_19 = arith.constant 2.500000e-01 : f32
    %18 = vector.broadcast %cst_19 : f32 to vector<18x128xf32>
    %19 = arith.mulf %18, %17 : vector<18x128xf32>
    %20 = arith.addf %15, %19 : vector<18x128xf32>
    %c2 = arith.constant 2 : index
    %c0_20 = arith.constant 0 : index
    %c0_21 = arith.constant 0 : index
    %21 = vector.load %arg11[%c2, %c0_20, %c0_21] : memref<18x18x128xf32, #tpu.memory_space<vmem>>, vector<1x18x128xf32>
    %22 = vector.shape_cast %21 : vector<1x18x128xf32> to vector<18x128xf32>
    %23 = vector.shape_cast %20 : vector<18x128xf32> to vector<1x18x128xf32>
    tpu.vector_store %arg11[%c2, %c0_20, %c0_21], %23 {strides = array<i32>} : memref<18x18x128xf32, #tpu.memory_space<vmem>>, vector<1x18x128xf32>,
    %c0_22 = arith.constant 0 : index
    %c0_23 = arith.constant 0 : index
    %c0_24 = arith.constant 0 : index
    %c0_25 = arith.constant 0 : index
    %24 = vector.load %arg2[%c0_22, %c0_23, %c0_24, %c0_25] : memref<1x8x18x128xf32, #tpu.memory_space<vmem>>, vector<1x1x18x128xf32>
    %25 = vector.shape_cast %24 : vector<1x1x18x128xf32> to vector<18x128xf32>
    %cst_26 = arith.constant 2.500000e-01 : f32
    %26 = vector.broadcast %cst_26 : f32 to vector<18x128xf32>
    %27 = arith.mulf %26, %25 : vector<18x128xf32>
    %c0_27 = arith.constant 0 : index
    %c1_28 = arith.constant 1 : index
    %c0_29 = arith.constant 0 : index
    %c0_30 = arith.constant 0 : index
    %28 = vector.load %arg2[%c0_27, %c1_28, %c0_29, %c0_30] : memref<1x8x18x128xf32, #tpu.memory_space<vmem>>, vector<1x1x18x128xf32>
    %29 = vector.shape_cast %28 : vector<1x1x18x128xf32> to vector<18x128xf32>
    %cst_31 = arith.constant 7.500000e-01 : f32
    %30 = vector.broadcast %cst_31 : f32 to vector<18x128xf32>
    %31 = arith.mulf %30, %29 : vector<18x128xf32>
    %32 = arith.addf %27, %31 : vector<18x128xf32>
    %c3 = arith.constant 3 : index
    %c0_32 = arith.constant 0 : index
    %c0_33 = arith.constant 0 : index
    %33 = vector.load %arg11[%c3, %c0_32, %c0_33] : memref<18x18x128xf32, #tpu.memory_space<vmem>>, vector<1x18x128xf32>
    %34 = vector.shape_cast %33 : vector<1x18x128xf32> to vector<18x128xf32>
    %35 = vector.shape_cast %32 : vector<18x128xf32> to vector<1x18x128xf32>
    tpu.vector_store %arg11[%c3, %c0_32, %c0_33], %35 {strides = array<i32>} : memref<18x18x128xf32, #tpu.memory_space<vmem>>, vector<1x18x128xf32>,
    %c0_34 = arith.constant 0 : index
    %c1_35 = arith.constant 1 : index
    %c0_36 = arith.constant 0 : index
    %c0_37 = arith.constant 0 : index
    %36 = vector.load %arg2[%c0_34, %c1_35, %c0_36, %c0_37] : memref<1x8x18x128xf32, #tpu.memory_space<vmem>>, vector<1x1x18x128xf32>
    %37 = vector.shape_cast %36 : vector<1x1x18x128xf32> to vector<18x128xf32>
    %cst_38 = arith.constant 7.500000e-01 : f32
    %38 = vector.broadcast %cst_38 : f32 to vector<18x128xf32>
    %39 = arith.mulf %38, %37 : vector<18x128xf32>
    %c0_39 = arith.constant 0 : index
    %c2_40 = arith.constant 2 : index
    %c0_41 = arith.constant 0 : index
    %c0_42 = arith.constant 0 : index
    %40 = vector.load %arg2[%c0_39, %c2_40, %c0_41, %c0_42] : memref<1x8x18x128xf32, #tpu.memory_space<vmem>>, vector<1x1x18x128xf32>
    %41 = vector.shape_cast %40 : vector<1x1x18x128xf32> to vector<18x128xf32>
    %cst_43 = arith.constant 2.500000e-01 : f32
    %42 = vector.broadcast %cst_43 : f32 to vector<18x128xf32>
    %43 = arith.mulf %42, %41 : vector<18x128xf32>
    %44 = arith.addf %39, %43 : vector<18x128xf32>
    %c4 = arith.constant 4 : index
    %c0_44 = arith.constant 0 : index
    %c0_45 = arith.constant 0 : index
    %45 = vector.load %arg11[%c4, %c0_44, %c0_45] : memref<18x18x128xf32, #tpu.memory_space<vmem>>, vector<1x18x128xf32>
    %46 = vector.shape_cast %45 : vector<1x18x128xf32> to vector<18x128xf32>
    %47 = vector.shape_cast %44 : vector<18x128xf32> to vector<1x18x128xf32>
    tpu.vector_store %arg11[%c4, %c0_44, %c0_45], %47 {strides = array<i32>} : memref<18x18x128xf32, #tpu.memory_space<vmem>>, vector<1x18x128xf32>,
    %c0_46 = arith.constant 0 : index
    %c1_47 = arith.constant 1 : index
    %c0_48 = arith.constant 0 : index
    %c0_49 = arith.constant 0 : index
    %48 = vector.load %arg2[%c0_46, %c1_47, %c0_48, %c0_49] : memref<1x8x18x128xf32, #tpu.memory_space<vmem>>, vector<1x1x18x128xf32>
    %49 = vector.shape_cast %48 : vector<1x1x18x128xf32> to vector<18x128xf32>
    %cst_50 = arith.constant 2.500000e-01 : f32
    %50 = vector.broadcast %cst_50 : f32 to vector<18x128xf32>
    %51 = arith.mulf %50, %49 : vector<18x128xf32>
    %c0_51 = arith.constant 0 : index
    %c2_52 = arith.constant 2 : index
    %c0_53 = arith.constant 0 : index
    %c0_54 = arith.constant 0 : index
    %52 = vector.load %arg2[%c0_51, %c2_52, %c0_53, %c0_54] : memref<1x8x18x128xf32, #tpu.memory_space<vmem>>, vector<1x1x18x128xf32>
    %53 = vector.shape_cast %52 : vector<1x1x18x128xf32> to vector<18x128xf32>
    %cst_55 = arith.constant 7.500000e-01 : f32
    %54 = vector.broadcast %cst_55 : f32 to vector<18x128xf32>
    %55 = arith.mulf %54, %53 : vector<18x128xf32>
    %56 = arith.addf %51, %55 : vector<18x128xf32>
    %c5 = arith.constant 5 : index
    %c0_56 = arith.constant 0 : index
    %c0_57 = arith.constant 0 : index
    %57 = vector.load %arg11[%c5, %c0_56, %c0_57] : memref<18x18x128xf32, #tpu.memory_space<vmem>>, vector<1x18x128xf32>
    %58 = vector.shape_cast %57 : vector<1x18x128xf32> to vector<18x128xf32>
    %59 = vector.shape_cast %56 : vector<18x128xf32> to vector<1x18x128xf32>
    tpu.vector_store %arg11[%c5, %c0_56, %c0_57], %59 {strides = array<i32>} : memref<18x18x128xf32, #tpu.memory_space<vmem>>, vector<1x18x128xf32>,
    %c0_58 = arith.constant 0 : index
    %c2_59 = arith.constant 2 : index
    %c0_60 = arith.constant 0 : index
    %c0_61 = arith.constant 0 : index
    %60 = vector.load %arg2[%c0_58, %c2_59, %c0_60, %c0_61] : memref<1x8x18x128xf32, #tpu.memory_space<vmem>>, vector<1x1x18x128xf32>
    %61 = vector.shape_cast %60 : vector<1x1x18x128xf32> to vector<18x128xf32>
    %cst_62 = arith.constant 7.500000e-01 : f32
    %62 = vector.broadcast %cst_62 : f32 to vector<18x128xf32>
    %63 = arith.mulf %62, %61 : vector<18x128xf32>
    %c0_63 = arith.constant 0 : index
    %c3_64 = arith.constant 3 : index
    %c0_65 = arith.constant 0 : index
    %c0_66 = arith.constant 0 : index
    %64 = vector.load %arg2[%c0_63, %c3_64, %c0_65, %c0_66] : memref<1x8x18x128xf32, #tpu.memory_space<vmem>>, vector<1x1x18x128xf32>
    %65 = vector.shape_cast %64 : vector<1x1x18x128xf32> to vector<18x128xf32>
    %cst_67 = arith.constant 2.500000e-01 : f32
    %66 = vector.broadcast %cst_67 : f32 to vector<18x128xf32>
    %67 = arith.mulf %66, %65 : vector<18x128xf32>
    %68 = arith.addf %63, %67 : vector<18x128xf32>
    %c6 = arith.constant 6 : index
    %c0_68 = arith.constant 0 : index
    %c0_69 = arith.constant 0 : index
    %69 = vector.load %arg11[%c6, %c0_68, %c0_69] : memref<18x18x128xf32, #tpu.memory_space<vmem>>, vector<1x18x128xf32>
    %70 = vector.shape_cast %69 : vector<1x18x128xf32> to vector<18x128xf32>
    %71 = vector.shape_cast %68 : vector<18x128xf32> to vector<1x18x128xf32>
    tpu.vector_store %arg11[%c6, %c0_68, %c0_69], %71 {strides = array<i32>} : memref<18x18x128xf32, #tpu.memory_space<vmem>>, vector<1x18x128xf32>,
    %c0_70 = arith.constant 0 : index
    %c2_71 = arith.constant 2 : index
    %c0_72 = arith.constant 0 : index
    %c0_73 = arith.constant 0 : index
    %72 = vector.load %arg2[%c0_70, %c2_71, %c0_72, %c0_73] : memref<1x8x18x128xf32, #tpu.memory_space<vmem>>, vector<1x1x18x128xf32>
    %73 = vector.shape_cast %72 : vector<1x1x18x128xf32> to vector<18x128xf32>
    %cst_74 = arith.constant 2.500000e-01 : f32
    %74 = vector.broadcast %cst_74 : f32 to vector<18x128xf32>
    %75 = arith.mulf %74, %73 : vector<18x128xf32>
    %c0_75 = arith.constant 0 : index
    %c3_76 = arith.constant 3 : index
    %c0_77 = arith.constant 0 : index
    %c0_78 = arith.constant 0 : index
    %76 = vector.load %arg2[%c0_75, %c3_76, %c0_77, %c0_78] : memref<1x8x18x128xf32, #tpu.memory_space<vmem>>, vector<1x1x18x128xf32>
    %77 = vector.shape_cast %76 : vector<1x1x18x128xf32> to vector<18x128xf32>
    %cst_79 = arith.constant 7.500000e-01 : f32
    %78 = vector.broadcast %cst_79 : f32 to vector<18x128xf32>
    %79 = arith.mulf %78, %77 : vector<18x128xf32>
    %80 = arith.addf %75, %79 : vector<18x128xf32>
    %c7 = arith.constant 7 : index
    %c0_80 = arith.constant 0 : index
    %c0_81 = arith.constant 0 : index
    %81 = vector.load %arg11[%c7, %c0_80, %c0_81] : memref<18x18x128xf32, #tpu.memory_space<vmem>>, vector<1x18x128xf32>
    %82 = vector.shape_cast %81 : vector<1x18x128xf32> to vector<18x128xf32>
    %83 = vector.shape_cast %80 : vector<18x128xf32> to vector<1x18x128xf32>
    tpu.vector_store %arg11[%c7, %c0_80, %c0_81], %83 {strides = array<i32>} : memref<18x18x128xf32, #tpu.memory_space<vmem>>, vector<1x18x128xf32>,
    %c0_82 = arith.constant 0 : index
    %c3_83 = arith.constant 3 : index
    %c0_84 = arith.constant 0 : index
    %c0_85 = arith.constant 0 : index
    %84 = vector.load %arg2[%c0_82, %c3_83, %c0_84, %c0_85] : memref<1x8x18x128xf32, #tpu.memory_space<vmem>>, vector<1x1x18x128xf32>
    %85 = vector.shape_cast %84 : vector<1x1x18x128xf32> to vector<18x128xf32>
    %cst_86 = arith.constant 7.500000e-01 : f32
    %86 = vector.broadcast %cst_86 : f32 to vector<18x128xf32>
    %87 = arith.mulf %86, %85 : vector<18x128xf32>
    %c0_87 = arith.constant 0 : index
    %c4_88 = arith.constant 4 : index
    %c0_89 = arith.constant 0 : index
    %c0_90 = arith.constant 0 : index
    %88 = vector.load %arg2[%c0_87, %c4_88, %c0_89, %c0_90] : memref<1x8x18x128xf32, #tpu.memory_space<vmem>>, vector<1x1x18x128xf32>
    %89 = vector.shape_cast %88 : vector<1x1x18x128xf32> to vector<18x128xf32>
    %cst_91 = arith.constant 2.500000e-01 : f32
    %90 = vector.broadcast %cst_91 : f32 to vector<18x128xf32>
    %91 = arith.mulf %90, %89 : vector<18x128xf32>
    %92 = arith.addf %87, %91 : vector<18x128xf32>
    %c8 = arith.constant 8 : index
    %c0_92 = arith.constant 0 : index
    %c0_93 = arith.constant 0 : index
    %93 = vector.load %arg11[%c8, %c0_92, %c0_93] : memref<18x18x128xf32, #tpu.memory_space<vmem>>, vector<1x18x128xf32>
    %94 = vector.shape_cast %93 : vector<1x18x128xf32> to vector<18x128xf32>
    %95 = vector.shape_cast %92 : vector<18x128xf32> to vector<1x18x128xf32>
    tpu.vector_store %arg11[%c8, %c0_92, %c0_93], %95 {strides = array<i32>} : memref<18x18x128xf32, #tpu.memory_space<vmem>>, vector<1x18x128xf32>,
    %c0_94 = arith.constant 0 : index
    %c3_95 = arith.constant 3 : index
    %c0_96 = arith.constant 0 : index
    %c0_97 = arith.constant 0 : index
    %96 = vector.load %arg2[%c0_94, %c3_95, %c0_96, %c0_97] : memref<1x8x18x128xf32, #tpu.memory_space<vmem>>, vector<1x1x18x128xf32>
    %97 = vector.shape_cast %96 : vector<1x1x18x128xf32> to vector<18x128xf32>
    %cst_98 = arith.constant 2.500000e-01 : f32
    %98 = vector.broadcast %cst_98 : f32 to vector<18x128xf32>
    %99 = arith.mulf %98, %97 : vector<18x128xf32>
    %c0_99 = arith.constant 0 : index
    %c4_100 = arith.constant 4 : index
    %c0_101 = arith.constant 0 : index
    %c0_102 = arith.constant 0 : index
    %100 = vector.load %arg2[%c0_99, %c4_100, %c0_101, %c0_102] : memref<1x8x18x128xf32, #tpu.memory_space<vmem>>, vector<1x1x18x128xf32>
    %101 = vector.shape_cast %100 : vector<1x1x18x128xf32> to vector<18x128xf32>
    %cst_103 = arith.constant 7.500000e-01 : f32
    %102 = vector.broadcast %cst_103 : f32 to vector<18x128xf32>
    %103 = arith.mulf %102, %101 : vector<18x128xf32>
    %104 = arith.addf %99, %103 : vector<18x128xf32>
    %c9 = arith.constant 9 : index
    %c0_104 = arith.constant 0 : index
    %c0_105 = arith.constant 0 : index
    %105 = vector.load %arg11[%c9, %c0_104, %c0_105] : memref<18x18x128xf32, #tpu.memory_space<vmem>>, vector<1x18x128xf32>
    %106 = vector.shape_cast %105 : vector<1x18x128xf32> to vector<18x128xf32>
    %107 = vector.shape_cast %104 : vector<18x128xf32> to vector<1x18x128xf32>
    tpu.vector_store %arg11[%c9, %c0_104, %c0_105], %107 {strides = array<i32>} : memref<18x18x128xf32, #tpu.memory_space<vmem>>, vector<1x18x128xf32>,
    %c0_106 = arith.constant 0 : index
    %c4_107 = arith.constant 4 : index
    %c0_108 = arith.constant 0 : index
    %c0_109 = arith.constant 0 : index
    %108 = vector.load %arg2[%c0_106, %c4_107, %c0_108, %c0_109] : memref<1x8x18x128xf32, #tpu.memory_space<vmem>>, vector<1x1x18x128xf32>
    %109 = vector.shape_cast %108 : vector<1x1x18x128xf32> to vector<18x128xf32>
    %cst_110 = arith.constant 7.500000e-01 : f32
    %110 = vector.broadcast %cst_110 : f32 to vector<18x128xf32>
    %111 = arith.mulf %110, %109 : vector<18x128xf32>
    %c0_111 = arith.constant 0 : index
    %c5_112 = arith.constant 5 : index
    %c0_113 = arith.constant 0 : index
    %c0_114 = arith.constant 0 : index
    %112 = vector.load %arg2[%c0_111, %c5_112, %c0_113, %c0_114] : memref<1x8x18x128xf32, #tpu.memory_space<vmem>>, vector<1x1x18x128xf32>
    %113 = vector.shape_cast %112 : vector<1x1x18x128xf32> to vector<18x128xf32>
    %cst_115 = arith.constant 2.500000e-01 : f32
    %114 = vector.broadcast %cst_115 : f32 to vector<18x128xf32>
    %115 = arith.mulf %114, %113 : vector<18x128xf32>
    %116 = arith.addf %111, %115 : vector<18x128xf32>
    %c10 = arith.constant 10 : index
    %c0_116 = arith.constant 0 : index
    %c0_117 = arith.constant 0 : index
    %117 = vector.load %arg11[%c10, %c0_116, %c0_117] : memref<18x18x128xf32, #tpu.memory_space<vmem>>, vector<1x18x128xf32>
    %118 = vector.shape_cast %117 : vector<1x18x128xf32> to vector<18x128xf32>
    %119 = vector.shape_cast %116 : vector<18x128xf32> to vector<1x18x128xf32>
    tpu.vector_store %arg11[%c10, %c0_116, %c0_117], %119 {strides = array<i32>} : memref<18x18x128xf32, #tpu.memory_space<vmem>>, vector<1x18x128xf32>,
    %c0_118 = arith.constant 0 : index
    %c4_119 = arith.constant 4 : index
    %c0_120 = arith.constant 0 : index
    %c0_121 = arith.constant 0 : index
    %120 = vector.load %arg2[%c0_118, %c4_119, %c0_120, %c0_121] : memref<1x8x18x128xf32, #tpu.memory_space<vmem>>, vector<1x1x18x128xf32>
    %121 = vector.shape_cast %120 : vector<1x1x18x128xf32> to vector<18x128xf32>
    %cst_122 = arith.constant 2.500000e-01 : f32
    %122 = vector.broadcast %cst_122 : f32 to vector<18x128xf32>
    %123 = arith.mulf %122, %121 : vector<18x128xf32>
    %c0_123 = arith.constant 0 : index
    %c5_124 = arith.constant 5 : index
    %c0_125 = arith.constant 0 : index
    %c0_126 = arith.constant 0 : index
    %124 = vector.load %arg2[%c0_123, %c5_124, %c0_125, %c0_126] : memref<1x8x18x128xf32, #tpu.memory_space<vmem>>, vector<1x1x18x128xf32>
    %125 = vector.shape_cast %124 : vector<1x1x18x128xf32> to vector<18x128xf32>
    %cst_127 = arith.constant 7.500000e-01 : f32
    %126 = vector.broadcast %cst_127 : f32 to vector<18x128xf32>
    %127 = arith.mulf %126, %125 : vector<18x128xf32>
    %128 = arith.addf %123, %127 : vector<18x128xf32>
    %c11 = arith.constant 11 : index
    %c0_128 = arith.constant 0 : index
    %c0_129 = arith.constant 0 : index
    %129 = vector.load %arg11[%c11, %c0_128, %c0_129] : memref<18x18x128xf32, #tpu.memory_space<vmem>>, vector<1x18x128xf32>
    %130 = vector.shape_cast %129 : vector<1x18x128xf32> to vector<18x128xf32>
    %131 = vector.shape_cast %128 : vector<18x128xf32> to vector<1x18x128xf32>
    tpu.vector_store %arg11[%c11, %c0_128, %c0_129], %131 {strides = array<i32>} : memref<18x18x128xf32, #tpu.memory_space<vmem>>, vector<1x18x128xf32>,
    %c0_130 = arith.constant 0 : index
    %c5_131 = arith.constant 5 : index
    %c0_132 = arith.constant 0 : index
    %c0_133 = arith.constant 0 : index
    %132 = vector.load %arg2[%c0_130, %c5_131, %c0_132, %c0_133] : memref<1x8x18x128xf32, #tpu.memory_space<vmem>>, vector<1x1x18x128xf32>
    %133 = vector.shape_cast %132 : vector<1x1x18x128xf32> to vector<18x128xf32>
    %cst_134 = arith.constant 7.500000e-01 : f32
    %134 = vector.broadcast %cst_134 : f32 to vector<18x128xf32>
    %135 = arith.mulf %134, %133 : vector<18x128xf32>
    %c0_135 = arith.constant 0 : index
    %c6_136 = arith.constant 6 : index
    %c0_137 = arith.constant 0 : index
    %c0_138 = arith.constant 0 : index
    %136 = vector.load %arg2[%c0_135, %c6_136, %c0_137, %c0_138] : memref<1x8x18x128xf32, #tpu.memory_space<vmem>>, vector<1x1x18x128xf32>
    %137 = vector.shape_cast %136 : vector<1x1x18x128xf32> to vector<18x128xf32>
    %cst_139 = arith.constant 2.500000e-01 : f32
    %138 = vector.broadcast %cst_139 : f32 to vector<18x128xf32>
    %139 = arith.mulf %138, %137 : vector<18x128xf32>
    %140 = arith.addf %135, %139 : vector<18x128xf32>
    %c12 = arith.constant 12 : index
    %c0_140 = arith.constant 0 : index
    %c0_141 = arith.constant 0 : index
    %141 = vector.load %arg11[%c12, %c0_140, %c0_141] : memref<18x18x128xf32, #tpu.memory_space<vmem>>, vector<1x18x128xf32>
    %142 = vector.shape_cast %141 : vector<1x18x128xf32> to vector<18x128xf32>
    %143 = vector.shape_cast %140 : vector<18x128xf32> to vector<1x18x128xf32>
    tpu.vector_store %arg11[%c12, %c0_140, %c0_141], %143 {strides = array<i32>} : memref<18x18x128xf32, #tpu.memory_space<vmem>>, vector<1x18x128xf32>,
    %c0_142 = arith.constant 0 : index
    %c5_143 = arith.constant 5 : index
    %c0_144 = arith.constant 0 : index
    %c0_145 = arith.constant 0 : index
    %144 = vector.load %arg2[%c0_142, %c5_143, %c0_144, %c0_145] : memref<1x8x18x128xf32, #tpu.memory_space<vmem>>, vector<1x1x18x128xf32>
    %145 = vector.shape_cast %144 : vector<1x1x18x128xf32> to vector<18x128xf32>
    %cst_146 = arith.constant 2.500000e-01 : f32
    %146 = vector.broadcast %cst_146 : f32 to vector<18x128xf32>
    %147 = arith.mulf %146, %145 : vector<18x128xf32>
    %c0_147 = arith.constant 0 : index
    %c6_148 = arith.constant 6 : index
    %c0_149 = arith.constant 0 : index
    %c0_150 = arith.constant 0 : index
    %148 = vector.load %arg2[%c0_147, %c6_148, %c0_149, %c0_150] : memref<1x8x18x128xf32, #tpu.memory_space<vmem>>, vector<1x1x18x128xf32>
    %149 = vector.shape_cast %148 : vector<1x1x18x128xf32> to vector<18x128xf32>
    %cst_151 = arith.constant 7.500000e-01 : f32
    %150 = vector.broadcast %cst_151 : f32 to vector<18x128xf32>
    %151 = arith.mulf %150, %149 : vector<18x128xf32>
    %152 = arith.addf %147, %151 : vector<18x128xf32>
    %c13 = arith.constant 13 : index
    %c0_152 = arith.constant 0 : index
    %c0_153 = arith.constant 0 : index
    %153 = vector.load %arg11[%c13, %c0_152, %c0_153] : memref<18x18x128xf32, #tpu.memory_space<vmem>>, vector<1x18x128xf32>
    %154 = vector.shape_cast %153 : vector<1x18x128xf32> to vector<18x128xf32>
    %155 = vector.shape_cast %152 : vector<18x128xf32> to vector<1x18x128xf32>
    tpu.vector_store %arg11[%c13, %c0_152, %c0_153], %155 {strides = array<i32>} : memref<18x18x128xf32, #tpu.memory_space<vmem>>, vector<1x18x128xf32>,
    %c0_154 = arith.constant 0 : index
    %c6_155 = arith.constant 6 : index
    %c0_156 = arith.constant 0 : index
    %c0_157 = arith.constant 0 : index
    %156 = vector.load %arg2[%c0_154, %c6_155, %c0_156, %c0_157] : memref<1x8x18x128xf32, #tpu.memory_space<vmem>>, vector<1x1x18x128xf32>
    %157 = vector.shape_cast %156 : vector<1x1x18x128xf32> to vector<18x128xf32>
    %cst_158 = arith.constant 7.500000e-01 : f32
    %158 = vector.broadcast %cst_158 : f32 to vector<18x128xf32>
    %159 = arith.mulf %158, %157 : vector<18x128xf32>
    %c0_159 = arith.constant 0 : index
    %c7_160 = arith.constant 7 : index
    %c0_161 = arith.constant 0 : index
    %c0_162 = arith.constant 0 : index
    %160 = vector.load %arg2[%c0_159, %c7_160, %c0_161, %c0_162] : memref<1x8x18x128xf32, #tpu.memory_space<vmem>>, vector<1x1x18x128xf32>
    %161 = vector.shape_cast %160 : vector<1x1x18x128xf32> to vector<18x128xf32>
    %cst_163 = arith.constant 2.500000e-01 : f32
    %162 = vector.broadcast %cst_163 : f32 to vector<18x128xf32>
    %163 = arith.mulf %162, %161 : vector<18x128xf32>
    %164 = arith.addf %159, %163 : vector<18x128xf32>
    %c14 = arith.constant 14 : index
    %c0_164 = arith.constant 0 : index
    %c0_165 = arith.constant 0 : index
    %165 = vector.load %arg11[%c14, %c0_164, %c0_165] : memref<18x18x128xf32, #tpu.memory_space<vmem>>, vector<1x18x128xf32>
    %166 = vector.shape_cast %165 : vector<1x18x128xf32> to vector<18x128xf32>
    %167 = vector.shape_cast %164 : vector<18x128xf32> to vector<1x18x128xf32>
    tpu.vector_store %arg11[%c14, %c0_164, %c0_165], %167 {strides = array<i32>} : memref<18x18x128xf32, #tpu.memory_space<vmem>>, vector<1x18x128xf32>,
    %c0_166 = arith.constant 0 : index
    %c6_167 = arith.constant 6 : index
    %c0_168 = arith.constant 0 : index
    %c0_169 = arith.constant 0 : index
    %168 = vector.load %arg2[%c0_166, %c6_167, %c0_168, %c0_169] : memref<1x8x18x128xf32, #tpu.memory_space<vmem>>, vector<1x1x18x128xf32>
    %169 = vector.shape_cast %168 : vector<1x1x18x128xf32> to vector<18x128xf32>
    %cst_170 = arith.constant 2.500000e-01 : f32
    %170 = vector.broadcast %cst_170 : f32 to vector<18x128xf32>
    %171 = arith.mulf %170, %169 : vector<18x128xf32>
    %c0_171 = arith.constant 0 : index
    %c7_172 = arith.constant 7 : index
    %c0_173 = arith.constant 0 : index
    %c0_174 = arith.constant 0 : index
    %172 = vector.load %arg2[%c0_171, %c7_172, %c0_173, %c0_174] : memref<1x8x18x128xf32, #tpu.memory_space<vmem>>, vector<1x1x18x128xf32>
    %173 = vector.shape_cast %172 : vector<1x1x18x128xf32> to vector<18x128xf32>
    %cst_175 = arith.constant 7.500000e-01 : f32
    %174 = vector.broadcast %cst_175 : f32 to vector<18x128xf32>
    %175 = arith.mulf %174, %173 : vector<18x128xf32>
    %176 = arith.addf %171, %175 : vector<18x128xf32>
    %c15 = arith.constant 15 : index
    %c0_176 = arith.constant 0 : index
    %c0_177 = arith.constant 0 : index
    %177 = vector.load %arg11[%c15, %c0_176, %c0_177] : memref<18x18x128xf32, #tpu.memory_space<vmem>>, vector<1x18x128xf32>
    %178 = vector.shape_cast %177 : vector<1x18x128xf32> to vector<18x128xf32>
    %179 = vector.shape_cast %176 : vector<18x128xf32> to vector<1x18x128xf32>
    tpu.vector_store %arg11[%c15, %c0_176, %c0_177], %179 {strides = array<i32>} : memref<18x18x128xf32, #tpu.memory_space<vmem>>, vector<1x18x128xf32>,
    %c0_178 = arith.constant 0 : index
    %c7_179 = arith.constant 7 : index
    %c0_180 = arith.constant 0 : index
    %c0_181 = arith.constant 0 : index
    %180 = vector.load %arg2[%c0_178, %c7_179, %c0_180, %c0_181] : memref<1x8x18x128xf32, #tpu.memory_space<vmem>>, vector<1x1x18x128xf32>
    %181 = vector.shape_cast %180 : vector<1x1x18x128xf32> to vector<18x128xf32>
    %c16 = arith.constant 16 : index
    %c0_182 = arith.constant 0 : index
    %c0_183 = arith.constant 0 : index
    %182 = vector.load %arg11[%c16, %c0_182, %c0_183] : memref<18x18x128xf32, #tpu.memory_space<vmem>>, vector<1x18x128xf32>
    %183 = vector.shape_cast %182 : vector<1x18x128xf32> to vector<18x128xf32>
    %184 = vector.shape_cast %181 : vector<18x128xf32> to vector<1x18x128xf32>
    tpu.vector_store %arg11[%c16, %c0_182, %c0_183], %184 {strides = array<i32>} : memref<18x18x128xf32, #tpu.memory_space<vmem>>, vector<1x18x128xf32>,
    %c0_184 = arith.constant 0 : index
    %c0_185 = arith.constant 0 : index
    %c0_186 = arith.constant 0 : index
    %185 = vector.load %arg11[%c0_184, %c0_185, %c0_186] : memref<18x18x128xf32, #tpu.memory_space<vmem>>, vector<18x18x128xf32>
    %c0_187 = arith.constant 0 : index
    %c0_188 = arith.constant 0 : index
    %186 = vector.load %arg4[%c0_187, %c0_188] : memref<1152x128xbf16, #tpu.memory_space<vmem>>, vector<1152x128xbf16>
    %c0_189 = arith.constant 0 : index
    %c0_190 = arith.constant 0 : index
    %187 = vector.load %arg5[%c0_189, %c0_190] : memref<1x128xf32, #tpu.memory_space<vmem>>, vector<1x128xf32>
    %188 = vector.extract_strided_slice %185 {offsets = [0, 0, 0], sizes = [16, 16, 128], strides = [1, 1, 1]} : vector<18x18x128xf32> to vector<16x16x128xf32>
    %189 = vector.extract_strided_slice %185 {offsets = [0, 1, 0], sizes = [16, 16, 128], strides = [1, 1, 1]} : vector<18x18x128xf32> to vector<16x16x128xf32>
    %190 = vector.extract_strided_slice %185 {offsets = [0, 2, 0], sizes = [16, 16, 128], strides = [1, 1, 1]} : vector<18x18x128xf32> to vector<16x16x128xf32>
    %191 = vector.extract_strided_slice %185 {offsets = [1, 0, 0], sizes = [16, 16, 128], strides = [1, 1, 1]} : vector<18x18x128xf32> to vector<16x16x128xf32>
    %192 = vector.extract_strided_slice %185 {offsets = [1, 1, 0], sizes = [16, 16, 128], strides = [1, 1, 1]} : vector<18x18x128xf32> to vector<16x16x128xf32>
    %193 = vector.extract_strided_slice %185 {offsets = [1, 2, 0], sizes = [16, 16, 128], strides = [1, 1, 1]} : vector<18x18x128xf32> to vector<16x16x128xf32>
    %194 = vector.extract_strided_slice %185 {offsets = [2, 0, 0], sizes = [16, 16, 128], strides = [1, 1, 1]} : vector<18x18x128xf32> to vector<16x16x128xf32>
    %195 = vector.extract_strided_slice %185 {offsets = [2, 1, 0], sizes = [16, 16, 128], strides = [1, 1, 1]} : vector<18x18x128xf32> to vector<16x16x128xf32>
    %196 = vector.extract_strided_slice %185 {offsets = [2, 2, 0], sizes = [16, 16, 128], strides = [1, 1, 1]} : vector<18x18x128xf32> to vector<16x16x128xf32>
    %197 = tpu.concatenate %188, %189, %190, %191, %192, %193, %194, %195, %196 in 2 : vector<16x16x128xf32>, vector<16x16x128xf32>, vector<16x16x128xf32>, vector<16x16x128xf32>, vector<16x16x128xf32>, vector<16x16x128xf32>, vector<16x16x128xf32>, vector<16x16x128xf32>, vector<16x16x128xf32> -> vector<16x16x1152xf32>
    %198 = vector.shape_cast %197 : vector<16x16x1152xf32> to vector<256x1152xf32>
    %199 = arith.truncf %198 : vector<256x1152xf32> to vector<256x1152xbf16>
    %cst_191 = arith.constant dense<0.000000e+00> : vector<256x128xf32>
    %200 = tpu.matmul %199, %186, %cst_191 {dimension_numbers = #tpu.dot_dimension_numbers<[1], [0], [0], [1], [0, 0, 1, 1], [], []>} : vector<256x1152xbf16>, vector<1152x128xbf16>, vector<256x128xf32> -> vector<256x128xf32>
    %201 = vector.broadcast %187 : vector<1x128xf32> to vector<256x128xf32>
    %202 = arith.addf %200, %201 : vector<256x128xf32>
    %cst_192 = arith.constant 0.000000e+00 : f32
    %203 = vector.broadcast %cst_192 : f32 to vector<256x128xf32>
    %204 = arith.maximumf %202, %203 : vector<256x128xf32>
    %cst_193 = arith.constant 0.000000e+00 : f32
    %205 = vector.broadcast %cst_193 : f32 to vector<18x128xf32>
    %c0_194 = arith.constant 0 : index
    %c0_195 = arith.constant 0 : index
    %c0_196 = arith.constant 0 : index
    %206 = vector.load %arg11[%c0_194, %c0_195, %c0_196] : memref<18x18x128xf32, #tpu.memory_space<vmem>>, vector<1x18x128xf32>
    %207 = vector.shape_cast %206 : vector<1x18x128xf32> to vector<18x128xf32>
    %208 = vector.shape_cast %205 : vector<18x128xf32> to vector<1x18x128xf32>
    tpu.vector_store %arg11[%c0_194, %c0_195, %c0_196], %208 {strides = array<i32>} : memref<18x18x128xf32, #tpu.memory_space<vmem>>, vector<1x18x128xf32>,
    %c17_197 = arith.constant 17 : index
    %c0_198 = arith.constant 0 : index
    %c0_199 = arith.constant 0 : index
    %209 = vector.load %arg11[%c17_197, %c0_198, %c0_199] : memref<18x18x128xf32, #tpu.memory_space<vmem>>, vector<1x18x128xf32>
    %210 = vector.shape_cast %209 : vector<1x18x128xf32> to vector<18x128xf32>
    %211 = vector.shape_cast %205 : vector<18x128xf32> to vector<1x18x128xf32>
    tpu.vector_store %arg11[%c17_197, %c0_198, %c0_199], %211 {strides = array<i32>} : memref<18x18x128xf32, #tpu.memory_space<vmem>>, vector<1x18x128xf32>,
    %c0_200 = arith.constant 0 : index
    %c0_201 = arith.constant 0 : index
    %c0_202 = arith.constant 0 : index
    %c0_203 = arith.constant 0 : index
    %212 = vector.load %arg3[%c0_200, %c0_201, %c0_202, %c0_203] : memref<1x4x18x128xf32, #tpu.memory_space<vmem>>, vector<1x1x18x128xf32>
    %213 = vector.shape_cast %212 : vector<1x1x18x128xf32> to vector<18x128xf32>
    %c1_204 = arith.constant 1 : index
    %c0_205 = arith.constant 0 : index
    %c0_206 = arith.constant 0 : index
    %214 = vector.load %arg11[%c1_204, %c0_205, %c0_206] : memref<18x18x128xf32, #tpu.memory_space<vmem>>, vector<1x18x128xf32>
    %215 = vector.shape_cast %214 : vector<1x18x128xf32> to vector<18x128xf32>
    %216 = vector.shape_cast %213 : vector<18x128xf32> to vector<1x18x128xf32>
    tpu.vector_store %arg11[%c1_204, %c0_205, %c0_206], %216 {strides = array<i32>} : memref<18x18x128xf32, #tpu.memory_space<vmem>>, vector<1x18x128xf32>,
    %c0_207 = arith.constant 0 : index
    %c0_208 = arith.constant 0 : index
    %c0_209 = arith.constant 0 : index
    %c0_210 = arith.constant 0 : index
    %217 = vector.load %arg3[%c0_207, %c0_208, %c0_209, %c0_210] : memref<1x4x18x128xf32, #tpu.memory_space<vmem>>, vector<1x1x18x128xf32>
    %218 = vector.shape_cast %217 : vector<1x1x18x128xf32> to vector<18x128xf32>
    %c2_211 = arith.constant 2 : index
    %c0_212 = arith.constant 0 : index
    %c0_213 = arith.constant 0 : index
    %219 = vector.load %arg11[%c2_211, %c0_212, %c0_213] : memref<18x18x128xf32, #tpu.memory_space<vmem>>, vector<1x18x128xf32>
    %220 = vector.shape_cast %219 : vector<1x18x128xf32> to vector<18x128xf32>
    %221 = vector.shape_cast %218 : vector<18x128xf32> to vector<1x18x128xf32>
    tpu.vector_store %arg11[%c2_211, %c0_212, %c0_213], %221 {strides = array<i32>} : memref<18x18x128xf32, #tpu.memory_space<vmem>>, vector<1x18x128xf32>,
    %c0_214 = arith.constant 0 : index
    %c0_215 = arith.constant 0 : index
    %c0_216 = arith.constant 0 : index
    %c0_217 = arith.constant 0 : index
    %222 = vector.load %arg3[%c0_214, %c0_215, %c0_216, %c0_217] : memref<1x4x18x128xf32, #tpu.memory_space<vmem>>, vector<1x1x18x128xf32>
    %223 = vector.shape_cast %222 : vector<1x1x18x128xf32> to vector<18x128xf32>
    %cst_218 = arith.constant 8.750000e-01 : f32
    %224 = vector.broadcast %cst_218 : f32 to vector<18x128xf32>
    %225 = arith.mulf %224, %223 : vector<18x128xf32>
    %c0_219 = arith.constant 0 : index
    %c1_220 = arith.constant 1 : index
    %c0_221 = arith.constant 0 : index
    %c0_222 = arith.constant 0 : index
    %226 = vector.load %arg3[%c0_219, %c1_220, %c0_221, %c0_222] : memref<1x4x18x128xf32, #tpu.memory_space<vmem>>, vector<1x1x18x128xf32>
    %227 = vector.shape_cast %226 : vector<1x1x18x128xf32> to vector<18x128xf32>
    %cst_223 = arith.constant 1.250000e-01 : f32
    %228 = vector.broadcast %cst_223 : f32 to vector<18x128xf32>
    %229 = arith.mulf %228, %227 : vector<18x128xf32>
    %230 = arith.addf %225, %229 : vector<18x128xf32>
    %c3_224 = arith.constant 3 : index
    %c0_225 = arith.constant 0 : index
    %c0_226 = arith.constant 0 : index
    %231 = vector.load %arg11[%c3_224, %c0_225, %c0_226] : memref<18x18x128xf32, #tpu.memory_space<vmem>>, vector<1x18x128xf32>
    %232 = vector.shape_cast %231 : vector<1x18x128xf32> to vector<18x128xf32>
    %233 = vector.shape_cast %230 : vector<18x128xf32> to vector<1x18x128xf32>
    tpu.vector_store %arg11[%c3_224, %c0_225, %c0_226], %233 {strides = array<i32>} : memref<18x18x128xf32, #tpu.memory_space<vmem>>, vector<1x18x128xf32>,
    %c0_227 = arith.constant 0 : index
    %c0_228 = arith.constant 0 : index
    %c0_229 = arith.constant 0 : index
    %c0_230 = arith.constant 0 : index
    %234 = vector.load %arg3[%c0_227, %c0_228, %c0_229, %c0_230] : memref<1x4x18x128xf32, #tpu.memory_space<vmem>>, vector<1x1x18x128xf32>
    %235 = vector.shape_cast %234 : vector<1x1x18x128xf32> to vector<18x128xf32>
    %cst_231 = arith.constant 6.250000e-01 : f32
    %236 = vector.broadcast %cst_231 : f32 to vector<18x128xf32>
    %237 = arith.mulf %236, %235 : vector<18x128xf32>
    %c0_232 = arith.constant 0 : index
    %c1_233 = arith.constant 1 : index
    %c0_234 = arith.constant 0 : index
    %c0_235 = arith.constant 0 : index
    %238 = vector.load %arg3[%c0_232, %c1_233, %c0_234, %c0_235] : memref<1x4x18x128xf32, #tpu.memory_space<vmem>>, vector<1x1x18x128xf32>
    %239 = vector.shape_cast %238 : vector<1x1x18x128xf32> to vector<18x128xf32>
    %cst_236 = arith.constant 3.750000e-01 : f32
    %240 = vector.broadcast %cst_236 : f32 to vector<18x128xf32>
    %241 = arith.mulf %240, %239 : vector<18x128xf32>
    %242 = arith.addf %237, %241 : vector<18x128xf32>
    %c4_237 = arith.constant 4 : index
    %c0_238 = arith.constant 0 : index
    %c0_239 = arith.constant 0 : index
    %243 = vector.load %arg11[%c4_237, %c0_238, %c0_239] : memref<18x18x128xf32, #tpu.memory_space<vmem>>, vector<1x18x128xf32>
    %244 = vector.shape_cast %243 : vector<1x18x128xf32> to vector<18x128xf32>
    %245 = vector.shape_cast %242 : vector<18x128xf32> to vector<1x18x128xf32>
    tpu.vector_store %arg11[%c4_237, %c0_238, %c0_239], %245 {strides = array<i32>} : memref<18x18x128xf32, #tpu.memory_space<vmem>>, vector<1x18x128xf32>,
    %c0_240 = arith.constant 0 : index
    %c0_241 = arith.constant 0 : index
    %c0_242 = arith.constant 0 : index
    %c0_243 = arith.constant 0 : index
    %246 = vector.load %arg3[%c0_240, %c0_241, %c0_242, %c0_243] : memref<1x4x18x128xf32, #tpu.memory_space<vmem>>, vector<1x1x18x128xf32>
    %247 = vector.shape_cast %246 : vector<1x1x18x128xf32> to vector<18x128xf32>
    %cst_244 = arith.constant 3.750000e-01 : f32
    %248 = vector.broadcast %cst_244 : f32 to vector<18x128xf32>
    %249 = arith.mulf %248, %247 : vector<18x128xf32>
    %c0_245 = arith.constant 0 : index
    %c1_246 = arith.constant 1 : index
    %c0_247 = arith.constant 0 : index
    %c0_248 = arith.constant 0 : index
    %250 = vector.load %arg3[%c0_245, %c1_246, %c0_247, %c0_248] : memref<1x4x18x128xf32, #tpu.memory_space<vmem>>, vector<1x1x18x128xf32>
    %251 = vector.shape_cast %250 : vector<1x1x18x128xf32> to vector<18x128xf32>
    %cst_249 = arith.constant 6.250000e-01 : f32
    %252 = vector.broadcast %cst_249 : f32 to vector<18x128xf32>
    %253 = arith.mulf %252, %251 : vector<18x128xf32>
    %254 = arith.addf %249, %253 : vector<18x128xf32>
    %c5_250 = arith.constant 5 : index
    %c0_251 = arith.constant 0 : index
    %c0_252 = arith.constant 0 : index
    %255 = vector.load %arg11[%c5_250, %c0_251, %c0_252] : memref<18x18x128xf32, #tpu.memory_space<vmem>>, vector<1x18x128xf32>
    %256 = vector.shape_cast %255 : vector<1x18x128xf32> to vector<18x128xf32>
    %257 = vector.shape_cast %254 : vector<18x128xf32> to vector<1x18x128xf32>
    tpu.vector_store %arg11[%c5_250, %c0_251, %c0_252], %257 {strides = array<i32>} : memref<18x18x128xf32, #tpu.memory_space<vmem>>, vector<1x18x128xf32>,
    %c0_253 = arith.constant 0 : index
    %c0_254 = arith.constant 0 : index
    %c0_255 = arith.constant 0 : index
    %c0_256 = arith.constant 0 : index
    %258 = vector.load %arg3[%c0_253, %c0_254, %c0_255, %c0_256] : memref<1x4x18x128xf32, #tpu.memory_space<vmem>>, vector<1x1x18x128xf32>
    %259 = vector.shape_cast %258 : vector<1x1x18x128xf32> to vector<18x128xf32>
    %cst_257 = arith.constant 1.250000e-01 : f32
    %260 = vector.broadcast %cst_257 : f32 to vector<18x128xf32>
    %261 = arith.mulf %260, %259 : vector<18x128xf32>
    %c0_258 = arith.constant 0 : index
    %c1_259 = arith.constant 1 : index
    %c0_260 = arith.constant 0 : index
    %c0_261 = arith.constant 0 : index
    %262 = vector.load %arg3[%c0_258, %c1_259, %c0_260, %c0_261] : memref<1x4x18x128xf32, #tpu.memory_space<vmem>>, vector<1x1x18x128xf32>
    %263 = vector.shape_cast %262 : vector<1x1x18x128xf32> to vector<18x128xf32>
    %cst_262 = arith.constant 8.750000e-01 : f32
    %264 = vector.broadcast %cst_262 : f32 to vector<18x128xf32>
    %265 = arith.mulf %264, %263 : vector<18x128xf32>
    %266 = arith.addf %261, %265 : vector<18x128xf32>
    %c6_263 = arith.constant 6 : index
    %c0_264 = arith.constant 0 : index
    %c0_265 = arith.constant 0 : index
    %267 = vector.load %arg11[%c6_263, %c0_264, %c0_265] : memref<18x18x128xf32, #tpu.memory_space<vmem>>, vector<1x18x128xf32>
    %268 = vector.shape_cast %267 : vector<1x18x128xf32> to vector<18x128xf32>
    %269 = vector.shape_cast %266 : vector<18x128xf32> to vector<1x18x128xf32>
    tpu.vector_store %arg11[%c6_263, %c0_264, %c0_265], %269 {strides = array<i32>} : memref<18x18x128xf32, #tpu.memory_space<vmem>>, vector<1x18x128xf32>,
    %c0_266 = arith.constant 0 : index
    %c1_267 = arith.constant 1 : index
    %c0_268 = arith.constant 0 : index
    %c0_269 = arith.constant 0 : index
    %270 = vector.load %arg3[%c0_266, %c1_267, %c0_268, %c0_269] : memref<1x4x18x128xf32, #tpu.memory_space<vmem>>, vector<1x1x18x128xf32>
    %271 = vector.shape_cast %270 : vector<1x1x18x128xf32> to vector<18x128xf32>
    %cst_270 = arith.constant 8.750000e-01 : f32
    %272 = vector.broadcast %cst_270 : f32 to vector<18x128xf32>
    %273 = arith.mulf %272, %271 : vector<18x128xf32>
    %c0_271 = arith.constant 0 : index
    %c2_272 = arith.constant 2 : index
    %c0_273 = arith.constant 0 : index
    %c0_274 = arith.constant 0 : index
    %274 = vector.load %arg3[%c0_271, %c2_272, %c0_273, %c0_274] : memref<1x4x18x128xf32, #tpu.memory_space<vmem>>, vector<1x1x18x128xf32>
    %275 = vector.shape_cast %274 : vector<1x1x18x128xf32> to vector<18x128xf32>
    %cst_275 = arith.constant 1.250000e-01 : f32
    %276 = vector.broadcast %cst_275 : f32 to vector<18x128xf32>
    %277 = arith.mulf %276, %275 : vector<18x128xf32>
    %278 = arith.addf %273, %277 : vector<18x128xf32>
    %c7_276 = arith.constant 7 : index
    %c0_277 = arith.constant 0 : index
    %c0_278 = arith.constant 0 : index
    %279 = vector.load %arg11[%c7_276, %c0_277, %c0_278] : memref<18x18x128xf32, #tpu.memory_space<vmem>>, vector<1x18x128xf32>
    %280 = vector.shape_cast %279 : vector<1x18x128xf32> to vector<18x128xf32>
    %281 = vector.shape_cast %278 : vector<18x128xf32> to vector<1x18x128xf32>
    tpu.vector_store %arg11[%c7_276, %c0_277, %c0_278], %281 {strides = array<i32>} : memref<18x18x128xf32, #tpu.memory_space<vmem>>, vector<1x18x128xf32>,
    %c0_279 = arith.constant 0 : index
    %c1_280 = arith.constant 1 : index
    %c0_281 = arith.constant 0 : index
    %c0_282 = arith.constant 0 : index
    %282 = vector.load %arg3[%c0_279, %c1_280, %c0_281, %c0_282] : memref<1x4x18x128xf32, #tpu.memory_space<vmem>>, vector<1x1x18x128xf32>
    %283 = vector.shape_cast %282 : vector<1x1x18x128xf32> to vector<18x128xf32>
    %cst_283 = arith.constant 6.250000e-01 : f32
    %284 = vector.broadcast %cst_283 : f32 to vector<18x128xf32>
    %285 = arith.mulf %284, %283 : vector<18x128xf32>
    %c0_284 = arith.constant 0 : index
    %c2_285 = arith.constant 2 : index
    %c0_286 = arith.constant 0 : index
    %c0_287 = arith.constant 0 : index
    %286 = vector.load %arg3[%c0_284, %c2_285, %c0_286, %c0_287] : memref<1x4x18x128xf32, #tpu.memory_space<vmem>>, vector<1x1x18x128xf32>
    %287 = vector.shape_cast %286 : vector<1x1x18x128xf32> to vector<18x128xf32>
    %cst_288 = arith.constant 3.750000e-01 : f32
    %288 = vector.broadcast %cst_288 : f32 to vector<18x128xf32>
    %289 = arith.mulf %288, %287 : vector<18x128xf32>
    %290 = arith.addf %285, %289 : vector<18x128xf32>
    %c8_289 = arith.constant 8 : index
    %c0_290 = arith.constant 0 : index
    %c0_291 = arith.constant 0 : index
    %291 = vector.load %arg11[%c8_289, %c0_290, %c0_291] : memref<18x18x128xf32, #tpu.memory_space<vmem>>, vector<1x18x128xf32>
    %292 = vector.shape_cast %291 : vector<1x18x128xf32> to vector<18x128xf32>
    %293 = vector.shape_cast %290 : vector<18x128xf32> to vector<1x18x128xf32>
    tpu.vector_store %arg11[%c8_289, %c0_290, %c0_291], %293 {strides = array<i32>} : memref<18x18x128xf32, #tpu.memory_space<vmem>>, vector<1x18x128xf32>,
    %c0_292 = arith.constant 0 : index
    %c1_293 = arith.constant 1 : index
    %c0_294 = arith.constant 0 : index
    %c0_295 = arith.constant 0 : index
    %294 = vector.load %arg3[%c0_292, %c1_293, %c0_294, %c0_295] : memref<1x4x18x128xf32, #tpu.memory_space<vmem>>, vector<1x1x18x128xf32>
    %295 = vector.shape_cast %294 : vector<1x1x18x128xf32> to vector<18x128xf32>
    %cst_296 = arith.constant 3.750000e-01 : f32
    %296 = vector.broadcast %cst_296 : f32 to vector<18x128xf32>
    %297 = arith.mulf %296, %295 : vector<18x128xf32>
    %c0_297 = arith.constant 0 : index
    %c2_298 = arith.constant 2 : index
    %c0_299 = arith.constant 0 : index
    %c0_300 = arith.constant 0 : index
    %298 = vector.load %arg3[%c0_297, %c2_298, %c0_299, %c0_300] : memref<1x4x18x128xf32, #tpu.memory_space<vmem>>, vector<1x1x18x128xf32>
    %299 = vector.shape_cast %298 : vector<1x1x18x128xf32> to vector<18x128xf32>
    %cst_301 = arith.constant 6.250000e-01 : f32
    %300 = vector.broadcast %cst_301 : f32 to vector<18x128xf32>
    %301 = arith.mulf %300, %299 : vector<18x128xf32>
    %302 = arith.addf %297, %301 : vector<18x128xf32>
    %c9_302 = arith.constant 9 : index
    %c0_303 = arith.constant 0 : index
    %c0_304 = arith.constant 0 : index
    %303 = vector.load %arg11[%c9_302, %c0_303, %c0_304] : memref<18x18x128xf32, #tpu.memory_space<vmem>>, vector<1x18x128xf32>
    %304 = vector.shape_cast %303 : vector<1x18x128xf32> to vector<18x128xf32>
    %305 = vector.shape_cast %302 : vector<18x128xf32> to vector<1x18x128xf32>
    tpu.vector_store %arg11[%c9_302, %c0_303, %c0_304], %305 {strides = array<i32>} : memref<18x18x128xf32, #tpu.memory_space<vmem>>, vector<1x18x128xf32>,
    %c0_305 = arith.constant 0 : index
    %c1_306 = arith.constant 1 : index
    %c0_307 = arith.constant 0 : index
    %c0_308 = arith.constant 0 : index
    %306 = vector.load %arg3[%c0_305, %c1_306, %c0_307, %c0_308] : memref<1x4x18x128xf32, #tpu.memory_space<vmem>>, vector<1x1x18x128xf32>
    %307 = vector.shape_cast %306 : vector<1x1x18x128xf32> to vector<18x128xf32>
    %cst_309 = arith.constant 1.250000e-01 : f32
    %308 = vector.broadcast %cst_309 : f32 to vector<18x128xf32>
    %309 = arith.mulf %308, %307 : vector<18x128xf32>
    %c0_310 = arith.constant 0 : index
    %c2_311 = arith.constant 2 : index
    %c0_312 = arith.constant 0 : index
    %c0_313 = arith.constant 0 : index
    %310 = vector.load %arg3[%c0_310, %c2_311, %c0_312, %c0_313] : memref<1x4x18x128xf32, #tpu.memory_space<vmem>>, vector<1x1x18x128xf32>
    %311 = vector.shape_cast %310 : vector<1x1x18x128xf32> to vector<18x128xf32>
    %cst_314 = arith.constant 8.750000e-01 : f32
    %312 = vector.broadcast %cst_314 : f32 to vector<18x128xf32>
    %313 = arith.mulf %312, %311 : vector<18x128xf32>
    %314 = arith.addf %309, %313 : vector<18x128xf32>
    %c10_315 = arith.constant 10 : index
    %c0_316 = arith.constant 0 : index
    %c0_317 = arith.constant 0 : index
    %315 = vector.load %arg11[%c10_315, %c0_316, %c0_317] : memref<18x18x128xf32, #tpu.memory_space<vmem>>, vector<1x18x128xf32>
    %316 = vector.shape_cast %315 : vector<1x18x128xf32> to vector<18x128xf32>
    %317 = vector.shape_cast %314 : vector<18x128xf32> to vector<1x18x128xf32>
    tpu.vector_store %arg11[%c10_315, %c0_316, %c0_317], %317 {strides = array<i32>} : memref<18x18x128xf32, #tpu.memory_space<vmem>>, vector<1x18x128xf32>,
    %c0_318 = arith.constant 0 : index
    %c2_319 = arith.constant 2 : index
    %c0_320 = arith.constant 0 : index
    %c0_321 = arith.constant 0 : index
    %318 = vector.load %arg3[%c0_318, %c2_319, %c0_320, %c0_321] : memref<1x4x18x128xf32, #tpu.memory_space<vmem>>, vector<1x1x18x128xf32>
    %319 = vector.shape_cast %318 : vector<1x1x18x128xf32> to vector<18x128xf32>
    %cst_322 = arith.constant 8.750000e-01 : f32
    %320 = vector.broadcast %cst_322 : f32 to vector<18x128xf32>
    %321 = arith.mulf %320, %319 : vector<18x128xf32>
    %c0_323 = arith.constant 0 : index
    %c3_324 = arith.constant 3 : index
    %c0_325 = arith.constant 0 : index
    %c0_326 = arith.constant 0 : index
    %322 = vector.load %arg3[%c0_323, %c3_324, %c0_325, %c0_326] : memref<1x4x18x128xf32, #tpu.memory_space<vmem>>, vector<1x1x18x128xf32>
    %323 = vector.shape_cast %322 : vector<1x1x18x128xf32> to vector<18x128xf32>
    %cst_327 = arith.constant 1.250000e-01 : f32
    %324 = vector.broadcast %cst_327 : f32 to vector<18x128xf32>
    %325 = arith.mulf %324, %323 : vector<18x128xf32>
    %326 = arith.addf %321, %325 : vector<18x128xf32>
    %c11_328 = arith.constant 11 : index
    %c0_329 = arith.constant 0 : index
    %c0_330 = arith.constant 0 : index
    %327 = vector.load %arg11[%c11_328, %c0_329, %c0_330] : memref<18x18x128xf32, #tpu.memory_space<vmem>>, vector<1x18x128xf32>
    %328 = vector.shape_cast %327 : vector<1x18x128xf32> to vector<18x128xf32>
    %329 = vector.shape_cast %326 : vector<18x128xf32> to vector<1x18x128xf32>
    tpu.vector_store %arg11[%c11_328, %c0_329, %c0_330], %329 {strides = array<i32>} : memref<18x18x128xf32, #tpu.memory_space<vmem>>, vector<1x18x128xf32>,
    %c0_331 = arith.constant 0 : index
    %c2_332 = arith.constant 2 : index
    %c0_333 = arith.constant 0 : index
    %c0_334 = arith.constant 0 : index
    %330 = vector.load %arg3[%c0_331, %c2_332, %c0_333, %c0_334] : memref<1x4x18x128xf32, #tpu.memory_space<vmem>>, vector<1x1x18x128xf32>
    %331 = vector.shape_cast %330 : vector<1x1x18x128xf32> to vector<18x128xf32>
    %cst_335 = arith.constant 6.250000e-01 : f32
    %332 = vector.broadcast %cst_335 : f32 to vector<18x128xf32>
    %333 = arith.mulf %332, %331 : vector<18x128xf32>
    %c0_336 = arith.constant 0 : index
    %c3_337 = arith.constant 3 : index
    %c0_338 = arith.constant 0 : index
    %c0_339 = arith.constant 0 : index
    %334 = vector.load %arg3[%c0_336, %c3_337, %c0_338, %c0_339] : memref<1x4x18x128xf32, #tpu.memory_space<vmem>>, vector<1x1x18x128xf32>
    %335 = vector.shape_cast %334 : vector<1x1x18x128xf32> to vector<18x128xf32>
    %cst_340 = arith.constant 3.750000e-01 : f32
    %336 = vector.broadcast %cst_340 : f32 to vector<18x128xf32>
    %337 = arith.mulf %336, %335 : vector<18x128xf32>
    %338 = arith.addf %333, %337 : vector<18x128xf32>
    %c12_341 = arith.constant 12 : index
    %c0_342 = arith.constant 0 : index
    %c0_343 = arith.constant 0 : index
    %339 = vector.load %arg11[%c12_341, %c0_342, %c0_343] : memref<18x18x128xf32, #tpu.memory_space<vmem>>, vector<1x18x128xf32>
    %340 = vector.shape_cast %339 : vector<1x18x128xf32> to vector<18x128xf32>
    %341 = vector.shape_cast %338 : vector<18x128xf32> to vector<1x18x128xf32>
    tpu.vector_store %arg11[%c12_341, %c0_342, %c0_343], %341 {strides = array<i32>} : memref<18x18x128xf32, #tpu.memory_space<vmem>>, vector<1x18x128xf32>,
    %c0_344 = arith.constant 0 : index
    %c2_345 = arith.constant 2 : index
    %c0_346 = arith.constant 0 : index
    %c0_347 = arith.constant 0 : index
    %342 = vector.load %arg3[%c0_344, %c2_345, %c0_346, %c0_347] : memref<1x4x18x128xf32, #tpu.memory_space<vmem>>, vector<1x1x18x128xf32>
    %343 = vector.shape_cast %342 : vector<1x1x18x128xf32> to vector<18x128xf32>
    %cst_348 = arith.constant 3.750000e-01 : f32
    %344 = vector.broadcast %cst_348 : f32 to vector<18x128xf32>
    %345 = arith.mulf %344, %343 : vector<18x128xf32>
    %c0_349 = arith.constant 0 : index
    %c3_350 = arith.constant 3 : index
    %c0_351 = arith.constant 0 : index
    %c0_352 = arith.constant 0 : index
    %346 = vector.load %arg3[%c0_349, %c3_350, %c0_351, %c0_352] : memref<1x4x18x128xf32, #tpu.memory_space<vmem>>, vector<1x1x18x128xf32>
    %347 = vector.shape_cast %346 : vector<1x1x18x128xf32> to vector<18x128xf32>
    %cst_353 = arith.constant 6.250000e-01 : f32
    %348 = vector.broadcast %cst_353 : f32 to vector<18x128xf32>
    %349 = arith.mulf %348, %347 : vector<18x128xf32>
    %350 = arith.addf %345, %349 : vector<18x128xf32>
    %c13_354 = arith.constant 13 : index
    %c0_355 = arith.constant 0 : index
    %c0_356 = arith.constant 0 : index
    %351 = vector.load %arg11[%c13_354, %c0_355, %c0_356] : memref<18x18x128xf32, #tpu.memory_space<vmem>>, vector<1x18x128xf32>
    %352 = vector.shape_cast %351 : vector<1x18x128xf32> to vector<18x128xf32>
    %353 = vector.shape_cast %350 : vector<18x128xf32> to vector<1x18x128xf32>
    tpu.vector_store %arg11[%c13_354, %c0_355, %c0_356], %353 {strides = array<i32>} : memref<18x18x128xf32, #tpu.memory_space<vmem>>, vector<1x18x128xf32>,
    %c0_357 = arith.constant 0 : index
    %c2_358 = arith.constant 2 : index
    %c0_359 = arith.constant 0 : index
    %c0_360 = arith.constant 0 : index
    %354 = vector.load %arg3[%c0_357, %c2_358, %c0_359, %c0_360] : memref<1x4x18x128xf32, #tpu.memory_space<vmem>>, vector<1x1x18x128xf32>
    %355 = vector.shape_cast %354 : vector<1x1x18x128xf32> to vector<18x128xf32>
    %cst_361 = arith.constant 1.250000e-01 : f32
    %356 = vector.broadcast %cst_361 : f32 to vector<18x128xf32>
    %357 = arith.mulf %356, %355 : vector<18x128xf32>
    %c0_362 = arith.constant 0 : index
    %c3_363 = arith.constant 3 : index
    %c0_364 = arith.constant 0 : index
    %c0_365 = arith.constant 0 : index
    %358 = vector.load %arg3[%c0_362, %c3_363, %c0_364, %c0_365] : memref<1x4x18x128xf32, #tpu.memory_space<vmem>>, vector<1x1x18x128xf32>
    %359 = vector.shape_cast %358 : vector<1x1x18x128xf32> to vector<18x128xf32>
    %cst_366 = arith.constant 8.750000e-01 : f32
    %360 = vector.broadcast %cst_366 : f32 to vector<18x128xf32>
    %361 = arith.mulf %360, %359 : vector<18x128xf32>
    %362 = arith.addf %357, %361 : vector<18x128xf32>
    %c14_367 = arith.constant 14 : index
    %c0_368 = arith.constant 0 : index
    %c0_369 = arith.constant 0 : index
    %363 = vector.load %arg11[%c14_367, %c0_368, %c0_369] : memref<18x18x128xf32, #tpu.memory_space<vmem>>, vector<1x18x128xf32>
    %364 = vector.shape_cast %363 : vector<1x18x128xf32> to vector<18x128xf32>
    %365 = vector.shape_cast %362 : vector<18x128xf32> to vector<1x18x128xf32>
    tpu.vector_store %arg11[%c14_367, %c0_368, %c0_369], %365 {strides = array<i32>} : memref<18x18x128xf32, #tpu.memory_space<vmem>>, vector<1x18x128xf32>,
    %c0_370 = arith.constant 0 : index
    %c3_371 = arith.constant 3 : index
    %c0_372 = arith.constant 0 : index
    %c0_373 = arith.constant 0 : index
    %366 = vector.load %arg3[%c0_370, %c3_371, %c0_372, %c0_373] : memref<1x4x18x128xf32, #tpu.memory_space<vmem>>, vector<1x1x18x128xf32>
    %367 = vector.shape_cast %366 : vector<1x1x18x128xf32> to vector<18x128xf32>
    %c15_374 = arith.constant 15 : index
    %c0_375 = arith.constant 0 : index
    %c0_376 = arith.constant 0 : index
    %368 = vector.load %arg11[%c15_374, %c0_375, %c0_376] : memref<18x18x128xf32, #tpu.memory_space<vmem>>, vector<1x18x128xf32>
    %369 = vector.shape_cast %368 : vector<1x18x128xf32> to vector<18x128xf32>
    %370 = vector.shape_cast %367 : vector<18x128xf32> to vector<1x18x128xf32>
    tpu.vector_store %arg11[%c15_374, %c0_375, %c0_376], %370 {strides = array<i32>} : memref<18x18x128xf32, #tpu.memory_space<vmem>>, vector<1x18x128xf32>,
    %c0_377 = arith.constant 0 : index
    %c3_378 = arith.constant 3 : index
    %c0_379 = arith.constant 0 : index
    %c0_380 = arith.constant 0 : index
    %371 = vector.load %arg3[%c0_377, %c3_378, %c0_379, %c0_380] : memref<1x4x18x128xf32, #tpu.memory_space<vmem>>, vector<1x1x18x128xf32>
    %372 = vector.shape_cast %371 : vector<1x1x18x128xf32> to vector<18x128xf32>
    %c16_381 = arith.constant 16 : index
    %c0_382 = arith.constant 0 : index
    %c0_383 = arith.constant 0 : index
    %373 = vector.load %arg11[%c16_381, %c0_382, %c0_383] : memref<18x18x128xf32, #tpu.memory_space<vmem>>, vector<1x18x128xf32>
    %374 = vector.shape_cast %373 : vector<1x18x128xf32> to vector<18x128xf32>
    %375 = vector.shape_cast %372 : vector<18x128xf32> to vector<1x18x128xf32>
    tpu.vector_store %arg11[%c16_381, %c0_382, %c0_383], %375 {strides = array<i32>} : memref<18x18x128xf32, #tpu.memory_space<vmem>>, vector<1x18x128xf32>,
    %c0_384 = arith.constant 0 : index
    %c0_385 = arith.constant 0 : index
    %c0_386 = arith.constant 0 : index
    %376 = vector.load %arg11[%c0_384, %c0_385, %c0_386] : memref<18x18x128xf32, #tpu.memory_space<vmem>>, vector<18x18x128xf32>
    %c0_387 = arith.constant 0 : index
    %c0_388 = arith.constant 0 : index
    %377 = vector.load %arg6[%c0_387, %c0_388] : memref<1152x128xbf16, #tpu.memory_space<vmem>>, vector<1152x128xbf16>
    %c0_389 = arith.constant 0 : index
    %c0_390 = arith.constant 0 : index
    %378 = vector.load %arg7[%c0_389, %c0_390] : memref<1x128xf32, #tpu.memory_space<vmem>>, vector<1x128xf32>
    %379 = vector.extract_strided_slice %376 {offsets = [0, 0, 0], sizes = [16, 16, 128], strides = [1, 1, 1]} : vector<18x18x128xf32> to vector<16x16x128xf32>
    %380 = vector.extract_strided_slice %376 {offsets = [0, 1, 0], sizes = [16, 16, 128], strides = [1, 1, 1]} : vector<18x18x128xf32> to vector<16x16x128xf32>
    %381 = vector.extract_strided_slice %376 {offsets = [0, 2, 0], sizes = [16, 16, 128], strides = [1, 1, 1]} : vector<18x18x128xf32> to vector<16x16x128xf32>
    %382 = vector.extract_strided_slice %376 {offsets = [1, 0, 0], sizes = [16, 16, 128], strides = [1, 1, 1]} : vector<18x18x128xf32> to vector<16x16x128xf32>
    %383 = vector.extract_strided_slice %376 {offsets = [1, 1, 0], sizes = [16, 16, 128], strides = [1, 1, 1]} : vector<18x18x128xf32> to vector<16x16x128xf32>
    %384 = vector.extract_strided_slice %376 {offsets = [1, 2, 0], sizes = [16, 16, 128], strides = [1, 1, 1]} : vector<18x18x128xf32> to vector<16x16x128xf32>
    %385 = vector.extract_strided_slice %376 {offsets = [2, 0, 0], sizes = [16, 16, 128], strides = [1, 1, 1]} : vector<18x18x128xf32> to vector<16x16x128xf32>
    %386 = vector.extract_strided_slice %376 {offsets = [2, 1, 0], sizes = [16, 16, 128], strides = [1, 1, 1]} : vector<18x18x128xf32> to vector<16x16x128xf32>
    %387 = vector.extract_strided_slice %376 {offsets = [2, 2, 0], sizes = [16, 16, 128], strides = [1, 1, 1]} : vector<18x18x128xf32> to vector<16x16x128xf32>
    %388 = tpu.concatenate %379, %380, %381, %382, %383, %384, %385, %386, %387 in 2 : vector<16x16x128xf32>, vector<16x16x128xf32>, vector<16x16x128xf32>, vector<16x16x128xf32>, vector<16x16x128xf32>, vector<16x16x128xf32>, vector<16x16x128xf32>, vector<16x16x128xf32>, vector<16x16x128xf32> -> vector<16x16x1152xf32>
    %389 = vector.shape_cast %388 : vector<16x16x1152xf32> to vector<256x1152xf32>
    %390 = arith.truncf %389 : vector<256x1152xf32> to vector<256x1152xbf16>
    %cst_391 = arith.constant dense<0.000000e+00> : vector<256x128xf32>
    %391 = tpu.matmul %390, %377, %cst_391 {dimension_numbers = #tpu.dot_dimension_numbers<[1], [0], [0], [1], [0, 0, 1, 1], [], []>} : vector<256x1152xbf16>, vector<1152x128xbf16>, vector<256x128xf32> -> vector<256x128xf32>
    %392 = vector.broadcast %378 : vector<1x128xf32> to vector<256x128xf32>
    %393 = arith.addf %391, %392 : vector<256x128xf32>
    %cst_392 = arith.constant 0.000000e+00 : f32
    %394 = vector.broadcast %cst_392 : f32 to vector<256x128xf32>
    %395 = arith.maximumf %393, %394 : vector<256x128xf32>
    %396 = arith.addf %204, %395 : vector<256x128xf32>
    %c0_393 = arith.constant 0 : index
    %c0_394 = arith.constant 0 : index
    %c0_395 = arith.constant 0 : index
    %c0_396 = arith.constant 0 : index
    %397 = vector.load %arg1[%c0_393, %c0_394, %c0_395, %c0_396] : memref<1x16x16x128xf32, #tpu.memory_space<vmem>>, vector<1x16x16x128xf32>
    %398 = vector.shape_cast %397 : vector<1x16x16x128xf32> to vector<16x16x128xf32>
    %399 = vector.shape_cast %398 : vector<16x16x128xf32> to vector<256x128xf32>
    %400 = arith.addf %396, %399 : vector<256x128xf32>
    %cst_397 = arith.constant 0.000000e+00 : f32
    %401 = vector.broadcast %cst_397 : f32 to vector<18x32x128xf32>
    %c0_398 = arith.constant 0 : index
    %c0_399 = arith.constant 0 : index
    %c0_400 = arith.constant 0 : index
    %402 = vector.load %arg12[%c0_398, %c0_399, %c0_400] : memref<18x32x128xf32, #tpu.memory_space<vmem>>, vector<18x32x128xf32>
    tpu.vector_store %arg12[%c0_398, %c0_399, %c0_400], %401 {strides = array<i32>} : memref<18x32x128xf32, #tpu.memory_space<vmem>>, vector<18x32x128xf32>,
    %403 = vector.shape_cast %400 : vector<256x128xf32> to vector<16x16x128xf32>
    %c1_401 = arith.constant 1 : index
    %c8_402 = arith.constant 8 : index
    %c0_403 = arith.constant 0 : index
    %404 = vector.load %arg12[%c1_401, %c8_402, %c0_403] : memref<18x32x128xf32, #tpu.memory_space<vmem>>, vector<16x16x128xf32>
    tpu.vector_store %arg12[%c1_401, %c8_402, %c0_403], %403 {strides = array<i32>} : memref<18x32x128xf32, #tpu.memory_space<vmem>>, vector<16x16x128xf32>,
    %c0_404 = arith.constant 0 : index
    %c0_405 = arith.constant 0 : index
    %c0_406 = arith.constant 0 : index
    %405 = vector.load %arg12[%c0_404, %c0_405, %c0_406] : memref<18x32x128xf32, #tpu.memory_space<vmem>>, vector<18x32x128xf32>
    %c0_407 = arith.constant 0 : index
    %c0_408 = arith.constant 0 : index
    %406 = vector.load %arg8[%c0_407, %c0_408] : memref<1152x128xbf16, #tpu.memory_space<vmem>>, vector<1152x128xbf16>
    %c0_409 = arith.constant 0 : index
    %c0_410 = arith.constant 0 : index
    %407 = vector.load %arg9[%c0_409, %c0_410] : memref<1x128xf32, #tpu.memory_space<vmem>>, vector<1x128xf32>
    %408 = vector.extract_strided_slice %405 {offsets = [0, 7, 0], sizes = [16, 16, 128], strides = [1, 1, 1]} : vector<18x32x128xf32> to vector<16x16x128xf32>
    %409 = vector.extract_strided_slice %405 {offsets = [0, 8, 0], sizes = [16, 16, 128], strides = [1, 1, 1]} : vector<18x32x128xf32> to vector<16x16x128xf32>
    %410 = vector.extract_strided_slice %405 {offsets = [0, 9, 0], sizes = [16, 16, 128], strides = [1, 1, 1]} : vector<18x32x128xf32> to vector<16x16x128xf32>
    %411 = vector.extract_strided_slice %405 {offsets = [1, 7, 0], sizes = [16, 16, 128], strides = [1, 1, 1]} : vector<18x32x128xf32> to vector<16x16x128xf32>
    %412 = vector.extract_strided_slice %405 {offsets = [1, 8, 0], sizes = [16, 16, 128], strides = [1, 1, 1]} : vector<18x32x128xf32> to vector<16x16x128xf32>
    %413 = vector.extract_strided_slice %405 {offsets = [1, 9, 0], sizes = [16, 16, 128], strides = [1, 1, 1]} : vector<18x32x128xf32> to vector<16x16x128xf32>
    %414 = vector.extract_strided_slice %405 {offsets = [2, 7, 0], sizes = [16, 16, 128], strides = [1, 1, 1]} : vector<18x32x128xf32> to vector<16x16x128xf32>
    %415 = vector.extract_strided_slice %405 {offsets = [2, 8, 0], sizes = [16, 16, 128], strides = [1, 1, 1]} : vector<18x32x128xf32> to vector<16x16x128xf32>
    %416 = vector.extract_strided_slice %405 {offsets = [2, 9, 0], sizes = [16, 16, 128], strides = [1, 1, 1]} : vector<18x32x128xf32> to vector<16x16x128xf32>
    %417 = tpu.concatenate %408, %409, %410, %411, %412, %413, %414, %415, %416 in 2 : vector<16x16x128xf32>, vector<16x16x128xf32>, vector<16x16x128xf32>, vector<16x16x128xf32>, vector<16x16x128xf32>, vector<16x16x128xf32>, vector<16x16x128xf32>, vector<16x16x128xf32>, vector<16x16x128xf32> -> vector<16x16x1152xf32>
    %418 = vector.shape_cast %417 : vector<16x16x1152xf32> to vector<256x1152xf32>
    %419 = arith.truncf %418 : vector<256x1152xf32> to vector<256x1152xbf16>
    %cst_411 = arith.constant dense<0.000000e+00> : vector<256x128xf32>
    %420 = tpu.matmul %419, %406, %cst_411 {dimension_numbers = #tpu.dot_dimension_numbers<[1], [0], [0], [1], [0, 0, 1, 1], [], []>} : vector<256x1152xbf16>, vector<1152x128xbf16>, vector<256x128xf32> -> vector<256x128xf32>
    %421 = vector.broadcast %407 : vector<1x128xf32> to vector<256x128xf32>
    %422 = arith.addf %420, %421 : vector<256x128xf32>
    %cst_412 = arith.constant 0.000000e+00 : f32
    %423 = vector.broadcast %cst_412 : f32 to vector<256x128xf32>
    %424 = arith.maximumf %422, %423 : vector<256x128xf32>
    %425 = vector.shape_cast %424 : vector<256x128xf32> to vector<16x16x128xf32>
    %c0_413 = arith.constant 0 : index
    %c0_414 = arith.constant 0 : index
    %c0_415 = arith.constant 0 : index
    %c0_416 = arith.constant 0 : index
    %426 = vector.load %arg10[%c0_413, %c0_414, %c0_415, %c0_416] : memref<1x16x16x128xf32, #tpu.memory_space<vmem>>, vector<1x16x16x128xf32>
    %427 = vector.shape_cast %426 : vector<1x16x16x128xf32> to vector<16x16x128xf32>
    %428 = vector.shape_cast %425 : vector<16x16x128xf32> to vector<1x16x16x128xf32>
    tpu.vector_store %arg10[%c0_413, %c0_414, %c0_415, %c0_416], %428 {strides = array<i32>} : memref<1x16x16x128xf32, #tpu.memory_space<vmem>>, vector<1x16x16x128xf32>,
    return
  }
  func.func @transform_0(%arg0: i32) -> (i32, i32, i32, i32) {
    %c0_i32 = arith.constant 0 : i32
    %c0_i32_0 = arith.constant 0 : i32
    %c0_i32_1 = arith.constant 0 : i32
    %c0_i32_2 = arith.constant 0 : i32
    return %arg0, %c0_i32, %c0_i32_0, %c0_i32_1 : i32, i32, i32, i32
  }
  func.func @transform_1(%arg0: i32) -> (i32, i32, i32, i32) {
    %c0_i32 = arith.constant 0 : i32
    %c0_i32_0 = arith.constant 0 : i32
    %c0_i32_1 = arith.constant 0 : i32
    %c0_i32_2 = arith.constant 0 : i32
    return %arg0, %c0_i32, %c0_i32_0, %c0_i32_1 : i32, i32, i32, i32
  }
  func.func @transform_2(%arg0: i32) -> (i32, i32, i32, i32) {
    %c0_i32 = arith.constant 0 : i32
    %c0_i32_0 = arith.constant 0 : i32
    %c0_i32_1 = arith.constant 0 : i32
    %c0_i32_2 = arith.constant 0 : i32
    return %arg0, %c0_i32, %c0_i32_0, %c0_i32_1 : i32, i32, i32, i32
  }
  func.func @transform_3(%arg0: i32) -> (i32, i32) {
    %c0_i32 = arith.constant 0 : i32
    %c0_i32_0 = arith.constant 0 : i32
    %c0_i32_1 = arith.constant 0 : i32
    return %c0_i32, %c0_i32_0 : i32, i32
  }
  func.func @transform_4(%arg0: i32) -> (i32, i32) {
    %c0_i32 = arith.constant 0 : i32
    %c0_i32_0 = arith.constant 0 : i32
    %c0_i32_1 = arith.constant 0 : i32
    return %c0_i32, %c0_i32_0 : i32, i32
  }
  func.func @transform_5(%arg0: i32) -> (i32, i32) {
    %c0_i32 = arith.constant 0 : i32
    %c0_i32_0 = arith.constant 0 : i32
    %c0_i32_1 = arith.constant 0 : i32
    return %c0_i32, %c0_i32_0 : i32, i32
  }
  func.func @transform_6(%arg0: i32) -> (i32, i32) {
    %c0_i32 = arith.constant 0 : i32
    %c0_i32_0 = arith.constant 0 : i32
    %c0_i32_1 = arith.constant 0 : i32
    return %c0_i32, %c0_i32_0 : i32, i32
  }
  func.func @transform_7(%arg0: i32) -> (i32, i32) {
    %c0_i32 = arith.constant 0 : i32
    %c0_i32_0 = arith.constant 0 : i32
    %c0_i32_1 = arith.constant 0 : i32
    return %c0_i32, %c0_i32_0 : i32, i32
  }
  func.func @transform_8(%arg0: i32) -> (i32, i32) {
    %c0_i32 = arith.constant 0 : i32
    %c0_i32_0 = arith.constant 0 : i32
    %c0_i32_1 = arith.constant 0 : i32
    return %c0_i32, %c0_i32_0 : i32, i32
  }
  func.func @transform_9(%arg0: i32) -> (i32, i32, i32, i32) {
    %c0_i32 = arith.constant 0 : i32
    %c0_i32_0 = arith.constant 0 : i32
    %c0_i32_1 = arith.constant 0 : i32
    %c0_i32_2 = arith.constant 0 : i32
    return %arg0, %c0_i32, %c0_i32_0, %c0_i32_1 : i32, i32, i32, i32
  }
}

</mosaic_0001>

<bundles_post_ra>
// kernel: gf_forward.1
= control target key start
LH: loop header
LB: loop body
LE: loop exit
PB: predicated region body
PF: predicated region fallthrough
CT: control target
= control target key end

     0   :  { %s8363_s30 = smov 0   ;;  %s11908_s0 = inlined_call_operand.vmem [shape: f32[2,16,16,128], index: 0, kind: input, shape index: {}]   ;;  %s11909_s1 = inlined_call_operand.vmem [shape: f32[2,8,18,128], index: 1, kind: input, shape index: {}]   ;;  %s11910_s2 = inlined_call_operand.vmem [shape: f32[2,4,18,128], index: 2, kind: input, shape index: {}]   ;;  %s11911_s3 = inlined_call_operand.vmem [shape: bf16[1152,128], index: 3, kind: input, shape index: {}]   ;;  %s11912_s4 = inlined_call_operand.vmem [shape: f32[1,128], index: 4, kind: input, shape index: {}]   ;;  %s11913_s5 = inlined_call_operand.vmem [shape: bf16[1152,128], index: 5, kind: input, shape index: {}]   ;;  %s11914_s6 = inlined_call_operand.vmem [shape: f32[1,128], index: 6, kind: input, shape index: {}]   ;;  %s11915_s7 = inlined_call_operand.vmem [shape: bf16[1152,128], index: 7, kind: input, shape index: {}]   ;;  %s11916_s8 = inlined_call_operand.vmem [shape: f32[1,128], index: 8, kind: input, shape index: {}]   ;;  %s11917_s9 = inlined_call_operand.vmem [shape: f32[2,16,16,128], index: 9, kind: output, shape index: {}]  }
   0x1 LB: > { %s7018_s10 = sadd.s32 4294967295, %s8309_s30   ;;  %p7022_p0 = scmp.ge.s32.totalorder %s8309_s30, 1  ;;  %s8309_s30 = sphi %s8363_s30, %s19_s30  }
   0x2   : > { %p307_p1 = scmp.lt.s32.totalorder %s8309_s30, 3 }
   0x4   : > { %p308_p2 = pnand %p7022_p0, %p307_p1 }
   0x6   : > { %311 = sbr.rel (%p308_p2) target bundleno = 2041 (0x7f9), region = 56 }
   0xb   : > { %v8051_v0 = vld [vmem:[%s11911_s3 + $0x38] sm:$0xff]  ;;  %p353_p3 = scmp.lt.s32.totalorder %s7018_s10, 1  ;;  %v8311_v3 = vmov 0.0   ;;  %v8050_v4 = vld [vmem:[%s11911_s3 + $0x30] sm:$0xff]  ;;  %v8049_v7 = vld [vmem:[%s11911_s3 + $0x28] sm:$0xff]  ;;  %vm914_vm0 = vcmask 1046528  }
   0xc   : > { %v8377_v1 = vld [vmem:[%s11911_s3 + $0x78] sm:$0xff]  ;;  %2496 = vst [vmem:[#allocation2 + $0x98] sm:$0xff] %v8311_v3  ;;  %1663 = vmatpush.bf16.msra.mxu0 %v8051_v0  ;;  %8260 = vmatpush.bf16.msra.mxu3 %v8051_v0  ;;  %v8393_v5 = vld [vmem:[%s11911_s3 + $0x70] sm:$0xff]  ;;  %v8413_v8 = vld [vmem:[%s11911_s3 + $0x68] sm:$0xff]  ;;  %v915_v51 = vrot.slane %v8311_v3, 1  ;;  %v8549_v55 = vrot.slane %v8311_v3, 2 }
   0xd   : > { %v8382_v2 = vld [vmem:[%s11911_s3 + $0xb8] sm:$0xff]  ;;  %1752 = vmatpush.bf16.msra.mxu1 %v8377_v1  ;;  %v8398_v6 = vld [vmem:[%s11911_s3 + $0xb0] sm:$0xff]  ;;  %375 = vst [vmem:[#allocation2 + $0x10] sm:$0x3] %v8311_v3  ;;  %s12477_s10 = smov (!%p353_p3, %s7018_s10), 1  ;;  %v8418_v9 = vld [vmem:[%s11911_s3 + $0xa8] sm:$0xff] }
   0xe   : > { %1841 = vmatpush.bf16.msra.mxu2 %v8382_v2  ;;  %379 = vst [vmem:[#allocation2 + $0x110] sm:$0x3] %v8311_v3  ;;  %s8285_s23 = smul.u32 96, %s12477_s10  ;;  %v8048_v12 = vld [vmem:[%s11911_s3 + $0x20] sm:$0xff]  ;;  %v8047_v24 = vld [vmem:[%s11911_s3 + $0x18] sm:$0xff]  ;;  %v8046_v35 = vld [vmem:[%s11911_s3 + $0x10] sm:$0xff] }
   0xf   : > { %s8284_s14 = smul.u32 192, %s12477_s10  ;;  %v8448_v17 = vld [vmem:[%s11911_s3 + $0x60] sm:$0xff]  ;;  %v8474_v25 = vld [vmem:[%s11911_s3 + $0x58] sm:$0xff]  ;;  %v8514_v39 = vld [vmem:[%s11911_s3 + $0x50] sm:$0xff]  ;;  %12058 = vst [vmem:[#allocation4_spill] sm:$0xff] %v8549_v55  ;;  %vm1027_vm1 = vcmask 1045504  }
  0x10   : > { %1664 = vmatpush.bf16.msra.mxu0 %v8050_v4  ;;  %8261 = vmatpush.bf16.msra.mxu3 %v8050_v4  ;;  %s8423_s13 = scalar_lea.vmem %s11910_s2, %s8285_s23  ;;  %v8453_v18 = vld [vmem:[%s11911_s3 + $0xa0] sm:$0xff]  ;;  %v8479_v26 = vld [vmem:[%s11911_s3 + $0x98] sm:$0xff]  ;;  %v8519_v40 = vld [vmem:[%s11911_s3 + $0x90] sm:$0xff]  ;;  %s8042_s11 = sshll.u32 %s12477_s10, 8  ;;  %vm5206_vm2 = vcmask 1040384  }
  0x11   : > { %1753 = vmatpush.bf16.msra.mxu1 %v8393_v5  ;;  %v8427_v10 = vld [vmem:[%s8423_s13 + $0x30] sm:$0xff]  ;;  %v8430_v11 = vld [vmem:[%s8423_s13 + $0x38] sm:$0xff]  ;;  %v8438_v15 = vld [vmem:[%s8423_s13 + $0x48] sm:$0xff]  ;;  %s8463_s23 = scalar_lea.vmem %s11909_s1, %s8284_s14  ;;  %s10773_s15 = scalar_lea.vmem %s11908_s0, %s8042_s11 }
  0x12   : > { %1842 = vmatpush.bf16.msra.mxu2 %v8398_v6  ;;  %v2682_v13 = vmul.f32 0.625, %v8427_v10  ;;  %v2683_v14 = vmul.f32 0.625, %v8430_v11  ;;  %v8441_v16 = vld [vmem:[%s8423_s13 + $0x50] sm:$0xff]  ;;  %v2688_v19 = vmul.f32 0.375, %v8438_v15  ;;  %2736 = vst [vmem:[#allocation2 + $0x20] sm:$0xff] %v8438_v15  ;;  %v8482_v27 = vld [vmem:[%s8463_s23 + $0x78] sm:$0xff]  ;;  %s11833_s17 = scalar_lea.vmem %s11917_s9, %s8042_s11 }
  0x13   : > { %v2689_v20 = vmul.f32 0.375, %v8441_v16  ;;  %v8485_v28 = vld [vmem:[%s8463_s23 + $0x80] sm:$0xff]  ;;  %v382_v29 = vld [vmem:[%s8463_s23 + $0x10] sm:$0x3]  ;;  %v8492_v31 = vld [vmem:[%s8423_s13 + $0x8] sm:$0xff]  ;;  %v2700_v32 = vmul.f32 0.375, %v8427_v10 }
  0x14   : > { %1665 = vmatpush.bf16.msra.mxu0 %v8049_v7  ;;  %8262 = vmatpush.bf16.msra.mxu3 %v8049_v7  ;;  %v8457_v21 = vld [vmem:[#allocation2 + $0x10] sm:$0x3]  ;;  %v2691_v22 = vadd.f32 %v2688_v19, %v2682_v13  ;;  %v8489_v30 = vld [vmem:[%s8423_s13] sm:$0xff]  ;;  %v2701_v33 = vmul.f32 0.375, %v8430_v11  ;;  %v2706_v34 = vmul.f32 0.625, %v8438_v15  ;;  %2737 = vst [vmem:[#allocation2 + $0x1a0] sm:$0xff] %v8441_v16 }
  0x15   : > { %1754 = vmatpush.bf16.msra.mxu1 %v8413_v8  ;;  %2498 = vst [vmem:[#allocation2 + $0x10] sm:$0x3] %v8311_v3  ;;  %v2692_v23 = vadd.f32 %v2689_v20, %v2683_v14  ;;  %v8502_v36 = vld [vmem:[%s8463_s23 + $0x90] sm:$0xff]  ;;  %v8505_v37 = vld [vmem:[%s8463_s23 + $0x98] sm:$0xff]  ;;  %v2707_v38 = vmul.f32 0.625, %v8441_v16  ;;  %v585_v42 = vmul.f32 0.75, %v8482_v27 }
  0x16   : > { %1843 = vmatpush.bf16.msra.mxu2 %v8418_v9  ;;  %2694 = vst [vmem:[#allocation2 + $0xd8] sm:$0xff] %v2691_v22  ;;  %v2709_v41 = vadd.f32 %v2706_v34, %v2700_v32  ;;  %v586_v43 = vmul.f32 0.75, %v8485_v28  ;;  %v389_v45 = vld [vmem:[%s8463_s23 + $0x10] sm:$0x3]  ;;  %v8526_v46 = vmul.f32 0.25, %v8502_v36  ;;  %v8529_v47 = vmul.f32 0.25, %v8505_v37 }
  0x17   : > { %2695 = vst [vmem:[#allocation2 + $0x138] sm:$0xff] %v2692_v23  ;;  %v2710_v44 = vadd.f32 %v2707_v38, %v2701_v33  ;;  %v392_v48 = vmul.f32 0.75, %v389_v45  ;;  %v7031_v49 = vld [vmem:[%s8463_s23 + $0x28] sm:$0x3]  ;;  %v918_v56 = vrot.slane %v8457_v21, 1  ;;  %v1031_v57 = vrot.slane %v8457_v21, 2 }
  0x18   : > { %1666 = vmatpush.bf16.msra.mxu0 %v8048_v12  ;;  %8263 = vmatpush.bf16.msra.mxu3 %v8048_v12  ;;  %2505 = vst [vmem:[#allocation2 + $0x28] sm:$0xff] %v8489_v30  ;;  %v8045_v50 = vld [vmem:[%s11911_s3 + $0x8] sm:$0xff]  ;;  %v399_v52 = vmul.f32 0.25, %v7031_v49  ;;  %v8556_v59 = vadd.f32 %v8526_v46, %v585_v42  ;;  %v8559_v60 = vadd.f32 %v8529_v47, %v586_v43  ;;  %v2504_v61 = vld [vmem:[%s8423_s13 + $0x10] sm:$0x3]  ;;  %v8044_v62 = vld [vmem:[%s11911_s3] sm:$0xff] }
  0x19   : > { %1755 = vmatpush.bf16.msra.mxu1 %v8448_v17  ;;  %2506 = vst [vmem:[#allocation2 + $0x160] sm:$0xff] %v8492_v31  ;;  %v8541_v53 = vld [vmem:[%s11911_s3 + $0x48] sm:$0xff]  ;;  %v8570_v63 = vld [vmem:[%s11911_s3 + $0x40] sm:$0xff]  ;;  %v919_v3 = vsel %vm914_vm0, %v915_v51, %v918_v56  ;;  %v1032_v4 = vsel %vm1027_vm1, %v8549_v55, %v1031_v57  ;;  %v8083_v12 = vld [vmem:[%s11911_s3 + $0x138] sm:$0xff]  ;;  %v8312_v21 = vmov 0.0|0.0   ;;  %v2718_v23 = vmul.f32 0.125, %v8427_v10 }
  0x1a   : > { %1844 = vmatpush.bf16.msra.mxu2 %v8453_v18  ;;  %386 = vst [vmem:[#allocation2 + $0xf0] sm:$0x3] %v382_v29  ;;  %v8546_v54 = vld [vmem:[%s11911_s3 + $0x88] sm:$0xff]  ;;  %v402_v58 = vadd.f32 %v399_v52, %v392_v48  ;;  %v8575_v0 = vld [vmem:[%s11911_s3 + $0x80] sm:$0xff]  ;;  %v8587_v13 = vpack.c.bf16 %v8559_v60, %v8556_v59  ;;  %v1175_v14 = vpack.c.bf16 %v919_v3, %v915_v51  ;;  %v8091_v20 = vld [vmem:[%s11911_s3 + $0x178] sm:$0xff]  ;;  %v2724_v29 = vmul.f32 0.875, %v8438_v15 }
  0x1b   : > { %2712 = vst [vmem:[#allocation2 + $0xe0] sm:$0xff] %v2709_v41  ;;  %v1176_v19 = vpack.c.bf16 %v1032_v4, %v8549_v55  ;;  %v8598_v22 = vld [vmem:[%s8463_s23] sm:$0xff]  ;;  %v409_v32 = vld [vmem:[%s8463_s23 + $0x10] sm:$0x3]  ;;  %v8612_v38 = vld [vmem:[%s8463_s23 + $0x8] sm:$0xff]  ;;  %v606_v42 = vmul.f32 0.25, %v8485_v28 }
  0x1c   : > { %1667 = vmatpush.bf16.msra.mxu0 %v8047_v24  ;;  %8264 = vmatpush.bf16.msra.mxu3 %v8047_v24  ;;  %2713 = vst [vmem:[#allocation2 + $0x198] sm:$0xff] %v2710_v44  ;;  %v2719_v24 = vmul.f32 0.125, %v8430_v11  ;;  %v2510_v34 = vld [vmem:[%s8423_s13 + $0x10] sm:$0x3]  ;;  %v2727_v10 = vadd.f32 %v2724_v29, %v2718_v23  ;;  %v7034_v15 = vld [vmem:[%s8463_s23 + $0x28] sm:$0x3]  ;;  %v8652_v3 = vpack.c.bf16 %v8612_v38, %v8598_v22 }
  0x1d   : > { %1756 = vmatpush.bf16.msra.mxu1 %v8474_v25  ;;  %2511 = vst [vmem:[#allocation2 + $0xf8] sm:$0xff] %v8489_v30  ;;  %v8090_v11 = vld [vmem:[%s11911_s3 + $0x170] sm:$0xff]  ;;  %v8622_v43 = vmul.f32 0.75, %v8502_v36  ;;  %v8625_v44 = vmul.f32 0.75, %v8505_v37  ;;  %v412_v45 = vmul.f32 0.25, %v409_v32  ;;  %v920_v48 = vrot.slane %v8598_v22, 1 }
  0x1e   : > { %1845 = vmatpush.bf16.msra.mxu2 %v8479_v26  ;;  %2512 = vst [vmem:[#allocation2 + $0x78] sm:$0xff] %v8492_v31  ;;  %v1033_v28 = vrot.slane %v8598_v22, 2  ;;  %v1034_v36 = vrot.slane %v8612_v38, 2  ;;  %v8641_v56 = vld [vmem:[%s8463_s23 + $0x18] sm:$0xff]  ;;  %v8644_v57 = vld [vmem:[%s8463_s23 + $0x20] sm:$0xff]  ;;  %v390_v4 = vmul.f32 0.75, %v8598_v22 }
  0x1f   : > { %406 = vst [vmem:[#allocation2 + $0x100] sm:$0x3] %v402_v58  ;;  %v8638_v52 = vadd.f32 %v8625_v44, %v606_v42  ;;  %v8675_v23 = vld [vmem:[%s8463_s23 + $0xb0] sm:$0xff]  ;;  %v7037_v29 = vld [vmem:[%s8463_s23 + $0x28] sm:$0x3] }
  0x20   : > { %1668 = vmatpush.bf16.msra.mxu0 %v8046_v35  ;;  %8265 = vmatpush.bf16.msra.mxu3 %v8046_v35  ;;  %12059 = vst [vmem:[#allocation5_spill] sm:$0xff] %v8587_v13  ;;  %v8082_v35 = vld [vmem:[%s11911_s3 + $0x130] sm:$0xff]  ;;  %v7085_v42 = vld [vmem:[%s8463_s23 + $0x88] sm:$0x3] }
  0x21   : > { %1757 = vmatpush.bf16.msra.mxu1 %v8514_v39  ;;  %v8580_v7 = vld [vmem:[#allocation2 + $0xf0] sm:$0x3]  ;;  %2730 = vst [vmem:[#allocation2 + $0x48] sm:$0xff] %v2727_v10  ;;  %v8687_v10 = vld [vmem:[%s8423_s13 + $0x18] sm:$0xff] }
  0x22   : > { %1846 = vmatpush.bf16.msra.mxu2 %v8519_v40  ;;  %2507 = vst [vmem:[#allocation2 + $0xf0] sm:$0x3] %v2504_v61  ;;  %v923_v49 = vrot.slane %v8580_v7, 1 }
  0x24   : > { %1669 = vmatpush.bf16.msra.mxu0 %v8045_v50  ;;  %8266 = vmatpush.bf16.msra.mxu3 %v8045_v50  ;;  %v1036_v50 = vrot.slane %v8580_v7, 2 }
  0x25   : > { %1758 = vmatpush.bf16.msra.mxu1 %v8541_v53 }
  0x26   : > { %1847 = vmatpush.bf16.msra.mxu2 %v8546_v54  ;;  %v8605_v33 = vld [vmem:[#allocation2 + $0x100] sm:$0x3] }
  0x27   : > { %2513 = vst [vmem:[#allocation2 + $0x100] sm:$0x3] %v2510_v34  ;;  %v2517_v34 = vmul.f32 0.875, %v8489_v30 }
  0x28   : > { %1670 = vmatpush.bf16.msra.mxu0 %v8044_v62  ;;  %8267 = vmatpush.bf16.msra.mxu3 %v8044_v62  ;;  %v1037_v62 = vsel %vm1027_vm1, %v1034_v36, %v1036_v50 }
  0x29   : > { %1759 = vmatpush.bf16.msra.mxu1 %v8570_v63 }
  0x2a   : > { %1848 = vmatpush.bf16.msra.mxu2 %v8575_v0 }
  0x2b   : > { %1671 = vmatmul.bf16.vlgmr.msra.gmra.mxu0 %v8312_v21  ;;  %1731 = vmatmul.bf16.vlgmr.msra.gmra.mxu3 %v8587_v13  ;;  %v1041_v13 = vrot.slane %v8605_v33, 2 }
  0x2c   : > { %8268 = vmatpush.bf16.msrb.mxu3 %v8377_v1  ;;  %2019 = vmatpush.bf16.msrb.mxu0 %v8083_v12  ;;  %v2725_v1 = vmul.f32 0.875, %v8441_v16  ;;  %v605_v16 = vmul.f32 0.25, %v8482_v27  ;;  %v418_v27 = vmul.f32 0.75, %v7034_v15  ;;  %v391_v12 = vmul.f32 0.75, %v8612_v38 }
  0x2d   : > { %1760 = vmatmul.bf16.vlgmr.msra.gmra.mxu1 %v1175_v14  ;;  %1849 = vmatmul.bf16.vlgmr.msra.gmra.mxu2 %v1176_v19  ;;  %v8662_v14 = vmul.f32 0.25, %v8641_v56  ;;  %v8665_v19 = vmul.f32 0.25, %v8644_v57  ;;  %v2524_v15 = vmul.f32 0.125, %v8687_v10 }
  0x2e   : > { %2108 = vmatpush.bf16.msrb.mxu1 %v8091_v20  ;;  %v2728_v41 = vadd.f32 %v2725_v1, %v2719_v24  ;;  %v421_v37 = vadd.f32 %v418_v27, %v412_v45  ;;  %v8635_v51 = vadd.f32 %v8622_v43, %v605_v16  ;;  %v8668_v20 = vld [vmem:[%s8463_s23 + $0xa8] sm:$0xff]  ;;  %v632_v45 = vmul.f32 0.25, %v8675_v23 }
  0x2f   : > { %v631_v24 = vmul.f32 0.25, %v8668_v20  ;;  %v400_v32 = vadd.f32 %v8662_v14, %v390_v4  ;;  %v401_v1 = vadd.f32 %v8665_v19, %v391_v12  ;;  %v8081_v27 = vld [vmem:[%s11911_s3 + $0x128] sm:$0xff]  ;;  %v928_v12 = vrot.slane %v8605_v33, 1 }
  0x30   : > { %8269 = vmatpush.bf16.msrb.mxu3 %v8393_v5  ;;  %2020 = vmatpush.bf16.msrb.mxu0 %v8082_v35  ;;  %v921_v5 = vrot.slane %v8612_v38, 1  ;;  %2731 = vst [vmem:[#allocation2 + $0x58] sm:$0xff] %v2728_v41  ;;  %v8658_v7 = vpack.c.bf16 %v8638_v52, %v8635_v51  ;;  %v2518_v35 = vmul.f32 0.875, %v8492_v31  ;;  %v2516_v41 = vld [vmem:[%s8423_s13 + $0x10] sm:$0x3] }
  0x31   : > { %425 = vst [vmem:[#allocation2 + $0x40] sm:$0x3] %v421_v37  ;;  %v431_v37 = vmul.f32 0.75, %v7037_v29  ;;  %v1039_v4 = vrot.slane %v401_v1, 2  ;;  %v8723_v33 = vadd.f32 %v631_v24, %v8622_v43  ;;  %v8739_v43 = vpack.c.bf16 %v401_v1, %v400_v32 }
  0x32   : > { %2109 = vmatpush.bf16.msrb.mxu1 %v8090_v11  ;;  %v922_v58 = vsel %vm914_vm0, %v920_v48, %v921_v5  ;;  %v924_v61 = vsel %vm914_vm0, %v921_v5, %v923_v49  ;;  %12060 = vst [vmem:[#allocation6_spill] sm:$0xff] %v8658_v7  ;;  %v8690_v11 = vld [vmem:[%s8423_s13 + $0x20] sm:$0xff]  ;;  %v2519_v48 = vmul.f32 0.875, %v2516_v41  ;;  %v7400_v5 = vld [vmem:[%s8423_s13 + $0x28] sm:$0x3]  ;;  %v650_v24 = vmul.f32 0.75, %v8668_v20 }
  0x33   : > { %v2525_v16 = vmul.f32 0.125, %v8690_v11  ;;  %v8089_v49 = vld [vmem:[%s11911_s3 + $0x168] sm:$0xff]  ;;  %v2526_v50 = vmul.f32 0.125, %v7400_v5  ;;  %v2537_v5 = vmul.f32 0.625, %v8492_v31  ;;  %v8760_v20 = vmul.f32 0.375, %v8687_v10 }
  0x34   : > { %8270 = vmatpush.bf16.msrb.mxu3 %v8413_v8  ;;  %v1035_v8 = vsel %vm1027_vm1, %v1033_v28, %v1034_v36  ;;  %v2527_v28 = vadd.f32 %v2524_v15, %v2517_v34  ;;  %2021 = vmatpush.bf16.msrb.mxu0 %v8081_v27  ;;  %v8716_v15 = vmul.f32 0.75, %v8641_v56  ;;  %v2535_v27 = vld [vmem:[%s8423_s13 + $0x10] sm:$0x3] }
  0x35   : > { %v8672_v21 = vpack.c.bf16 %v1037_v62, %v1035_v8  ;;  %v2528_v36 = vadd.f32 %v2525_v16, %v2518_v35  ;;  %v926_v8 = vrot.slane %v401_v1, 1  ;;  %v1038_v62 = vrot.slane %v400_v32, 2 }
  0x36   : > { %2110 = vmatpush.bf16.msrb.mxu1 %v8089_v49  ;;  %2530 = vst [vmem:[#allocation2 + $0x130] sm:$0xff] %v2527_v28  ;;  %v2529_v41 = vadd.f32 %v2526_v50, %v2519_v48  ;;  %v411_v35 = vmul.f32 0.25, %v8612_v38  ;;  %v8719_v16 = vmul.f32 0.75, %v8644_v57  ;;  %v1042_v57 = vsel %vm1027_vm1, %v1039_v4, %v1041_v13  ;;  %v7403_v49 = vld [vmem:[%s8423_s13 + $0x28] sm:$0x3] }
  0x37   : > { %2531 = vst [vmem:[#allocation2 + $0xe8] sm:$0xff] %v2528_v36  ;;  %v929_v56 = vsel %vm914_vm0, %v926_v8, %v928_v12  ;;  %v1040_v48 = vsel %vm1027_vm1, %v1038_v62, %v1039_v4  ;;  %v7043_v28 = vld [vmem:[%s8463_s23 + $0x28] sm:$0x3]  ;;  %v8776_v62 = vld [vmem:[%s8463_s23 + $0x30] sm:$0xff]  ;;  %v7445_v12 = vld [vmem:[%s8423_s13 + $0x58] sm:$0x3] }
  0x38   : > { %8271 = vmatpush.bf16.msrb.mxu3 %v8448_v17  ;;  %v8670_v17 = vpack.c.bf16 %v924_v61, %v922_v58  ;;  %v7088_v58 = vld [vmem:[%s8463_s23 + $0xa0] sm:$0x3]  ;;  %v925_v61 = vrot.slane %v400_v32, 1  ;;  %v8748_v13 = vpack.c.bf16 %v1042_v57, %v1040_v48  ;;  %v451_v48 = vmul.f32 0.25, %v7043_v28 }
  0x39   : > { %v8712_v34 = vld [vmem:[#allocation2 + $0x40] sm:$0x3]  ;;  %v594_v29 = vmul.f32 0.25, %v7088_v58  ;;  %v2544_v58 = vmul.f32 0.375, %v7403_v49  ;;  %v8790_v57 = vmul.f32 0.25, %v8776_v62 }
  0x3a   : > { %2532 = vst [vmem:[#allocation2 + $0x40] sm:$0x3] %v2529_v41  ;;  %v927_v38 = vsel %vm914_vm0, %v925_v61, %v926_v8  ;;  %v7442_v61 = vld [vmem:[%s8423_s13 + $0x40] sm:$0x3]  ;;  %v7091_v41 = vld [vmem:[%s8463_s23 + $0x88] sm:$0x3] }
  0x3b   : > { %1676 = vmatmul.bf16.gmra.mxu0 %v8652_v3  ;;  %1736 = vmatmul.bf16.gmra.mxu3 %v8658_v7  ;;  %v587_v7 = vmul.f32 0.75, %v7085_v42  ;;  %v7046_v8 = vld [vmem:[%s8463_s23 + $0x40] sm:$0x3]  ;;  %v2684_v4 = vmul.f32 0.625, %v7442_v61 }
  0x3c   : > { %8272 = vmatpush.bf16.msrb.mxu3 %v8474_v25  ;;  %v7040_v25 = vld [vmem:[%s8463_s23 + $0x40] sm:$0x3] }
  0x3d   : > { %1765 = vmatmul.bf16.gmra.mxu1 %v8670_v17  ;;  %1854 = vmatmul.bf16.gmra.mxu2 %v8672_v21  ;;  %v438_v55 = vmul.f32 0.25, %v7040_v25  ;;  %v597_v42 = vadd.f32 %v594_v29, %v587_v7  ;;  %v8746_v7 = vpack.c.bf16 %v929_v56, %v927_v38  ;;  %v8782_v29 = vld [vmem:[%s8463_s23 + $0x38] sm:$0xff]  ;;  %v933_v38 = vrot.slane %v8712_v34, 1 }
  0x3e   : > { %v1046_v56 = vrot.slane %v8712_v34, 2  ;;  %v8794_v49 = vmul.f32 0.25, %v8782_v29  ;;  %v8799_v34 = vadd.f32 %v650_v24, %v8526_v46 }
  0x3f   : > { %v441_v25 = vadd.f32 %v438_v55, %v431_v37  ;;  %601 = vst [vmem:[#allocation2 + $0x18] sm:$0x3] %v597_v42  ;;  %v8736_v55 = vadd.f32 %v8719_v16, %v411_v35  ;;  %v2538_v37 = vmul.f32 0.625, %v2535_v27  ;;  %v7094_v42 = vld [vmem:[%s8463_s23 + $0xa0] sm:$0x3]  ;;  %v607_v27 = vmul.f32 0.25, %v7091_v41 }
  0x40   : > { %8273 = vmatpush.bf16.msrb.mxu3 %v8514_v39  ;;  %v410_v39 = vmul.f32 0.25, %v8598_v22  ;;  %v8726_v22 = vadd.f32 %v632_v45, %v8625_v44  ;;  %v651_v45 = vmul.f32 0.75, %v8675_v23  ;;  %v8763_v23 = vmul.f32 0.375, %v8690_v11 }
  0x41   : > { %445 = vst [vmem:[#allocation2 + $0x118] sm:$0x3] %v441_v25  ;;  %v931_v32 = vrot.slane %v8736_v55, 1  ;;  %v2547_v35 = vadd.f32 %v2544_v58, %v2538_v37  ;;  %v2690_v25 = vmul.f32 0.375, %v7445_v12  ;;  %v613_v37 = vmul.f32 0.75, %v7094_v42 }
  0x42   : > { %v8743_v44 = vpack.c.bf16 %v8726_v22, %v8723_v33  ;;  %v2546_v50 = vadd.f32 %v8763_v23, %v2537_v5  ;;  %v457_v5 = vmul.f32 0.75, %v7046_v8  ;;  %v8802_v28 = vadd.f32 %v651_v45, %v8529_v47 }
  0x43   : > { %v616_v8 = vadd.f32 %v613_v37, %v607_v27  ;;  %v8810_v12 = vadd.f32 %v8790_v57, %v8716_v15  ;;  %v8815_v46 = vadd.f32 %v8794_v49, %v8719_v16  ;;  %v8843_v41 = vmul.f32 0.625, %v8690_v11 }
  0x44   : > { %8274 = vmatpush.bf16.msrb.mxu3 %v8541_v53  ;;  %v8733_v53 = vadd.f32 %v8716_v15, %v410_v39  ;;  %12061 = vst [vmem:[#allocation7_spill] sm:$0xff] %v8743_v44  ;;  %v1044_v39 = vrot.slane %v8736_v55, 2  ;;  %v8823_v24 = vpack.c.bf16 %v8802_v28, %v8799_v34 }
  0x45   : > { %2549 = vst [vmem:[#allocation2 + $0x168] sm:$0xff] %v2546_v50  ;;  %v460_v50 = vadd.f32 %v457_v5, %v451_v48  ;;  %v936_v16 = vrot.slane %v8815_v46, 1  ;;  %v1049_v42 = vrot.slane %v8815_v46, 2  ;;  %v7052_v5 = vld [vmem:[%s8463_s23 + $0x58] sm:$0x3] }
  0x46   : > { %v1043_v1 = vrot.slane %v8733_v53, 2  ;;  %620 = vst [vmem:[#allocation2 + $0x8] sm:$0x3] %v616_v8  ;;  %v8819_v47 = vpack.c.bf16 %v8736_v55, %v8733_v53  ;;  %v976_v55 = vrot.slane %v8559_v60, 1  ;;  %v8080_v8 = vld [vmem:[%s11911_s3 + $0x120] sm:$0xff] }
  0x47   : > { %464 = vst [vmem:[#allocation2 + $0x188] sm:$0x3] %v460_v50  ;;  %v7451_v50 = vld [vmem:[%s8423_s13 + $0x58] sm:$0x3]  ;;  %2022 = vmatpush.bf16.msrb.mxu0 %v8080_v8 }
  0x48   : > { %8275 = vmatpush.bf16.msrb.mxu3 %v8570_v63  ;;  %v930_v63 = vrot.slane %v8733_v53, 1  ;;  %v1045_v61 = vsel %vm1027_vm1, %v1043_v1, %v1044_v39  ;;  %12062 = vst [vmem:[#allocation8_spill] sm:$0xff] %v8823_v24  ;;  %v975_v53 = vrot.slane %v8556_v59, 1  ;;  %v2555_v1 = vmul.f32 0.375, %v8492_v31 }
  0x4a   : > { %v932_v58 = vsel %vm914_vm0, %v930_v63, %v931_v32  ;;  %v1048_v63 = vrot.slane %v8810_v12, 2 }
  0x4b   : > { %1681 = vmatmul.bf16.gmra.mxu0 %v8739_v43  ;;  %1741 = vmatmul.bf16.gmra.mxu3 %v8743_v44  ;;  %v8876_v44 = vmul.f32 0.75, %v8782_v29 }
  0x4c   : > { %8276 = vmatpush.bf16.msra.mxu3 %v8382_v2  ;;  %v2536_v2 = vmul.f32 0.625, %v8489_v30  ;;  %v1050_v29 = vsel %vm1027_vm1, %v1048_v63, %v1049_v42  ;;  %v8916_v63 = vmul.f32 0.875, %v8690_v11 }
  0x4d   : > { %1770 = vmatmul.bf16.gmra.mxu1 %v8746_v7  ;;  %1859 = vmatmul.bf16.gmra.mxu2 %v8748_v13 }
  0x4e   : > { %v2545_v36 = vadd.f32 %v8760_v20, %v2536_v2  ;;  %v2693_v2 = vadd.f32 %v2690_v25, %v2684_v4  ;;  %v1047_v4 = vsel %vm1027_vm1, %v1044_v39, %v1046_v56  ;;  %v2553_v39 = vld [vmem:[%s8423_s13 + $0x10] sm:$0x3]  ;;  %v7049_v25 = vld [vmem:[%s8463_s23 + $0x40] sm:$0x3]  ;;  %v2564_v56 = vadd.f32 %v8843_v41, %v2555_v1 }
  0x4f   : > { %v8827_v15 = vpack.c.bf16 %v1047_v4, %v1045_v61  ;;  %v2556_v48 = vmul.f32 0.375, %v2553_v39  ;;  %v2708_v61 = vmul.f32 0.625, %v7451_v50  ;;  %v7100_v4 = vld [vmem:[%s8463_s23 + $0xb8] sm:$0x3]  ;;  %v470_v39 = vmul.f32 0.75, %v7049_v25 }
  0x50   : > { %8277 = vmatpush.bf16.msra.mxu3 %v8398_v6  ;;  %2548 = vst [vmem:[#allocation2 + $0xc0] sm:$0xff] %v2545_v36  ;;  %v8787_v6 = vld [vmem:[#allocation2 + $0x118] sm:$0x3]  ;;  %v8873_v50 = vld [vmem:[#allocation2 + $0x8] sm:$0x3] }
  0x51   : > { %2550 = vst [vmem:[#allocation2 + $0x118] sm:$0x3] %v2547_v35  ;;  %v8796_v36 = vld [vmem:[#allocation2 + $0x18] sm:$0x3]  ;;  %v7406_v35 = vld [vmem:[%s8423_s13 + $0x28] sm:$0x3] }
  0x52   : > { %2696 = vst [vmem:[#allocation2 + $0x18] sm:$0x3] %v2693_v2  ;;  %v7448_v2 = vld [vmem:[%s8423_s13 + $0x40] sm:$0x3]  ;;  %v2562_v27 = vmul.f32 0.625, %v7406_v35  ;;  %v978_v1 = vrot.slane %v8796_v36, 1 }
  0x53   : > { %12063 = vst [vmem:[#allocation9_spill] sm:$0xff] %v8827_v15  ;;  %v2702_v37 = vmul.f32 0.375, %v7448_v2  ;;  %v1051_v35 = vrot.slane %v8787_v6, 2  ;;  %v8871_v2 = vld [vmem:[#allocation2 + $0x188] sm:$0x3] }
  0x54   : > { %8278 = vmatpush.bf16.msra.mxu3 %v8418_v9  ;;  %v934_v9 = vsel %vm914_vm0, %v931_v32, %v933_v38  ;;  %v2554_v32 = vmul.f32 0.375, %v8489_v30  ;;  %2567 = vst [vmem:[#allocation2 + $0x60] sm:$0xff] %v2564_v56 }
  0x55   : > { %v8825_v45 = vpack.c.bf16 %v934_v9, %v932_v58  ;;  %v7097_v58 = vld [vmem:[%s8463_s23 + $0xa0] sm:$0x3]  ;;  %v1052_v8 = vsel %vm1027_vm1, %v1049_v42, %v1051_v35  ;;  %v2571_v42 = vld [vmem:[%s8423_s13 + $0x10] sm:$0x3] }
  0x56   : > { %v8088_v9 = vld [vmem:[%s11911_s3 + $0x160] sm:$0xff]  ;;  %v626_v56 = vmul.f32 0.75, %v7097_v58  ;;  %v7409_v58 = vld [vmem:[%s8423_s13 + $0x28] sm:$0x3] }
  0x57   : > { %2111 = vmatpush.bf16.msrb.mxu1 %v8088_v9  ;;  %v7454_v9 = vld [vmem:[%s8423_s13 + $0x40] sm:$0x3] }
  0x58   : > { %8279 = vmatpush.bf16.msra.mxu3 %v8453_v18  ;;  %v935_v18 = vrot.slane %v8810_v12, 1 }
  0x5b   : > { %1686 = vmatmul.bf16.gmra.mxu0 %v8819_v47  ;;  %1746 = vmatmul.bf16.gmra.mxu3 %v8823_v24  ;;  %v2711_v24 = vadd.f32 %v2708_v61, %v2702_v37  ;;  %v937_v37 = vsel %vm914_vm0, %v935_v18, %v936_v16 }
  0x5c   : > { %8280 = vmatpush.bf16.msra.mxu3 %v8479_v26  ;;  %v8840_v26 = vmul.f32 0.625, %v8687_v10 }
  0x5d   : > { %1775 = vmatmul.bf16.gmra.mxu1 %v8825_v45  ;;  %1864 = vmatmul.bf16.gmra.mxu2 %v8827_v15  ;;  %v477_v15 = vmul.f32 0.25, %v7052_v5  ;;  %2714 = vst [vmem:[#allocation2 + $0x8] sm:$0x3] %v2711_v24  ;;  %v8896_v24 = vpack.c.bf16 %v8815_v46, %v8810_v12  ;;  %v2572_v12 = vmul.f32 0.125, %v8489_v30  ;;  %v2573_v46 = vmul.f32 0.125, %v8492_v31 }
  0x5e   : > { %v2563_v38 = vadd.f32 %v8840_v26, %v2554_v32  ;;  %v938_v32 = vrot.slane %v8787_v6, 1  ;;  %v979_v6 = vsel %vm914_vm0, %v976_v55, %v978_v1  ;;  %v2574_v31 = vmul.f32 0.125, %v2571_v42  ;;  %v7055_v1 = vld [vmem:[%s8463_s23 + $0x40] sm:$0x3] }
  0x5f   : > { %v480_v25 = vadd.f32 %v477_v15, %v470_v39  ;;  %v2582_v30 = vadd.f32 %v8916_v63, %v2573_v46  ;;  %v2720_v39 = vmul.f32 0.125, %v7454_v9  ;;  %v1056_v46 = vrot.slane %v8871_v2, 2 }
  0x60   : > { %8281 = vmatpush.bf16.msra.mxu3 %v8519_v40  ;;  %2566 = vst [vmem:[#allocation2 + $0x120] sm:$0xff] %v2563_v38  ;;  %v2565_v40 = vadd.f32 %v2562_v27, %v2556_v48  ;;  %v8869_v38 = vmul.f32 0.75, %v8776_v62  ;;  %v633_v48 = vmul.f32 0.25, %v7100_v4  ;;  %v977_v62 = vsel %vm914_vm0, %v975_v53, %v976_v55 }
  0x61   : > { %v939_v61 = vsel %vm914_vm0, %v936_v16, %v938_v32  ;;  %484 = vst [vmem:[#allocation2 + $0xd0] sm:$0x3] %v480_v25  ;;  %v8898_v15 = vpack.c.bf16 %v979_v6, %v977_v62  ;;  %v981_v53 = vrot.slane %v8638_v52, 1  ;;  %v8913_v55 = vmul.f32 0.875, %v8687_v10  ;;  %v7457_v10 = vld [vmem:[%s8423_s13 + $0x58] sm:$0x3] }
  0x62   : > { %2568 = vst [vmem:[#allocation2 + $0x188] sm:$0x3] %v2565_v40  ;;  %v636_v27 = vadd.f32 %v633_v48, %v626_v56  ;;  %v8887_v5 = vadd.f32 %v8869_v38, %v8662_v14  ;;  %v8900_v18 = vpack.c.bf16 %v939_v61, %v937_v37  ;;  %v8902_v14 = vpack.c.bf16 %v1052_v8, %v1050_v29  ;;  %v7058_v56 = vld [vmem:[%s8463_s23 + $0x58] sm:$0x3] }
  0x63   : > { %12064 = vst [vmem:[#allocation10_spill] sm:$0xff] %v8898_v15  ;;  %v2581_v4 = vadd.f32 %v8913_v55, %v2572_v12  ;;  %v2580_v32 = vmul.f32 0.875, %v7409_v58  ;;  %v2726_v35 = vmul.f32 0.875, %v7457_v10  ;;  %v983_v48 = vrot.slane %v8873_v50, 1  ;;  %v8079_v6 = vld [vmem:[%s11911_s3 + $0x118] sm:$0xff]  ;;  %v8949_v10 = vld [vmem:[%s8463_s23 + $0x48] sm:$0xff] }
  0x64   : > { %8282 = vmatpush.bf16.msra.mxu3 %v8546_v54  ;;  %v8891_v54 = vadd.f32 %v8876_v44, %v8665_v19  ;;  %640 = vst [vmem:[#allocation2 + $0x50] sm:$0x3] %v636_v27  ;;  %v940_v19 = vrot.slane %v8887_v5, 1  ;;  %v1053_v11 = vrot.slane %v8887_v5, 2  ;;  %v8087_v25 = vld [vmem:[%s11911_s3 + $0x158] sm:$0xff]  ;;  %v490_v29 = vmul.f32 0.25, %v7055_v1  ;;  %2023 = vmatpush.bf16.msrb.mxu0 %v8079_v6 }
  0x65   : > { %2584 = vst [vmem:[#allocation2 + $0x140] sm:$0xff] %v2581_v4  ;;  %v2583_v62 = vadd.f32 %v2580_v32, %v2574_v31  ;;  %v7103_v27 = vld [vmem:[%s8463_s23 + $0xa0] sm:$0x3]  ;;  %v2729_v61 = vadd.f32 %v2726_v35, %v2720_v39  ;;  %v7106_v8 = vld [vmem:[%s8463_s23 + $0xb8] sm:$0x3]  ;;  %v943_v12 = vrot.slane %v8871_v2, 1  ;;  %2112 = vmatpush.bf16.msrb.mxu1 %v8087_v25  ;;  %v984_v32 = vsel %vm914_vm0, %v981_v53, %v983_v48 }
  0x66   : > { %v941_v16 = vrot.slane %v8891_v54, 1  ;;  %v1054_v40 = vrot.slane %v8891_v54, 2  ;;  %2585 = vst [vmem:[#allocation2 + $0x80] sm:$0xff] %v2582_v30  ;;  %v496_v58 = vmul.f32 0.75, %v7058_v56  ;;  %v646_v9 = vmul.f32 0.25, %v7103_v27  ;;  %v8952_v2 = vld [vmem:[%s8463_s23 + $0x50] sm:$0xff] }
  0x67   : > { %v652_v4 = vmul.f32 0.75, %v7106_v8  ;;  %v8967_v48 = vmul.f32 0.25, %v8952_v2  ;;  %v7064_v6 = vld [vmem:[%s8463_s23 + $0x70] sm:$0x3]  ;;  %v8985_v27 = vld [vmem:[%s8423_s13 + $0x38] sm:$0xff] }
  0x68   : > { %8283 = vmatpush.bf16.msra.mxu3 %v8575_v0  ;;  %v980_v0 = vrot.slane %v8635_v51, 1  ;;  %v8938_v37 = vld [vmem:[#allocation2 + $0xd0] sm:$0x3]  ;;  %v942_v30 = vsel %vm914_vm0, %v940_v19, %v941_v16  ;;  %v499_v1 = vadd.f32 %v496_v58, %v490_v29  ;;  %v944_v39 = vsel %vm914_vm0, %v941_v16, %v943_v12  ;;  %v7415_v58 = vld [vmem:[%s8423_s13 + $0x40] sm:$0x3] }
  0x69   : > { %2586 = vst [vmem:[#allocation2 + $0xd0] sm:$0x3] %v2583_v62  ;;  %v1055_v35 = vsel %vm1027_vm1, %v1053_v11, %v1054_v40  ;;  %v1057_v56 = vsel %vm1027_vm1, %v1054_v40, %v1056_v46  ;;  %v655_v62 = vadd.f32 %v652_v4, %v646_v9  ;;  %v8959_v19 = vpack.c.bf16 %v8891_v54, %v8887_v5  ;;  %v7061_v40 = vld [vmem:[%s8463_s23 + $0x58] sm:$0x3]  ;;  %v8982_v25 = vld [vmem:[%s8423_s13 + $0x30] sm:$0xff] }
  0x6a   : > { %v982_v31 = vsel %vm914_vm0, %v980_v0, %v981_v53  ;;  %503 = vst [vmem:[#allocation2 + $0x1a8] sm:$0x3] %v499_v1  ;;  %v8964_v53 = vmul.f32 0.25, %v8949_v10  ;;  %v8969_v16 = vpack.c.bf16 %v944_v39, %v942_v30  ;;  %v8971_v11 = vpack.c.bf16 %v1057_v56, %v1055_v35  ;;  %v7412_v46 = vld [vmem:[%s8423_s13 + $0x28] sm:$0x3] }
  0x6b   : > { %1691 = vmatmul.bf16.gmra.mxu0 %v8896_v24  ;;  %1820 = vmatmul.bf16.vlgmr.msrb.gmra.mxu3 %v8898_v15  ;;  %v8943_v42 = vld [vmem:[#allocation2 + $0x50] sm:$0x3]  ;;  %v8961_v0 = vpack.c.bf16 %v984_v32, %v982_v31  ;;  %659 = vst [vmem:[#allocation2 + $0x70] sm:$0x3] %v655_v62  ;;  %v479_v54 = vadd.f32 %v8967_v48, %v8876_v44  ;;  %v516_v29 = vmul.f32 0.25, %v7064_v6  ;;  %v2597_v8 = vmul.f32 0.125, %v8982_v25 }
  0x6c   : > { %2732 = vst [vmem:[#allocation2 + $0x50] sm:$0x3] %v2729_v61  ;;  %v478_v5 = vadd.f32 %v8964_v53, %v8869_v38  ;;  %v509_v61 = vmul.f32 0.75, %v7061_v40  ;;  %v2598_v12 = vmul.f32 0.125, %v8985_v27  ;;  %v2592_v38 = vmul.f32 0.875, %v7412_v46 }
  0x6d   : > { %1780 = vmatmul.bf16.gmra.mxu1 %v8900_v18  ;;  %1869 = vmatmul.bf16.gmra.mxu2 %v8902_v14  ;;  %12065 = vst [vmem:[#allocation11_spill] sm:$0xff] %v8961_v0  ;;  %v2599_v9 = vmul.f32 0.125, %v7415_v58  ;;  %v7460_v4 = vld [vmem:[%s8423_s13 + $0x58] sm:$0x3]  ;;  %v2600_v44 = vadd.f32 %v2597_v8, %v8913_v55  ;;  %v946_v1 = vrot.slane %v479_v54, 1  ;;  %v985_v56 = vrot.slane %v8723_v33, 1 }
  0x6e   : > { %v2601_v30 = vadd.f32 %v2598_v12, %v8916_v63  ;;  %v945_v32 = vrot.slane %v478_v5, 1  ;;  %v519_v35 = vadd.f32 %v516_v29, %v509_v61  ;;  %v986_v62 = vrot.slane %v8726_v22, 1 }
  0x6f   : > { %v2602_v39 = vadd.f32 %v2599_v9, %v2592_v38  ;;  %v988_v40 = vrot.slane %v8943_v42, 1  ;;  %v1058_v6 = vrot.slane %v478_v5, 2  ;;  %2603 = vst [vmem:[#allocation2 + $0x68] sm:$0xff] %v2600_v44  ;;  %v948_v46 = vrot.slane %v8938_v37, 1 }
  0x70   : > { %v1059_v55 = vrot.slane %v479_v54, 2  ;;  %v1061_v63 = vrot.slane %v8938_v37, 2  ;;  %2604 = vst [vmem:[#allocation2 + $0x90] sm:$0xff] %v2601_v30  ;;  %v1088_v61 = vrot.slane %v8556_v59, 2  ;;  %v1089_v29 = vrot.slane %v8559_v60, 2 }
  0x71   : > { %v9003_v8 = vld [vmem:[#allocation2 + $0x1a8] sm:$0x3]  ;;  %523 = vst [vmem:[#allocation2 + $0xa0] sm:$0x3] %v519_v35  ;;  %v987_v12 = vsel %vm914_vm0, %v985_v56, %v986_v62  ;;  %v989_v58 = vsel %vm914_vm0, %v986_v62, %v988_v40  ;;  %v947_v38 = vsel %vm914_vm0, %v945_v32, %v946_v1  ;;  %v949_v9 = vsel %vm914_vm0, %v946_v1, %v948_v46  ;;  %v7067_v35 = vld [vmem:[%s8463_s23 + $0x58] sm:$0x3] }
  0x72   : > { %v8996_v31 = vld [vmem:[#allocation2 + $0x70] sm:$0x3]  ;;  %2605 = vst [vmem:[#allocation2 + $0x1a8] sm:$0x3] %v2602_v39  ;;  %v1060_v37 = vsel %vm1027_vm1, %v1058_v6, %v1059_v55  ;;  %v9013_v44 = vpack.c.bf16 %v479_v54, %v478_v5  ;;  %v9015_v30 = vpack.c.bf16 %v989_v58, %v987_v12  ;;  %v9018_v59 = vmul.f32 0.75, %v8949_v10 }
  0x73   : > { %2738 = vst [vmem:[#allocation2 + $0x70] sm:$0x3] %v7460_v4  ;;  %v1062_v4 = vsel %vm1027_vm1, %v1059_v55, %v1061_v63  ;;  %v9021_v60 = vmul.f32 0.75, %v8952_v2  ;;  %v9023_v39 = vpack.c.bf16 %v949_v9, %v947_v38  ;;  %v1091_v1 = vrot.slane %v8796_v36, 2  ;;  %v7070_v36 = vld [vmem:[%s8463_s23 + $0x70] sm:$0x3] }
  0x74   : > { %12066 = vst [vmem:[#allocation12_spill] sm:$0xff] %v9015_v30  ;;  %v9025_v32 = vpack.c.bf16 %v1062_v4, %v1060_v37  ;;  %v1090_v5 = vsel %vm1027_vm1, %v1088_v61, %v1089_v29  ;;  %v497_v10 = vadd.f32 %v9018_v59, %v8790_v57  ;;  %v2615_v56 = vmul.f32 0.375, %v8982_v25  ;;  %v7418_v40 = vld [vmem:[%s8423_s13 + $0x28] sm:$0x3]  ;;  %v7421_v6 = vld [vmem:[%s8423_s13 + $0x40] sm:$0x3] }
  0x75   : > { %v1092_v54 = vsel %vm1027_vm1, %v1089_v29, %v1091_v1  ;;  %v498_v2 = vadd.f32 %v9021_v60, %v8794_v49  ;;  %v2616_v62 = vmul.f32 0.375, %v8985_v27  ;;  %v8075_v57 = vld [vmem:[%s11911_s3 + $0xf8] sm:$0xff]  ;;  %v529_v55 = vmul.f32 0.25, %v7067_v35  ;;  %v8078_v29 = vld [vmem:[%s11911_s3 + $0x110] sm:$0xff] }
  0x76   : > { %12067 = vst [vmem:[#allocation13_spill] sm:$0xff] %v9025_v32  ;;  %v9044_v46 = vpack.c.bf16 %v1092_v54, %v1090_v5  ;;  %v2618_v49 = vadd.f32 %v2615_v56, %v8840_v26  ;;  %v2611_v61 = vmul.f32 0.625, %v7418_v40  ;;  %v8086_v12 = vld [vmem:[%s11911_s3 + $0x150] sm:$0xff]  ;;  %v2617_v58 = vmul.f32 0.375, %v7421_v6  ;;  %1930 = vmatpush.bf16.msrb.mxu3 %v8075_v57  ;;  %2024 = vmatpush.bf16.msrb.mxu0 %v8078_v29  ;;  %v7063_v29 = vld [vmem:[%s8463_s23 + $0x68] sm:$0xff] }
  0x77   : > { %v2619_v63 = vadd.f32 %v2616_v62, %v8843_v41  ;;  %v535_v38 = vmul.f32 0.75, %v7070_v36  ;;  %v950_v9 = vrot.slane %v497_v10, 1  ;;  %v951_v37 = vrot.slane %v498_v2, 1  ;;  %2113 = vmatpush.bf16.msrb.mxu1 %v8086_v12  ;;  %v8074_v40 = vld [vmem:[%s11911_s3 + $0xf0] sm:$0xff] }
  0x78   : > { %12068 = vst [vmem:[#allocation14_spill] sm:$0xff] %v9044_v46  ;;  %v990_v4 = vrot.slane %v8799_v34, 1  ;;  %v991_v26 = vrot.slane %v8802_v28, 1  ;;  %v993_v41 = vrot.slane %v8996_v31, 1  ;;  %v2620_v1 = vadd.f32 %v2617_v58, %v2611_v61  ;;  %v693_v36 = vld [vmem:[#allocation2 + $0xa0] sm:$0x3] }
  0x79   : > { %2621 = vst [vmem:[#allocation2] sm:$0xff] %v2618_v49  ;;  %v538_v5 = vadd.f32 %v535_v38, %v529_v55  ;;  %v953_v54 = vrot.slane %v9003_v8, 1  ;;  %v1063_v35 = vrot.slane %v497_v10, 2  ;;  %v1064_v56 = vrot.slane %v498_v2, 2  ;;  %v7062_v61 = vld [vmem:[%s8463_s23 + $0x60] sm:$0xff] }
  0x7a   : > { %2622 = vst [vmem:[#allocation2 + $0x150] sm:$0xff] %v2619_v63  ;;  %v1066_v62 = vrot.slane %v9003_v8, 2  ;;  %v992_v6 = vsel %vm914_vm0, %v990_v4, %v991_v26  ;;  %v994_v57 = vsel %vm914_vm0, %v991_v26, %v993_v41  ;;  %v952_v55 = vsel %vm914_vm0, %v950_v9, %v951_v37  ;;  %1931 = vmatpush.bf16.msrb.mxu3 %v8074_v40  ;;  %v7073_v26 = vld [vmem:[%s8463_s23 + $0x70] sm:$0x3] }
  0x7b   : > { %1696 = vmatmul.bf16.gmra.mxu0 %v8959_v19  ;;  %1825 = vmatmul.bf16.gmra.mxu3 %v8961_v0  ;;  %2623 = vst [vmem:[#allocation2 + $0xa0] sm:$0x3] %v2620_v1  ;;  %v954_v49 = vsel %vm914_vm0, %v951_v37, %v953_v54  ;;  %v1065_v63 = vsel %vm1027_vm1, %v1063_v35, %v1064_v56  ;;  %v9081_v9 = vmul.f32 0.25, %v7062_v61  ;;  %v9083_v37 = vmul.f32 0.25, %v7063_v29  ;;  %v7076_v1 = vld [vmem:[%s8463_s23 + $0x88] sm:$0x3] }
  0x7c   : > { %542 = vst [vmem:[#allocation2 + $0x38] sm:$0x3] %v538_v5  ;;  %v1067_v8 = vsel %vm1027_vm1, %v1064_v56, %v1066_v62  ;;  %v9073_v12 = vpack.c.bf16 %v498_v2, %v497_v10  ;;  %v9075_v58 = vpack.c.bf16 %v994_v57, %v992_v6  ;;  %v9077_v38 = vpack.c.bf16 %v954_v49, %v952_v55  ;;  %v8099_v10 = vld [vmem:[%s11911_s3 + $0x1b8] sm:$0xff]  ;;  %v7424_v35 = vld [vmem:[%s8423_s13 + $0x28] sm:$0x3] }
  0x7d   : > { %1785 = vmatmul.bf16.gmra.mxu1 %v8969_v16  ;;  %1874 = vmatmul.bf16.gmra.mxu2 %v8971_v11  ;;  %v9079_v4 = vpack.c.bf16 %v1067_v8, %v1065_v63  ;;  %v2633_v2 = vmul.f32 0.625, %v8982_v25  ;;  %v2634_v41 = vmul.f32 0.625, %v8985_v27  ;;  %v517_v5 = vadd.f32 %v9081_v9, %v9018_v59  ;;  %v7427_v56 = vld [vmem:[%s8423_s13 + $0x40] sm:$0x3]  ;;  %v8073_v62 = vld [vmem:[%s11911_s3 + $0xe8] sm:$0xff] }
  0x7e   : > { %12069 = vst [vmem:[#allocation15_spill] sm:$0xff] %v9075_v58  ;;  %v518_v54 = vadd.f32 %v9083_v37, %v9021_v60  ;;  %v548_v40 = vmul.f32 0.75, %v7073_v26  ;;  %2197 = vmatpush.bf16.msrb.mxu2 %v8099_v10  ;;  %v2629_v55 = vmul.f32 0.375, %v7424_v35  ;;  %v2635_v49 = vmul.f32 0.625, %v7427_v56  ;;  %1932 = vmatpush.bf16.msrb.mxu3 %v8073_v62  ;;  %v8085_v10 = vld [vmem:[%s11911_s3 + $0x148] sm:$0xff] }
  0x7f   : > { %12070 = vst [vmem:[#allocation16_spill] sm:$0xff] %v9079_v4  ;;  %v2636_v6 = vadd.f32 %v2633_v2, %v8760_v20  ;;  %v2637_v57 = vadd.f32 %v2634_v41, %v8763_v23  ;;  %v555_v63 = vmul.f32 0.25, %v7076_v1  ;;  %v955_v59 = vrot.slane %v517_v5, 1  ;;  %v8072_v20 = vld [vmem:[%s11911_s3 + $0xe0] sm:$0xff]  ;;  %v8077_v23 = vld [vmem:[%s11911_s3 + $0x108] sm:$0xff]  ;;  %2114 = vmatpush.bf16.msrb.mxu1 %v8085_v10 }
  0x80   : > { %v956_v8 = vrot.slane %v518_v54, 1  ;;  %v2638_v60 = vadd.f32 %v2635_v49, %v2629_v55  ;;  %v1068_v0 = vrot.slane %v517_v5, 2  ;;  %v1069_v15 = vrot.slane %v518_v54, 2  ;;  %2025 = vmatpush.bf16.msrb.mxu0 %v8077_v23  ;;  %v9127_v56 = vld [vmem:[%s11912_s4] ss:$0 sm:$0xff] }
  0x81   : > { %2639 = vst [vmem:[#allocation2 + $0x190] sm:$0xff] %v2636_v6  ;;  %v9122_v35 = vmul.f32 0.75, %v7062_v61  ;;  %v7079_v6 = vld [vmem:[%s8463_s23 + $0x70] sm:$0x3]  ;;  %v7429_v55 = vld [vmem:[%s8423_s13 + $0x20] sm:$0xff]  ;;  %v9151_v49 = vmul.f32 0.875, %v8982_v25 }
  0x82   : > { %2640 = vst [vmem:[#allocation2 + $0x128] sm:$0xff] %v2637_v57  ;;  %v957_v2 = vsel %vm914_vm0, %v955_v59, %v956_v8  ;;  %v1070_v41 = vsel %vm1027_vm1, %v1068_v0, %v1069_v15  ;;  %1933 = vmatpush.bf16.msrb.mxu3 %v8072_v20  ;;  %v7082_v57 = vld [vmem:[%s8463_s23 + $0x88] sm:$0x3]  ;;  %v2646_v59 = vmul.f32 0.125, %v7429_v55  ;;  %v7433_v20 = vld [vmem:[%s8423_s13 + $0x40] sm:$0x3] }
  0x83   : > { %v9107_v26 = vld [vmem:[#allocation2 + $0x38] sm:$0x3]  ;;  %v568_v23 = vmul.f32 0.25, %v7079_v6  ;;  %v574_v10 = vmul.f32 0.75, %v7082_v57  ;;  %v8098_v6 = vld [vmem:[%s11911_s3 + $0x1b0] sm:$0xff] }
  0x84   : > { %2641 = vst [vmem:[#allocation2 + $0x38] sm:$0x3] %v2638_v60  ;;  %2198 = vmatpush.bf16.msrb.mxu2 %v8098_v6 }
  0x85   : > { %v577_v57 = vadd.f32 %v574_v10, %v568_v23 }
  0x87   : > { %581 = vst [vmem:[#allocation2 + $0xb0] sm:$0x3] %v577_v57 }
  0x8b   : > { %1701 = vmatmul.bf16.gmra.mxu0 %v9013_v44  ;;  %1830 = vmatmul.bf16.gmra.mxu3 %v9015_v30  ;;  %v958_v30 = vrot.slane %v693_v36, 1 }
  0x8d   : > { %1790 = vmatmul.bf16.gmra.mxu1 %v9023_v39  ;;  %1879 = vmatmul.bf16.gmra.mxu2 %v9025_v32 }
  0x9b   : > { %1706 = vmatmul.bf16.gmra.mxu0 %v9073_v12  ;;  %1835 = vmatmul.bf16.gmra.mxu3 %v9075_v58  ;;  %v558_v58 = vadd.f32 %v555_v63, %v548_v40  ;;  %v9140_v40 = vadd.f32 %v9122_v35, %v8964_v53  ;;  %v9154_v63 = vmul.f32 0.875, %v8985_v27 }
  0x9d   : > { %1795 = vmatmul.bf16.gmra.mxu1 %v9077_v38  ;;  %1884 = vmatmul.bf16.gmra.mxu2 %v9079_v4  ;;  %v1071_v4 = vrot.slane %v693_v36, 2  ;;  %562 = vst [vmem:[#allocation2 + $0x180] sm:$0x3] %v558_v58  ;;  %v959_v36 = vsel %vm914_vm0, %v956_v8, %v958_v30  ;;  %v9129_v58 = vpack.c.bf16 %v518_v54, %v517_v5  ;;  %v9131_v30 = vmul.f32 0.75, %v7063_v29  ;;  %v7428_v54 = vld [vmem:[%s8423_s13 + $0x18] sm:$0xff] }
  0x9e   : > { %v9133_v62 = vpack.c.bf16 %v959_v36, %v957_v2  ;;  %v2645_v53 = vmul.f32 0.125, %v7428_v54  ;;  %v7430_v8 = vld [vmem:[%s8423_s13 + $0x28] sm:$0x3]  ;;  %v960_v27 = vrot.slane %v9140_v40, 1  ;;  %v2655_v36 = vadd.f32 %v9154_v63, %v2646_v59 }
  0x9f   : > { %v1072_v1 = vsel %vm1027_vm1, %v1069_v15, %v1071_v4  ;;  %v537_v29 = vadd.f32 %v9131_v30, %v8967_v48  ;;  %v2647_v60 = vmul.f32 0.125, %v7430_v8  ;;  %v8071_v48 = vld [vmem:[%s11911_s3 + $0xd8] sm:$0xff]  ;;  %v1096_v59 = vrot.slane %v8873_v50, 2  ;;  %v8070_v50 = vld [vmem:[%s11911_s3 + $0xd0] sm:$0xff] }
  0xa0   : > { %12071 = vst [vmem:[#allocation17_spill] sm:$0xff] %v9133_v62  ;;  %v9135_v15 = vpack.c.bf16 %v1072_v1, %v1070_v41  ;;  %v2654_v2 = vadd.f32 %v9151_v49, %v2645_v53  ;;  %v2653_v41 = vmul.f32 0.875, %v7433_v20  ;;  %1934 = vmatpush.bf16.msrb.mxu3 %v8071_v48  ;;  %v1094_v53 = vrot.slane %v8638_v52, 2 }
  0xa1   : > { %v1074_v48 = vrot.slane %v537_v29, 2  ;;  %2658 = vst [vmem:[#allocation2 + $0x158] sm:$0xff] %v2655_v36  ;;  %v9195_v36 = vld [vmem:[%s8463_s23 + $0x80] sm:$0xff] }
  0xa2   : > { %12072 = vst [vmem:[#allocation18_spill] sm:$0xff] %v9135_v15  ;;  %v2656_v8 = vadd.f32 %v2653_v41, %v2647_v60  ;;  %v8097_v60 = vld [vmem:[%s11911_s3 + $0x1a8] sm:$0xff] }
  0xa3   : > { %2657 = vst [vmem:[#allocation2 + $0x88] sm:$0xff] %v2654_v2  ;;  %v9192_v2 = vld [vmem:[%s8463_s23 + $0x78] sm:$0xff]  ;;  %2199 = vmatpush.bf16.msrb.mxu2 %v8097_v60 }
  0xa4   : > { %1935 = vmatpush.bf16.msrb.mxu3 %v8070_v50  ;;  %v7438_v50 = vld [vmem:[%s8423_s13 + $0x50] sm:$0xff]  ;;  %v8095_v60 = vld [vmem:[%s11911_s3 + $0x198] sm:$0xff] }
  0xa5   : > { %2743 = vst [vmem:[#allocation2 + $0x108] sm:$0xff] %v7438_v50 }
  0xa8   : > { %v1672_v0 = vpop.f32.mrf.mxu0 }
  0xa9   : > { %v1673_v61 = vadd.f32 %v9127_v56, %v1672_v0  ;;  %v961_v0 = vrot.slane %v537_v29, 1 }
  0xaa   : > { %v1761_v4 = vpop.f32.mrf.mxu1 }
  0xab   : > { %v1762_v5 = vadd.f32 %v1761_v4, %v1673_v61  ;;  %1711 = vmatmul.bf16.gmra.mxu0 %v9129_v58  ;;  %1909 = vmatmul.bf16.vlgmr.msra.gmra.mxu3 %v9044_v46  ;;  %v1073_v61 = vrot.slane %v9140_v40, 2  ;;  %v1093_v4 = vrot.slane %v8635_v51, 2  ;;  %v963_v51 = vrot.slane %v9107_v26, 1 }
  0xac   : > { %v962_v23 = vsel %vm914_vm0, %v960_v27, %v961_v0  ;;  %v9203_v27 = vpack.c.bf16 %v537_v29, %v9140_v40 }
  0xad   : > { %1800 = vmatmul.bf16.gmra.mxu1 %v9133_v62  ;;  %1889 = vmatmul.bf16.gmra.mxu2 %v9135_v15  ;;  %v1076_v15 = vrot.slane %v9107_v26, 2  ;;  %v1095_v10 = vsel %vm1027_vm1, %v1093_v4, %v1094_v53  ;;  %v1097_v26 = vsel %vm1027_vm1, %v1094_v53, %v1096_v59  ;;  %v1075_v41 = vsel %vm1027_vm1, %v1073_v61, %v1074_v48 }
  0xae   : > { %v9163_v25 = vpop.f32.mrf.mxu3  ;;  %v9205_v4 = vpack.c.bf16 %v1097_v26, %v1095_v10  ;;  %v2671_v10 = vmul.f32 0.125, %v7438_v50  ;;  %v7436_v26 = vld [vmem:[%s8423_s13 + $0x40] sm:$0x3] }
  0xb0   : > { %v1850_v1 = vpop.f32.mrf.mxu2  ;;  %v1674_v55 = vpop.f32.mrf.mxu0  ;;  %12073 = vst [vmem:[#allocation19_spill] sm:$0xff] %v9205_v4 }
  0xb1   : > { %v9173_v54 = vadd.f32 %v1850_v1, %v1762_v5  ;;  %v1675_v20 = vadd.f32 %v9127_v56, %v1674_v55  ;;  %v9180_v5 = vld [vmem:[#allocation2 + $0x180] sm:$0x3]  ;;  %v1077_v1 = vsel %vm1027_vm1, %v1074_v48, %v1076_v15  ;;  %v553_v55 = vmul.f32 0.25, %v9192_v2 }
  0xb2   : > { %v1763_v46 = vpop.f32.mrf.mxu1  ;;  %2659 = vst [vmem:[#allocation2 + $0x180] sm:$0x3] %v2656_v8  ;;  %v8096_v15 = vld [vmem:[%s11911_s3 + $0x1a0] sm:$0xff]  ;;  %v9216_v8 = vpack.c.bf16 %v1077_v1, %v1075_v41  ;;  %v2665_v41 = vmul.f32 0.875, %v7436_v26 }
  0xb3   : > { %v1764_v52 = vadd.f32 %v1763_v46, %v1675_v20  ;;  %v964_v46 = vsel %vm914_vm0, %v961_v0, %v963_v51  ;;  %v554_v0 = vmul.f32 0.25, %v9195_v36  ;;  %2200 = vmatpush.bf16.msrb.mxu2 %v8096_v15  ;;  %v556_v51 = vadd.f32 %v553_v55, %v9122_v35  ;;  %v8069_v35 = vld [vmem:[%s11911_s3 + $0xc8] sm:$0xff] }
  0xb4   : > { %v9214_v59 = vpack.c.bf16 %v964_v46, %v962_v23  ;;  %v7439_v46 = vld [vmem:[%s8423_s13 + $0x58] sm:$0x3]  ;;  %v2674_v15 = vadd.f32 %v2671_v10, %v9154_v63  ;;  %1936 = vmatpush.bf16.msrb.mxu3 %v8069_v35  ;;  %v1101_v63 = vrot.slane %v8943_v42, 2  ;;  %v968_v10 = vrot.slane %v9180_v5, 1 }
  0xb5   : > { %v557_v48 = vadd.f32 %v554_v0, %v9131_v30  ;;  %v2672_v1 = vmul.f32 0.125, %v7439_v46  ;;  %v8076_v30 = vld [vmem:[%s11911_s3 + $0x100] sm:$0xff]  ;;  %v1078_v26 = vrot.slane %v556_v51, 2 }
  0xb6   : > { %v9200_v6 = vpop.f32.mrf.mxu3  ;;  %2026 = vmatpush.bf16.msrb.mxu0 %v8076_v30  ;;  %2677 = vst [vmem:[#allocation2 + $0x178] sm:$0xff] %v2674_v15 }
  0xb7   : > { %2201 = vmatpush.bf16.msrb.mxu2 %v8095_v60  ;;  %v2675_v46 = vadd.f32 %v2672_v1, %v2665_v41  ;;  %v8094_v60 = vld [vmem:[%s11911_s3 + $0x190] sm:$0xff]  ;;  %v1079_v41 = vrot.slane %v557_v48, 2  ;;  %v1081_v1 = vrot.slane %v9180_v5, 2 }
  0xb8   : > { %v1852_v57 = vpop.f32.mrf.mxu2  ;;  %v1677_v53 = vpop.f32.mrf.mxu0 }
  0xb9   : > { %v9212_v61 = vadd.f32 %v1852_v57, %v1764_v52  ;;  %v1678_v40 = vadd.f32 %v9127_v56, %v1677_v53  ;;  %v7437_v52 = vld [vmem:[%s8423_s13 + $0x48] sm:$0xff]  ;;  %v8084_v57 = vld [vmem:[%s11911_s3 + $0x140] sm:$0xff]  ;;  %v1082_v15 = vsel %vm1027_vm1, %v1079_v41, %v1081_v1 }
  0xba   : > { %v1766_v29 = vpop.f32.mrf.mxu1  ;;  %v2670_v23 = vmul.f32 0.125, %v7437_v52  ;;  %2742 = vst [vmem:[#allocation2 + $0xc8] sm:$0xff] %v7437_v52  ;;  %2115 = vmatpush.bf16.msrb.mxu1 %v8084_v57 }
  0xbb   : > { %12074 = vst [vmem:[#allocation20_spill] sm:$0xff] %v9212_v61  ;;  %v1767_v20 = vadd.f32 %v1766_v29, %v1678_v40  ;;  %1716 = vmatmul.bf16.gmra.mxu0 %v9203_v27  ;;  %1914 = vmatmul.bf16.gmra.mxu3 %v9205_v4  ;;  %v965_v40 = vrot.slane %v556_v51, 1  ;;  %v966_v29 = vrot.slane %v557_v48, 1  ;;  %v1098_v61 = vrot.slane %v8723_v33, 2  ;;  %v8068_v33 = vld [vmem:[%s11911_s3 + $0xc0] sm:$0xff] }
  0xbc   : > { %v2673_v0 = vadd.f32 %v2670_v23, %v9151_v49  ;;  %v1099_v49 = vrot.slane %v8726_v22, 2  ;;  %2202 = vmatpush.bf16.msrb.mxu2 %v8094_v60  ;;  %v8093_v22 = vld [vmem:[%s11911_s3 + $0x188] sm:$0xff]  ;;  %1937 = vmatpush.bf16.msrb.mxu3 %v8068_v33  ;;  %v9270_v60 = vpack.c.bf16 %v557_v48, %v556_v51 }
  0xbd   : > { %1805 = vmatmul.bf16.gmra.mxu1 %v9214_v59  ;;  %1894 = vmatmul.bf16.gmra.mxu2 %v9216_v8  ;;  %v967_v42 = vsel %vm914_vm0, %v965_v40, %v966_v29  ;;  %v969_v5 = vsel %vm914_vm0, %v966_v29, %v968_v10  ;;  %v572_v40 = vmul.f32 0.75, %v9192_v2  ;;  %v8092_v29 = vld [vmem:[%s11911_s3 + $0x180] sm:$0xff]  ;;  %v8107_v10 = vld [vmem:[%s11911_s3 + $0x1f8] sm:$0xff] }
  0xbe   : > { %v9241_v55 = vpop.f32.mrf.mxu3  ;;  %2676 = vst [vmem:[#allocation2 + $0xa8] sm:$0xff] %v2673_v0  ;;  %v1100_v30 = vsel %vm1027_vm1, %v1098_v61, %v1099_v49  ;;  %v1102_v57 = vsel %vm1027_vm1, %v1099_v49, %v1101_v63  ;;  %v1080_v0 = vsel %vm1027_vm1, %v1078_v26, %v1079_v41  ;;  %v573_v61 = vmul.f32 0.75, %v9195_v36 }
  0xbf   : > { %v9281_v63 = vpack.c.bf16 %v969_v5, %v967_v42  ;;  %v575_v2 = vadd.f32 %v572_v40, %v9081_v9 }
  0xc0   : > { %v1855_v53 = vpop.f32.mrf.mxu2  ;;  %v1679_v52 = vpop.f32.mrf.mxu0  ;;  %2203 = vmatpush.bf16.msrb.mxu2 %v8093_v22  ;;  %v576_v36 = vadd.f32 %v573_v61, %v9083_v37  ;;  %2286 = vmatpush.bf16.msra.mxu3 %v8107_v10  ;;  %v1103_v37 = vrot.slane %v8799_v34, 2 }
  0xc1   : > { %v9248_v4 = vadd.f32 %v1855_v53, %v1767_v20  ;;  %v1680_v50 = vadd.f32 %v9127_v56, %v1679_v52  ;;  %v702_v20 = vld [vmem:[#allocation2 + $0xb0] sm:$0x3]  ;;  %v9272_v52 = vpack.c.bf16 %v1102_v57, %v1100_v30  ;;  %v1083_v22 = vrot.slane %v575_v2, 2 }
  0xc2   : > { %v1768_v23 = vpop.f32.mrf.mxu1  ;;  %2678 = vst [vmem:[#allocation2 + $0xb0] sm:$0x3] %v2675_v46  ;;  %v971_v33 = vrot.slane %v576_v36, 1  ;;  %v1104_v30 = vrot.slane %v8802_v28, 2  ;;  %v1106_v57 = vrot.slane %v8996_v31, 2  ;;  %v1086_v40 = vrot.slane %v702_v20, 2 }
  0xc3   : > { %v1769_v35 = vadd.f32 %v1768_v23, %v1680_v50  ;;  %12075 = vst [vmem:[#allocation21_spill] sm:$0xff] %v9272_v52  ;;  %v9283_v50 = vpack.c.bf16 %v1082_v15, %v1080_v0  ;;  %v973_v15 = vrot.slane %v702_v20, 1 }
  0xc4   : > { %2204 = vmatpush.bf16.msrb.mxu2 %v8092_v29  ;;  %v8115_v29 = vld [vmem:[%s11911_s3 + $0x238] sm:$0xff]  ;;  %v1105_v28 = vsel %vm1027_vm1, %v1103_v37, %v1104_v30  ;;  %v1107_v31 = vsel %vm1027_vm1, %v1104_v30, %v1106_v57 }
  0xc5   : > { %2375 = vmatpush.bf16.msra.mxu0 %v8115_v29 }
  0xc6   : > { %v9268_v53 = vpop.f32.mrf.mxu3 }
  0xc8   : > { %v1857_v46 = vpop.f32.mrf.mxu2  ;;  %v1682_v49 = vpop.f32.mrf.mxu0 }
  0xc9   : > { %v9279_v26 = vadd.f32 %v1857_v46, %v1769_v35  ;;  %v1683_v51 = vadd.f32 %v9127_v56, %v1682_v49  ;;  %v970_v35 = vrot.slane %v575_v2, 1  ;;  %v1084_v46 = vrot.slane %v576_v36, 2  ;;  %v8123_v49 = vld [vmem:[%s11913_s5 + $0x38] sm:$0xff] }
  0xca   : > { %v1771_v48 = vpop.f32.mrf.mxu1  ;;  %3739 = vmatpush.bf16.msra.mxu1 %v8123_v49 }
  0xcb   : > { %v1772_v23 = vadd.f32 %v1771_v48, %v1683_v51  ;;  %1721 = vmatmul.bf16.gmra.mxu0 %v9270_v60  ;;  %1919 = vmatmul.bf16.gmra.mxu3 %v9272_v52  ;;  %v972_v34 = vsel %vm914_vm0, %v970_v35, %v971_v33  ;;  %v974_v51 = vsel %vm914_vm0, %v971_v33, %v973_v15 }
  0xcc   : > { %v1085_v48 = vsel %vm1027_vm1, %v1083_v22, %v1084_v46  ;;  %v1087_v20 = vsel %vm1027_vm1, %v1084_v46, %v1086_v40 }
  0xcd   : > { %1810 = vmatmul.bf16.gmra.mxu1 %v9281_v63  ;;  %1899 = vmatmul.bf16.gmra.mxu2 %v9283_v50  ;;  %v9325_v30 = vpack.c.bf16 %v1087_v20, %v1085_v48  ;;  %v8106_v20 = vld [vmem:[%s11911_s3 + $0x1f0] sm:$0xff] }
  0xce   : > { %v9295_v41 = vpop.f32.mrf.mxu3  ;;  %2287 = vmatpush.bf16.msra.mxu3 %v8106_v20 }
  0xd0   : > { %v1860_v1 = vpop.f32.mrf.mxu2  ;;  %v1684_v9 = vpop.f32.mrf.mxu0 }
  0xd1   : > { %v9297_v42 = vadd.f32 %v1860_v1, %v1772_v23  ;;  %v1685_v5 = vadd.f32 %v9127_v56, %v1684_v9  ;;  %v9317_v1 = vpack.c.bf16 %v576_v36, %v575_v2  ;;  %v9319_v9 = vpack.c.bf16 %v1107_v31, %v1105_v28 }
  0xd2   : > { %v1773_v0 = vpop.f32.mrf.mxu1 }
  0xd3   : > { %v1774_v61 = vadd.f32 %v1773_v0, %v1685_v5  ;;  %12076 = vst [vmem:[#allocation22_spill] sm:$0xff] %v9319_v9  ;;  %v9323_v5 = vpack.c.bf16 %v974_v51, %v972_v34 }
  0xd6   : > { %v9315_v23 = vpop.f32.mrf.mxu3 }
  0xd8   : > { %v1862_v10 = vpop.f32.mrf.mxu2  ;;  %v1687_v37 = vpop.f32.mrf.mxu0 }
  0xd9   : > { %v9321_v35 = vadd.f32 %v1862_v10, %v1774_v61  ;;  %v1688_v33 = vadd.f32 %v9127_v56, %v1687_v37  ;;  %v1733_v10 = vadd.f32 %v9127_v56, %v9163_v25  ;;  %v8122_v25 = vld [vmem:[%s11913_s5 + $0x30] sm:$0xff] }
  0xda   : > { %v1776_v22 = vpop.f32.mrf.mxu1  ;;  %3740 = vmatpush.bf16.msra.mxu1 %v8122_v25 }
  0xdb   : > { %v1777_v57 = vadd.f32 %v1776_v22, %v1688_v33  ;;  %1726 = vmatmul.bf16.gmra.mxu0 %v9317_v1  ;;  %1924 = vmatmul.bf16.gmra.mxu3 %v9319_v9 }
  0xdd   : > { %1815 = vmatmul.bf16.gmra.mxu1 %v9323_v5  ;;  %1904 = vmatmul.bf16.gmra.mxu2 %v9325_v30 }
  0xde   : > { %v9332_v2 = vpop.f32.mrf.mxu3 }
  0xe0   : > { %v1865_v36 = vpop.f32.mrf.mxu2  ;;  %v1689_v15 = vpop.f32.mrf.mxu0 }
  0xe1   : > { %v9334_v0 = vadd.f32 %v1865_v36, %v1777_v57  ;;  %v1690_v46 = vadd.f32 %v9127_v56, %v1689_v15  ;;  %v8114_v15 = vld [vmem:[%s11911_s3 + $0x230] sm:$0xff] }
  0xe2   : > { %v1778_v40 = vpop.f32.mrf.mxu1  ;;  %2376 = vmatpush.bf16.msra.mxu0 %v8114_v15  ;;  %v1740_v15 = vadd.f32 %v9127_v56, %v9268_v53  ;;  %v8105_v53 = vld [vmem:[%s11911_s3 + $0x1e8] sm:$0xff] }
  0xe3   : > { %v1779_v61 = vadd.f32 %v1778_v40, %v1690_v46  ;;  %v1735_v46 = vadd.f32 %v9127_v56, %v9200_v6  ;;  %v1738_v6 = vadd.f32 %v9127_v56, %v9241_v55  ;;  %2288 = vmatpush.bf16.msra.mxu3 %v8105_v53 }
  0xe6   : > { %v9337_v29 = vpop.f32.mrf.mxu3 }
  0xe8   : > { %v1867_v49 = vpop.f32.mrf.mxu2  ;;  %v1692_v28 = vpop.f32.mrf.mxu0 }
  0xe9   : > { %v9339_v34 = vadd.f32 %v1867_v49, %v1779_v61  ;;  %v1693_v31 = vadd.f32 %v9127_v56, %v1692_v28 }
  0xea   : > { %v1781_v51 = vpop.f32.mrf.mxu1 }
  0xeb   : > { %v1782_v48 = vadd.f32 %v1781_v51, %v1693_v31  ;;  %1938 = vmatmul.bf16.vlgmr.msrb.gmra.mxu3 %v8652_v3  ;;  %2027 = vmatmul.bf16.vlgmr.msrb.gmra.mxu0 %v8670_v17 }
  0xed   : > { %2116 = vmatmul.bf16.vlgmr.msrb.gmra.mxu1 %v8672_v21  ;;  %2205 = vmatmul.bf16.vlgmr.msrb.gmra.mxu2 %v8739_v43 }
  0xee   : > { %v1821_v37 = vpop.f32.mrf.mxu3 }
  0xef   : > { %v9351_v33 = vadd.f32 %v1821_v37, %v1733_v10 }
  0xf0   : > { %v1870_v22 = vpop.f32.mrf.mxu2  ;;  %v1694_v3 = vpop.f32.mrf.mxu0 }
  0xf1   : > { %v9353_v57 = vadd.f32 %v1870_v22, %v1782_v48  ;;  %v1695_v17 = vadd.f32 %v9127_v56, %v1694_v3 }
  0xf2   : > { %v1783_v21 = vpop.f32.mrf.mxu1 }
  0xf3   : > { %v1784_v36 = vadd.f32 %v1783_v21, %v1695_v17 }
  0xf6   : > { %v1823_v40 = vpop.f32.mrf.mxu3 }
  0xf7   : > { %v9364_v61 = vadd.f32 %v1823_v40, %v1735_v46 }
  0xf8   : > { %v1872_v49 = vpop.f32.mrf.mxu2  ;;  %v1697_v31 = vpop.f32.mrf.mxu0 }
  0xf9   : > { %v9366_v28 = vadd.f32 %v1872_v49, %v1784_v36  ;;  %v1698_v51 = vadd.f32 %v9127_v56, %v1697_v31 }
  0xfa   : > { %v1786_v48 = vpop.f32.mrf.mxu1 }
  0xfb   : > { %v1787_v20 = vadd.f32 %v1786_v48, %v1698_v51  ;;  %1943 = vmatmul.bf16.gmra.mxu3 %v8739_v43  ;;  %2032 = vmatmul.bf16.gmra.mxu0 %v8746_v7 }
  0xfd   : > { %2121 = vmatmul.bf16.gmra.mxu1 %v8748_v13  ;;  %2210 = vmatmul.bf16.gmra.mxu2 %v8819_v47 }
  0xfe   : > { %v1826_v10 = vpop.f32.mrf.mxu3 }
  0xff   : > { %v9375_v37 = vadd.f32 %v1826_v10, %v1738_v6  ;;  %v1743_v6 = vadd.f32 %v9127_v56, %v9295_v41  ;;  %v8121_v41 = vld [vmem:[%s11913_s5 + $0x28] sm:$0xff] }
 0x100   : > { %v1875_v22 = vpop.f32.mrf.mxu2  ;;  %v1699_v17 = vpop.f32.mrf.mxu0  ;;  %3741 = vmatpush.bf16.msra.mxu1 %v8121_v41 }
 0x101   : > { %v9377_v3 = vadd.f32 %v1875_v22, %v1787_v20  ;;  %v1700_v21 = vadd.f32 %v9127_v56, %v1699_v17  ;;  %v12077_v20 = vld [vmem:[#allocation9_spill] sm:$0xff] }
 0x102   : > { %v1788_v36 = vpop.f32.mrf.mxu1 }
 0x103   : > { %v1789_v43 = vadd.f32 %v1788_v36, %v1700_v21 }
 0x106   : > { %v1828_v25 = vpop.f32.mrf.mxu3 }
 0x107   : > { %v9382_v46 = vadd.f32 %v1828_v25, %v1740_v15  ;;  %v8113_v25 = vld [vmem:[%s11911_s3 + $0x228] sm:$0xff] }
 0x108   : > { %v1877_v40 = vpop.f32.mrf.mxu2  ;;  %v1702_v55 = vpop.f32.mrf.mxu0  ;;  %2377 = vmatpush.bf16.msra.mxu0 %v8113_v25 }
 0x109   : > { %v9384_v49 = vadd.f32 %v1877_v40, %v1789_v43  ;;  %v1703_v31 = vadd.f32 %v9127_v56, %v1702_v55  ;;  %v1745_v40 = vadd.f32 %v9127_v56, %v9315_v23  ;;  %v1748_v23 = vadd.f32 %v9127_v56, %v9332_v2 }
 0x10a   : > { %v1791_v51 = vpop.f32.mrf.mxu1 }
 0x10b   : > { %v1792_v48 = vadd.f32 %v1791_v51, %v1703_v31  ;;  %1948 = vmatmul.bf16.gmra.mxu3 %v8819_v47  ;;  %2037 = vmatmul.bf16.gmra.mxu0 %v8825_v45 }
 0x10d   : > { %2126 = vmatmul.bf16.gmra.mxu1 %v12077_v20  ;;  %2215 = vmatmul.bf16.gmra.mxu2 %v8896_v24 }
 0x10e   : > { %v1831_v10 = vpop.f32.mrf.mxu3 }
 0x10f   : > { %v9396_v22 = vadd.f32 %v1831_v10, %v1743_v6 }
 0x110   : > { %v1880_v17 = vpop.f32.mrf.mxu2  ;;  %v1704_v47 = vpop.f32.mrf.mxu0 }
 0x111   : > { %v9398_v21 = vadd.f32 %v1880_v17, %v1792_v48  ;;  %v1705_v36 = vadd.f32 %v9127_v56, %v1704_v47 }
 0x112   : > { %v1793_v43 = vpop.f32.mrf.mxu1 }
 0x113   : > { %v1794_v15 = vadd.f32 %v1793_v43, %v1705_v36 }
 0x116   : > { %v1833_v55 = vpop.f32.mrf.mxu3 }
 0x117   : > { %v9409_v31 = vadd.f32 %v1833_v55, %v1745_v40  ;;  %v1750_v55 = vadd.f32 %v9127_v56, %v9337_v29  ;;  %v8104_v29 = vld [vmem:[%s11911_s3 + $0x1e0] sm:$0xff] }
 0x118   : > { %v1882_v51 = vpop.f32.mrf.mxu2  ;;  %v1707_v53 = vpop.f32.mrf.mxu0  ;;  %2289 = vmatpush.bf16.msra.mxu3 %v8104_v29 }
 0x119   : > { %v9411_v48 = vadd.f32 %v1882_v51, %v1794_v15  ;;  %v1708_v6 = vadd.f32 %v9127_v56, %v1707_v53 }
 0x11a   : > { %v1796_v10 = vpop.f32.mrf.mxu1 }
 0x11b   : > { %v1797_v17 = vadd.f32 %v1796_v10, %v1708_v6  ;;  %1953 = vmatmul.bf16.gmra.mxu3 %v8896_v24  ;;  %2042 = vmatmul.bf16.gmra.mxu0 %v8900_v18 }
 0x11d   : > { %2131 = vmatmul.bf16.gmra.mxu1 %v8902_v14  ;;  %2220 = vmatmul.bf16.gmra.mxu2 %v8959_v19 }
 0x11e   : > { %v1836_v47 = vpop.f32.mrf.mxu3 }
 0x11f   : > { %v9420_v36 = vadd.f32 %v1836_v47, %v1748_v23 }
 0x120   : > { %v1885_v43 = vpop.f32.mrf.mxu2  ;;  %v1709_v25 = vpop.f32.mrf.mxu0 }
 0x121   : > { %v9422_v15 = vadd.f32 %v1885_v43, %v1797_v17  ;;  %v1710_v41 = vadd.f32 %v9127_v56, %v1709_v25 }
 0x122   : > { %v1798_v40 = vpop.f32.mrf.mxu1 }
 0x123   : > { %v1799_v24 = vadd.f32 %v1798_v40, %v1710_v41 }
 0x126   : > { %v1838_v51 = vpop.f32.mrf.mxu3 }
 0x127   : > { %v9427_v53 = vadd.f32 %v1838_v51, %v1750_v55 }
 0x128   : > { %v1887_v6 = vpop.f32.mrf.mxu2  ;;  %v1712_v2 = vpop.f32.mrf.mxu0 }
 0x129   : > { %v9429_v10 = vadd.f32 %v1887_v6, %v1799_v24  ;;  %v1713_v23 = vadd.f32 %v9127_v56, %v1712_v2  ;;  %v8112_v6 = vld [vmem:[%s11911_s3 + $0x220] sm:$0xff] }
 0x12a   : > { %v1801_v47 = vpop.f32.mrf.mxu1  ;;  %v8120_v2 = vld [vmem:[%s11913_s5 + $0x20] sm:$0xff]  ;;  %2378 = vmatpush.bf16.msra.mxu0 %v8112_v6 }
 0x12b   : > { %v1802_v17 = vadd.f32 %v1801_v47, %v1713_v23  ;;  %1958 = vmatmul.bf16.gmra.mxu3 %v8959_v19  ;;  %2047 = vmatmul.bf16.gmra.mxu0 %v8969_v16 }
 0x12c   : > { %3742 = vmatpush.bf16.msra.mxu1 %v8120_v2 }
 0x12d   : > { %2136 = vmatmul.bf16.gmra.mxu1 %v8971_v11  ;;  %2225 = vmatmul.bf16.gmra.mxu2 %v9013_v44 }
 0x12e   : > { %v1910_v43 = vpop.f32.mrf.mxu3 }
 0x12f   : > { %v9440_v41 = vadd.f32 %v1910_v43, %v9351_v33 }
 0x130   : > { %v1890_v25 = vpop.f32.mrf.mxu2  ;;  %v1714_v24 = vpop.f32.mrf.mxu0 }
 0x131   : > { %12078 = vst [vmem:[#allocation9_spill] sm:$0xff] %v9440_v41  ;;  %v9442_v40 = vadd.f32 %v1890_v25, %v1802_v17  ;;  %v1715_v19 = vadd.f32 %v9127_v56, %v1714_v24 }
 0x132   : > { %v1803_v55 = vpop.f32.mrf.mxu1 }
 0x133   : > { %v1804_v51 = vadd.f32 %v1803_v55, %v1715_v19 }
 0x136   : > { %v1912_v23 = vpop.f32.mrf.mxu3 }
 0x137   : > { %v9452_v47 = vadd.f32 %v1912_v23, %v9364_v61 }
 0x138   : > { %v1892_v33 = vpop.f32.mrf.mxu2  ;;  %v1717_v29 = vpop.f32.mrf.mxu0 }
 0x139   : > { %12079 = vst [vmem:[#allocation23_spill] sm:$0xff] %v9452_v47  ;;  %v9454_v17 = vadd.f32 %v1892_v33, %v1804_v51  ;;  %v1718_v43 = vadd.f32 %v9127_v56, %v1717_v29 }
 0x13a   : > { %v1806_v25 = vpop.f32.mrf.mxu1 }
 0x13b   : > { %v1807_v24 = vadd.f32 %v1806_v25, %v1718_v43  ;;  %1963 = vmatmul.bf16.gmra.mxu3 %v9013_v44  ;;  %2052 = vmatmul.bf16.gmra.mxu0 %v9023_v39 }
 0x13d   : > { %2141 = vmatmul.bf16.gmra.mxu1 %v9025_v32  ;;  %2230 = vmatmul.bf16.gmra.mxu2 %v9073_v12 }
 0x13e   : > { %v1915_v19 = vpop.f32.mrf.mxu3 }
 0x13f   : > { %v9462_v61 = vadd.f32 %v1915_v19, %v9375_v37 }
 0x140   : > { %v1895_v55 = vpop.f32.mrf.mxu2  ;;  %v1719_v6 = vpop.f32.mrf.mxu0 }
 0x141   : > { %v9464_v51 = vadd.f32 %v1895_v55, %v1807_v24  ;;  %v1720_v2 = vadd.f32 %v9127_v56, %v1719_v6  ;;  %v12080_v24 = vld [vmem:[#allocation16_spill] sm:$0xff] }
 0x142   : > { %v1808_v23 = vpop.f32.mrf.mxu1 }
 0x143   : > { %v1809_v33 = vadd.f32 %v1808_v23, %v1720_v2  ;;  %v8111_v23 = vld [vmem:[%s11911_s3 + $0x218] sm:$0xff] }
 0x144   : > { %2379 = vmatpush.bf16.msra.mxu0 %v8111_v23 }
 0x146   : > { %v1917_v29 = vpop.f32.mrf.mxu3 }
 0x147   : > { %v9468_v43 = vadd.f32 %v1917_v29, %v9382_v46  ;;  %v8103_v46 = vld [vmem:[%s11911_s3 + $0x1d8] sm:$0xff] }
 0x148   : > { %v1897_v44 = vpop.f32.mrf.mxu2  ;;  %v1722_v47 = vpop.f32.mrf.mxu0  ;;  %2290 = vmatpush.bf16.msra.mxu3 %v8103_v46 }
 0x149   : > { %v9470_v25 = vadd.f32 %v1897_v44, %v1809_v33  ;;  %v1723_v41 = vadd.f32 %v9127_v56, %v1722_v47  ;;  %v8119_v33 = vld [vmem:[%s11913_s5 + $0x18] sm:$0xff] }
 0x14a   : > { %v1811_v32 = vpop.f32.mrf.mxu1  ;;  %3743 = vmatpush.bf16.msra.mxu1 %v8119_v33 }
 0x14b   : > { %v1812_v37 = vadd.f32 %v1811_v32, %v1723_v41  ;;  %1968 = vmatmul.bf16.gmra.mxu3 %v9073_v12  ;;  %2057 = vmatmul.bf16.gmra.mxu0 %v9077_v38 }
 0x14d   : > { %2146 = vmatmul.bf16.gmra.mxu1 %v12080_v24  ;;  %2235 = vmatmul.bf16.gmra.mxu2 %v9129_v58 }
 0x14e   : > { %v1920_v19 = vpop.f32.mrf.mxu3 }
 0x14f   : > { %v9481_v6 = vadd.f32 %v1920_v19, %v9396_v22 }
 0x150   : > { %v1900_v55 = vpop.f32.mrf.mxu2  ;;  %v1724_v32 = vpop.f32.mrf.mxu0 }
 0x151   : > { %12081 = vst [vmem:[#allocation16_spill] sm:$0xff] %v9481_v6  ;;  %v9483_v47 = vadd.f32 %v1900_v55, %v1812_v37  ;;  %v1725_v12 = vadd.f32 %v9127_v56, %v1724_v32 }
 0x152   : > { %v1813_v41 = vpop.f32.mrf.mxu1 }
 0x153   : > { %v1814_v2 = vadd.f32 %v1813_v41, %v1725_v12  ;;  %v12083_v12 = vld [vmem:[#allocation18_spill] sm:$0xff] }
 0x156   : > { %v1922_v29 = vpop.f32.mrf.mxu3 }
 0x157   : > { %v9493_v22 = vadd.f32 %v1922_v29, %v9409_v31  ;;  %v8131_v31 = vld [vmem:[%s11913_s5 + $0x78] sm:$0xff] }
 0x158   : > { %v1902_v44 = vpop.f32.mrf.mxu2  ;;  %v1727_v46 = vpop.f32.mrf.mxu0  ;;  %3828 = vmatpush.bf16.msra.mxu2 %v8131_v31 }
 0x159   : > { %12082 = vst [vmem:[#allocation24_spill] sm:$0xff] %v9493_v22  ;;  %v9495_v37 = vadd.f32 %v1902_v44, %v1814_v2  ;;  %v1728_v19 = vadd.f32 %v9127_v56, %v1727_v46 }
 0x15a   : > { %v1816_v55 = vpop.f32.mrf.mxu1 }
 0x15b   : > { %v1817_v32 = vadd.f32 %v1816_v55, %v1728_v19  ;;  %1973 = vmatmul.bf16.gmra.mxu3 %v9129_v58  ;;  %2062 = vmatmul.bf16.gmra.mxu0 %v9133_v62 }
 0x15d   : > { %2151 = vmatmul.bf16.gmra.mxu1 %v12083_v12  ;;  %2240 = vmatmul.bf16.gmra.mxu2 %v9203_v27 }
 0x15e   : > { %v1925_v41 = vpop.f32.mrf.mxu3 }
 0x15f   : > { %v9506_v23 = vadd.f32 %v1925_v41, %v9420_v36 }
 0x160   : > { %v1905_v2 = vpop.f32.mrf.mxu2  ;;  %v1729_v29 = vpop.f32.mrf.mxu0 }
 0x161   : > { %v9508_v33 = vadd.f32 %v1905_v2, %v1817_v32  ;;  %v1730_v58 = vadd.f32 %v9127_v56, %v1729_v29  ;;  %v8102_v56 = vld [vmem:[%s11911_s3 + $0x1d0] sm:$0xff] }
 0x162   : > { %v1818_v44 = vpop.f32.mrf.mxu1  ;;  %2291 = vmatpush.bf16.msra.mxu3 %v8102_v56 }
 0x163   : > { %v1819_v46 = vadd.f32 %v1818_v44, %v1730_v58  ;;  %v8110_v58 = vld [vmem:[%s11911_s3 + $0x210] sm:$0xff] }
 0x164   : > { %v8118_v44 = vld [vmem:[%s11913_s5 + $0x10] sm:$0xff]  ;;  %2380 = vmatpush.bf16.msra.mxu0 %v8110_v58 }
 0x165   : > { %3744 = vmatpush.bf16.msra.mxu1 %v8118_v44 }
 0x166   : > { %v1927_v19 = vpop.f32.mrf.mxu3 }
 0x167   : > { %v9512_v22 = vadd.f32 %v1927_v19, %v9427_v53  ;;  %v12085_v19 = vld [vmem:[#allocation20_spill] sm:$0xff] }
 0x168   : > { %v1907_v55 = vpop.f32.mrf.mxu2  ;;  %v2028_v12 = vpop.f32.mrf.mxu0 }
 0x169   : > { %v9514_v6 = vadd.f32 %v1907_v55, %v1819_v46 }
 0x16a   : > { %v2117_v62 = vpop.f32.mrf.mxu1 }
 0x16b   : > { %1978 = vmatmul.bf16.gmra.mxu3 %v9203_v27  ;;  %2067 = vmatmul.bf16.gmra.mxu0 %v9214_v59 }
 0x16d   : > { %2156 = vmatmul.bf16.gmra.mxu1 %v9216_v8  ;;  %2245 = vmatmul.bf16.gmra.mxu2 %v9270_v60 }
 0x16e   : > { %v1939_v36 = vpop.f32.mrf.mxu3 }
 0x16f   : > { %v1940_v53 = vadd.f32 %v1939_v36, %v9173_v54 }
 0x170   : > { %v2206_v32 = vpop.f32.mrf.mxu2  ;;  %v2030_v31 = vpop.f32.mrf.mxu0 }
 0x171   : > { %v2029_v41 = vadd.f32 %v2028_v12, %v1940_v53 }
 0x172   : > { %v2119_v2 = vpop.f32.mrf.mxu1 }
 0x173   : > { %v2118_v29 = vadd.f32 %v2117_v62, %v2029_v41 }
 0x175   : > { %v9524_v27 = vadd.f32 %v2206_v32, %v2118_v29  ;;  %v8130_v32 = vld [vmem:[%s11913_s5 + $0x70] sm:$0xff] }
 0x176   : > { %v1941_v46 = vpop.f32.mrf.mxu3  ;;  %3829 = vmatpush.bf16.msra.mxu2 %v8130_v32 }
 0x177   : > { %12084 = vst [vmem:[#allocation25_spill] sm:$0xff] %v9524_v27  ;;  %v1942_v55 = vadd.f32 %v1941_v46, %v12085_v19 }
 0x178   : > { %v2208_v54 = vpop.f32.mrf.mxu2  ;;  %v2033_v56 = vpop.f32.mrf.mxu0 }
 0x179   : > { %v2031_v12 = vadd.f32 %v2030_v31, %v1942_v55 }
 0x17a   : > { %v2122_v36 = vpop.f32.mrf.mxu1 }
 0x17b   : > { %v2120_v62 = vadd.f32 %v2119_v2, %v2031_v12  ;;  %1983 = vmatmul.bf16.gmra.mxu3 %v9270_v60  ;;  %2072 = vmatmul.bf16.gmra.mxu0 %v9281_v63 }
 0x17d   : > { %2161 = vmatmul.bf16.gmra.mxu1 %v9283_v50  ;;  %2250 = vmatmul.bf16.gmra.mxu2 %v9317_v1  ;;  %v9537_v53 = vadd.f32 %v2208_v54, %v2120_v62 }
 0x17e   : > { %v1944_v41 = vpop.f32.mrf.mxu3 }
 0x17f   : > { %12086 = vst [vmem:[#allocation20_spill] sm:$0xff] %v9537_v53  ;;  %v1945_v29 = vadd.f32 %v1944_v41, %v9248_v4  ;;  %v12087_v4 = vld [vmem:[#allocation5_spill] sm:$0xff] }
 0x180   : > { %v2211_v31 = vpop.f32.mrf.mxu2  ;;  %v2035_v2 = vpop.f32.mrf.mxu0 }
 0x181   : > { %v2034_v58 = vadd.f32 %v2033_v56, %v1945_v29 }
 0x182   : > { %v2124_v60 = vpop.f32.mrf.mxu1 }
 0x183   : > { %v2123_v44 = vadd.f32 %v2122_v36, %v2034_v58  ;;  %v8101_v36 = vld [vmem:[%s11911_s3 + $0x1c8] sm:$0xff] }
 0x184   : > { %2292 = vmatpush.bf16.msra.mxu3 %v8101_v36  ;;  %v12090_v36 = vld [vmem:[#allocation14_spill] sm:$0xff] }
 0x185   : > { %v9543_v46 = vadd.f32 %v2211_v31, %v2123_v44 }
 0x186   : > { %v1946_v19 = vpop.f32.mrf.mxu3 }
 0x187   : > { %v1947_v55 = vadd.f32 %v1946_v19, %v9279_v26 }
 0x188   : > { %v2213_v54 = vpop.f32.mrf.mxu2  ;;  %v2038_v12 = vpop.f32.mrf.mxu0 }
 0x189   : > { %v2036_v62 = vadd.f32 %v2035_v2, %v1947_v55 }
 0x18a   : > { %v2127_v53 = vpop.f32.mrf.mxu1 }
 0x18b   : > { %v2125_v27 = vadd.f32 %v2124_v60, %v2036_v62  ;;  %1988 = vmatmul.bf16.gmra.mxu3 %v9317_v1  ;;  %2077 = vmatmul.bf16.gmra.mxu0 %v9323_v5  ;;  %v8117_v60 = vld [vmem:[%s11913_s5 + $0x8] sm:$0xff]  ;;  %v12089_v62 = vld [vmem:[#allocation10_spill] sm:$0xff] }
 0x18c   : > { %3745 = vmatpush.bf16.msra.mxu1 %v8117_v60 }
 0x18d   : > { %2166 = vmatmul.bf16.gmra.mxu1 %v9325_v30  ;;  %2255 = vmatmul.bf16.gmra.mxu2 %v12087_v4  ;;  %v9550_v56 = vadd.f32 %v2213_v54, %v2125_v27  ;;  %v8109_v27 = vld [vmem:[%s11911_s3 + $0x208] sm:$0xff] }
 0x18e   : > { %v1949_v26 = vpop.f32.mrf.mxu3  ;;  %2381 = vmatpush.bf16.msra.mxu0 %v8109_v27 }
 0x18f   : > { %v1950_v32 = vadd.f32 %v1949_v26, %v9297_v42  ;;  %v12091_v26 = vld [vmem:[#allocation6_spill] sm:$0xff] }
 0x190   : > { %v2216_v41 = vpop.f32.mrf.mxu2  ;;  %v2040_v29 = vpop.f32.mrf.mxu0 }
 0x191   : > { %v2039_v31 = vadd.f32 %v2038_v12, %v1950_v32 }
 0x192   : > { %v2129_v1 = vpop.f32.mrf.mxu1 }
 0x193   : > { %v2128_v2 = vadd.f32 %v2127_v53, %v2039_v31 }
 0x195   : > { %v9556_v58 = vadd.f32 %v2216_v41, %v2128_v2 }
 0x196   : > { %v1951_v44 = vpop.f32.mrf.mxu3 }
 0x197   : > { %12088 = vst [vmem:[#allocation5_spill] sm:$0xff] %v9556_v58  ;;  %v1952_v19 = vadd.f32 %v1951_v44, %v9321_v35  ;;  %v8129_v35 = vld [vmem:[%s11913_s5 + $0x68] sm:$0xff] }
 0x198   : > { %v2218_v42 = vpop.f32.mrf.mxu2  ;;  %v2043_v55 = vpop.f32.mrf.mxu0  ;;  %3830 = vmatpush.bf16.msra.mxu2 %v8129_v35  ;;  %v12094_v35 = vld [vmem:[#allocation19_spill] sm:$0xff] }
 0x199   : > { %v2041_v54 = vadd.f32 %v2040_v29, %v1952_v19 }
 0x19a   : > { %v2132_v12 = vpop.f32.mrf.mxu1 }
 0x19b   : > { %v2130_v53 = vadd.f32 %v2129_v1, %v2041_v54  ;;  %1993 = vmatmul.bf16.gmra.mxu3 %v12087_v4  ;;  %2082 = vmatmul.bf16.gmra.mxu0 %v12089_v62 }
 0x19d   : > { %2171 = vmatmul.bf16.gmra.mxu1 %v12090_v36  ;;  %2260 = vmatmul.bf16.gmra.mxu2 %v12091_v26  ;;  %v9569_v32 = vadd.f32 %v2218_v42, %v2130_v53 }
 0x19e   : > { %v1954_v41 = vpop.f32.mrf.mxu3 }
 0x19f   : > { %12092 = vst [vmem:[#allocation10_spill] sm:$0xff] %v9569_v32  ;;  %v1955_v31 = vadd.f32 %v1954_v41, %v9334_v0  ;;  %v12093_v0 = vld [vmem:[#allocation11_spill] sm:$0xff]  ;;  %v8100_v41 = vld [vmem:[%s11911_s3 + $0x1c0] sm:$0xff] }
 0x1a0   : > { %v2221_v29 = vpop.f32.mrf.mxu2  ;;  %v2045_v1 = vpop.f32.mrf.mxu0  ;;  %2293 = vmatpush.bf16.msra.mxu3 %v8100_v41 }
 0x1a1   : > { %v2044_v2 = vadd.f32 %v2043_v55, %v1955_v31  ;;  %v12095_v55 = vld [vmem:[#allocation7_spill] sm:$0xff]  ;;  %v7109_v31 = vld [vmem:[%s8463_s23 + $0xb8] sm:$0x3] }
 0x1a2   : > { %v2134_v4 = vpop.f32.mrf.mxu1  ;;  %666 = vst [vmem:[#allocation2 + $0x170] sm:$0x3] %v7109_v31 }
 0x1a3   : > { %v2133_v27 = vadd.f32 %v2132_v12, %v2044_v2 }
 0x1a5   : > { %v9575_v60 = vadd.f32 %v2221_v29, %v2133_v27 }
 0x1a6   : > { %v1956_v44 = vpop.f32.mrf.mxu3 }
 0x1a7   : > { %v1957_v19 = vadd.f32 %v1956_v44, %v9339_v34 }
 0x1a8   : > { %v2223_v42 = vpop.f32.mrf.mxu2  ;;  %v2048_v54 = vpop.f32.mrf.mxu0 }
 0x1a9   : > { %v2046_v53 = vadd.f32 %v2045_v1, %v1957_v19  ;;  %v8116_v19 = vld [vmem:[%s11913_s5] sm:$0xff] }
 0x1aa   : > { %v2137_v32 = vpop.f32.mrf.mxu1  ;;  %3746 = vmatpush.bf16.msra.mxu1 %v8116_v19  ;;  %v8126_v19 = vld [vmem:[%s11913_s5 + $0x50] sm:$0xff] }
 0x1ab   : > { %v2135_v58 = vadd.f32 %v2134_v4, %v2046_v53  ;;  %1998 = vmatmul.bf16.gmra.mxu3 %v12091_v26  ;;  %2087 = vmatmul.bf16.gmra.mxu0 %v12093_v0 }
 0x1ad   : > { %2176 = vmatmul.bf16.gmra.mxu1 %v12094_v35  ;;  %2265 = vmatmul.bf16.gmra.mxu2 %v12095_v55  ;;  %v9582_v12 = vadd.f32 %v2223_v42, %v2135_v58  ;;  %v8108_v58 = vld [vmem:[%s11911_s3 + $0x200] sm:$0xff] }
 0x1ae   : > { %v1959_v34 = vpop.f32.mrf.mxu3  ;;  %2382 = vmatpush.bf16.msra.mxu0 %v8108_v58 }
 0x1af   : > { %v1960_v29 = vadd.f32 %v1959_v34, %v9353_v57 }
 0x1b0   : > { %v2226_v1 = vpop.f32.mrf.mxu2  ;;  %v2050_v26 = vpop.f32.mrf.mxu0 }
 0x1b1   : > { %v2049_v2 = vadd.f32 %v2048_v54, %v1960_v29  ;;  %v12097_v29 = vld [vmem:[#allocation12_spill] sm:$0xff] }
 0x1b2   : > { %v2139_v4 = vpop.f32.mrf.mxu1 }
 0x1b3   : > { %v2138_v27 = vadd.f32 %v2137_v32, %v2049_v2  ;;  %v8128_v32 = vld [vmem:[%s11913_s5 + $0x60] sm:$0xff] }
 0x1b4   : > { %3831 = vmatpush.bf16.msra.mxu2 %v8128_v32 }
 0x1b5   : > { %v9589_v44 = vadd.f32 %v2226_v1, %v2138_v27  ;;  %v12098_v1 = vld [vmem:[#allocation8_spill] sm:$0xff] }
 0x1b6   : > { %v1961_v42 = vpop.f32.mrf.mxu3  ;;  %v717_v27 = vld [vmem:[#allocation2 + $0x170] sm:$0x3] }
 0x1b7   : > { %12096 = vst [vmem:[#allocation14_spill] sm:$0xff] %v9589_v44  ;;  %v1962_v57 = vadd.f32 %v1961_v42, %v9366_v28  ;;  %v8127_v28 = vld [vmem:[%s11913_s5 + $0x58] sm:$0xff] }
 0x1b8   : > { %v2228_v53 = vpop.f32.mrf.mxu2  ;;  %v2053_v54 = vpop.f32.mrf.mxu0  ;;  %3832 = vmatpush.bf16.msra.mxu2 %v8127_v28  ;;  %v7107_v28 = vld [vmem:[%s8463_s23 + $0xa8] sm:$0xff] }
 0x1b9   : > { %v2051_v41 = vadd.f32 %v2050_v26, %v1962_v57  ;;  %v7463_v26 = vld [vmem:[%s8423_s13 + $0x58] sm:$0x3] }
 0x1ba   : > { %v2142_v34 = vpop.f32.mrf.mxu1  ;;  %2744 = vst [vmem:[#allocation2 + $0x170] sm:$0x3] %v7463_v26  ;;  %v7108_v26 = vld [vmem:[%s8463_s23 + $0xb0] sm:$0xff] }
 0x1bb   : > { %v2140_v31 = vadd.f32 %v2139_v4, %v2051_v41  ;;  %2003 = vmatmul.bf16.gmra.mxu3 %v12095_v55  ;;  %2092 = vmatmul.bf16.gmra.mxu0 %v12097_v29  ;;  %v8125_v41 = vld [vmem:[%s11913_s5 + $0x48] sm:$0xff] }
 0x1bc   : > { %3833 = vmatpush.bf16.msra.mxu2 %v8126_v19  ;;  %v1222_v19 = vpack.c.bf16 %v7108_v26, %v7107_v28 }
 0x1bd   : > { %2181 = vmatmul.bf16.gmra.mxu1 %v9272_v52  ;;  %2270 = vmatmul.bf16.gmra.mxu2 %v12098_v1  ;;  %v9608_v2 = vadd.f32 %v2228_v53, %v2140_v31  ;;  %v1153_v52 = vrot.slane %v717_v27, 2 }
 0x1be   : > { %v1964_v4 = vpop.f32.mrf.mxu3 }
 0x1bf   : > { %12099 = vst [vmem:[#allocation6_spill] sm:$0xff] %v9608_v2  ;;  %v1965_v55 = vadd.f32 %v1964_v4, %v9377_v3 }
 0x1c0   : > { %v2231_v58 = vpop.f32.mrf.mxu2  ;;  %v2055_v42 = vpop.f32.mrf.mxu0  ;;  %3834 = vmatpush.bf16.msra.mxu2 %v8125_v41 }
 0x1c1   : > { %v2054_v57 = vadd.f32 %v2053_v54, %v1965_v55  ;;  %v8124_v54 = vld [vmem:[%s11913_s5 + $0x40] sm:$0xff] }
 0x1c2   : > { %v2144_v32 = vpop.f32.mrf.mxu1 }
 0x1c3   : > { %v2143_v53 = vadd.f32 %v2142_v34, %v2054_v57 }
 0x1c4   : > { %3835 = vmatpush.bf16.msra.mxu2 %v8124_v54  ;;  %v1144_v54 = vrot.slane %v7108_v26, 1 }
 0x1c5   : > { %v9618_v31 = vadd.f32 %v2231_v58, %v2143_v53  ;;  %v12101_v58 = vld [vmem:[#allocation15_spill] sm:$0xff] }
 0x1c6   : > { %v1966_v3 = vpop.f32.mrf.mxu3 }
 0x1c7   : > { %12100 = vst [vmem:[#allocation11_spill] sm:$0xff] %v9618_v31  ;;  %v1967_v4 = vadd.f32 %v1966_v3, %v9384_v49  ;;  %v8139_v49 = vld [vmem:[%s11913_s5 + $0xb8] sm:$0xff] }
 0x1c8   : > { %v2233_v2 = vpop.f32.mrf.mxu2  ;;  %v2058_v55 = vpop.f32.mrf.mxu0  ;;  %3917 = vmatpush.bf16.msrb.mxu3 %v8139_v49 }
 0x1c9   : > { %v2056_v34 = vadd.f32 %v2055_v42, %v1967_v4 }
 0x1ca   : > { %v2147_v57 = vpop.f32.mrf.mxu1 }
 0x1cb   : > { %v2145_v44 = vadd.f32 %v2144_v32, %v2056_v34  ;;  %2008 = vmatmul.bf16.gmra.mxu3 %v12098_v1  ;;  %2097 = vmatmul.bf16.gmra.mxu0 %v12101_v58  ;;  %v1143_v32 = vrot.slane %v7107_v28, 1  ;;  %v1146_v1 = vrot.slane %v717_v27, 1  ;;  %v1150_v58 = vrot.slane %v7107_v28, 2  ;;  %v8155_v28 = vld [vmem:[%s11913_s5 + $0x138] sm:$0xff] }
 0x1cc   : > { %4095 = vmatpush.bf16.msrb.mxu1 %v8155_v28 }
 0x1cd   : > { %2186 = vmatmul.bf16.gmra.mxu1 %v9319_v9  ;;  %2275 = vmatmul.bf16.gmra.mxu2 %v1222_v19  ;;  %v9629_v53 = vadd.f32 %v2233_v2, %v2145_v44  ;;  %v1151_v9 = vrot.slane %v7108_v26, 2  ;;  %v1145_v2 = vsel %vm914_vm0, %v1143_v32, %v1144_v54 }
 0x1ce   : > { %v1969_v41 = vpop.f32.mrf.mxu3 }
 0x1cf   : > { %12102 = vst [vmem:[#allocation19_spill] sm:$0xff] %v9629_v53  ;;  %v1970_v3 = vadd.f32 %v1969_v41, %v9398_v21  ;;  %v1147_v53 = vsel %vm914_vm0, %v1144_v54, %v1146_v1  ;;  %v1152_v21 = vsel %vm1027_vm1, %v1150_v58, %v1151_v9  ;;  %v1154_v49 = vsel %vm1027_vm1, %v1151_v9, %v1153_v52  ;;  %v8147_v41 = vld [vmem:[%s11913_s5 + $0xf8] sm:$0xff]  ;;  %v2747_v1 = vld [vmem:[#allocation2 + $0x10] sm:$0x3] }
 0x1d0   : > { %v2236_v42 = vpop.f32.mrf.mxu2  ;;  %v2060_v4 = vpop.f32.mrf.mxu0  ;;  %4006 = vmatpush.bf16.msrb.mxu0 %v8147_v41  ;;  %v9650_v58 = vpack.c.bf16 %v1154_v49, %v1152_v21  ;;  %v9652_v52 = vld [vmem:[#allocation2 + $0x98] sm:$0xff]  ;;  %v2995_v41 = vrot.slane %v2747_v1, 1 }
 0x1d1   : > { %v2059_v34 = vadd.f32 %v2058_v55, %v1970_v3  ;;  %v1225_v9 = vpack.c.bf16 %v9652_v52, %v9652_v52 }
 0x1d2   : > { %v2149_v31 = vpop.f32.mrf.mxu1 }
 0x1d3   : > { %v2148_v44 = vadd.f32 %v2147_v57, %v2059_v34  ;;  %v9648_v57 = vpack.c.bf16 %v1147_v53, %v1145_v2 }
 0x1d5   : > { %v9637_v29 = vadd.f32 %v2236_v42, %v2148_v44 }
 0x1d6   : > { %v1971_v27 = vpop.f32.mrf.mxu3 }
 0x1d7   : > { %v1972_v26 = vadd.f32 %v1971_v27, %v9411_v48 }
 0x1d8   : > { %v2238_v55 = vpop.f32.mrf.mxu2  ;;  %v2063_v3 = vpop.f32.mrf.mxu0 }
 0x1d9   : > { %v2061_v42 = vadd.f32 %v2060_v4, %v1972_v26  ;;  %v2992_v4 = vrot.slane %v9652_v52, 1 }
 0x1da   : > { %v2152_v32 = vpop.f32.mrf.mxu1 }
 0x1db   : > { %v2150_v54 = vadd.f32 %v2149_v31, %v2061_v42  ;;  %2013 = vmatmul.bf16.gmra.mxu3 %v1222_v19  ;;  %2102 = vmatmul.bf16.gmra.mxu0 %v9648_v57  ;;  %v2996_v28 = vsel %vm914_vm0, %v2992_v4, %v2995_v41 }
 0x1dd   : > { %2191 = vmatmul.bf16.gmra.mxu1 %v9650_v58  ;;  %2280 = vmatmul.bf16.gmra.mxu2 %v1225_v9  ;;  %v9658_v48 = vadd.f32 %v2238_v55, %v2150_v54  ;;  %v3251_v54 = vpack.c.bf16 %v2996_v28, %v2992_v4 }
 0x1de   : > { %v1974_v53 = vpop.f32.mrf.mxu3 }
 0x1df   : > { %12103 = vst [vmem:[#allocation7_spill] sm:$0xff] %v9658_v48  ;;  %v1975_v34 = vadd.f32 %v1974_v53, %v9422_v15 }
 0x1e0   : > { %v2241_v44 = vpop.f32.mrf.mxu2  ;;  %v2065_v2 = vpop.f32.mrf.mxu0 }
 0x1e1   : > { %v2064_v21 = vadd.f32 %v2063_v3, %v1975_v34  ;;  %v9675_v34 = vld [vmem:[#allocation2 + $0x160] sm:$0xff] }
 0x1e2   : > { %v2154_v49 = vpop.f32.mrf.mxu1 }
 0x1e3   : > { %v2153_v31 = vadd.f32 %v2152_v32, %v2064_v21  ;;  %v8138_v32 = vld [vmem:[%s11913_s5 + $0xb0] sm:$0xff] }
 0x1e4   : > { %3918 = vmatpush.bf16.msrb.mxu3 %v8138_v32 }
 0x1e5   : > { %v9662_v19 = vadd.f32 %v2241_v44, %v2153_v31  ;;  %v9677_v44 = vld [vmem:[#allocation2 + $0xf0] sm:$0x3] }
 0x1e6   : > { %v1976_v27 = vpop.f32.mrf.mxu3  ;;  %v3000_v4 = vrot.slane %v9677_v44, 1 }
 0x1e7   : > { %v1977_v26 = vadd.f32 %v1976_v27, %v9429_v10  ;;  %v9673_v10 = vld [vmem:[#allocation2 + $0x28] sm:$0xff] }
 0x1e8   : > { %v2243_v55 = vpop.f32.mrf.mxu2  ;;  %v2068_v42 = vpop.f32.mrf.mxu0  ;;  %v2997_v21 = vrot.slane %v9673_v10, 1 }
 0x1e9   : > { %v2066_v48 = vadd.f32 %v2065_v2, %v1977_v26  ;;  %v8154_v26 = vld [vmem:[%s11913_s5 + $0x130] sm:$0xff] }
 0x1ea   : > { %v2157_v15 = vpop.f32.mrf.mxu1  ;;  %4096 = vmatpush.bf16.msrb.mxu1 %v8154_v26 }
 0x1eb   : > { %v2155_v53 = vadd.f32 %v2154_v49, %v2066_v48  ;;  %2294 = vmatmul.bf16.vlgmr.msra.gmra.mxu3 %v8746_v7  ;;  %2383 = vmatmul.bf16.vlgmr.msra.gmra.mxu0 %v8748_v13  ;;  %v2998_v49 = vrot.slane %v9675_v34, 1 }
 0x1ed   : > { %3747 = vmatmul.bf16.vlgmr.msra.gmra.mxu1 %v1225_v9  ;;  %3836 = vmatmul.bf16.vlgmr.msra.gmra.mxu2 %v3251_v54  ;;  %v9668_v3 = vadd.f32 %v2243_v55, %v2155_v53  ;;  %v2999_v28 = vsel %vm914_vm0, %v2997_v21, %v2998_v49  ;;  %v3001_v27 = vsel %vm914_vm0, %v2998_v49, %v3000_v4  ;;  %v9706_v21 = vld [vmem:[#allocation2 + $0xf8] sm:$0xff]  ;;  %v9710_v4 = vld [vmem:[#allocation2 + $0x100] sm:$0x3] }
 0x1ee   : > { %v1979_v1 = vpop.f32.mrf.mxu3  ;;  %v9696_v53 = vpack.c.bf16 %v9675_v34, %v9673_v10  ;;  %v9698_v32 = vpack.c.bf16 %v3001_v27, %v2999_v28  ;;  %v9708_v49 = vld [vmem:[#allocation2 + $0x78] sm:$0xff] }
 0x1ef   : > { %v1980_v48 = vadd.f32 %v1979_v1, %v9442_v40  ;;  %v8146_v40 = vld [vmem:[%s11913_s5 + $0xf0] sm:$0xff]  ;;  %v3003_v27 = vrot.slane %v9708_v49, 1 }
 0x1f0   : > { %v2246_v7 = vpop.f32.mrf.mxu2  ;;  %v2070_v13 = vpop.f32.mrf.mxu0  ;;  %4007 = vmatpush.bf16.msrb.mxu0 %v8146_v40  ;;  %v3005_v40 = vrot.slane %v9710_v4, 1 }
 0x1f1   : > { %v2069_v9 = vadd.f32 %v2068_v42, %v1980_v48 }
 0x1f2   : > { %v2159_v2 = vpop.f32.mrf.mxu1 }
 0x1f3   : > { %v2158_v41 = vadd.f32 %v2157_v15, %v2069_v9 }
 0x1f5   : > { %v9683_v31 = vadd.f32 %v2246_v7, %v2158_v41 }
 0x1f6   : > { %v1981_v55 = vpop.f32.mrf.mxu3 }
 0x1f7   : > { %12104 = vst [vmem:[#allocation8_spill] sm:$0xff] %v9683_v31  ;;  %v1982_v42 = vadd.f32 %v1981_v55, %v9454_v17 }
 0x1f8   : > { %v2248_v54 = vpop.f32.mrf.mxu2  ;;  %v2073_v15 = vpop.f32.mrf.mxu0 }
 0x1f9   : > { %v2071_v1 = vadd.f32 %v2070_v13, %v1982_v42 }
 0x1fa   : > { %v2162_v48 = vpop.f32.mrf.mxu1 }
 0x1fb   : > { %v2160_v7 = vadd.f32 %v2159_v2, %v2071_v1  ;;  %2299 = vmatmul.bf16.gmra.mxu3 %v8825_v45  ;;  %2388 = vmatmul.bf16.gmra.mxu0 %v12077_v20  ;;  %v3002_v20 = vrot.slane %v9706_v21, 1 }
 0x1fd   : > { %3752 = vmatmul.bf16.gmra.mxu1 %v9696_v53  ;;  %3841 = vmatmul.bf16.gmra.mxu2 %v9698_v32  ;;  %v9704_v17 = vadd.f32 %v2248_v54, %v2160_v7  ;;  %v3004_v42 = vsel %vm914_vm0, %v3002_v20, %v3003_v27  ;;  %v3006_v54 = vsel %vm914_vm0, %v3003_v27, %v3005_v40  ;;  %v9736_v20 = vld [vmem:[#allocation2 + $0x130] sm:$0xff] }
 0x1fe   : > { %v1984_v9 = vpop.f32.mrf.mxu3 }
 0x1ff   : > { %12105 = vst [vmem:[#allocation26_spill] sm:$0xff] %v9704_v17  ;;  %v1985_v13 = vadd.f32 %v1984_v9, %v9464_v51 }
 0x200   : > { %v2251_v2 = vpop.f32.mrf.mxu2  ;;  %v2075_v41 = vpop.f32.mrf.mxu0 }
 0x201   : > { %v2074_v45 = vadd.f32 %v2073_v15, %v1985_v13  ;;  %v9723_v15 = vpack.c.bf16 %v9708_v49, %v9706_v21  ;;  %v9725_v13 = vpack.c.bf16 %v3006_v54, %v3004_v42 }
 0x202   : > { %v2164_v28 = vpop.f32.mrf.mxu1 }
 0x203   : > { %v2163_v26 = vadd.f32 %v2162_v48, %v2074_v45 }
 0x205   : > { %v9716_v55 = vadd.f32 %v2251_v2, %v2163_v26  ;;  %v8137_v2 = vld [vmem:[%s11913_s5 + $0xa8] sm:$0xff]  ;;  %v3007_v26 = vrot.slane %v9736_v20, 1 }
 0x206   : > { %v1986_v1 = vpop.f32.mrf.mxu3  ;;  %3919 = vmatpush.bf16.msrb.mxu3 %v8137_v2 }
 0x207   : > { %12106 = vst [vmem:[#allocation27_spill] sm:$0xff] %v9716_v55  ;;  %v1987_v51 = vadd.f32 %v1986_v1, %v9470_v25 }
 0x208   : > { %v2253_v7 = vpop.f32.mrf.mxu2  ;;  %v2078_v9 = vpop.f32.mrf.mxu0 }
 0x209   : > { %v2076_v17 = vadd.f32 %v2075_v41, %v1987_v51  ;;  %v9738_v41 = vld [vmem:[#allocation2 + $0xe8] sm:$0xff] }
 0x20a   : > { %v2167_v31 = vpop.f32.mrf.mxu1  ;;  %v3008_v42 = vrot.slane %v9738_v41, 1 }
 0x20b   : > { %v2165_v48 = vadd.f32 %v2164_v28, %v2076_v17  ;;  %2304 = vmatmul.bf16.gmra.mxu3 %v8900_v18  ;;  %2393 = vmatmul.bf16.gmra.mxu0 %v8902_v14  ;;  %v9740_v17 = vld [vmem:[#allocation2 + $0x40] sm:$0x3] }
 0x20c   : > { %v3010_v54 = vrot.slane %v9740_v17, 1 }
 0x20d   : > { %3757 = vmatmul.bf16.gmra.mxu1 %v9723_v15  ;;  %3846 = vmatmul.bf16.gmra.mxu2 %v9725_v13  ;;  %v9731_v25 = vadd.f32 %v2253_v7, %v2165_v48  ;;  %v3009_v7 = vsel %vm914_vm0, %v3007_v26, %v3008_v42 }
 0x20e   : > { %v1989_v45 = vpop.f32.mrf.mxu3  ;;  %v3011_v48 = vsel %vm914_vm0, %v3008_v42, %v3010_v54 }
 0x20f   : > { %12107 = vst [vmem:[#allocation28_spill] sm:$0xff] %v9731_v25  ;;  %v1990_v18 = vadd.f32 %v1989_v45, %v9483_v47  ;;  %v8145_v47 = vld [vmem:[%s11913_s5 + $0xe8] sm:$0xff] }
 0x210   : > { %v2256_v14 = vpop.f32.mrf.mxu2  ;;  %v2080_v28 = vpop.f32.mrf.mxu0  ;;  %4008 = vmatpush.bf16.msrb.mxu0 %v8145_v47  ;;  %v9769_v47 = vld [vmem:[#allocation2 + $0xc0] sm:$0xff] }
 0x211   : > { %v2079_v27 = vadd.f32 %v2078_v9, %v1990_v18  ;;  %v8153_v9 = vld [vmem:[%s11913_s5 + $0x128] sm:$0xff] }
 0x212   : > { %v2169_v40 = vpop.f32.mrf.mxu1  ;;  %4097 = vmatpush.bf16.msrb.mxu1 %v8153_v9  ;;  %v9771_v9 = vld [vmem:[#allocation2 + $0x168] sm:$0xff] }
 0x213   : > { %v2168_v1 = vadd.f32 %v2167_v31, %v2079_v27  ;;  %v9761_v27 = vpack.c.bf16 %v3011_v48, %v3009_v7  ;;  %v9773_v7 = vld [vmem:[#allocation2 + $0x118] sm:$0x3] }
 0x215   : > { %v9746_v51 = vadd.f32 %v2256_v14, %v2168_v1  ;;  %v9759_v14 = vpack.c.bf16 %v9738_v41, %v9736_v20  ;;  %12110 = vst [vmem:[#allocation31_spill] sm:$0xff] %v9761_v27 }
 0x216   : > { %v1991_v2 = vpop.f32.mrf.mxu3 }
 0x217   : > { %12108 = vst [vmem:[#allocation29_spill] sm:$0xff] %v9746_v51  ;;  %v1992_v45 = vadd.f32 %v1991_v2, %v9495_v37 }
 0x218   : > { %v2258_v18 = vpop.f32.mrf.mxu2  ;;  %v2083_v31 = vpop.f32.mrf.mxu0  ;;  %12109 = vst [vmem:[#allocation30_spill] sm:$0xff] %v9759_v14 }
 0x219   : > { %v2081_v26 = vadd.f32 %v2080_v28, %v1992_v45  ;;  %v3013_v45 = vrot.slane %v9771_v9, 1 }
 0x21a   : > { %v2172_v42 = vpop.f32.mrf.mxu1 }
 0x21b   : > { %v2170_v54 = vadd.f32 %v2169_v40, %v2081_v26  ;;  %2309 = vmatmul.bf16.gmra.mxu3 %v8969_v16  ;;  %2398 = vmatmul.bf16.gmra.mxu0 %v8971_v11  ;;  %v3012_v11 = vrot.slane %v9769_v47, 1 }
 0x21d   : > { %3762 = vmatmul.bf16.gmra.mxu1 %v9759_v14  ;;  %3851 = vmatmul.bf16.gmra.mxu2 %v9761_v27  ;;  %v9767_v37 = vadd.f32 %v2258_v18, %v2170_v54  ;;  %v3015_v18 = vrot.slane %v9773_v7, 1 }
 0x21e   : > { %v1994_v1 = vpop.f32.mrf.mxu3 }
 0x21f   : > { %12111 = vst [vmem:[#allocation32_spill] sm:$0xff] %v9767_v37  ;;  %v1995_v28 = vadd.f32 %v1994_v1, %v9508_v33  ;;  %v3014_v37 = vsel %vm914_vm0, %v3012_v11, %v3013_v45  ;;  %v3016_v51 = vsel %vm914_vm0, %v3013_v45, %v3015_v18 }
 0x220   : > { %v2261_v40 = vpop.f32.mrf.mxu2  ;;  %v2085_v48 = vpop.f32.mrf.mxu0 }
 0x221   : > { %v2084_v16 = vadd.f32 %v2083_v31, %v1995_v28  ;;  %v9786_v31 = vpack.c.bf16 %v9771_v9, %v9769_v47  ;;  %v9788_v28 = vpack.c.bf16 %v3016_v51, %v3014_v37  ;;  %v9799_v51 = vld [vmem:[#allocation2 + $0x120] sm:$0xff] }
 0x222   : > { %v2174_v2 = vpop.f32.mrf.mxu1  ;;  %v9801_v37 = vld [vmem:[#allocation2 + $0x60] sm:$0xff] }
 0x223   : > { %v2173_v26 = vadd.f32 %v2172_v42, %v2084_v16  ;;  %12113 = vst [vmem:[#allocation34_spill] sm:$0xff] %v9786_v31 }
 0x224   : > { %12114 = vst [vmem:[#allocation35_spill] sm:$0xff] %v9788_v28 }
 0x225   : > { %v9779_v54 = vadd.f32 %v2261_v40, %v2173_v26  ;;  %v12115_v40 = vld [vmem:[#allocation13_spill] sm:$0xff]  ;;  %v3017_v26 = vrot.slane %v9799_v51, 1 }
 0x226   : > { %v1996_v27 = vpop.f32.mrf.mxu3 }
 0x227   : > { %12112 = vst [vmem:[#allocation33_spill] sm:$0xff] %v9779_v54  ;;  %v1997_v33 = vadd.f32 %v1996_v27, %v9514_v6  ;;  %v8136_v27 = vld [vmem:[%s11913_s5 + $0xa0] sm:$0xff] }
 0x228   : > { %v2263_v1 = vpop.f32.mrf.mxu2  ;;  %v2088_v14 = vpop.f32.mrf.mxu0  ;;  %3920 = vmatpush.bf16.msrb.mxu3 %v8136_v27  ;;  %v8144_v27 = vld [vmem:[%s11913_s5 + $0xe0] sm:$0xff] }
 0x229   : > { %v2086_v25 = vadd.f32 %v2085_v48, %v1997_v33  ;;  %v3018_v33 = vrot.slane %v9801_v37, 1  ;;  %4009 = vmatpush.bf16.msrb.mxu0 %v8144_v27 }
 0x22a   : > { %v2177_v55 = vpop.f32.mrf.mxu1 }
 0x22b   : > { %v2175_v42 = vadd.f32 %v2174_v2, %v2086_v25  ;;  %2314 = vmatmul.bf16.gmra.mxu3 %v9023_v39  ;;  %2403 = vmatmul.bf16.gmra.mxu0 %v12115_v40  ;;  %v9803_v25 = vld [vmem:[#allocation2 + $0x188] sm:$0x3]  ;;  %v12117_v39 = vld [vmem:[#allocation9_spill] sm:$0xff] }
 0x22d   : > { %3767 = vmatmul.bf16.gmra.mxu1 %v9786_v31  ;;  %3856 = vmatmul.bf16.gmra.mxu2 %v9788_v28  ;;  %v9794_v6 = vadd.f32 %v2263_v1, %v2175_v42  ;;  %v3020_v1 = vrot.slane %v9803_v25, 1 }
 0x22e   : > { %v1999_v16 = vpop.f32.mrf.mxu3 }
 0x22f   : > { %12116 = vst [vmem:[#allocation13_spill] sm:$0xff] %v9794_v6  ;;  %v2000_v48 = vadd.f32 %v1999_v16, %v12117_v39  ;;  %v3019_v6 = vsel %vm914_vm0, %v3017_v26, %v3018_v33  ;;  %v3021_v54 = vsel %vm914_vm0, %v3018_v33, %v3020_v1  ;;  %v12119_v39 = vld [vmem:[#allocation23_spill] sm:$0xff] }
 0x230   : > { %v2266_v2 = vpop.f32.mrf.mxu2  ;;  %v2090_v11 = vpop.f32.mrf.mxu0 }
 0x231   : > { %v2089_v45 = vadd.f32 %v2088_v14, %v2000_v48  ;;  %v8152_v14 = vld [vmem:[%s11913_s5 + $0x120] sm:$0xff] }
 0x232   : > { %v2179_v18 = vpop.f32.mrf.mxu1  ;;  %4098 = vmatpush.bf16.msrb.mxu1 %v8152_v14  ;;  %v9832_v14 = vld [vmem:[#allocation2 + $0x140] sm:$0xff] }
 0x233   : > { %v2178_v42 = vadd.f32 %v2177_v55, %v2089_v45  ;;  %v9824_v45 = vpack.c.bf16 %v3021_v54, %v3019_v6  ;;  %v9836_v54 = vld [vmem:[#allocation2 + $0xd0] sm:$0x3] }
 0x234   : > { %12124 = vst [vmem:[#allocation39_spill] sm:$0xff] %v9836_v54 }
 0x235   : > { %v9809_v40 = vadd.f32 %v2266_v2, %v2178_v42  ;;  %v9822_v2 = vpack.c.bf16 %v9801_v37, %v9799_v51  ;;  %12121 = vst [vmem:[#allocation36_spill] sm:$0xff] %v9824_v45 }
 0x236   : > { %v2001_v16 = vpop.f32.mrf.mxu3 }
 0x237   : > { %12118 = vst [vmem:[#allocation9_spill] sm:$0xff] %v9809_v40  ;;  %v2002_v48 = vadd.f32 %v2001_v16, %v12119_v39  ;;  %v9834_v16 = vld [vmem:[#allocation2 + $0x80] sm:$0xff] }
 0x238   : > { %v2268_v28 = vpop.f32.mrf.mxu2  ;;  %v2093_v55 = vpop.f32.mrf.mxu0  ;;  %12120 = vst [vmem:[#allocation23_spill] sm:$0xff] %v9822_v2 }
 0x239   : > { %v2091_v26 = vadd.f32 %v2090_v11, %v2002_v48  ;;  %12123 = vst [vmem:[#allocation38_spill] sm:$0xff] %v9834_v16  ;;  %v3023_v48 = vrot.slane %v9834_v16, 1 }
 0x23a   : > { %v2182_v33 = vpop.f32.mrf.mxu1 }
 0x23b   : > { %v2180_v1 = vadd.f32 %v2179_v18, %v2091_v26  ;;  %2319 = vmatmul.bf16.gmra.mxu3 %v9077_v38  ;;  %2408 = vmatmul.bf16.gmra.mxu0 %v12080_v24  ;;  %v3022_v24 = vrot.slane %v9832_v14, 1 }
 0x23d   : > { %3772 = vmatmul.bf16.gmra.mxu1 %v9822_v2  ;;  %3861 = vmatmul.bf16.gmra.mxu2 %v9824_v45  ;;  %v9830_v42 = vadd.f32 %v2268_v28, %v2180_v1  ;;  %v3025_v28 = vrot.slane %v9836_v54, 1 }
 0x23e   : > { %v2004_v27 = vpop.f32.mrf.mxu3 }
 0x23f   : > { %12122 = vst [vmem:[#allocation37_spill] sm:$0xff] %v9830_v42  ;;  %v2005_v6 = vadd.f32 %v2004_v27, %v9462_v61  ;;  %v3024_v42 = vsel %vm914_vm0, %v3022_v24, %v3023_v48  ;;  %v3026_v40 = vsel %vm914_vm0, %v3023_v48, %v3025_v28 }
 0x240   : > { %v2271_v11 = vpop.f32.mrf.mxu2  ;;  %v2095_v18 = vpop.f32.mrf.mxu0 }
 0x241   : > { %v2094_v38 = vadd.f32 %v2093_v55, %v2005_v6  ;;  %v9849_v55 = vpack.c.bf16 %v9834_v16, %v9832_v14  ;;  %v9851_v6 = vpack.c.bf16 %v3026_v40, %v3024_v42  ;;  %v9862_v40 = vld [vmem:[#allocation2 + $0x68] sm:$0xff]  ;;  %v9864_v42 = vld [vmem:[#allocation2 + $0x90] sm:$0xff] }
 0x242   : > { %v2184_v39 = vpop.f32.mrf.mxu1 }
 0x243   : > { %v2183_v26 = vadd.f32 %v2182_v33, %v2094_v38  ;;  %12126 = vst [vmem:[#allocation41_spill] sm:$0xff] %v9849_v55  ;;  %v12129_v38 = vld [vmem:[#allocation18_spill] sm:$0xff] }
 0x244   : > { %12127 = vst [vmem:[#allocation42_spill] sm:$0xff] %v9851_v6 }
 0x245   : > { %v9842_v1 = vadd.f32 %v2271_v11, %v2183_v26  ;;  %v12128_v11 = vld [vmem:[#allocation17_spill] sm:$0xff] }
 0x246   : > { %v2006_v45 = vpop.f32.mrf.mxu3 }
 0x247   : > { %12125 = vst [vmem:[#allocation40_spill] sm:$0xff] %v9842_v1  ;;  %v2007_v61 = vadd.f32 %v2006_v45, %v9468_v43  ;;  %v8135_v45 = vld [vmem:[%s11913_s5 + $0x98] sm:$0xff]  ;;  %v12134_v1 = vld [vmem:[#allocation24_spill] sm:$0xff] }
 0x248   : > { %v2273_v27 = vpop.f32.mrf.mxu2  ;;  %v2098_v2 = vpop.f32.mrf.mxu0  ;;  %3921 = vmatpush.bf16.msrb.mxu3 %v8135_v45 }
 0x249   : > { %v2096_v31 = vadd.f32 %v2095_v18, %v2007_v61  ;;  %v12132_v18 = vld [vmem:[#allocation16_spill] sm:$0xff] }
 0x24a   : > { %v2187_v54 = vpop.f32.mrf.mxu1 }
 0x24b   : > { %v2185_v33 = vadd.f32 %v2184_v39, %v2096_v31  ;;  %2324 = vmatmul.bf16.gmra.mxu3 %v12128_v11  ;;  %2413 = vmatmul.bf16.gmra.mxu0 %v12129_v38  ;;  %v9866_v31 = vld [vmem:[#allocation2 + $0x1a8] sm:$0x3] }
 0x24c   : > { %12131 = vst [vmem:[#allocation18_spill] sm:$0xff] %v9866_v31  ;;  %v3030_v11 = vrot.slane %v9866_v31, 1 }
 0x24d   : > { %3777 = vmatmul.bf16.gmra.mxu1 %v9849_v55  ;;  %3866 = vmatmul.bf16.gmra.mxu2 %v9851_v6  ;;  %v9857_v43 = vadd.f32 %v2273_v27, %v2185_v33  ;;  %v3027_v27 = vrot.slane %v9862_v40, 1  ;;  %v3028_v33 = vrot.slane %v9864_v42, 1  ;;  %v9885_v55 = vpack.c.bf16 %v9864_v42, %v9862_v40 }
 0x24e   : > { %v2009_v24 = vpop.f32.mrf.mxu3 }
 0x24f   : > { %12130 = vst [vmem:[#allocation17_spill] sm:$0xff] %v9857_v43  ;;  %v2010_v39 = vadd.f32 %v2009_v24, %v12132_v18  ;;  %v8143_v43 = vld [vmem:[%s11913_s5 + $0xd8] sm:$0xff]  ;;  %v3031_v45 = vsel %vm914_vm0, %v3028_v33, %v3030_v11 }
 0x250   : > { %v2276_v48 = vpop.f32.mrf.mxu2  ;;  %v2100_v28 = vpop.f32.mrf.mxu0  ;;  %v8151_v24 = vld [vmem:[%s11913_s5 + $0x118] sm:$0xff]  ;;  %4010 = vmatpush.bf16.msrb.mxu0 %v8143_v43 }
 0x251   : > { %v2099_v26 = vadd.f32 %v2098_v2, %v2010_v39  ;;  %v3029_v2 = vsel %vm914_vm0, %v3027_v27, %v3028_v33  ;;  %4099 = vmatpush.bf16.msrb.mxu1 %v8151_v24  ;;  %v8163_v43 = vld [vmem:[%s11913_s5 + $0x178] sm:$0xff]  ;;  %v9898_v33 = vld [vmem:[#allocation2] sm:$0xff] }
 0x252   : > { %v2189_v61 = vpop.f32.mrf.mxu1  ;;  %v9887_v31 = vpack.c.bf16 %v3031_v45, %v3029_v2  ;;  %4184 = vmatpush.bf16.msrb.mxu2 %v8163_v43  ;;  %v3032_v24 = vrot.slane %v9898_v33, 1 }
 0x253   : > { %v2188_v38 = vadd.f32 %v2187_v54, %v2099_v26 }
 0x255   : > { %v9878_v18 = vadd.f32 %v2276_v48, %v2188_v38 }
 0x256   : > { %v2011_v39 = vpop.f32.mrf.mxu3 }
 0x257   : > { %12133 = vst [vmem:[#allocation16_spill] sm:$0xff] %v9878_v18  ;;  %v2012_v6 = vadd.f32 %v2011_v39, %v12134_v1 }
 0x258   : > { %v2278_v54 = vpop.f32.mrf.mxu2  ;;  %v2103_v26 = vpop.f32.mrf.mxu0 }
 0x259   : > { %v2101_v16 = vadd.f32 %v2100_v28, %v2012_v6  ;;  %v9900_v6 = vld [vmem:[#allocation2 + $0x150] sm:$0xff] }
 0x25a   : > { %v2192_v48 = vpop.f32.mrf.mxu1  ;;  %v3033_v2 = vrot.slane %v9900_v6, 1 }
 0x25b   : > { %v2190_v38 = vadd.f32 %v2189_v61, %v2101_v16  ;;  %2329 = vmatmul.bf16.gmra.mxu3 %v9214_v59  ;;  %2418 = vmatmul.bf16.gmra.mxu0 %v9216_v8  ;;  %v9902_v16 = vld [vmem:[#allocation2 + $0xa0] sm:$0x3] }
 0x25c   : > { %v3035_v45 = vrot.slane %v9902_v16, 1 }
 0x25d   : > { %3782 = vmatmul.bf16.gmra.mxu1 %v9885_v55  ;;  %3871 = vmatmul.bf16.gmra.mxu2 %v9887_v31  ;;  %v9896_v1 = vadd.f32 %v2278_v54, %v2190_v38  ;;  %v3034_v38 = vsel %vm914_vm0, %v3032_v24, %v3033_v2 }
 0x25e   : > { %v2014_v27 = vpop.f32.mrf.mxu3  ;;  %v3036_v43 = vsel %vm914_vm0, %v3033_v2, %v3035_v45 }
 0x25f   : > { %12135 = vst [vmem:[#allocation24_spill] sm:$0xff] %v9896_v1  ;;  %v2015_v59 = vadd.f32 %v2014_v27, %v9506_v23 }
 0x260   : > { %v2281_v8 = vpop.f32.mrf.mxu2  ;;  %v2105_v28 = vpop.f32.mrf.mxu0 }
 0x261   : > { %v2104_v61 = vadd.f32 %v2103_v26, %v2015_v59  ;;  %v9916_v26 = vld [vmem:[%s11914_s6] ss:$0 sm:$0xff]  ;;  %v9920_v59 = vpack.c.bf16 %v9900_v6, %v9898_v33 }
 0x262   : > { %v2194_v11 = vpop.f32.mrf.mxu1 }
 0x263   : > { %v2193_v39 = vadd.f32 %v2192_v48, %v2104_v61  ;;  %12137 = vst [vmem:[#allocation44_spill] sm:$0xff] %v9920_v59  ;;  %v9922_v48 = vpack.c.bf16 %v3036_v43, %v3034_v38 }
 0x265   : > { %v9908_v54 = vadd.f32 %v2281_v8, %v2193_v39  ;;  %12138 = vst [vmem:[#allocation45_spill] sm:$0xff] %v9922_v48 }
 0x266   : > { %v2016_v1 = vpop.f32.mrf.mxu3 }
 0x267   : > { %12136 = vst [vmem:[#allocation43_spill] sm:$0xff] %v9908_v54  ;;  %v2017_v23 = vadd.f32 %v2016_v1, %v9512_v22  ;;  %v8134_v1 = vld [vmem:[%s11913_s5 + $0x90] sm:$0xff] }
 0x268   : > { %v2283_v27 = vpop.f32.mrf.mxu2  ;;  %v2384_v18 = vpop.f32.mrf.mxu0  ;;  %3922 = vmatpush.bf16.msrb.mxu3 %v8134_v1  ;;  %v8142_v54 = vld [vmem:[%s11913_s5 + $0xd0] sm:$0xff] }
 0x269   : > { %v2106_v8 = vadd.f32 %v2105_v28, %v2017_v23  ;;  %v9934_v28 = vld [vmem:[#allocation2 + $0x190] sm:$0xff]  ;;  %4011 = vmatpush.bf16.msrb.mxu0 %v8142_v54 }
 0x26a   : > { %v3748_v61 = vpop.f32.mrf.mxu1  ;;  %v8150_v1 = vld [vmem:[%s11913_s5 + $0x110] sm:$0xff] }
 0x26b   : > { %v2195_v24 = vadd.f32 %v2194_v11, %v2106_v8  ;;  %2334 = vmatmul.bf16.gmra.mxu3 %v9281_v63  ;;  %2423 = vmatmul.bf16.gmra.mxu0 %v9283_v50  ;;  %v3749_v22 = vadd.f32 %v9916_v26, %v3748_v61  ;;  %v9936_v11 = vld [vmem:[#allocation2 + $0x128] sm:$0xff]  ;;  %v9938_v63 = vld [vmem:[#allocation2 + $0x38] sm:$0x3]  ;;  %v8162_v54 = vld [vmem:[%s11913_s5 + $0x170] sm:$0xff] }
 0x26c   : > { %12140 = vst [vmem:[#allocation47_spill] sm:$0xff] %v9938_v63  ;;  %v12141_v50 = vld [vmem:[#allocation25_spill] sm:$0xff]  ;;  %4100 = vmatpush.bf16.msrb.mxu1 %v8150_v1  ;;  %4185 = vmatpush.bf16.msrb.mxu2 %v8162_v54  ;;  %v9980_v1 = vld [vmem:[#allocation2 + $0x180] sm:$0x3] }
 0x26d   : > { %3787 = vmatmul.bf16.gmra.mxu1 %v9920_v59  ;;  %3876 = vmatmul.bf16.gmra.mxu2 %v9922_v48  ;;  %v9932_v2 = vadd.f32 %v2283_v27, %v2195_v24  ;;  %v3037_v27 = vrot.slane %v9934_v28, 1  ;;  %v3038_v24 = vrot.slane %v9936_v11, 1  ;;  %v9962_v59 = vpack.c.bf16 %v9936_v11, %v9934_v28 }
 0x26e   : > { %v2295_v45 = vpop.f32.mrf.mxu3 }
 0x26f   : > { %12139 = vst [vmem:[#allocation46_spill] sm:$0xff] %v9932_v2  ;;  %v2296_v39 = vadd.f32 %v2295_v45, %v12141_v50  ;;  %v3040_v2 = vrot.slane %v9938_v63, 1 }
 0x270   : > { %v3837_v38 = vpop.f32.mrf.mxu2  ;;  %v2386_v23 = vpop.f32.mrf.mxu0 }
 0x271   : > { %v9941_v43 = vadd.f32 %v3837_v38, %v3749_v22  ;;  %v9943_v8 = vadd.f32 %v2384_v18, %v2296_v39  ;;  %v3039_v22 = vsel %vm914_vm0, %v3037_v27, %v3038_v24  ;;  %v3041_v18 = vsel %vm914_vm0, %v3038_v24, %v3040_v2  ;;  %v12144_v39 = vld [vmem:[#allocation20_spill] sm:$0xff]  ;;  %v9976_v24 = vld [vmem:[#allocation2 + $0x88] sm:$0xff] }
 0x272   : > { %v3750_v61 = vpop.f32.mrf.mxu1  ;;  %v9964_v63 = vpack.c.bf16 %v3041_v18, %v3039_v22 }
 0x273   : > { %12142 = vst [vmem:[#allocation25_spill] sm:$0xff] %v9941_v43  ;;  %v3751_v45 = vadd.f32 %v9916_v26, %v3750_v61 }
 0x274   : > { %12143 = vst [vmem:[#allocation48_spill] sm:$0xff] %v9943_v8 }
 0x275   : > { %12146 = vst [vmem:[#allocation49_spill] sm:$0xff] %v9964_v63 }
 0x276   : > { %v2297_v50 = vpop.f32.mrf.mxu3 }
 0x277   : > { %v2298_v38 = vadd.f32 %v2297_v50, %v12144_v39  ;;  %v3042_v39 = vrot.slane %v9976_v24, 1 }
 0x278   : > { %v3839_v8 = vpop.f32.mrf.mxu2  ;;  %v2389_v48 = vpop.f32.mrf.mxu0 }
 0x279   : > { %v9958_v43 = vadd.f32 %v3839_v8, %v3751_v45  ;;  %v9966_v27 = vadd.f32 %v2386_v23, %v2298_v38  ;;  %v9978_v23 = vld [vmem:[#allocation2 + $0x158] sm:$0xff] }
 0x27a   : > { %v3753_v2 = vpop.f32.mrf.mxu1  ;;  %v3043_v38 = vrot.slane %v9978_v23, 1 }
 0x27b   : > { %12145 = vst [vmem:[#allocation20_spill] sm:$0xff] %v9958_v43  ;;  %2339 = vmatmul.bf16.gmra.mxu3 %v9323_v5  ;;  %2428 = vmatmul.bf16.gmra.mxu0 %v9325_v30  ;;  %v3754_v8 = vadd.f32 %v9916_v26, %v3753_v2  ;;  %v3045_v2 = vrot.slane %v9980_v1, 1 }
 0x27c   : > { %12147 = vst [vmem:[#allocation50_spill] sm:$0xff] %v9966_v27  ;;  %v3044_v54 = vsel %vm914_vm0, %v3042_v39, %v3043_v38 }
 0x27d   : > { %3792 = vmatmul.bf16.gmra.mxu1 %v9962_v59  ;;  %3881 = vmatmul.bf16.gmra.mxu2 %v9964_v63  ;;  %v3046_v27 = vsel %vm914_vm0, %v3043_v38, %v3045_v2  ;;  %v10016_v38 = vld [vmem:[#allocation2 + $0xb0] sm:$0x3] }
 0x27e   : > { %v2300_v61 = vpop.f32.mrf.mxu3  ;;  %12154 = vst [vmem:[#allocation57_spill] sm:$0xff] %v10016_v38 }
 0x27f   : > { %v2301_v5 = vadd.f32 %v2300_v61, %v9543_v46 }
 0x280   : > { %v3842_v30 = vpop.f32.mrf.mxu2  ;;  %v2391_v18 = vpop.f32.mrf.mxu0 }
 0x281   : > { %v9983_v22 = vadd.f32 %v3842_v30, %v3754_v8  ;;  %v9985_v45 = vadd.f32 %v2389_v48, %v2301_v5  ;;  %v9998_v5 = vpack.c.bf16 %v9978_v23, %v9976_v24 }
 0x282   : > { %v3755_v50 = vpop.f32.mrf.mxu1 }
 0x283   : > { %12148 = vst [vmem:[#allocation51_spill] sm:$0xff] %v9983_v22  ;;  %v3756_v43 = vadd.f32 %v9916_v26, %v3755_v50 }
 0x284   : > { %12149 = vst [vmem:[#allocation52_spill] sm:$0xff] %v9985_v45  ;;  %v10000_v45 = vpack.c.bf16 %v3046_v27, %v3044_v54  ;;  %v10012_v27 = vld [vmem:[#allocation2 + $0xa8] sm:$0xff] }
 0x285   : > { %12151 = vst [vmem:[#allocation54_spill] sm:$0xff] %v9998_v5 }
 0x286   : > { %v2302_v46 = vpop.f32.mrf.mxu3  ;;  %12152 = vst [vmem:[#allocation55_spill] sm:$0xff] %v10000_v45 }
 0x287   : > { %v2303_v8 = vadd.f32 %v2302_v46, %v9550_v56  ;;  %v8133_v56 = vld [vmem:[%s11913_s5 + $0x88] sm:$0xff] }
 0x288   : > { %v3844_v61 = vpop.f32.mrf.mxu2  ;;  %v2394_v48 = vpop.f32.mrf.mxu0  ;;  %3923 = vmatpush.bf16.msrb.mxu3 %v8133_v56  ;;  %v8149_v56 = vld [vmem:[%s11913_s5 + $0x108] sm:$0xff] }
 0x289   : > { %v9994_v30 = vadd.f32 %v3844_v61, %v3756_v43  ;;  %v10002_v22 = vadd.f32 %v2391_v18, %v2303_v8  ;;  %v10014_v18 = vld [vmem:[#allocation2 + $0x178] sm:$0xff]  ;;  %4101 = vmatpush.bf16.msrb.mxu1 %v8149_v56 }
 0x28a   : > { %v3758_v39 = vpop.f32.mrf.mxu1  ;;  %v10058_v56 = vld [vmem:[#allocation2 + $0x18] sm:$0x3] }
 0x28b   : > { %12150 = vst [vmem:[#allocation53_spill] sm:$0xff] %v9994_v30  ;;  %2344 = vmatmul.bf16.gmra.mxu3 %v12089_v62  ;;  %2433 = vmatmul.bf16.gmra.mxu0 %v12090_v36  ;;  %v3759_v50 = vadd.f32 %v9916_v26, %v3758_v39  ;;  %v12155_v62 = vld [vmem:[#allocation5_spill] sm:$0xff]  ;;  %v3047_v39 = vrot.slane %v10012_v27, 1  ;;  %v3050_v30 = vrot.slane %v10016_v38, 1  ;;  %v10040_v38 = vpack.c.bf16 %v10014_v18, %v10012_v27 }
 0x28c   : > { %12153 = vst [vmem:[#allocation56_spill] sm:$0xff] %v10002_v22  ;;  %v3048_v22 = vrot.slane %v10014_v18, 1 }
 0x28d   : > { %3797 = vmatmul.bf16.gmra.mxu1 %v9998_v5  ;;  %3886 = vmatmul.bf16.gmra.mxu2 %v10000_v45  ;;  %v8141_v45 = vld [vmem:[%s11913_s5 + $0xc8] sm:$0xff]  ;;  %12160 = vst [vmem:[#allocation59_spill] sm:$0xff] %v10040_v38 }
 0x28e   : > { %v2305_v43 = vpop.f32.mrf.mxu3  ;;  %4012 = vmatpush.bf16.msrb.mxu0 %v8141_v45  ;;  %v8161_v45 = vld [vmem:[%s11913_s5 + $0x168] sm:$0xff]  ;;  %12163 = vst [vmem:[#allocation62_spill] sm:$0xff] %v10058_v56 }
 0x28f   : > { %v2306_v36 = vadd.f32 %v2305_v43, %v12155_v62  ;;  %4186 = vmatpush.bf16.msrb.mxu2 %v8161_v45 }
 0x290   : > { %v3847_v2 = vpop.f32.mrf.mxu2  ;;  %v2396_v46 = vpop.f32.mrf.mxu0 }
 0x291   : > { %v10019_v54 = vadd.f32 %v3847_v2, %v3759_v50  ;;  %v10021_v8 = vadd.f32 %v2394_v48, %v2306_v36  ;;  %v3049_v50 = vsel %vm914_vm0, %v3047_v39, %v3048_v22  ;;  %v3051_v48 = vsel %vm914_vm0, %v3048_v22, %v3050_v30  ;;  %v12158_v36 = vld [vmem:[#allocation10_spill] sm:$0xff] }
 0x292   : > { %v3760_v61 = vpop.f32.mrf.mxu1  ;;  %v10042_v63 = vpack.c.bf16 %v3051_v48, %v3049_v50 }
 0x293   : > { %12156 = vst [vmem:[#allocation5_spill] sm:$0xff] %v10019_v54  ;;  %v3761_v43 = vadd.f32 %v9916_v26, %v3760_v61  ;;  %v10054_v61 = vld [vmem:[#allocation2 + $0xd8] sm:$0xff] }
 0x294   : > { %12157 = vst [vmem:[#allocation58_spill] sm:$0xff] %v10021_v8 }
 0x295   : > { %12161 = vst [vmem:[#allocation60_spill] sm:$0xff] %v10042_v63 }
 0x296   : > { %v2307_v62 = vpop.f32.mrf.mxu3 }
 0x297   : > { %v2308_v2 = vadd.f32 %v2307_v62, %v12158_v36  ;;  %v3052_v36 = vrot.slane %v10054_v61, 1 }
 0x298   : > { %v3849_v8 = vpop.f32.mrf.mxu2  ;;  %v2399_v5 = vpop.f32.mrf.mxu0 }
 0x299   : > { %v10036_v54 = vadd.f32 %v3849_v8, %v3761_v43  ;;  %v10044_v39 = vadd.f32 %v2396_v46, %v2308_v2  ;;  %v10056_v46 = vld [vmem:[#allocation2 + $0x138] sm:$0xff] }
 0x29a   : > { %v3763_v22 = vpop.f32.mrf.mxu1  ;;  %v3053_v2 = vrot.slane %v10056_v46, 1 }
 0x29b   : > { %12159 = vst [vmem:[#allocation10_spill] sm:$0xff] %v10036_v54  ;;  %2349 = vmatmul.bf16.gmra.mxu3 %v12093_v0  ;;  %2438 = vmatmul.bf16.gmra.mxu0 %v12094_v35  ;;  %v3764_v30 = vadd.f32 %v9916_v26, %v3763_v22  ;;  %v3055_v22 = vrot.slane %v10058_v56, 1 }
 0x29c   : > { %12162 = vst [vmem:[#allocation61_spill] sm:$0xff] %v10044_v39  ;;  %v3054_v45 = vsel %vm914_vm0, %v3052_v36, %v3053_v2 }
 0x29d   : > { %3802 = vmatmul.bf16.gmra.mxu1 %v10040_v38  ;;  %3891 = vmatmul.bf16.gmra.mxu2 %v10042_v63  ;;  %v3056_v39 = vsel %vm914_vm0, %v3053_v2, %v3055_v22  ;;  %v12170_v63 = vld [vmem:[#allocation12_spill] sm:$0xff]  ;;  %v12171_v2 = vld [vmem:[#allocation21_spill] sm:$0xff]  ;;  %v10094_v22 = vld [vmem:[#allocation2 + $0x8] sm:$0x3] }
 0x29e   : > { %v2310_v8 = vpop.f32.mrf.mxu3  ;;  %12174 = vst [vmem:[#allocation69_spill] sm:$0xff] %v10094_v22 }
 0x29f   : > { %v2311_v0 = vadd.f32 %v2310_v8, %v9575_v60 }
 0x2a0   : > { %v3852_v35 = vpop.f32.mrf.mxu2  ;;  %v2401_v48 = vpop.f32.mrf.mxu0 }
 0x2a1   : > { %v10061_v50 = vadd.f32 %v3852_v35, %v3764_v30  ;;  %v10063_v43 = vadd.f32 %v2399_v5, %v2311_v0  ;;  %v10076_v0 = vpack.c.bf16 %v10056_v46, %v10054_v61 }
 0x2a2   : > { %v3765_v62 = vpop.f32.mrf.mxu1 }
 0x2a3   : > { %12164 = vst [vmem:[#allocation63_spill] sm:$0xff] %v10061_v50  ;;  %v3766_v54 = vadd.f32 %v9916_v26, %v3765_v62 }
 0x2a4   : > { %12165 = vst [vmem:[#allocation64_spill] sm:$0xff] %v10063_v43  ;;  %v10078_v43 = vpack.c.bf16 %v3056_v39, %v3054_v45  ;;  %v10090_v39 = vld [vmem:[#allocation2 + $0xe0] sm:$0xff] }
 0x2a5   : > { %12167 = vst [vmem:[#allocation66_spill] sm:$0xff] %v10076_v0 }
 0x2a6   : > { %v2312_v60 = vpop.f32.mrf.mxu3  ;;  %12168 = vst [vmem:[#allocation67_spill] sm:$0xff] %v10078_v43 }
 0x2a7   : > { %v2313_v30 = vadd.f32 %v2312_v60, %v9582_v12  ;;  %v8132_v12 = vld [vmem:[%s11913_s5 + $0x80] sm:$0xff]  ;;  %12172 = vst [vmem:[#allocation12_spill] sm:$0xff] %v10090_v39 }
 0x2a8   : > { %v3854_v8 = vpop.f32.mrf.mxu2  ;;  %v2404_v5 = vpop.f32.mrf.mxu0  ;;  %3924 = vmatpush.bf16.msrb.mxu3 %v8132_v12  ;;  %v8148_v12 = vld [vmem:[%s11913_s5 + $0x100] sm:$0xff] }
 0x2a9   : > { %v10072_v35 = vadd.f32 %v3854_v8, %v3766_v54  ;;  %v10080_v50 = vadd.f32 %v2401_v48, %v2313_v30  ;;  %v10092_v48 = vld [vmem:[#allocation2 + $0x198] sm:$0xff]  ;;  %4102 = vmatpush.bf16.msrb.mxu1 %v8148_v12  ;;  %v12184_v12 = vld [vmem:[#allocation22_spill] sm:$0xff] }
 0x2aa   : > { %v3768_v36 = vpop.f32.mrf.mxu1  ;;  %12173 = vst [vmem:[#allocation21_spill] sm:$0xff] %v10092_v48 }
 0x2ab   : > { %12166 = vst [vmem:[#allocation65_spill] sm:$0xff] %v10072_v35  ;;  %2354 = vmatmul.bf16.gmra.mxu3 %v12170_v63  ;;  %2443 = vmatmul.bf16.gmra.mxu0 %v12171_v2  ;;  %v3769_v62 = vadd.f32 %v9916_v26, %v3768_v36  ;;  %v12175_v63 = vld [vmem:[#allocation14_spill] sm:$0xff]  ;;  %v3058_v35 = vrot.slane %v10092_v48, 1 }
 0x2ac   : > { %12169 = vst [vmem:[#allocation68_spill] sm:$0xff] %v10080_v50  ;;  %v3057_v50 = vrot.slane %v10090_v39, 1 }
 0x2ad   : > { %3807 = vmatmul.bf16.gmra.mxu1 %v10076_v0  ;;  %3896 = vmatmul.bf16.gmra.mxu2 %v10078_v43  ;;  %v3060_v43 = vrot.slane %v10094_v22, 1  ;;  %v8140_v0 = vld [vmem:[%s11913_s5 + $0xc0] sm:$0xff] }
 0x2ae   : > { %v2315_v54 = vpop.f32.mrf.mxu3  ;;  %4013 = vmatpush.bf16.msrb.mxu0 %v8140_v0 }
 0x2af   : > { %v2316_v45 = vadd.f32 %v2315_v54, %v12175_v63 }
 0x2b0   : > { %v3857_v60 = vpop.f32.mrf.mxu2  ;;  %v2406_v8 = vpop.f32.mrf.mxu0 }
 0x2b1   : > { %v10097_v30 = vadd.f32 %v3857_v60, %v3769_v62  ;;  %v10099_v36 = vadd.f32 %v2404_v5, %v2316_v45  ;;  %v3059_v62 = vsel %vm914_vm0, %v3057_v50, %v3058_v35  ;;  %v3061_v5 = vsel %vm914_vm0, %v3058_v35, %v3060_v43  ;;  %v10113_v45 = vld [vmem:[#allocation2 + $0x110] sm:$0x3]  ;;  %v12178_v60 = vld [vmem:[#allocation6_spill] sm:$0xff] }
 0x2b2   : > { %v3770_v2 = vpop.f32.mrf.mxu1  ;;  %2501 = vst [vmem:[#allocation2 + $0x110] sm:$0x3] %v9652_v52  ;;  %v10121_v50 = vpack.c.bf16 %v10092_v48, %v10090_v39  ;;  %v10123_v43 = vpack.c.bf16 %v3061_v5, %v3059_v62  ;;  %v8160_v52 = vld [vmem:[%s11913_s5 + $0x160] sm:$0xff]  ;;  %v10135_v5 = vld [vmem:[#allocation2 + $0x48] sm:$0xff] }
 0x2b3   : > { %12176 = vst [vmem:[#allocation14_spill] sm:$0xff] %v10097_v30  ;;  %v3771_v54 = vadd.f32 %v9916_v26, %v3770_v2  ;;  %v12183_v2 = vld [vmem:[#allocation15_spill] sm:$0xff]  ;;  %4187 = vmatpush.bf16.msrb.mxu2 %v8160_v52 }
 0x2b4   : > { %12177 = vst [vmem:[#allocation70_spill] sm:$0xff] %v10099_v36 }
 0x2b5   : > { %12180 = vst [vmem:[#allocation71_spill] sm:$0xff] %v10121_v50 }
 0x2b6   : > { %v2317_v63 = vpop.f32.mrf.mxu3  ;;  %12181 = vst [vmem:[#allocation72_spill] sm:$0xff] %v10123_v43 }
 0x2b7   : > { %v2318_v36 = vadd.f32 %v2317_v63, %v12178_v60  ;;  %12185 = vst [vmem:[#allocation15_spill] sm:$0xff] %v10135_v5 }
 0x2b8   : > { %v3859_v30 = vpop.f32.mrf.mxu2  ;;  %v2409_v38 = vpop.f32.mrf.mxu0 }
 0x2b9   : > { %v10117_v22 = vadd.f32 %v3859_v30, %v3771_v54  ;;  %v10125_v35 = vadd.f32 %v2406_v8, %v2318_v36  ;;  %v10137_v8 = vld [vmem:[#allocation2 + $0x58] sm:$0xff]  ;;  %v10139_v36 = vld [vmem:[#allocation2 + $0x50] sm:$0x3]  ;;  %v12188_v54 = vld [vmem:[#allocation11_spill] sm:$0xff] }
 0x2ba   : > { %v3773_v0 = vpop.f32.mrf.mxu1  ;;  %12186 = vst [vmem:[#allocation22_spill] sm:$0xff] %v10137_v8  ;;  %v3063_v52 = vrot.slane %v10137_v8, 1 }
 0x2bb   : > { %12179 = vst [vmem:[#allocation6_spill] sm:$0xff] %v10117_v22  ;;  %2359 = vmatmul.bf16.gmra.mxu3 %v12183_v2  ;;  %2448 = vmatmul.bf16.gmra.mxu0 %v12184_v12  ;;  %v3774_v30 = vadd.f32 %v9916_v26, %v3773_v0  ;;  %v3062_v22 = vrot.slane %v10135_v5, 1 }
 0x2bc   : > { %12182 = vst [vmem:[#allocation73_spill] sm:$0xff] %v10125_v35 }
 0x2bd   : > { %3812 = vmatmul.bf16.gmra.mxu1 %v10121_v50  ;;  %3901 = vmatmul.bf16.gmra.mxu2 %v10123_v43  ;;  %12187 = vst [vmem:[#allocation74_spill] sm:$0xff] %v10139_v36  ;;  %v3065_v43 = vrot.slane %v10139_v36, 1  ;;  %v8159_v50 = vld [vmem:[%s11913_s5 + $0x158] sm:$0xff] }
 0x2be   : > { %v2320_v62 = vpop.f32.mrf.mxu3  ;;  %4188 = vmatpush.bf16.msrb.mxu2 %v8159_v50  ;;  %v10163_v50 = vpack.c.bf16 %v10137_v8, %v10135_v5  ;;  %v1170_v8 = vrot.slane %v10113_v45, 2 }
 0x2bf   : > { %v2321_v63 = vadd.f32 %v2320_v62, %v12188_v54  ;;  %v3064_v62 = vsel %vm914_vm0, %v3062_v22, %v3063_v52 }
 0x2c0   : > { %v3862_v60 = vpop.f32.mrf.mxu2  ;;  %v2411_v12 = vpop.f32.mrf.mxu0  ;;  %12193 = vst [vmem:[#allocation76_spill] sm:$0xff] %v10163_v50 }
 0x2c1   : > { %v10142_v2 = vadd.f32 %v3862_v60, %v3774_v30  ;;  %v10144_v35 = vadd.f32 %v2409_v38, %v2321_v63  ;;  %v3066_v30 = vsel %vm914_vm0, %v3063_v52, %v3065_v43  ;;  %v8158_v38 = vld [vmem:[%s11913_s5 + $0x150] sm:$0xff]  ;;  %v12191_v60 = vld [vmem:[#allocation19_spill] sm:$0xff] }
 0x2c2   : > { %v3775_v0 = vpop.f32.mrf.mxu1  ;;  %4189 = vmatpush.bf16.msrb.mxu2 %v8158_v38  ;;  %v10165_v22 = vpack.c.bf16 %v3066_v30, %v3064_v62  ;;  %v3110_v38 = vrot.slane %v9675_v34, 2  ;;  %v10190_v30 = vld [vmem:[#allocation2 + $0x70] sm:$0x3] }
 0x2c3   : > { %12189 = vst [vmem:[#allocation11_spill] sm:$0xff] %v10142_v2  ;;  %v3776_v54 = vadd.f32 %v9916_v26, %v3775_v0  ;;  %v8157_v0 = vld [vmem:[%s11913_s5 + $0x148] sm:$0xff]  ;;  %v3070_v56 = vrot.slane %v10190_v30, 1 }
 0x2c4   : > { %12190 = vst [vmem:[#allocation75_spill] sm:$0xff] %v10144_v35 }
 0x2c5   : > { %12194 = vst [vmem:[#allocation77_spill] sm:$0xff] %v10165_v22 }
 0x2c6   : > { %v2322_v63 = vpop.f32.mrf.mxu3  ;;  %4190 = vmatpush.bf16.msrb.mxu2 %v8157_v0  ;;  %12196 = vst [vmem:[#allocation79_spill] sm:$0xff] %v10190_v30 }
 0x2c7   : > { %v2323_v35 = vadd.f32 %v2322_v63, %v12191_v60  ;;  %v3109_v63 = vrot.slane %v9673_v10, 2  ;;  %v8156_v10 = vld [vmem:[%s11913_s5 + $0x140] sm:$0xff] }
 0x2c8   : > { %v3864_v2 = vpop.f32.mrf.mxu2  ;;  %v2414_v48 = vpop.f32.mrf.mxu0 }
 0x2c9   : > { %v10159_v36 = vadd.f32 %v3864_v2, %v3776_v54  ;;  %v10167_v43 = vadd.f32 %v2411_v12, %v2323_v35  ;;  %v3112_v2 = vrot.slane %v9677_v44, 2  ;;  %v8171_v35 = vld [vmem:[%s11913_s5 + $0x1b8] sm:$0xff]  ;;  %v10186_v12 = vld [vmem:[#allocation2 + $0x20] sm:$0xff]  ;;  %v3111_v0 = vsel %vm1027_vm1, %v3109_v63, %v3110_v38 }
 0x2ca   : > { %v3778_v52 = vpop.f32.mrf.mxu1  ;;  %v8299_v44 = vld [vmem:[#allocation2 + $0x98] sm:$0xff]  ;;  %4273 = vmatpush.bf16.msra.mxu3 %v8171_v35  ;;  %4191 = vmatpush.bf16.msrb.mxu2 %v8156_v10 }
 0x2cb   : > { %12192 = vst [vmem:[#allocation19_spill] sm:$0xff] %v10159_v36  ;;  %2364 = vmatmul.bf16.gmra.mxu3 %v9648_v57  ;;  %2453 = vmatmul.bf16.gmra.mxu0 %v9650_v58  ;;  %v3779_v62 = vadd.f32 %v9916_v26, %v3778_v52  ;;  %v1160_v57 = vrot.slane %v8299_v44, 1  ;;  %v10188_v58 = vld [vmem:[#allocation2 + $0x1a0] sm:$0xff]  ;;  %v1163_v52 = vrot.slane %v10113_v45, 1  ;;  %v8179_v63 = vld [vmem:[%s11913_s5 + $0x1f8] sm:$0xff] }
 0x2cc   : > { %12195 = vst [vmem:[#allocation78_spill] sm:$0xff] %v10167_v43  ;;  %v3113_v43 = vsel %vm1027_vm1, %v3110_v38, %v3112_v2  ;;  %v8187_v45 = vld [vmem:[%s11913_s5 + $0x238] sm:$0xff]  ;;  %4362 = vmatpush.bf16.msra.mxu0 %v8179_v63  ;;  %v3117_v63 = vrot.slane %v9710_v4, 2 }
 0x2cd   : > { %3817 = vmatmul.bf16.gmra.mxu1 %v10163_v50  ;;  %3906 = vmatmul.bf16.gmra.mxu2 %v10165_v22  ;;  %v1167_v50 = vrot.slane %v8299_v44, 2  ;;  %v10199_v5 = vpack.c.bf16 %v3113_v43, %v3111_v0  ;;  %v1164_v43 = vsel %vm914_vm0, %v1160_v57, %v1163_v52  ;;  %v12199_v44 = vld [vmem:[#allocation7_spill] sm:$0xff] }
 0x2ce   : > { %v2325_v34 = vpop.f32.mrf.mxu3  ;;  %4451 = vmatpush.bf16.msra.mxu1 %v8187_v45  ;;  %v1226_v0 = vpack.c.bf16 %v1164_v43, %v1160_v57 }
 0x2cf   : > { %v2326_v54 = vadd.f32 %v2325_v34, %v9637_v29  ;;  %v3067_v29 = vrot.slane %v10186_v12, 1  ;;  %v3068_v34 = vrot.slane %v10188_v58, 1 }
 0x2d0   : > { %v3867_v60 = vpop.f32.mrf.mxu2  ;;  %v2416_v22 = vpop.f32.mrf.mxu0 }
 0x2d1   : > { %v10196_v36 = vadd.f32 %v3867_v60, %v3779_v62  ;;  %v10201_v39 = vadd.f32 %v2414_v48, %v2326_v54  ;;  %v1171_v48 = vsel %vm1027_vm1, %v1167_v50, %v1170_v8  ;;  %v3069_v38 = vsel %vm914_vm0, %v3067_v29, %v3068_v34 }
 0x2d2   : > { %v3780_v35 = vpop.f32.mrf.mxu1  ;;  %v3071_v2 = vsel %vm914_vm0, %v3068_v34, %v3070_v56  ;;  %v10222_v8 = vpack.c.bf16 %v10188_v58, %v10186_v12  ;;  %v3115_v34 = vrot.slane %v9708_v49, 2 }
 0x2d3   : > { %12197 = vst [vmem:[#allocation80_spill] sm:$0xff] %v10196_v36  ;;  %v3781_v62 = vadd.f32 %v9916_v26, %v3780_v35  ;;  %v10224_v52 = vpack.c.bf16 %v3071_v2, %v3069_v38  ;;  %v3114_v35 = vrot.slane %v9706_v21, 2 }
 0x2d4   : > { %12198 = vst [vmem:[#allocation81_spill] sm:$0xff] %v10201_v39  ;;  %v1227_v39 = vpack.c.bf16 %v1171_v48, %v1167_v50  ;;  %v3118_v21 = vsel %vm1027_vm1, %v3115_v34, %v3117_v63 }
 0x2d5   : > { %12200 = vst [vmem:[#allocation7_spill] sm:$0xff] %v10222_v8  ;;  %v3116_v48 = vsel %vm1027_vm1, %v3114_v35, %v3115_v34 }
 0x2d6   : > { %v2327_v10 = vpop.f32.mrf.mxu3  ;;  %12201 = vst [vmem:[#allocation82_spill] sm:$0xff] %v10224_v52 }
 0x2d7   : > { %v2328_v54 = vadd.f32 %v2327_v10, %v12199_v44 }
 0x2d8   : > { %v3869_v60 = vpop.f32.mrf.mxu2  ;;  %v2419_v30 = vpop.f32.mrf.mxu0 }
 0x2d9   : > { %v10218_v36 = vadd.f32 %v3869_v60, %v3781_v62  ;;  %v10226_v56 = vadd.f32 %v2416_v22, %v2328_v54  ;;  %v10239_v62 = vpack.c.bf16 %v3118_v21, %v3116_v48 }
 0x2da   : > { %v3783_v29 = vpop.f32.mrf.mxu1 }
 0x2db   : > { %12202 = vst [vmem:[#allocation83_spill] sm:$0xff] %v10226_v56  ;;  %2369 = vmatmul.bf16.gmra.mxu3 %v1226_v0  ;;  %2458 = vmatmul.bf16.gmra.mxu0 %v1227_v39  ;;  %v3784_v57 = vadd.f32 %v9916_v26, %v3783_v29  ;;  %v8300_v39 = vld [vmem:[#allocation2 + $0x10] sm:$0x3] }
 0x2dc   : > { %v3107_v2 = vrot.slane %v8300_v39, 2 }
 0x2dd   : > { %3822 = vmatmul.bf16.gmra.mxu1 %v10222_v8  ;;  %3911 = vmatmul.bf16.gmra.mxu2 %v10224_v52 }
 0x2de   : > { %v2330_v45 = vpop.f32.mrf.mxu3  ;;  %v3108_v4 = vsel %vm1027_vm1, %v1167_v50, %v3107_v2 }
 0x2df   : > { %v2331_v43 = vadd.f32 %v2330_v45, %v9662_v19  ;;  %v3252_v29 = vpack.c.bf16 %v3108_v4, %v1167_v50  ;;  %v3119_v45 = vrot.slane %v9736_v20, 2  ;;  %v3122_v50 = vrot.slane %v9740_v17, 2  ;;  %v12205_v20 = vld [vmem:[#allocation8_spill] sm:$0xff] }
 0x2e0   : > { %v3872_v22 = vpop.f32.mrf.mxu2  ;;  %v2421_v49 = vpop.f32.mrf.mxu0  ;;  %v8178_v17 = vld [vmem:[%s11913_s5 + $0x1f0] sm:$0xff] }
 0x2e1   : > { %v10237_v38 = vadd.f32 %v3872_v22, %v3784_v57  ;;  %v10241_v10 = vadd.f32 %v2419_v30, %v2331_v43  ;;  %v3120_v30 = vrot.slane %v9738_v41, 2  ;;  %v8186_v4 = vld [vmem:[%s11913_s5 + $0x230] sm:$0xff]  ;;  %4363 = vmatpush.bf16.msra.mxu0 %v8178_v17 }
 0x2e2   : > { %v3785_v44 = vpop.f32.mrf.mxu1  ;;  %4452 = vmatpush.bf16.msra.mxu1 %v8186_v4 }
 0x2e3   : > { %12203 = vst [vmem:[#allocation84_spill] sm:$0xff] %v10241_v10  ;;  %v3786_v54 = vadd.f32 %v9916_v26, %v3785_v44  ;;  %v3121_v21 = vsel %vm1027_vm1, %v3119_v45, %v3120_v30 }
 0x2e6   : > { %v2332_v19 = vpop.f32.mrf.mxu3 }
 0x2e7   : > { %v2333_v60 = vadd.f32 %v2332_v19, %v9668_v3  ;;  %v8170_v3 = vld [vmem:[%s11913_s5 + $0x1b0] sm:$0xff] }
 0x2e8   : > { %v3874_v0 = vpop.f32.mrf.mxu2  ;;  %v2424_v34 = vpop.f32.mrf.mxu0  ;;  %4274 = vmatpush.bf16.msra.mxu3 %v8170_v3  ;;  %v3125_v3 = vrot.slane %v9771_v9, 2 }
 0x2e9   : > { %v10246_v35 = vadd.f32 %v3874_v0, %v3786_v54  ;;  %v10248_v57 = vadd.f32 %v2421_v49, %v2333_v60  ;;  %v12207_v60 = vld [vmem:[#allocation26_spill] sm:$0xff] }
 0x2ea   : > { %v3788_v63 = vpop.f32.mrf.mxu1 }
 0x2eb   : > { %12204 = vst [vmem:[#allocation85_spill] sm:$0xff] %v10248_v57  ;;  %3925 = vmatmul.bf16.vlgmr.msrb.gmra.mxu3 %v3252_v29  ;;  %4014 = vmatmul.bf16.vlgmr.msrb.gmra.mxu0 %v9696_v53  ;;  %v3789_v43 = vadd.f32 %v9916_v26, %v3788_v63  ;;  %v3123_v53 = vsel %vm1027_vm1, %v3120_v30, %v3122_v50 }
 0x2ec   : > { %v10265_v39 = vpack.c.bf16 %v3123_v53, %v3121_v21 }
 0x2ed   : > { %4103 = vmatmul.bf16.vlgmr.msrb.gmra.mxu1 %v9698_v32  ;;  %4192 = vmatmul.bf16.vlgmr.msrb.gmra.mxu2 %v10199_v5 }
 0x2ee   : > { %v2335_v22 = vpop.f32.mrf.mxu3 }
 0x2ef   : > { %v2336_v48 = vadd.f32 %v2335_v22, %v12205_v20  ;;  %v3127_v22 = vrot.slane %v9773_v7, 2  ;;  %v12211_v7 = vld [vmem:[#allocation28_spill] sm:$0xff] }
 0x2f0   : > { %v3877_v41 = vpop.f32.mrf.mxu2  ;;  %v2426_v32 = vpop.f32.mrf.mxu0 }
 0x2f1   : > { %v10263_v49 = vadd.f32 %v3877_v41, %v3789_v43  ;;  %v10267_v2 = vadd.f32 %v2424_v34, %v2336_v48  ;;  %v3124_v43 = vrot.slane %v9769_v47, 2  ;;  %v12209_v48 = vld [vmem:[#allocation27_spill] sm:$0xff]  ;;  %v3128_v9 = vsel %vm1027_vm1, %v3125_v3, %v3127_v22 }
 0x2f2   : > { %v3790_v44 = vpop.f32.mrf.mxu1 }
 0x2f3   : > { %12206 = vst [vmem:[#allocation8_spill] sm:$0xff] %v10267_v2  ;;  %v3791_v54 = vadd.f32 %v9916_v26, %v3790_v44  ;;  %v3126_v47 = vsel %vm1027_vm1, %v3124_v43, %v3125_v3  ;;  %v3129_v3 = vrot.slane %v9799_v51, 2  ;;  %v12215_v51 = vld [vmem:[#allocation29_spill] sm:$0xff] }
 0x2f6   : > { %v2337_v19 = vpop.f32.mrf.mxu3 }
 0x2f7   : > { %v2338_v0 = vadd.f32 %v2337_v19, %v12207_v60 }
 0x2f8   : > { %v3879_v29 = vpop.f32.mrf.mxu2  ;;  %v2429_v34 = vpop.f32.mrf.mxu0 }
 0x2f9   : > { %v10277_v63 = vadd.f32 %v3879_v29, %v3791_v54  ;;  %v10279_v45 = vadd.f32 %v2426_v32, %v2338_v0  ;;  %v10294_v32 = vpack.c.bf16 %v3128_v9, %v3126_v47 }
 0x2fa   : > { %v3793_v30 = vpop.f32.mrf.mxu1 }
 0x2fb   : > { %12208 = vst [vmem:[#allocation26_spill] sm:$0xff] %v10279_v45  ;;  %3930 = vmatmul.bf16.gmra.mxu3 %v10199_v5  ;;  %4019 = vmatmul.bf16.gmra.mxu0 %v9723_v15  ;;  %v3794_v50 = vadd.f32 %v9916_v26, %v3793_v30 }
 0x2fd   : > { %4108 = vmatmul.bf16.gmra.mxu1 %v9725_v13  ;;  %4197 = vmatmul.bf16.gmra.mxu2 %v10239_v62 }
 0x2fe   : > { %v2340_v20 = vpop.f32.mrf.mxu3 }
 0x2ff   : > { %v2341_v41 = vadd.f32 %v2340_v20, %v12209_v48  ;;  %v12214_v20 = vld [vmem:[#allocation31_spill] sm:$0xff] }
 0x300   : > { %v3882_v21 = vpop.f32.mrf.mxu2  ;;  %v2431_v5 = vpop.f32.mrf.mxu0  ;;  %v8169_v48 = vld [vmem:[%s11913_s5 + $0x1a8] sm:$0xff] }
 0x301   : > { %v10292_v53 = vadd.f32 %v3882_v21, %v3794_v50  ;;  %v10296_v44 = vadd.f32 %v2429_v34, %v2341_v41  ;;  %v3130_v50 = vrot.slane %v9801_v37, 2  ;;  %v12213_v34 = vld [vmem:[#allocation30_spill] sm:$0xff]  ;;  %v3132_v41 = vrot.slane %v9803_v25, 2  ;;  %4275 = vmatpush.bf16.msra.mxu3 %v8169_v48  ;;  %v8177_v25 = vld [vmem:[%s11913_s5 + $0x1e8] sm:$0xff] }
 0x302   : > { %v3795_v17 = vpop.f32.mrf.mxu1  ;;  %4364 = vmatpush.bf16.msra.mxu0 %v8177_v25  ;;  %v12221_v25 = vld [vmem:[#allocation35_spill] sm:$0xff] }
 0x303   : > { %12210 = vst [vmem:[#allocation27_spill] sm:$0xff] %v10296_v44  ;;  %v3796_v4 = vadd.f32 %v9916_v26, %v3795_v17  ;;  %v3131_v9 = vsel %vm1027_vm1, %v3129_v3, %v3130_v50 }
 0x306   : > { %v2342_v54 = vpop.f32.mrf.mxu3 }
 0x307   : > { %v2343_v19 = vadd.f32 %v2342_v54, %v12211_v7 }
 0x308   : > { %v3884_v60 = vpop.f32.mrf.mxu2  ;;  %v2434_v29 = vpop.f32.mrf.mxu0 }
 0x309   : > { %v10300_v0 = vadd.f32 %v3884_v60, %v3796_v4  ;;  %v10302_v30 = vadd.f32 %v2431_v5, %v2343_v19  ;;  %v3133_v5 = vsel %vm1027_vm1, %v3130_v50, %v3132_v41  ;;  %v8185_v60 = vld [vmem:[%s11913_s5 + $0x228] sm:$0xff]  ;;  %v12217_v50 = vld [vmem:[#allocation32_spill] sm:$0xff] }
 0x30a   : > { %v3798_v43 = vpop.f32.mrf.mxu1  ;;  %v10320_v54 = vpack.c.bf16 %v3133_v5, %v3131_v9  ;;  %4453 = vmatpush.bf16.msra.mxu1 %v8185_v60  ;;  %v12220_v5 = vld [vmem:[#allocation34_spill] sm:$0xff]  ;;  %v12222_v60 = vld [vmem:[#allocation39_spill] sm:$0xff] }
 0x30b   : > { %12212 = vst [vmem:[#allocation28_spill] sm:$0xff] %v10302_v30  ;;  %3935 = vmatmul.bf16.gmra.mxu3 %v10239_v62  ;;  %4024 = vmatmul.bf16.gmra.mxu0 %v12213_v34  ;;  %v3799_v22 = vadd.f32 %v9916_v26, %v3798_v43 }
 0x30d   : > { %4113 = vmatmul.bf16.gmra.mxu1 %v12214_v20  ;;  %4202 = vmatmul.bf16.gmra.mxu2 %v10265_v39 }
 0x30e   : > { %v2345_v21 = vpop.f32.mrf.mxu3 }
 0x30f   : > { %v2346_v37 = vadd.f32 %v2345_v21, %v12215_v51 }
 0x310   : > { %v3887_v47 = vpop.f32.mrf.mxu2  ;;  %v2436_v4 = vpop.f32.mrf.mxu0 }
 0x311   : > { %v10318_v17 = vadd.f32 %v3887_v47, %v3799_v22  ;;  %v10322_v7 = vadd.f32 %v2434_v29, %v2346_v37  ;;  %v3134_v37 = vrot.slane %v9832_v14, 2  ;;  %v12219_v47 = vld [vmem:[#allocation38_spill] sm:$0xff] }
 0x312   : > { %v3800_v19 = vpop.f32.mrf.mxu1  ;;  %v3135_v9 = vrot.slane %v12219_v47, 2 }
 0x313   : > { %12216 = vst [vmem:[#allocation30_spill] sm:$0xff] %v10322_v7  ;;  %v3801_v43 = vadd.f32 %v9916_v26, %v3800_v19 }
 0x314   : > { %v3136_v14 = vsel %vm1027_vm1, %v3134_v37, %v3135_v9 }
 0x316   : > { %v2347_v3 = vpop.f32.mrf.mxu3 }
 0x317   : > { %v2348_v22 = vadd.f32 %v2347_v3, %v12217_v50 }
 0x318   : > { %v3889_v48 = vpop.f32.mrf.mxu2  ;;  %v2439_v29 = vpop.f32.mrf.mxu0 }
 0x319   : > { %v10332_v41 = vadd.f32 %v3889_v48, %v3801_v43  ;;  %v10334_v21 = vadd.f32 %v2436_v4, %v2348_v22  ;;  %v3137_v43 = vrot.slane %v12222_v60, 2  ;;  %v12223_v4 = vld [vmem:[#allocation33_spill] sm:$0xff] }
 0x31a   : > { %v3803_v51 = vpop.f32.mrf.mxu1  ;;  %v12225_v60 = vld [vmem:[#allocation13_spill] sm:$0xff] }
 0x31b   : > { %12218 = vst [vmem:[#allocation31_spill] sm:$0xff] %v10334_v21  ;;  %3940 = vmatmul.bf16.gmra.mxu3 %v10265_v39  ;;  %4029 = vmatmul.bf16.gmra.mxu0 %v12220_v5  ;;  %v3804_v19 = vadd.f32 %v9916_v26, %v3803_v51  ;;  %v3138_v48 = vsel %vm1027_vm1, %v3135_v9, %v3137_v43  ;;  %v3140_v43 = vrot.slane %v9864_v42, 2 }
 0x31c   : > { %v10349_v7 = vpack.c.bf16 %v3138_v48, %v3136_v14 }
 0x31d   : > { %4118 = vmatmul.bf16.gmra.mxu1 %v12221_v25  ;;  %4207 = vmatmul.bf16.gmra.mxu2 %v10294_v32 }
 0x31e   : > { %v2350_v3 = vpop.f32.mrf.mxu3 }
 0x31f   : > { %v2351_v50 = vadd.f32 %v2350_v3, %v12223_v4 }
 0x320   : > { %v3892_v22 = vpop.f32.mrf.mxu2  ;;  %v2441_v21 = vpop.f32.mrf.mxu0 }
 0x321   : > { %v10347_v47 = vadd.f32 %v3892_v22, %v3804_v19  ;;  %v10351_v51 = vadd.f32 %v2439_v29, %v2351_v50  ;;  %v3139_v19 = vrot.slane %v9862_v40, 2  ;;  %v12227_v29 = vld [vmem:[#allocation23_spill] sm:$0xff]  ;;  %v12228_v50 = vld [vmem:[#allocation36_spill] sm:$0xff]  ;;  %v12230_v40 = vld [vmem:[#allocation9_spill] sm:$0xff] }
 0x322   : > { %v3805_v30 = vpop.f32.mrf.mxu1 }
 0x323   : > { %12224 = vst [vmem:[#allocation29_spill] sm:$0xff] %v10351_v51  ;;  %v3806_v44 = vadd.f32 %v9916_v26, %v3805_v30  ;;  %v3141_v22 = vsel %vm1027_vm1, %v3139_v19, %v3140_v43 }
 0x326   : > { %v2352_v45 = vpop.f32.mrf.mxu3 }
 0x327   : > { %v2353_v2 = vadd.f32 %v2352_v45, %v12225_v60 }
 0x328   : > { %v3894_v57 = vpop.f32.mrf.mxu2  ;;  %v2444_v4 = vpop.f32.mrf.mxu0 }
 0x329   : > { %v10355_v3 = vadd.f32 %v3894_v57, %v3806_v44  ;;  %v10357_v37 = vadd.f32 %v2441_v21, %v2353_v2  ;;  %v8168_v57 = vld [vmem:[%s11913_s5 + $0x1a0] sm:$0xff] }
 0x32a   : > { %v3808_v9 = vpop.f32.mrf.mxu1  ;;  %v12229_v2 = vld [vmem:[#allocation18_spill] sm:$0xff]  ;;  %4276 = vmatpush.bf16.msra.mxu3 %v8168_v57 }
 0x32b   : > { %12226 = vst [vmem:[#allocation32_spill] sm:$0xff] %v10357_v37  ;;  %3945 = vmatmul.bf16.gmra.mxu3 %v10294_v32  ;;  %4034 = vmatmul.bf16.gmra.mxu0 %v12227_v29  ;;  %v3809_v30 = vadd.f32 %v9916_v26, %v3808_v9  ;;  %v3142_v45 = vrot.slane %v12229_v2, 2  ;;  %v8176_v2 = vld [vmem:[%s11913_s5 + $0x1e0] sm:$0xff] }
 0x32c   : > { %v8184_v57 = vld [vmem:[%s11913_s5 + $0x220] sm:$0xff]  ;;  %4365 = vmatpush.bf16.msra.mxu0 %v8176_v2  ;;  %v12236_v2 = vld [vmem:[#allocation41_spill] sm:$0xff] }
 0x32d   : > { %4123 = vmatmul.bf16.gmra.mxu1 %v12228_v50  ;;  %4212 = vmatmul.bf16.gmra.mxu2 %v10320_v54  ;;  %v3143_v14 = vsel %vm1027_vm1, %v3140_v43, %v3142_v45 }
 0x32e   : > { %v2355_v44 = vpop.f32.mrf.mxu3  ;;  %v10375_v9 = vpack.c.bf16 %v3143_v14, %v3141_v22  ;;  %4454 = vmatpush.bf16.msra.mxu1 %v8184_v57  ;;  %v3144_v22 = vrot.slane %v9898_v33, 2  ;;  %v3145_v14 = vrot.slane %v9900_v6, 2  ;;  %v12237_v57 = vld [vmem:[#allocation42_spill] sm:$0xff] }
 0x32f   : > { %v2356_v42 = vadd.f32 %v2355_v44, %v12230_v40 }
 0x330   : > { %v3897_v21 = vpop.f32.mrf.mxu2  ;;  %v2446_v60 = vpop.f32.mrf.mxu0  ;;  %v3146_v33 = vsel %vm1027_vm1, %v3144_v22, %v3145_v14 }
 0x331   : > { %v10373_v48 = vadd.f32 %v3897_v21, %v3809_v30  ;;  %v10377_v37 = vadd.f32 %v2444_v4, %v2356_v42  ;;  %v12233_v30 = vld [vmem:[#allocation37_spill] sm:$0xff] }
 0x332   : > { %v3810_v51 = vpop.f32.mrf.mxu1 }
 0x333   : > { %12231 = vst [vmem:[#allocation38_spill] sm:$0xff] %v10373_v48  ;;  %v3811_v19 = vadd.f32 %v9916_v26, %v3810_v51 }
 0x334   : > { %12232 = vst [vmem:[#allocation34_spill] sm:$0xff] %v10377_v37 }
 0x336   : > { %v2357_v43 = vpop.f32.mrf.mxu3 }
 0x337   : > { %v2358_v45 = vadd.f32 %v2357_v43, %v12233_v30 }
 0x338   : > { %v3899_v44 = vpop.f32.mrf.mxu2  ;;  %v2449_v4 = vpop.f32.mrf.mxu0 }
 0x339   : > { %v10387_v40 = vadd.f32 %v3899_v44, %v3811_v19  ;;  %v10389_v42 = vadd.f32 %v2446_v60, %v2358_v45  ;;  %v3147_v19 = vrot.slane %v9902_v16, 2  ;;  %v12238_v60 = vld [vmem:[#allocation40_spill] sm:$0xff]  ;;  %v12240_v16 = vld [vmem:[#allocation17_spill] sm:$0xff] }
 0x33a   : > { %v3813_v21 = vpop.f32.mrf.mxu1 }
 0x33b   : > { %12234 = vst [vmem:[#allocation35_spill] sm:$0xff] %v10387_v40  ;;  %3950 = vmatmul.bf16.gmra.mxu3 %v10320_v54  ;;  %4039 = vmatmul.bf16.gmra.mxu0 %v12236_v2  ;;  %v3814_v51 = vadd.f32 %v9916_v26, %v3813_v21  ;;  %v3148_v6 = vsel %vm1027_vm1, %v3145_v14, %v3147_v19  ;;  %v3150_v19 = vrot.slane %v9936_v11, 2 }
 0x33c   : > { %12235 = vst [vmem:[#allocation39_spill] sm:$0xff] %v10389_v42  ;;  %v10404_v37 = vpack.c.bf16 %v3148_v6, %v3146_v33 }
 0x33d   : > { %4128 = vmatmul.bf16.gmra.mxu1 %v12237_v57  ;;  %4217 = vmatmul.bf16.gmra.mxu2 %v10349_v7 }
 0x33e   : > { %v2360_v43 = vpop.f32.mrf.mxu3 }
 0x33f   : > { %v2361_v30 = vadd.f32 %v2360_v43, %v12238_v60 }
 0x340   : > { %v3902_v45 = vpop.f32.mrf.mxu2  ;;  %v2451_v42 = vpop.f32.mrf.mxu0 }
 0x341   : > { %v10402_v44 = vadd.f32 %v3902_v45, %v3814_v51  ;;  %v10406_v21 = vadd.f32 %v2449_v4, %v2361_v30  ;;  %v3149_v51 = vrot.slane %v9934_v28, 2  ;;  %v12243_v28 = vld [vmem:[#allocation16_spill] sm:$0xff] }
 0x342   : > { %v3815_v10 = vpop.f32.mrf.mxu1 }
 0x343   : > { %12239 = vst [vmem:[#allocation33_spill] sm:$0xff] %v10406_v21  ;;  %v3816_v56 = vadd.f32 %v9916_v26, %v3815_v10 }
 0x346   : > { %v2362_v40 = vpop.f32.mrf.mxu3 }
 0x347   : > { %v2363_v48 = vadd.f32 %v2362_v40, %v12240_v16 }
 0x348   : > { %v3904_v57 = vpop.f32.mrf.mxu2  ;;  %v2454_v60 = vpop.f32.mrf.mxu0 }
 0x349   : > { %v10410_v43 = vadd.f32 %v3904_v57, %v3816_v56  ;;  %v10412_v22 = vadd.f32 %v2451_v42, %v2363_v48  ;;  %v8167_v56 = vld [vmem:[%s11913_s5 + $0x198] sm:$0xff]  ;;  %v12242_v48 = vld [vmem:[#allocation47_spill] sm:$0xff]  ;;  %v3151_v57 = vsel %vm1027_vm1, %v3149_v51, %v3150_v19 }
 0x34a   : > { %v3818_v14 = vpop.f32.mrf.mxu1  ;;  %v3152_v40 = vrot.slane %v12242_v48, 2  ;;  %4277 = vmatpush.bf16.msra.mxu3 %v8167_v56  ;;  %v8175_v48 = vld [vmem:[%s11913_s5 + $0x1d8] sm:$0xff] }
 0x34b   : > { %12241 = vst [vmem:[#allocation13_spill] sm:$0xff] %v10412_v22  ;;  %3955 = vmatmul.bf16.gmra.mxu3 %v10349_v7  ;;  %4044 = vmatmul.bf16.gmra.mxu0 %v9885_v55  ;;  %v3819_v10 = vadd.f32 %v9916_v26, %v3818_v14  ;;  %v8183_v56 = vld [vmem:[%s11913_s5 + $0x218] sm:$0xff] }
 0x34c   : > { %v3153_v30 = vsel %vm1027_vm1, %v3150_v19, %v3152_v40  ;;  %4366 = vmatpush.bf16.msra.mxu0 %v8175_v48  ;;  %4455 = vmatpush.bf16.msra.mxu1 %v8183_v56  ;;  %v3155_v48 = vrot.slane %v9978_v23, 2 }
 0x34d   : > { %4133 = vmatmul.bf16.gmra.mxu1 %v9887_v31  ;;  %4222 = vmatmul.bf16.gmra.mxu2 %v10375_v9  ;;  %v10430_v6 = vpack.c.bf16 %v3153_v30, %v3151_v57  ;;  %v8195_v57 = vld [vmem:[%s11915_s7 + $0x38] sm:$0xff]  ;;  %v3154_v30 = vrot.slane %v9976_v24, 2  ;;  %v12252_v24 = vld [vmem:[#allocation43_spill] sm:$0xff] }
 0x34e   : > { %v2365_v4 = vpop.f32.mrf.mxu3  ;;  %6074 = vmatpush.bf16.msra.mxu2 %v8195_v57 }
 0x34f   : > { %v2366_v11 = vadd.f32 %v2365_v4, %v12243_v28  ;;  %12245 = vst [vmem:[#allocation36_spill] sm:$0xff] %v10430_v6 }
 0x350   : > { %v3907_v42 = vpop.f32.mrf.mxu2  ;;  %v2456_v33 = vpop.f32.mrf.mxu0 }
 0x351   : > { %v10428_v45 = vadd.f32 %v3907_v42, %v3819_v10  ;;  %v10432_v16 = vadd.f32 %v2454_v60, %v2366_v11  ;;  %v12247_v10 = vld [vmem:[#allocation24_spill] sm:$0xff] }
 0x352   : > { %v3820_v14 = vpop.f32.mrf.mxu1 }
 0x353   : > { %12244 = vst [vmem:[#allocation23_spill] sm:$0xff] %v10428_v45  ;;  %v3821_v51 = vadd.f32 %v9916_v26, %v3820_v14  ;;  %v12250_v26 = vld [vmem:[#allocation44_spill] sm:$0xff]  ;;  %v8301_v14 = vld [vmem:[%s11914_s6] ss:$0 sm:$0xff] }
 0x354   : > { %12246 = vst [vmem:[#allocation18_spill] sm:$0xff] %v10432_v16  ;;  %v12255_v45 = vld [vmem:[#allocation46_spill] sm:$0xff] }
 0x356   : > { %v2367_v19 = vpop.f32.mrf.mxu3 }
 0x357   : > { %v2368_v40 = vadd.f32 %v2367_v19, %v12247_v10 }
 0x358   : > { %v3909_v4 = vpop.f32.mrf.mxu2  ;;  %v2459_v60 = vpop.f32.mrf.mxu0 }
 0x359   : > { %v10442_v28 = vadd.f32 %v3909_v4, %v3821_v51  ;;  %v10444_v11 = vadd.f32 %v2456_v33, %v2368_v40  ;;  %v12251_v33 = vld [vmem:[#allocation45_spill] sm:$0xff]  ;;  %v3157_v51 = vrot.slane %v9980_v1, 2  ;;  %v3156_v40 = vsel %vm1027_vm1, %v3154_v30, %v3155_v48 }
 0x35a   : > { %v3823_v42 = vpop.f32.mrf.mxu1 }
 0x35b   : > { %12248 = vst [vmem:[#allocation9_spill] sm:$0xff] %v10442_v28  ;;  %3960 = vmatmul.bf16.gmra.mxu3 %v10375_v9  ;;  %4049 = vmatmul.bf16.gmra.mxu0 %v12250_v26  ;;  %v3824_v56 = vadd.f32 %v8301_v14, %v3823_v42  ;;  %v3158_v4 = vsel %vm1027_vm1, %v3155_v48, %v3157_v51  ;;  %v3159_v48 = vrot.slane %v10012_v27, 2 }
 0x35c   : > { %12249 = vst [vmem:[#allocation37_spill] sm:$0xff] %v10444_v11  ;;  %v10464_v22 = vpack.c.bf16 %v3158_v4, %v3156_v40 }
 0x35d   : > { %4138 = vmatmul.bf16.gmra.mxu1 %v12251_v33  ;;  %4227 = vmatmul.bf16.gmra.mxu2 %v10404_v37 }
 0x35e   : > { %v2370_v19 = vpop.f32.mrf.mxu3 }
 0x35f   : > { %v2371_v10 = vadd.f32 %v2370_v19, %v12252_v24 }
 0x360   : > { %v3912_v23 = vpop.f32.mrf.mxu2  ;;  %v2461_v16 = vpop.f32.mrf.mxu0 }
 0x361   : > { %v10462_v11 = vadd.f32 %v3912_v23, %v3824_v56  ;;  %v10466_v42 = vadd.f32 %v2459_v60, %v2371_v10  ;;  %v3160_v56 = vrot.slane %v10014_v18, 2  ;;  %v12258_v60 = vld [vmem:[#allocation49_spill] sm:$0xff] }
 0x362   : > { %v3825_v21 = vpop.f32.mrf.mxu1 }
 0x363   : > { %12253 = vst [vmem:[#allocation41_spill] sm:$0xff] %v10462_v11  ;;  %v3826_v28 = vadd.f32 %v8301_v14, %v3825_v21  ;;  %v8166_v21 = vld [vmem:[%s11913_s5 + $0x190] sm:$0xff]  ;;  %v12260_v14 = vld [vmem:[#allocation25_spill] sm:$0xff]  ;;  %v3161_v18 = vsel %vm1027_vm1, %v3159_v48, %v3160_v56 }
 0x364   : > { %12254 = vst [vmem:[#allocation40_spill] sm:$0xff] %v10466_v42  ;;  %4278 = vmatpush.bf16.msra.mxu3 %v8166_v21  ;;  %v8182_v21 = vld [vmem:[%s11913_s5 + $0x210] sm:$0xff] }
 0x365   : > { %4456 = vmatpush.bf16.msra.mxu1 %v8182_v21 }
 0x366   : > { %v2372_v57 = vpop.f32.mrf.mxu3 }
 0x367   : > { %v2373_v1 = vadd.f32 %v2372_v57, %v12255_v45  ;;  %v12259_v45 = vld [vmem:[#allocation57_spill] sm:$0xff]  ;;  %v8174_v57 = vld [vmem:[%s11913_s5 + $0x1d0] sm:$0xff] }
 0x368   : > { %v3914_v33 = vpop.f32.mrf.mxu2  ;;  %v4015_v19 = vpop.f32.mrf.mxu0  ;;  %4367 = vmatpush.bf16.msra.mxu0 %v8174_v57  ;;  %v12265_v57 = vld [vmem:[#allocation55_spill] sm:$0xff] }
 0x369   : > { %v10469_v26 = vadd.f32 %v3914_v33, %v3826_v28  ;;  %v10471_v24 = vadd.f32 %v2461_v16, %v2373_v1  ;;  %v3162_v16 = vrot.slane %v12259_v45, 2 }
 0x36a   : > { %v4104_v30 = vpop.f32.mrf.mxu1 }
 0x36b   : > { %12256 = vst [vmem:[#allocation17_spill] sm:$0xff] %v10469_v26  ;;  %3965 = vmatmul.bf16.gmra.mxu3 %v10404_v37  ;;  %4054 = vmatmul.bf16.gmra.mxu0 %v9962_v59  ;;  %v3163_v51 = vsel %vm1027_vm1, %v3160_v56, %v3162_v16 }
 0x36c   : > { %12257 = vst [vmem:[#allocation47_spill] sm:$0xff] %v10471_v24  ;;  %v10486_v23 = vpack.c.bf16 %v3163_v51, %v3161_v18  ;;  %v8194_v18 = vld [vmem:[%s11915_s7 + $0x30] sm:$0xff]  ;;  %v12264_v51 = vld [vmem:[#allocation54_spill] sm:$0xff] }
 0x36d   : > { %4143 = vmatmul.bf16.gmra.mxu1 %v12258_v60  ;;  %4232 = vmatmul.bf16.gmra.mxu2 %v10430_v6 }
 0x36e   : > { %v3926_v28 = vpop.f32.mrf.mxu3  ;;  %12261 = vst [vmem:[#allocation16_spill] sm:$0xff] %v10486_v23  ;;  %6075 = vmatpush.bf16.msra.mxu2 %v8194_v18  ;;  %v12270_v18 = vld [vmem:[#allocation53_spill] sm:$0xff] }
 0x36f   : > { %v3927_v27 = vadd.f32 %v3926_v28, %v12260_v14  ;;  %v12263_v28 = vld [vmem:[#allocation20_spill] sm:$0xff] }
 0x370   : > { %v4193_v33 = vpop.f32.mrf.mxu2  ;;  %v4017_v10 = vpop.f32.mrf.mxu0 }
 0x371   : > { %v4016_v40 = vadd.f32 %v4015_v19, %v3927_v27 }
 0x372   : > { %v4106_v4 = vpop.f32.mrf.mxu1 }
 0x373   : > { %v4105_v1 = vadd.f32 %v4104_v30, %v4016_v40  ;;  %v3164_v30 = vrot.slane %v10054_v61, 2 }
 0x375   : > { %v10491_v45 = vadd.f32 %v4193_v33, %v4105_v1  ;;  %v3165_v33 = vrot.slane %v10056_v46, 2 }
 0x376   : > { %v3928_v48 = vpop.f32.mrf.mxu3 }
 0x377   : > { %12262 = vst [vmem:[#allocation24_spill] sm:$0xff] %v10491_v45  ;;  %v3929_v56 = vadd.f32 %v3928_v48, %v12263_v28  ;;  %v12268_v28 = vld [vmem:[#allocation51_spill] sm:$0xff]  ;;  %v3166_v46 = vsel %vm1027_vm1, %v3164_v30, %v3165_v33  ;;  %v12272_v30 = vld [vmem:[#allocation21_spill] sm:$0xff] }
 0x378   : > { %v4195_v16 = vpop.f32.mrf.mxu2  ;;  %v4020_v14 = vpop.f32.mrf.mxu0 }
 0x379   : > { %v4018_v19 = vadd.f32 %v4017_v10, %v3929_v56  ;;  %v12267_v10 = vld [vmem:[#allocation62_spill] sm:$0xff] }
 0x37a   : > { %v4109_v27 = vpop.f32.mrf.mxu1  ;;  %v3167_v21 = vrot.slane %v12267_v10, 2 }
 0x37b   : > { %3970 = vmatmul.bf16.gmra.mxu3 %v10430_v6  ;;  %4059 = vmatmul.bf16.gmra.mxu0 %v12264_v51  ;;  %v4107_v40 = vadd.f32 %v4106_v4, %v4018_v19  ;;  %v3170_v6 = vrot.slane %v12272_v30, 2 }
 0x37c   : > { %v3168_v24 = vsel %vm1027_vm1, %v3165_v33, %v3167_v21  ;;  %v12274_v33 = vld [vmem:[#allocation60_spill] sm:$0xff] }
 0x37d   : > { %4148 = vmatmul.bf16.gmra.mxu1 %v12265_v57  ;;  %4237 = vmatmul.bf16.gmra.mxu2 %v10464_v22  ;;  %v10506_v1 = vadd.f32 %v4195_v16, %v4107_v40  ;;  %v10512_v45 = vpack.c.bf16 %v3168_v24, %v3166_v46  ;;  %v12273_v24 = vld [vmem:[#allocation59_spill] sm:$0xff] }
 0x37e   : > { %v3931_v48 = vpop.f32.mrf.mxu3 }
 0x37f   : > { %12266 = vst [vmem:[#allocation43_spill] sm:$0xff] %v10506_v1  ;;  %v3932_v56 = vadd.f32 %v3931_v48, %v12268_v28  ;;  %v12271_v28 = vld [vmem:[#allocation12_spill] sm:$0xff] }
 0x380   : > { %v4198_v61 = vpop.f32.mrf.mxu2  ;;  %v4022_v42 = vpop.f32.mrf.mxu0  ;;  %v3169_v11 = vrot.slane %v12271_v28, 2 }
 0x381   : > { %v4021_v4 = vadd.f32 %v4020_v14, %v3932_v56 }
 0x382   : > { %v4111_v19 = vpop.f32.mrf.mxu1 }
 0x383   : > { %v4110_v57 = vadd.f32 %v4109_v27, %v4021_v4  ;;  %v8165_v27 = vld [vmem:[%s11913_s5 + $0x188] sm:$0xff] }
 0x384   : > { %4279 = vmatpush.bf16.msra.mxu3 %v8165_v27  ;;  %v8181_v27 = vld [vmem:[%s11913_s5 + $0x208] sm:$0xff] }
 0x385   : > { %v10514_v51 = vadd.f32 %v4198_v61, %v4110_v57  ;;  %v12277_v61 = vld [vmem:[#allocation5_spill] sm:$0xff]  ;;  %4457 = vmatpush.bf16.msra.mxu1 %v8181_v27 }
 0x386   : > { %v3933_v16 = vpop.f32.mrf.mxu3 }
 0x387   : > { %12269 = vst [vmem:[#allocation46_spill] sm:$0xff] %v10514_v51  ;;  %v3934_v40 = vadd.f32 %v3933_v16, %v12270_v18  ;;  %v3171_v16 = vsel %vm1027_vm1, %v3169_v11, %v3170_v6 }
 0x388   : > { %v4200_v10 = vpop.f32.mrf.mxu2  ;;  %v4025_v1 = vpop.f32.mrf.mxu0 }
 0x389   : > { %v4023_v26 = vadd.f32 %v4022_v42, %v3934_v40  ;;  %v12276_v42 = vld [vmem:[#allocation69_spill] sm:$0xff] }
 0x38a   : > { %v4114_v48 = vpop.f32.mrf.mxu1  ;;  %v3172_v21 = vrot.slane %v12276_v42, 2  ;;  %v12280_v42 = vld [vmem:[#allocation10_spill] sm:$0xff] }
 0x38b   : > { %3975 = vmatmul.bf16.gmra.mxu3 %v10464_v22  ;;  %4064 = vmatmul.bf16.gmra.mxu0 %v12273_v24  ;;  %v4112_v14 = vadd.f32 %v4111_v19, %v4023_v26 }
 0x38c   : > { %v3173_v26 = vsel %vm1027_vm1, %v3170_v6, %v3172_v21 }
 0x38d   : > { %4153 = vmatmul.bf16.gmra.mxu1 %v12274_v33  ;;  %4242 = vmatmul.bf16.gmra.mxu2 %v10486_v23  ;;  %v10526_v57 = vadd.f32 %v4200_v10, %v4112_v14  ;;  %v10532_v18 = vpack.c.bf16 %v3173_v26, %v3171_v16  ;;  %v8173_v10 = vld [vmem:[%s11913_s5 + $0x1c8] sm:$0xff] }
 0x38e   : > { %v3936_v56 = vpop.f32.mrf.mxu3  ;;  %4368 = vmatpush.bf16.msra.mxu0 %v8173_v10 }
 0x38f   : > { %12275 = vst [vmem:[#allocation49_spill] sm:$0xff] %v10526_v57  ;;  %v3937_v46 = vadd.f32 %v3936_v56, %v12277_v61 }
 0x390   : > { %v4203_v4 = vpop.f32.mrf.mxu2  ;;  %v4027_v19 = vpop.f32.mrf.mxu0  ;;  %12278 = vst [vmem:[#allocation57_spill] sm:$0xff] %v10532_v18 }
 0x391   : > { %v4026_v40 = vadd.f32 %v4025_v1, %v3937_v46  ;;  %v8193_v46 = vld [vmem:[%s11915_s7 + $0x28] sm:$0xff] }
 0x392   : > { %v4116_v28 = vpop.f32.mrf.mxu1  ;;  %6076 = vmatpush.bf16.msra.mxu2 %v8193_v46  ;;  %v12290_v46 = vld [vmem:[#allocation65_spill] sm:$0xff] }
 0x393   : > { %v4115_v30 = vadd.f32 %v4114_v48, %v4026_v40  ;;  %v12281_v48 = vld [vmem:[#allocation15_spill] sm:$0xff]  ;;  %v12283_v40 = vld [vmem:[#allocation66_spill] sm:$0xff] }
 0x394   : > { %v3174_v16 = vrot.slane %v12281_v48, 2 }
 0x395   : > { %v10537_v14 = vadd.f32 %v4203_v4, %v4115_v30  ;;  %v12282_v4 = vld [vmem:[#allocation22_spill] sm:$0xff]  ;;  %v12284_v30 = vld [vmem:[#allocation67_spill] sm:$0xff] }
 0x396   : > { %v3938_v11 = vpop.f32.mrf.mxu3  ;;  %v3175_v26 = vrot.slane %v12282_v4, 2 }
 0x397   : > { %12279 = vst [vmem:[#allocation25_spill] sm:$0xff] %v10537_v14  ;;  %v3939_v6 = vadd.f32 %v3938_v11, %v12280_v42 }
 0x398   : > { %v4205_v21 = vpop.f32.mrf.mxu2  ;;  %v4030_v56 = vpop.f32.mrf.mxu0  ;;  %v3176_v4 = vsel %vm1027_vm1, %v3174_v16, %v3175_v26  ;;  %v3180_v16 = vrot.slane %v10188_v58, 2  ;;  %v12295_v58 = vld [vmem:[#allocation14_spill] sm:$0xff] }
 0x399   : > { %v4028_v1 = vadd.f32 %v4027_v19, %v3939_v6  ;;  %v12286_v19 = vld [vmem:[#allocation74_spill] sm:$0xff]  ;;  %v12287_v6 = vld [vmem:[#allocation63_spill] sm:$0xff] }
 0x39a   : > { %v4119_v61 = vpop.f32.mrf.mxu1  ;;  %v3177_v11 = vrot.slane %v12286_v19, 2 }
 0x39b   : > { %3980 = vmatmul.bf16.gmra.mxu3 %v10486_v23  ;;  %4069 = vmatmul.bf16.gmra.mxu0 %v12283_v40  ;;  %v4117_v10 = vadd.f32 %v4116_v28, %v4028_v1 }
 0x39c   : > { %v3178_v57 = vsel %vm1027_vm1, %v3175_v26, %v3177_v11 }
 0x39d   : > { %4158 = vmatmul.bf16.gmra.mxu1 %v12284_v30  ;;  %4247 = vmatmul.bf16.gmra.mxu2 %v10512_v45  ;;  %v10552_v27 = vadd.f32 %v4205_v21, %v4117_v10  ;;  %v10558_v40 = vpack.c.bf16 %v3178_v57, %v3176_v4  ;;  %v12291_v57 = vld [vmem:[#allocation71_spill] sm:$0xff] }
 0x39e   : > { %v3941_v42 = vpop.f32.mrf.mxu3 }
 0x39f   : > { %12285 = vst [vmem:[#allocation20_spill] sm:$0xff] %v10552_v27  ;;  %v3942_v14 = vadd.f32 %v3941_v42, %v12287_v6  ;;  %v3179_v6 = vrot.slane %v10186_v12, 2 }
 0x3a0   : > { %v4208_v48 = vpop.f32.mrf.mxu2  ;;  %v4032_v51 = vpop.f32.mrf.mxu0  ;;  %12288 = vst [vmem:[#allocation62_spill] sm:$0xff] %v10558_v40 }
 0x3a1   : > { %v4031_v28 = vadd.f32 %v4030_v56, %v3942_v14  ;;  %v12292_v56 = vld [vmem:[#allocation72_spill] sm:$0xff]  ;;  %v3181_v4 = vsel %vm1027_vm1, %v3179_v6, %v3180_v16 }
 0x3a2   : > { %v4121_v1 = vpop.f32.mrf.mxu1 }
 0x3a3   : > { %v4120_v30 = vadd.f32 %v4119_v61, %v4031_v28  ;;  %v8164_v61 = vld [vmem:[%s11913_s5 + $0x180] sm:$0xff] }
 0x3a4   : > { %4280 = vmatpush.bf16.msra.mxu3 %v8164_v61  ;;  %v8180_v61 = vld [vmem:[%s11913_s5 + $0x200] sm:$0xff] }
 0x3a5   : > { %v10560_v23 = vadd.f32 %v4208_v48, %v4120_v30  ;;  %4458 = vmatpush.bf16.msra.mxu1 %v8180_v61 }
 0x3a6   : > { %v3943_v21 = vpop.f32.mrf.mxu3 }
 0x3a7   : > { %12289 = vst [vmem:[#allocation51_spill] sm:$0xff] %v10560_v23  ;;  %v3944_v10 = vadd.f32 %v3943_v21, %v12290_v46 }
 0x3a8   : > { %v4210_v19 = vpop.f32.mrf.mxu2  ;;  %v4035_v27 = vpop.f32.mrf.mxu0 }
 0x3a9   : > { %v4033_v33 = vadd.f32 %v4032_v51, %v3944_v10  ;;  %v12294_v51 = vld [vmem:[#allocation79_spill] sm:$0xff]  ;;  %v8172_v10 = vld [vmem:[%s11913_s5 + $0x1c0] sm:$0xff] }
 0x3aa   : > { %v4124_v42 = vpop.f32.mrf.mxu1  ;;  %v3182_v30 = vrot.slane %v12294_v51, 2  ;;  %4369 = vmatpush.bf16.msra.mxu0 %v8172_v10  ;;  %v12297_v51 = vld [vmem:[#allocation6_spill] sm:$0xff] }
 0x3ab   : > { %3985 = vmatmul.bf16.gmra.mxu3 %v10512_v45  ;;  %4074 = vmatmul.bf16.gmra.mxu0 %v12291_v57  ;;  %v4122_v14 = vadd.f32 %v4121_v1, %v4033_v33 }
 0x3ac   : > { %v3183_v33 = vsel %vm1027_vm1, %v3180_v16, %v3182_v30 }
 0x3ad   : > { %4163 = vmatmul.bf16.gmra.mxu1 %v12292_v56  ;;  %4252 = vmatmul.bf16.gmra.mxu2 %v10532_v18  ;;  %v10572_v26 = vadd.f32 %v4210_v19, %v4122_v14  ;;  %v10578_v1 = vpack.c.bf16 %v3183_v33, %v3181_v4  ;;  %v12301_v4 = vld [vmem:[#allocation77_spill] sm:$0xff] }
 0x3ae   : > { %v3946_v12 = vpop.f32.mrf.mxu3 }
 0x3af   : > { %12293 = vst [vmem:[#allocation53_spill] sm:$0xff] %v10572_v26  ;;  %v3947_v11 = vadd.f32 %v3946_v12, %v12295_v58 }
 0x3b0   : > { %v4213_v48 = vpop.f32.mrf.mxu2  ;;  %v4037_v28 = vpop.f32.mrf.mxu0 }
 0x3b1   : > { %v4036_v21 = vadd.f32 %v4035_v27, %v3947_v11  ;;  %v12299_v11 = vld [vmem:[#allocation76_spill] sm:$0xff] }
 0x3b2   : > { %v4126_v46 = vpop.f32.mrf.mxu1 }
 0x3b3   : > { %v4125_v19 = vadd.f32 %v4124_v42, %v4036_v21  ;;  %v8192_v42 = vld [vmem:[%s11915_s7 + $0x20] sm:$0xff]  ;;  %v12302_v21 = vld [vmem:[#allocation11_spill] sm:$0xff] }
 0x3b4   : > { %6077 = vmatpush.bf16.msra.mxu2 %v8192_v42 }
 0x3b5   : > { %v10583_v14 = vadd.f32 %v4213_v48, %v4125_v19 }
 0x3b6   : > { %v3948_v6 = vpop.f32.mrf.mxu3 }
 0x3b7   : > { %12296 = vst [vmem:[#allocation12_spill] sm:$0xff] %v10583_v14  ;;  %v3949_v16 = vadd.f32 %v3948_v6, %v12297_v51  ;;  %v12304_v14 = vld [vmem:[#allocation19_spill] sm:$0xff] }
 0x3b8   : > { %v10589_v30 = vpop.f32.mrf.mxu2  ;;  %v4040_v27 = vpop.f32.mrf.mxu0 }
 0x3b9   : > { %12298 = vst [vmem:[#allocation21_spill] sm:$0xff] %v10589_v30  ;;  %v4038_v12 = vadd.f32 %v4037_v28, %v3949_v16 }
 0x3ba   : > { %v4129_v58 = vpop.f32.mrf.mxu1 }
 0x3bb   : > { %3990 = vmatmul.bf16.gmra.mxu3 %v10532_v18  ;;  %4079 = vmatmul.bf16.gmra.mxu0 %v12299_v11  ;;  %v10596_v48 = vadd.f32 %v4126_v46, %v4038_v12 }
 0x3bd   : > { %12300 = vst [vmem:[#allocation59_spill] sm:$0xff] %v10596_v48  ;;  %4168 = vmatmul.bf16.gmra.mxu1 %v12301_v4  ;;  %4257 = vmatmul.bf16.gmra.mxu2 %v10558_v40 }
 0x3be   : > { %v3951_v33 = vpop.f32.mrf.mxu3 }
 0x3bf   : > { %v3952_v10 = vadd.f32 %v3951_v33, %v12302_v21  ;;  %v2795_v33 = vld [vmem:[#allocation2 + $0x170] sm:$0x3] }
 0x3c0   : > { %v4218_v28 = vpop.f32.mrf.mxu2  ;;  %v4042_v19 = vpop.f32.mrf.mxu0 }
 0x3c1   : > { %v4041_v61 = vadd.f32 %v4040_v27, %v3952_v10  ;;  %v2793_v27 = vld [vmem:[#allocation2 + $0xc8] sm:$0xff] }
 0x3c2   : > { %v4131_v6 = vpop.f32.mrf.mxu1 }
 0x3c3   : > { %v4130_v51 = vadd.f32 %v4129_v58, %v4041_v61  ;;  %v2794_v58 = vld [vmem:[#allocation2 + $0x108] sm:$0xff]  ;;  %v3222_v61 = vrot.slane %v2795_v33, 1 }
 0x3c4   : > { %v10620_v18 = vpack.c.bf16 %v2794_v58, %v2793_v27 }
 0x3c5   : > { %v10601_v16 = vadd.f32 %v4218_v28, %v4130_v51 }
 0x3c6   : > { %v3953_v30 = vpop.f32.mrf.mxu3 }
 0x3c7   : > { %12303 = vst [vmem:[#allocation69_spill] sm:$0xff] %v10601_v16  ;;  %v3954_v11 = vadd.f32 %v3953_v30, %v12304_v14  ;;  %v12307_v14 = vld [vmem:[#allocation80_spill] sm:$0xff]  ;;  %v3226_v16 = vrot.slane %v2793_v27, 2 }
 0x3c8   : > { %v10604_v46 = vpop.f32.mrf.mxu2  ;;  %v4045_v12 = vpop.f32.mrf.mxu0 }
 0x3c9   : > { %12305 = vst [vmem:[#allocation5_spill] sm:$0xff] %v10604_v46  ;;  %v4043_v48 = vadd.f32 %v4042_v19, %v3954_v11  ;;  %v3219_v11 = vrot.slane %v2793_v27, 1  ;;  %v3220_v19 = vrot.slane %v2794_v58, 1 }
 0x3ca   : > { %v4134_v4 = vpop.f32.mrf.mxu1 }
 0x3cb   : > { %3995 = vmatmul.bf16.gmra.mxu3 %v10558_v40  ;;  %4084 = vmatmul.bf16.gmra.mxu0 %v10222_v8  ;;  %v10608_v42 = vadd.f32 %v4131_v6, %v4043_v48  ;;  %v3227_v48 = vrot.slane %v2794_v58, 2  ;;  %v3229_v6 = vrot.slane %v2795_v33, 2  ;;  %v3223_v40 = vsel %vm914_vm0, %v3220_v19, %v3222_v61 }
 0x3cd   : > { %12306 = vst [vmem:[#allocation10_spill] sm:$0xff] %v10608_v42  ;;  %4173 = vmatmul.bf16.gmra.mxu1 %v10224_v52  ;;  %4262 = vmatmul.bf16.gmra.mxu2 %v10578_v1  ;;  %v3221_v52 = vsel %vm914_vm0, %v3219_v11, %v3220_v19  ;;  %v3228_v26 = vsel %vm1027_vm1, %v3226_v16, %v3227_v48  ;;  %v8191_v16 = vld [vmem:[%s11915_s7 + $0x18] sm:$0xff] }
 0x3ce   : > { %v3956_v21 = vpop.f32.mrf.mxu3  ;;  %v10624_v33 = vpack.c.bf16 %v3223_v40, %v3221_v52  ;;  %6078 = vmatpush.bf16.msra.mxu2 %v8191_v16 }
 0x3cf   : > { %v3957_v30 = vadd.f32 %v3956_v21, %v12307_v14  ;;  %v3230_v21 = vsel %vm1027_vm1, %v3227_v48, %v3229_v6 }
 0x3d0   : > { %v4223_v10 = vpop.f32.mrf.mxu2  ;;  %v4047_v28 = vpop.f32.mrf.mxu0 }
 0x3d1   : > { %v4046_v51 = vadd.f32 %v4045_v12, %v3957_v30 }
 0x3d2   : > { %v4136_v46 = vpop.f32.mrf.mxu1 }
 0x3d3   : > { %v4135_v42 = vadd.f32 %v4134_v4, %v4046_v51  ;;  %v10626_v4 = vpack.c.bf16 %v3230_v21, %v3228_v26 }
 0x3d5   : > { %v10614_v8 = vadd.f32 %v4223_v10, %v4135_v42 }
 0x3d6   : > { %v3958_v14 = vpop.f32.mrf.mxu3 }
 0x3d7   : > { %v3959_v23 = vadd.f32 %v3958_v14, %v10218_v36 }
 0x3d8   : > { %v10622_v12 = vpop.f32.mrf.mxu2  ;;  %v4050_v30 = vpop.f32.mrf.mxu0 }
 0x3d9   : > { %v4048_v42 = vadd.f32 %v4047_v28, %v3959_v23 }
 0x3da   : > { %v4139_v10 = vpop.f32.mrf.mxu1 }
 0x3db   : > { %4000 = vmatmul.bf16.gmra.mxu3 %v10578_v1  ;;  %4089 = vmatmul.bf16.gmra.mxu0 %v10620_v18  ;;  %v10633_v36 = vadd.f32 %v4136_v46, %v4048_v42 }
 0x3dd   : > { %4178 = vmatmul.bf16.gmra.mxu1 %v10624_v33  ;;  %4267 = vmatmul.bf16.gmra.mxu2 %v10626_v4 }
 0x3de   : > { %v3961_v52 = vpop.f32.mrf.mxu3 }
 0x3df   : > { %v3962_v40 = vadd.f32 %v3961_v52, %v10237_v38 }
 0x3e0   : > { %v4228_v23 = vpop.f32.mrf.mxu2  ;;  %v4052_v26 = vpop.f32.mrf.mxu0 }
 0x3e1   : > { %v4051_v27 = vadd.f32 %v4050_v30, %v3962_v40 }
 0x3e2   : > { %v4141_v58 = vpop.f32.mrf.mxu1 }
 0x3e3   : > { %v4140_v28 = vadd.f32 %v4139_v10, %v4051_v27 }
 0x3e5   : > { %v10638_v11 = vadd.f32 %v4228_v23, %v4140_v28 }
 0x3e6   : > { %v3963_v19 = vpop.f32.mrf.mxu3 }
 0x3e7   : > { %v3964_v61 = vadd.f32 %v3963_v19, %v10246_v35 }
 0x3e8   : > { %v10641_v46 = vpop.f32.mrf.mxu2  ;;  %v4055_v51 = vpop.f32.mrf.mxu0 }
 0x3e9   : > { %v4053_v48 = vadd.f32 %v4052_v26, %v3964_v61 }
 0x3ea   : > { %v4144_v6 = vpop.f32.mrf.mxu1 }
 0x3eb   : > { %4281 = vmatmul.bf16.vlgmr.msra.gmra.mxu3 %v9723_v15  ;;  %4370 = vmatmul.bf16.vlgmr.msra.gmra.mxu0 %v9725_v13  ;;  %v10645_v38 = vadd.f32 %v4141_v58, %v4053_v48 }
 0x3ed   : > { %4459 = vmatmul.bf16.vlgmr.msra.gmra.mxu1 %v10239_v62  ;;  %v8190_v62 = vld [vmem:[%s11915_s7 + $0x10] sm:$0xff] }
 0x3ee   : > { %v3966_v21 = vpop.f32.mrf.mxu3  ;;  %6079 = vmatpush.bf16.msra.mxu2 %v8190_v62 }
 0x3ef   : > { %v3967_v14 = vadd.f32 %v3966_v21, %v10263_v49 }
 0x3f0   : > { %v4233_v30 = vpop.f32.mrf.mxu2  ;;  %v4057_v42 = vpop.f32.mrf.mxu0 }
 0x3f1   : > { %v4056_v10 = vadd.f32 %v4055_v51, %v3967_v14 }
 0x3f2   : > { %v4146_v35 = vpop.f32.mrf.mxu1 }
 0x3f3   : > { %v4145_v16 = vadd.f32 %v4144_v6, %v4056_v10 }
 0x3f5   : > { %v10649_v52 = vadd.f32 %v4233_v30, %v4145_v16 }
 0x3f6   : > { %v3968_v40 = vpop.f32.mrf.mxu3 }
 0x3f7   : > { %v3969_v23 = vadd.f32 %v3968_v40, %v10277_v63 }
 0x3f8   : > { %v10652_v15 = vpop.f32.mrf.mxu2  ;;  %v4060_v13 = vpop.f32.mrf.mxu0 }
 0x3f9   : > { %v4058_v26 = vadd.f32 %v4057_v42, %v3969_v23 }
 0x3fa   : > { %v4149_v27 = vpop.f32.mrf.mxu1 }
 0x3fb   : > { %4286 = vmatmul.bf16.gmra.mxu3 %v12213_v34  ;;  %4375 = vmatmul.bf16.gmra.mxu0 %v12214_v20  ;;  %v10659_v49 = vadd.f32 %v4146_v35, %v4058_v26 }
 0x3fd   : > { %4464 = vmatmul.bf16.gmra.mxu1 %v10265_v39 }
 0x3fe   : > { %v3971_v58 = vpop.f32.mrf.mxu3 }
 0x3ff   : > { %v3972_v63 = vadd.f32 %v3971_v58, %v10292_v53 }
 0x400   : > { %v4238_v28 = vpop.f32.mrf.mxu2  ;;  %v4062_v19 = vpop.f32.mrf.mxu0 }
 0x401   : > { %v4061_v61 = vadd.f32 %v4060_v13, %v3972_v63 }
 0x402   : > { %v4151_v51 = vpop.f32.mrf.mxu1 }
 0x403   : > { %v4150_v48 = vadd.f32 %v4149_v27, %v4061_v61 }
 0x405   : > { %v10663_v6 = vadd.f32 %v4238_v28, %v4150_v48 }
 0x406   : > { %v3973_v21 = vpop.f32.mrf.mxu3 }
 0x407   : > { %v3974_v34 = vadd.f32 %v3973_v21, %v10300_v0 }
 0x408   : > { %v10666_v14 = vpop.f32.mrf.mxu2  ;;  %v4065_v20 = vpop.f32.mrf.mxu0 }
 0x409   : > { %v4063_v30 = vadd.f32 %v4062_v19, %v3974_v34 }
 0x40a   : > { %v4154_v42 = vpop.f32.mrf.mxu1 }
 0x40b   : > { %4291 = vmatmul.bf16.gmra.mxu3 %v12220_v5  ;;  %4380 = vmatmul.bf16.gmra.mxu0 %v12221_v25  ;;  %v10670_v39 = vadd.f32 %v4151_v51, %v4063_v30 }
 0x40d   : > { %4469 = vmatmul.bf16.gmra.mxu1 %v10294_v32  ;;  %v8189_v32 = vld [vmem:[%s11915_s7 + $0x8] sm:$0xff] }
 0x40e   : > { %v3976_v53 = vpop.f32.mrf.mxu3  ;;  %6080 = vmatpush.bf16.msra.mxu2 %v8189_v32 }
 0x40f   : > { %v3977_v10 = vadd.f32 %v3976_v53, %v10318_v17 }
 0x410   : > { %v4243_v35 = vpop.f32.mrf.mxu2  ;;  %v4067_v16 = vpop.f32.mrf.mxu0 }
 0x411   : > { %v4066_v40 = vadd.f32 %v4065_v20, %v3977_v10  ;;  %v12309_v10 = vld [vmem:[#allocation38_spill] sm:$0xff] }
 0x412   : > { %v4156_v0 = vpop.f32.mrf.mxu1 }
 0x413   : > { %v4155_v23 = vadd.f32 %v4154_v42, %v4066_v40 }
 0x415   : > { %v10674_v13 = vadd.f32 %v4243_v35, %v4155_v23 }
 0x416   : > { %v3978_v26 = vpop.f32.mrf.mxu3 }
 0x417   : > { %v3979_v27 = vadd.f32 %v3978_v26, %v10332_v41 }
 0x418   : > { %v10677_v5 = vpop.f32.mrf.mxu2  ;;  %v4070_v25 = vpop.f32.mrf.mxu0 }
 0x419   : > { %v4068_v62 = vadd.f32 %v4067_v16, %v3979_v27 }
 0x41a   : > { %v4159_v58 = vpop.f32.mrf.mxu1 }
 0x41b   : > { %4296 = vmatmul.bf16.gmra.mxu3 %v12227_v29  ;;  %4385 = vmatmul.bf16.gmra.mxu0 %v12228_v50  ;;  %v10684_v17 = vadd.f32 %v4156_v0, %v4068_v62 }
 0x41d   : > { %4474 = vmatmul.bf16.gmra.mxu1 %v10320_v54  ;;  %v12308_v54 = vld [vmem:[#allocation42_spill] sm:$0xff] }
 0x41e   : > { %v3981_v63 = vpop.f32.mrf.mxu3 }
 0x41f   : > { %v3982_v41 = vadd.f32 %v3981_v63, %v10347_v47 }
 0x420   : > { %v4248_v28 = vpop.f32.mrf.mxu2  ;;  %v4072_v19 = vpop.f32.mrf.mxu0 }
 0x421   : > { %v4071_v61 = vadd.f32 %v4070_v25, %v3982_v41  ;;  %v12310_v25 = vld [vmem:[#allocation35_spill] sm:$0xff] }
 0x422   : > { %v4161_v51 = vpop.f32.mrf.mxu1 }
 0x423   : > { %v4160_v48 = vadd.f32 %v4159_v58, %v4071_v61 }
 0x425   : > { %v10688_v21 = vadd.f32 %v4248_v28, %v4160_v48 }
 0x426   : > { %v3983_v34 = vpop.f32.mrf.mxu3 }
 0x427   : > { %v3984_v29 = vadd.f32 %v3983_v34, %v10355_v3 }
 0x428   : > { %v10691_v20 = vpop.f32.mrf.mxu2  ;;  %v4075_v50 = vpop.f32.mrf.mxu0 }
 0x429   : > { %v4073_v30 = vadd.f32 %v4072_v19, %v3984_v29 }
 0x42a   : > { %v4164_v42 = vpop.f32.mrf.mxu1 }
 0x42b   : > { %4301 = vmatmul.bf16.gmra.mxu3 %v12236_v2  ;;  %4390 = vmatmul.bf16.gmra.mxu0 %v12308_v54  ;;  %v10695_v47 = vadd.f32 %v4161_v51, %v4073_v30 }
 0x42d   : > { %4479 = vmatmul.bf16.gmra.mxu1 %v10349_v7  ;;  %v8188_v7 = vld [vmem:[%s11915_s7] sm:$0xff] }
 0x42e   : > { %v3986_v53 = vpop.f32.mrf.mxu3  ;;  %6081 = vmatpush.bf16.msra.mxu2 %v8188_v7  ;;  %v12320_v7 = vld [vmem:[#allocation9_spill] sm:$0xff] }
 0x42f   : > { %v3987_v35 = vadd.f32 %v3986_v53, %v12309_v10 }
 0x430   : > { %v4253_v16 = vpop.f32.mrf.mxu2  ;;  %v4077_v40 = vpop.f32.mrf.mxu0 }
 0x431   : > { %v4076_v0 = vadd.f32 %v4075_v50, %v3987_v35  ;;  %v12315_v35 = vld [vmem:[#allocation45_spill] sm:$0xff] }
 0x432   : > { %v4166_v3 = vpop.f32.mrf.mxu1 }
 0x433   : > { %v4165_v23 = vadd.f32 %v4164_v42, %v4076_v0 }
 0x435   : > { %v10699_v26 = vadd.f32 %v4253_v16, %v4165_v23 }
 0x436   : > { %v3988_v27 = vpop.f32.mrf.mxu3 }
 0x437   : > { %v3989_v62 = vadd.f32 %v3988_v27, %v12310_v25 }
 0x438   : > { %v10702_v2 = vpop.f32.mrf.mxu2  ;;  %v4080_v58 = vpop.f32.mrf.mxu0 }
 0x439   : > { %12311 = vst [vmem:[#allocation15_spill] sm:$0xff] %v10702_v2  ;;  %v4078_v32 = vadd.f32 %v4077_v40, %v3989_v62 }
 0x43a   : > { %v4169_v63 = vpop.f32.mrf.mxu1 }
 0x43b   : > { %4306 = vmatmul.bf16.gmra.mxu3 %v9885_v55  ;;  %4395 = vmatmul.bf16.gmra.mxu0 %v9887_v31  ;;  %v10709_v41 = vadd.f32 %v4166_v3, %v4078_v32 }
 0x43d   : > { %4484 = vmatmul.bf16.gmra.mxu1 %v10375_v9  ;;  %v10718_v9 = vld [vmem:[#allocation2 + $0x98] sm:$0xff] }
 0x43e   : > { %v3991_v28 = vpop.f32.mrf.mxu3  ;;  %v10721_v10 = vrot.slane %v10718_v9, 7 }
 0x43f   : > { %v3992_v19 = vadd.f32 %v3991_v28, %v10402_v44  ;;  %v12314_v44 = vld [vmem:[#allocation44_spill] sm:$0xff] }
 0x440   : > { %v4258_v61 = vpop.f32.mrf.mxu2  ;;  %v4082_v51 = vpop.f32.mrf.mxu0  ;;  %v10731_v23 = vpack.c.bf16 %v10721_v10, %v10721_v10 }
 0x441   : > { %v4081_v48 = vadd.f32 %v4080_v58, %v3992_v19 }
 0x442   : > { %v4171_v34 = vpop.f32.mrf.mxu1  ;;  %12318 = vst [vmem:[#allocation65_spill] sm:$0xff] %v10731_v23  ;;  %6082 = vmatmul.bf16.vlgmr.msra.gmra.mxu2 %v10731_v23 }
 0x443   : > { %v4170_v29 = vadd.f32 %v4169_v63, %v4081_v48  ;;  %v8203_v48 = vld [vmem:[%s11915_s7 + $0x78] sm:$0xff] }
 0x444   : > { %6163 = vmatpush.bf16.msrb.mxu3 %v8203_v48 }
 0x445   : > { %v10713_v50 = vadd.f32 %v4258_v61, %v4170_v29  ;;  %v12323_v29 = vld [vmem:[#allocation36_spill] sm:$0xff] }
 0x446   : > { %v3993_v30 = vpop.f32.mrf.mxu3 }
 0x447   : > { %12312 = vst [vmem:[#allocation22_spill] sm:$0xff] %v10713_v50  ;;  %v3994_v55 = vadd.f32 %v3993_v30, %v10410_v43  ;;  %v12317_v43 = vld [vmem:[#allocation23_spill] sm:$0xff] }
 0x448   : > { %v10716_v42 = vpop.f32.mrf.mxu2  ;;  %v4085_v31 = vpop.f32.mrf.mxu0 }
 0x449   : > { %12313 = vst [vmem:[#allocation74_spill] sm:$0xff] %v10716_v42  ;;  %v4083_v54 = vadd.f32 %v4082_v51, %v3994_v55  ;;  %v12324_v55 = vld [vmem:[#allocation41_spill] sm:$0xff]  ;;  %v12362_v42 = vld [vmem:[#allocation59_spill] sm:$0xff] }
 0x44a   : > { %v4174_v53 = vpop.f32.mrf.mxu1 }
 0x44b   : > { %4311 = vmatmul.bf16.gmra.mxu3 %v12314_v44  ;;  %4400 = vmatmul.bf16.gmra.mxu0 %v12315_v35  ;;  %v10725_v16 = vadd.f32 %v4171_v34, %v4083_v54  ;;  %v8227_v35 = vld [vmem:[%s11915_s7 + $0x138] sm:$0xff] }
 0x44c   : > { %6430 = vmatpush.bf16.msrb.mxu2 %v8227_v35 }
 0x44d   : > { %12316 = vst [vmem:[#allocation63_spill] sm:$0xff] %v10725_v16  ;;  %4489 = vmatmul.bf16.gmra.mxu1 %v10404_v37  ;;  %v12366_v16 = vld [vmem:[#allocation82_spill] sm:$0xff] }
 0x44e   : > { %v3996_v40 = vpop.f32.mrf.mxu3 }
 0x44f   : > { %v3997_v0 = vadd.f32 %v3996_v40, %v12317_v43 }
 0x450   : > { %v4263_v3 = vpop.f32.mrf.mxu2  ;;  %v4087_v27 = vpop.f32.mrf.mxu0 }
 0x451   : > { %v4086_v25 = vadd.f32 %v4085_v31, %v3997_v0 }
 0x452   : > { %v4176_v62 = vpop.f32.mrf.mxu1 }
 0x453   : > { %v4175_v58 = vadd.f32 %v4174_v53, %v4086_v25 }
 0x455   : > { %v10734_v32 = vadd.f32 %v4263_v3, %v4175_v58 }
 0x456   : > { %v3998_v63 = vpop.f32.mrf.mxu3 }
 0x457   : > { %12319 = vst [vmem:[#allocation71_spill] sm:$0xff] %v10734_v32  ;;  %v3999_v28 = vadd.f32 %v3998_v63, %v12320_v7  ;;  %v12327_v7 = vld [vmem:[#allocation54_spill] sm:$0xff] }
 0x458   : > { %v4090_v37 = vpop.f32.mrf.mxu0  ;;  %v10737_v19 = vpop.f32.mrf.mxu2 }
 0x459   : > { %12321 = vst [vmem:[#allocation72_spill] sm:$0xff] %v10737_v19  ;;  %v4088_v61 = vadd.f32 %v4087_v27, %v3999_v28  ;;  %v12326_v27 = vld [vmem:[#allocation17_spill] sm:$0xff]  ;;  %v12328_v28 = vld [vmem:[#allocation55_spill] sm:$0xff] }
 0x45a   : > { %v4179_v51 = vpop.f32.mrf.mxu1 }
 0x45b   : > { %4316 = vmatmul.bf16.gmra.mxu3 %v9962_v59  ;;  %4405 = vmatmul.bf16.gmra.mxu0 %v12258_v60  ;;  %v10744_v34 = vadd.f32 %v4176_v62, %v4088_v61  ;;  %v8211_v59 = vld [vmem:[%s11915_s7 + $0xb8] sm:$0xff] }
 0x45c   : > { %v8219_v60 = vld [vmem:[%s11915_s7 + $0xf8] sm:$0xff]  ;;  %6252 = vmatpush.bf16.msrb.mxu0 %v8211_v59  ;;  %v12332_v59 = vld [vmem:[#allocation43_spill] sm:$0xff] }
 0x45d   : > { %12322 = vst [vmem:[#allocation79_spill] sm:$0xff] %v10744_v34  ;;  %4494 = vmatmul.bf16.gmra.mxu1 %v12323_v29 }
 0x45e   : > { %v4001_v30 = vpop.f32.mrf.mxu3  ;;  %6341 = vmatpush.bf16.msrb.mxu1 %v8219_v60 }
 0x45f   : > { %v4002_v31 = vadd.f32 %v4001_v30, %v12324_v55 }
 0x460   : > { %v4092_v54 = vpop.f32.mrf.mxu0  ;;  %v4268_v40 = vpop.f32.mrf.mxu2 }
 0x461   : > { %v4091_v53 = vadd.f32 %v4090_v37, %v4002_v31 }
 0x462   : > { %v4181_v44 = vpop.f32.mrf.mxu1 }
 0x463   : > { %v4180_v43 = vadd.f32 %v4179_v51, %v4091_v53  ;;  %v12330_v51 = vld [vmem:[#allocation24_spill] sm:$0xff] }
 0x464   : > { %v12331_v53 = vld [vmem:[#allocation48_spill] sm:$0xff] }
 0x465   : > { %v10757_v0 = vadd.f32 %v4268_v40, %v4180_v43  ;;  %v2464_v35 = vmax.f32 %v12331_v53, 0.0  ;;  %v4604_v43 = vld [vmem:[%s10773_s15] sm:$0xff] }
 0x466   : > { %v4003_v3 = vpop.f32.mrf.mxu3 }
 0x467   : > { %12325 = vst [vmem:[#allocation14_spill] sm:$0xff] %v10757_v0  ;;  %v4004_v25 = vadd.f32 %v4003_v3, %v12326_v27 }
 0x468   : > { %v4371_v62 = vpop.f32.mrf.mxu0 }
 0x469   : > { %v4093_v58 = vadd.f32 %v4092_v54, %v4004_v25  ;;  %v8202_v25 = vld [vmem:[%s11915_s7 + $0x70] sm:$0xff] }
 0x46a   : > { %v4460_v63 = vpop.f32.mrf.mxu1  ;;  %6164 = vmatpush.bf16.msrb.mxu3 %v8202_v25 }
 0x46b   : > { %4321 = vmatmul.bf16.gmra.mxu3 %v12327_v7  ;;  %4410 = vmatmul.bf16.gmra.mxu0 %v12328_v28  ;;  %v10762_v37 = vadd.f32 %v4181_v44, %v4093_v58  ;;  %v12333_v58 = vld [vmem:[#allocation60_spill] sm:$0xff]  ;;  %v12335_v28 = vld [vmem:[#allocation50_spill] sm:$0xff] }
 0x46c   : > { %v12334_v7 = vld [vmem:[#allocation16_spill] sm:$0xff] }
 0x46d   : > { %12329 = vst [vmem:[#allocation6_spill] sm:$0xff] %v10762_v37  ;;  %4499 = vmatmul.bf16.gmra.mxu1 %v10464_v22 }
 0x46e   : > { %v4282_v61 = vpop.f32.mrf.mxu3 }
 0x46f   : > { %v4283_v48 = vadd.f32 %v4282_v61, %v12330_v51  ;;  %v2465_v61 = vmax.f32 %v12335_v28, 0.0 }
 0x470   : > { %v4373_v29 = vpop.f32.mrf.mxu0 }
 0x471   : > { %v4372_v30 = vadd.f32 %v4371_v62, %v4283_v48  ;;  %v4605_v48 = vld [vmem:[%s10773_s15 + $0x8] sm:$0xff] }
 0x472   : > { %v4462_v55 = vpop.f32.mrf.mxu1 }
 0x473   : > { %v4461_v31 = vadd.f32 %v4460_v63, %v4372_v30 }
 0x475   : > { %v4540_v54 = vmax.f32 %v4461_v31, 0.0  ;;  %v12336_v31 = vld [vmem:[#allocation46_spill] sm:$0xff] }
 0x476   : > { %v4284_v44 = vpop.f32.mrf.mxu3 }
 0x477   : > { %v4572_v22 = vadd.f32 %v4540_v54, %v2464_v35  ;;  %v4285_v60 = vadd.f32 %v4284_v44, %v12332_v59 }
 0x478   : > { %v4376_v40 = vpop.f32.mrf.mxu0 }
 0x479   : > { %v4374_v3 = vadd.f32 %v4373_v29, %v4285_v60  ;;  %v4636_v63 = vadd.f32 %v4604_v43, %v4572_v22  ;;  %v8226_v22 = vld [vmem:[%s11915_s7 + $0x130] sm:$0xff] }
 0x47a   : > { %v4465_v27 = vpop.f32.mrf.mxu1  ;;  %v8210_v43 = vld [vmem:[%s11915_s7 + $0xb0] sm:$0xff]  ;;  %6431 = vmatpush.bf16.msrb.mxu2 %v8226_v22 }
 0x47b   : > { %v4463_v62 = vadd.f32 %v4462_v55, %v4374_v3  ;;  %4326 = vmatmul.bf16.gmra.mxu3 %v12273_v24  ;;  %4415 = vmatmul.bf16.gmra.mxu0 %v12333_v58  ;;  %v5217_v54 = vrot.slane %v4636_v63, 7  ;;  %v5025_v44 = vrot.slane %v4636_v63, 1  ;;  %v5091_v55 = vrot.slane %v4636_v63, 2  ;;  %v8218_v3 = vld [vmem:[%s11915_s7 + $0xf0] sm:$0xff] }
 0x47c   : > { %6253 = vmatpush.bf16.msrb.mxu0 %v8210_v43  ;;  %v12337_v63 = vld [vmem:[#allocation52_spill] sm:$0xff]  ;;  %6342 = vmatpush.bf16.msrb.mxu1 %v8218_v3  ;;  %v12339_v3 = vld [vmem:[#allocation49_spill] sm:$0xff] }
 0x47d   : > { %4504 = vmatmul.bf16.gmra.mxu1 %v12334_v7  ;;  %v4541_v51 = vmax.f32 %v4463_v62, 0.0  ;;  %v2466_v7 = vmax.f32 %v12337_v63, 0.0  ;;  %v5218_v28 = vsel %vm5206_vm2, %v10721_v10, %v5217_v54  ;;  %v12338_v22 = vld [vmem:[#allocation4_spill] sm:$0xff] }
 0x47e   : > { %v4287_v30 = vpop.f32.mrf.mxu3 }
 0x47f   : > { %v4573_v29 = vadd.f32 %v4541_v51, %v2465_v61  ;;  %v4288_v53 = vadd.f32 %v4287_v30, %v12336_v31  ;;  %v5219_v61 = vrot.slane %v5025_v44, 7  ;;  %v5222_v51 = vrot.slane %v5091_v55, 7 }
 0x480   : > { %v4378_v35 = vpop.f32.mrf.mxu0 }
 0x481   : > { %v4637_v59 = vadd.f32 %v4605_v48, %v4573_v29  ;;  %v4377_v24 = vadd.f32 %v4376_v40, %v4288_v53 }
 0x482   : > { %v4467_v60 = vpop.f32.mrf.mxu1 }
 0x483   : > { %v4466_v25 = vadd.f32 %v4465_v27, %v4377_v24  ;;  %v5240_v62 = vrot.slane %v4637_v59, 7  ;;  %v5026_v58 = vrot.slane %v4637_v59, 1  ;;  %v5092_v40 = vrot.slane %v4637_v59, 2 }
 0x485   : > { %v4542_v48 = vmax.f32 %v4466_v25, 0.0  ;;  %v5241_v30 = vsel %vm5206_vm2, %v5217_v54, %v5240_v62  ;;  %v5027_v29 = vsel %vm914_vm0, %v5025_v44, %v5026_v58  ;;  %v5242_v27 = vrot.slane %v5026_v58, 7  ;;  %v4606_v62 = vld [vmem:[%s10773_s15 + $0x10] sm:$0xff] }
 0x486   : > { %v4289_v31 = vpop.f32.mrf.mxu3  ;;  %v10800_v53 = vpack.c.bf16 %v5241_v30, %v5218_v28  ;;  %v5220_v24 = vrot.slane %v5027_v29, 7  ;;  %v5093_v59 = vsel %vm1027_vm1, %v5091_v55, %v5092_v40  ;;  %v5095_v43 = vsel %vm1027_vm1, %v5092_v40, %v12338_v22  ;;  %v12340_v30 = vld [vmem:[#allocation66_spill] sm:$0xff]  ;;  %v12341_v29 = vld [vmem:[#allocation67_spill] sm:$0xff] }
 0x487   : > { %v4574_v63 = vadd.f32 %v4542_v48, %v2466_v7  ;;  %v4290_v23 = vadd.f32 %v4289_v31, %v12339_v3  ;;  %v5223_v37 = vrot.slane %v5093_v59, 7  ;;  %v5244_v25 = vrot.slane %v5095_v43, 7  ;;  %v12344_v3 = vld [vmem:[#allocation25_spill] sm:$0xff] }
 0x488   : > { %v4381_v0 = vpop.f32.mrf.mxu0  ;;  %6087 = vmatmul.bf16.gmra.mxu2 %v10800_v53  ;;  %v5221_v54 = vsel %vm5206_vm2, %v5219_v61, %v5220_v24  ;;  %v5243_v44 = vsel %vm5206_vm2, %v5220_v24, %v5242_v27  ;;  %v12343_v27 = vld [vmem:[#allocation56_spill] sm:$0xff] }
 0x489   : > { %v4379_v58 = vadd.f32 %v4378_v35, %v4290_v23  ;;  %v10810_v55 = vpack.c.bf16 %v5243_v44, %v5221_v54  ;;  %v5224_v40 = vsel %vm5206_vm2, %v5222_v51, %v5223_v37  ;;  %v5245_v7 = vsel %vm5206_vm2, %v5223_v37, %v5244_v25  ;;  %v4607_v35 = vld [vmem:[%s10773_s15 + $0x18] sm:$0xff] }
 0x48a   : > { %v4470_v28 = vpop.f32.mrf.mxu1  ;;  %v10816_v31 = vpack.c.bf16 %v5245_v7, %v5224_v40  ;;  %v4638_v61 = vadd.f32 %v4606_v62, %v4574_v63  ;;  %v2467_v24 = vmax.f32 %v12343_v27, 0.0 }
 0x48b   : > { %v4468_v48 = vadd.f32 %v4467_v60, %v4379_v58  ;;  %4331 = vmatmul.bf16.gmra.mxu3 %v12340_v30  ;;  %4420 = vmatmul.bf16.gmra.mxu0 %v12341_v29 }
 0x48c   : > { %12342 = vst [vmem:[#allocation11_spill] sm:$0xff] %v10816_v31  ;;  %v5226_v37 = vrot.slane %v4638_v61, 7  ;;  %v5028_v60 = vrot.slane %v4638_v61, 1  ;;  %v5096_v25 = vrot.slane %v4638_v61, 2 }
 0x48d   : > { %4509 = vmatmul.bf16.gmra.mxu1 %v10512_v45  ;;  %v4543_v23 = vmax.f32 %v4468_v48, 0.0  ;;  %v12345_v45 = vld [vmem:[#allocation58_spill] sm:$0xff] }
 0x48e   : > { %v4292_v59 = vpop.f32.mrf.mxu3  ;;  %v2468_v29 = vmax.f32 %v12345_v45, 0.0  ;;  %v5227_v48 = vsel %vm5206_vm2, %v10721_v10, %v5226_v37  ;;  %v5228_v27 = vrot.slane %v5028_v60, 7 }
 0x48f   : > { %v4575_v43 = vadd.f32 %v4543_v23, %v2467_v24  ;;  %v4293_v51 = vadd.f32 %v4292_v59, %v12344_v3  ;;  %v5231_v24 = vrot.slane %v5096_v25, 7 }
 0x490   : > { %v4383_v54 = vpop.f32.mrf.mxu0 }
 0x491   : > { %v4639_v44 = vadd.f32 %v4607_v35, %v4575_v43  ;;  %v4382_v58 = vadd.f32 %v4381_v0, %v4293_v51 }
 0x492   : > { %v4472_v30 = vpop.f32.mrf.mxu1 }
 0x493   : > { %v4471_v40 = vadd.f32 %v4470_v28, %v4382_v58  ;;  %v5246_v7 = vrot.slane %v4639_v44, 7  ;;  %v5029_v63 = vrot.slane %v4639_v44, 1  ;;  %v5097_v62 = vrot.slane %v4639_v44, 2  ;;  %v12347_v58 = vld [vmem:[#allocation20_spill] sm:$0xff] }
 0x495   : > { %v4544_v23 = vmax.f32 %v4471_v40, 0.0  ;;  %v5247_v59 = vsel %vm5206_vm2, %v5226_v37, %v5246_v7  ;;  %v5030_v61 = vsel %vm914_vm0, %v5028_v60, %v5029_v63  ;;  %v5248_v35 = vrot.slane %v5029_v63, 7  ;;  %v4608_v7 = vld [vmem:[%s10773_s15 + $0x20] sm:$0xff] }
 0x496   : > { %v4294_v0 = vpop.f32.mrf.mxu3  ;;  %v10827_v43 = vpack.c.bf16 %v5247_v59, %v5227_v48  ;;  %v5229_v28 = vrot.slane %v5030_v61, 7  ;;  %v5098_v3 = vsel %vm1027_vm1, %v5096_v25, %v5097_v62  ;;  %v5100_v51 = vsel %vm1027_vm1, %v5097_v62, %v12338_v22  ;;  %v8201_v25 = vld [vmem:[%s11915_s7 + $0x68] sm:$0xff] }
 0x497   : > { %v4576_v44 = vadd.f32 %v4544_v23, %v2468_v29  ;;  %v4295_v45 = vadd.f32 %v4294_v0, %v12347_v58  ;;  %v5232_v19 = vrot.slane %v5098_v3, 7  ;;  %v5250_v40 = vrot.slane %v5100_v51, 7  ;;  %6165 = vmatpush.bf16.msrb.mxu3 %v8201_v25  ;;  %v4609_v3 = vld [vmem:[%s10773_s15 + $0x28] sm:$0xff] }
 0x498   : > { %12346 = vst [vmem:[#allocation19_spill] sm:$0xff] %v10827_v43  ;;  %v4386_v34 = vpop.f32.mrf.mxu0  ;;  %6092 = vmatmul.bf16.gmra.mxu2 %v10827_v43  ;;  %v5230_v37 = vsel %vm5206_vm2, %v5228_v27, %v5229_v28  ;;  %v5249_v60 = vsel %vm5206_vm2, %v5229_v28, %v5248_v35  ;;  %v12350_v35 = vld [vmem:[#allocation61_spill] sm:$0xff] }
 0x499   : > { %v4384_v63 = vadd.f32 %v4383_v54, %v4295_v45  ;;  %v10840_v62 = vpack.c.bf16 %v5249_v60, %v5230_v37  ;;  %v5233_v29 = vsel %vm5206_vm2, %v5231_v24, %v5232_v19  ;;  %v5251_v23 = vsel %vm5206_vm2, %v5232_v19, %v5250_v40  ;;  %v12349_v54 = vld [vmem:[#allocation57_spill] sm:$0xff]  ;;  %v12351_v24 = vld [vmem:[#allocation51_spill] sm:$0xff] }
 0x49a   : > { %v4475_v48 = vpop.f32.mrf.mxu1  ;;  %v10846_v27 = vpack.c.bf16 %v5251_v23, %v5233_v29  ;;  %v4640_v61 = vadd.f32 %v4608_v7, %v4576_v44  ;;  %v2469_v0 = vmax.f32 %v12350_v35, 0.0  ;;  %v8225_v44 = vld [vmem:[%s11915_s7 + $0x128] sm:$0xff] }
 0x49b   : > { %v4473_v59 = vadd.f32 %v4472_v30, %v4384_v63  ;;  %4336 = vmatmul.bf16.gmra.mxu3 %v12291_v57  ;;  %4425 = vmatmul.bf16.gmra.mxu0 %v12292_v56  ;;  %v8209_v7 = vld [vmem:[%s11915_s7 + $0xa8] sm:$0xff] }
 0x49c   : > { %12348 = vst [vmem:[#allocation80_spill] sm:$0xff] %v10846_v27  ;;  %v5253_v30 = vrot.slane %v4640_v61, 7  ;;  %v5031_v40 = vrot.slane %v4640_v61, 1  ;;  %v5101_v57 = vrot.slane %v4640_v61, 2  ;;  %v8217_v63 = vld [vmem:[%s11915_s7 + $0xe8] sm:$0xff]  ;;  %6432 = vmatpush.bf16.msrb.mxu2 %v8225_v44  ;;  %6254 = vmatpush.bf16.msrb.mxu0 %v8209_v7  ;;  %v12354_v7 = vld [vmem:[#allocation53_spill] sm:$0xff] }
 0x49d   : > { %4514 = vmatmul.bf16.gmra.mxu1 %v12349_v54  ;;  %v4545_v28 = vmax.f32 %v4473_v59, 0.0 }
 0x49e   : > { %v4297_v51 = vpop.f32.mrf.mxu3  ;;  %v5254_v54 = vsel %vm5206_vm2, %v10721_v10, %v5253_v30  ;;  %6343 = vmatpush.bf16.msrb.mxu1 %v8217_v63  ;;  %v5255_v35 = vrot.slane %v5031_v40, 7 }
 0x49f   : > { %v4577_v58 = vadd.f32 %v4545_v28, %v2469_v0  ;;  %v4298_v45 = vadd.f32 %v4297_v51, %v12351_v24  ;;  %v5258_v0 = vrot.slane %v5101_v57, 7 }
 0x4a0   : > { %v4388_v19 = vpop.f32.mrf.mxu0 }
 0x4a1   : > { %v4641_v37 = vadd.f32 %v4609_v3, %v4577_v58  ;;  %v4387_v56 = vadd.f32 %v4386_v34, %v4298_v45  ;;  %v12352_v34 = vld [vmem:[#allocation64_spill] sm:$0xff] }
 0x4a2   : > { %v4477_v60 = vpop.f32.mrf.mxu1  ;;  %v2470_v61 = vmax.f32 %v12352_v34, 0.0 }
 0x4a3   : > { %v4476_v25 = vadd.f32 %v4475_v48, %v4387_v56  ;;  %v5261_v29 = vrot.slane %v4641_v37, 7  ;;  %v5032_v23 = vrot.slane %v4641_v37, 1  ;;  %v5102_v59 = vrot.slane %v4641_v37, 2 }
 0x4a5   : > { %v4546_v28 = vmax.f32 %v4476_v25, 0.0  ;;  %v5262_v3 = vsel %vm5206_vm2, %v5253_v30, %v5261_v29  ;;  %v5033_v51 = vsel %vm914_vm0, %v5031_v40, %v5032_v23  ;;  %v5263_v48 = vrot.slane %v5032_v23, 7  ;;  %v4610_v29 = vld [vmem:[%s10773_s15 + $0x30] sm:$0xff] }
 0x4a6   : > { %v4299_v58 = vpop.f32.mrf.mxu3  ;;  %v10866_v24 = vpack.c.bf16 %v5262_v3, %v5254_v54  ;;  %v5256_v45 = vrot.slane %v5033_v51, 7  ;;  %v5103_v37 = vsel %vm1027_vm1, %v5101_v57, %v5102_v59  ;;  %v5105_v56 = vsel %vm1027_vm1, %v5102_v59, %v12338_v22  ;;  %v12355_v3 = vld [vmem:[#allocation76_spill] sm:$0xff]  ;;  %v12356_v51 = vld [vmem:[#allocation77_spill] sm:$0xff] }
 0x4a7   : > { %v4578_v44 = vadd.f32 %v4546_v28, %v2470_v61  ;;  %v4300_v63 = vadd.f32 %v4299_v58, %v12354_v7  ;;  %v5259_v34 = vrot.slane %v5103_v37, 7  ;;  %v5265_v25 = vrot.slane %v5105_v56, 7  ;;  %v12358_v37 = vld [vmem:[#allocation62_spill] sm:$0xff]  ;;  %v4611_v56 = vld [vmem:[%s10773_s15 + $0x38] sm:$0xff] }
 0x4a8   : > { %12353 = vst [vmem:[#allocation42_spill] sm:$0xff] %v10866_v24  ;;  %v4391_v32 = vpop.f32.mrf.mxu0  ;;  %6097 = vmatmul.bf16.gmra.mxu2 %v10866_v24  ;;  %v5257_v30 = vsel %vm5206_vm2, %v5255_v35, %v5256_v45  ;;  %v5264_v40 = vsel %vm5206_vm2, %v5256_v45, %v5263_v48  ;;  %v12359_v48 = vld [vmem:[#allocation68_spill] sm:$0xff] }
 0x4a9   : > { %v4389_v23 = vadd.f32 %v4388_v19, %v4300_v63  ;;  %v10876_v57 = vpack.c.bf16 %v5264_v40, %v5257_v30  ;;  %v5260_v59 = vsel %vm5206_vm2, %v5258_v0, %v5259_v34  ;;  %v5266_v61 = vsel %vm5206_vm2, %v5259_v34, %v5265_v25  ;;  %v12360_v30 = vld [vmem:[#allocation12_spill] sm:$0xff] }
 0x4aa   : > { %v4480_v54 = vpop.f32.mrf.mxu1  ;;  %v10882_v58 = vpack.c.bf16 %v5266_v61, %v5260_v59  ;;  %v4642_v35 = vadd.f32 %v4610_v29, %v4578_v44  ;;  %v2471_v45 = vmax.f32 %v12359_v48, 0.0  ;;  %v12361_v29 = vld [vmem:[#allocation70_spill] sm:$0xff]  ;;  %v12363_v48 = vld [vmem:[#allocation21_spill] sm:$0xff] }
 0x4ab   : > { %v4478_v28 = vadd.f32 %v4477_v60, %v4389_v23  ;;  %4341 = vmatmul.bf16.gmra.mxu3 %v12355_v3  ;;  %4430 = vmatmul.bf16.gmra.mxu0 %v12356_v51 }
 0x4ac   : > { %12357 = vst [vmem:[#allocation38_spill] sm:$0xff] %v10882_v58  ;;  %v5268_v34 = vrot.slane %v4642_v35, 7  ;;  %v5034_v3 = vrot.slane %v4642_v35, 1 }
 0x4ad   : > { %4519 = vmatmul.bf16.gmra.mxu1 %v12358_v37  ;;  %v4547_v19 = vmax.f32 %v4478_v28, 0.0  ;;  %v2472_v37 = vmax.f32 %v12361_v29, 0.0  ;;  %v4216_v28 = vadd.f32 %v12363_v48, %v12362_v42 }
 0x4ae   : > { %v4302_v7 = vpop.f32.mrf.mxu3 }
 0x4af   : > { %v4579_v63 = vadd.f32 %v4547_v19, %v2471_v45  ;;  %v4303_v0 = vadd.f32 %v4302_v7, %v12360_v30  ;;  %v5269_v45 = vsel %vm5206_vm2, %v10721_v10, %v5268_v34  ;;  %v5106_v19 = vrot.slane %v4642_v35, 2  ;;  %v8200_v35 = vld [vmem:[%s11915_s7 + $0x60] sm:$0xff] }
 0x4b0   : > { %v4393_v40 = vpop.f32.mrf.mxu0  ;;  %6166 = vmatpush.bf16.msrb.mxu3 %v8200_v35  ;;  %v4613_v35 = vld [vmem:[%s10773_s15 + $0x48] sm:$0xff] }
 0x4b1   : > { %v4643_v60 = vadd.f32 %v4611_v56, %v4579_v63  ;;  %v4392_v25 = vadd.f32 %v4391_v32, %v4303_v0  ;;  %v5270_v0 = vrot.slane %v5034_v3, 7 }
 0x4b2   : > { %v4482_v23 = vpop.f32.mrf.mxu1 }
 0x4b3   : > { %v4481_v51 = vadd.f32 %v4480_v54, %v4392_v25  ;;  %v5276_v59 = vrot.slane %v4643_v60, 7  ;;  %v5035_v61 = vrot.slane %v4643_v60, 1  ;;  %v5107_v44 = vrot.slane %v4643_v60, 2 }
 0x4b5   : > { %v4548_v7 = vmax.f32 %v4481_v51, 0.0  ;;  %v5277_v30 = vsel %vm5206_vm2, %v5268_v34, %v5276_v59  ;;  %v5036_v32 = vsel %vm914_vm0, %v5034_v3, %v5035_v61  ;;  %v5278_v56 = vrot.slane %v5035_v61, 7  ;;  %v8208_v34 = vld [vmem:[%s11915_s7 + $0xa0] sm:$0xff] }
 0x4b6   : > { %v4304_v54 = vpop.f32.mrf.mxu3  ;;  %v10895_v63 = vpack.c.bf16 %v5277_v30, %v5269_v45  ;;  %v5271_v60 = vrot.slane %v5036_v32, 7  ;;  %v5108_v25 = vsel %vm1027_vm1, %v5106_v19, %v5107_v44  ;;  %v8216_v3 = vld [vmem:[%s11915_s7 + $0xe0] sm:$0xff]  ;;  %6255 = vmatpush.bf16.msrb.mxu0 %v8208_v34  ;;  %v5110_v45 = vsel %vm1027_vm1, %v5107_v44, %v12338_v22  ;;  %v8215_v44 = vld [vmem:[%s11915_s7 + $0xd8] sm:$0xff] }
 0x4b7   : > { %v4580_v29 = vadd.f32 %v4548_v7, %v2472_v37  ;;  %v4305_v42 = vadd.f32 %v4304_v54, %v4216_v28  ;;  %v4612_v37 = vld [vmem:[%s10773_s15 + $0x40] sm:$0xff]  ;;  %v5274_v7 = vrot.slane %v5108_v25, 7  ;;  %6344 = vmatpush.bf16.msrb.mxu1 %v8216_v3  ;;  %v5273_v30 = vrot.slane %v5106_v19, 7  ;;  %v12365_v54 = vld [vmem:[#allocation7_spill] sm:$0xff] }
 0x4b8   : > { %12364 = vst [vmem:[#allocation35_spill] sm:$0xff] %v10895_v63  ;;  %v4396_v51 = vpop.f32.mrf.mxu0  ;;  %6102 = vmatmul.bf16.gmra.mxu2 %v10895_v63  ;;  %v5272_v59 = vsel %vm5206_vm2, %v5270_v0, %v5271_v60  ;;  %v5279_v61 = vsel %vm5206_vm2, %v5271_v60, %v5278_v56  ;;  %v8199_v56 = vld [vmem:[%s11915_s7 + $0x58] sm:$0xff]  ;;  %v5280_v19 = vrot.slane %v5110_v45, 7 }
 0x4b9   : > { %v4394_v48 = vadd.f32 %v4393_v40, %v4305_v42  ;;  %v8207_v40 = vld [vmem:[%s11915_s7 + $0x98] sm:$0xff]  ;;  %v10924_v0 = vadd.f32 %v4612_v37, %v4580_v29  ;;  %6167 = vmatpush.bf16.msrb.mxu3 %v8199_v56 }
 0x4ba   : > { %v4485_v28 = vpop.f32.mrf.mxu1  ;;  %v12367_v60 = vld [vmem:[#allocation73_spill] sm:$0xff]  ;;  %6256 = vmatpush.bf16.msrb.mxu0 %v8207_v40  ;;  %v5281_v3 = vsel %vm5206_vm2, %v5274_v7, %v5280_v19 }
 0x4bb   : > { %v4483_v32 = vadd.f32 %v4482_v23, %v4394_v48  ;;  %4346 = vmatmul.bf16.gmra.mxu3 %v12365_v54  ;;  %4435 = vmatmul.bf16.gmra.mxu0 %v12366_v16  ;;  %v10927_v23 = vpack.c.bf16 %v5279_v61, %v5272_v59  ;;  %v5275_v16 = vsel %vm5206_vm2, %v5273_v30, %v5274_v7  ;;  %v2473_v25 = vmax.f32 %v12367_v60, 0.0  ;;  %v12368_v29 = vld [vmem:[#allocation69_spill] sm:$0xff]  ;;  %v8206_v59 = vld [vmem:[%s11915_s7 + $0x90] sm:$0xff] }
 0x4bc   : > { %6345 = vmatpush.bf16.msrb.mxu1 %v8215_v44  ;;  %v10940_v61 = vpack.c.bf16 %v5281_v3, %v5275_v16  ;;  %v5283_v30 = vrot.slane %v10924_v0, 7  ;;  %v8214_v7 = vld [vmem:[%s11915_s7 + $0xd0] sm:$0xff]  ;;  %v8224_v44 = vld [vmem:[%s11915_s7 + $0x120] sm:$0xff]  ;;  %v12370_v16 = vld [vmem:[#allocation75_spill] sm:$0xff] }
 0x4bd   : > { %4524 = vmatmul.bf16.gmra.mxu1 %v10578_v1  ;;  %v4549_v42 = vmax.f32 %v4483_v32, 0.0  ;;  %v8198_v1 = vld [vmem:[%s11915_s7 + $0x50] sm:$0xff]  ;;  %v5037_v32 = vrot.slane %v10924_v0, 1  ;;  %v2474_v19 = vmax.f32 %v12370_v16, 0.0  ;;  %6433 = vmatpush.bf16.msrb.mxu2 %v8224_v44 }
 0x4be   : > { %v4307_v34 = vpop.f32.mrf.mxu3  ;;  %12369 = vst [vmem:[#allocation44_spill] sm:$0xff] %v10940_v61  ;;  %6168 = vmatpush.bf16.msrb.mxu3 %v8198_v1  ;;  %6257 = vmatpush.bf16.msrb.mxu0 %v8206_v59  ;;  %v5111_v59 = vrot.slane %v10924_v0, 2 }
 0x4bf   : > { %v4581_v48 = vadd.f32 %v4549_v42, %v2473_v25  ;;  %v4308_v37 = vadd.f32 %v4307_v34, %v12368_v29  ;;  %v8197_v42 = vld [vmem:[%s11915_s7 + $0x48] sm:$0xff]  ;;  %v12372_v29 = vld [vmem:[#allocation5_spill] sm:$0xff]  ;;  %v5285_v1 = vrot.slane %v5037_v32, 7 }
 0x4c0   : > { %v4398_v45 = vpop.f32.mrf.mxu0  ;;  %6346 = vmatpush.bf16.msrb.mxu1 %v8214_v7 }
 0x4c1   : > { %v4645_v54 = vadd.f32 %v4613_v35, %v4581_v48  ;;  %v4397_v56 = vadd.f32 %v4396_v51, %v4308_v37  ;;  %v8205_v51 = vld [vmem:[%s11915_s7 + $0x88] sm:$0xff]  ;;  %v12371_v48 = vld [vmem:[#allocation10_spill] sm:$0xff] }
 0x4c2   : > { %v4487_v40 = vpop.f32.mrf.mxu1  ;;  %v8213_v35 = vld [vmem:[%s11915_s7 + $0xc8] sm:$0xff]  ;;  %v4221_v37 = vadd.f32 %v12372_v29, %v12371_v48  ;;  %6169 = vmatpush.bf16.msrb.mxu3 %v8197_v42  ;;  %6258 = vmatpush.bf16.msrb.mxu0 %v8205_v51 }
 0x4c3   : > { %v4486_v60 = vadd.f32 %v4485_v28, %v4397_v56  ;;  %v5291_v25 = vrot.slane %v4645_v54, 7  ;;  %v5038_v34 = vrot.slane %v4645_v54, 1  ;;  %v5112_v3 = vrot.slane %v4645_v54, 2 }
 0x4c4   : > { %v5284_v28 = vsel %vm5206_vm2, %v10721_v10, %v5283_v30  ;;  %6347 = vmatpush.bf16.msrb.mxu1 %v8213_v35  ;;  %v8212_v35 = vld [vmem:[%s11915_s7 + $0xc0] sm:$0xff] }
 0x4c5   : > { %v4550_v7 = vmax.f32 %v4486_v60, 0.0  ;;  %v5292_v56 = vsel %vm5206_vm2, %v5283_v30, %v5291_v25  ;;  %v5039_v44 = vsel %vm914_vm0, %v5037_v32, %v5038_v34  ;;  %v5293_v16 = vrot.slane %v5038_v34, 7  ;;  %v8196_v30 = vld [vmem:[%s11915_s7 + $0x40] sm:$0xff] }
 0x4c6   : > { %v4309_v50 = vpop.f32.mrf.mxu3  ;;  %v10967_v2 = vpack.c.bf16 %v5292_v56, %v5284_v28  ;;  %v5286_v54 = vrot.slane %v5039_v44, 7  ;;  %v5113_v48 = vsel %vm1027_vm1, %v5111_v59, %v5112_v3  ;;  %v5115_v29 = vsel %vm1027_vm1, %v5112_v3, %v12338_v22  ;;  %v8204_v32 = vld [vmem:[%s11915_s7 + $0x80] sm:$0xff]  ;;  %v4614_v3 = vld [vmem:[%s10773_s15 + $0x50] sm:$0xff]  ;;  %6170 = vmatpush.bf16.msrb.mxu3 %v8196_v30 }
 0x4c7   : > { %v4582_v0 = vadd.f32 %v4550_v7, %v2474_v19  ;;  %v4310_v60 = vadd.f32 %v4309_v50, %v4221_v37  ;;  %v5289_v25 = vrot.slane %v5113_v48, 7  ;;  %v5295_v42 = vrot.slane %v5115_v29, 7  ;;  %6259 = vmatpush.bf16.msrb.mxu0 %v8204_v32  ;;  %v2798_v56 = vld [vmem:[#allocation2 + $0x110] sm:$0x3]  ;;  %v4615_v32 = vld [vmem:[%s10773_s15 + $0x58] sm:$0xff] }
 0x4c8   : > { %12373 = vst [vmem:[#allocation45_spill] sm:$0xff] %v10967_v2  ;;  %v4401_v51 = vpop.f32.mrf.mxu0  ;;  %6107 = vmatmul.bf16.gmra.mxu2 %v10967_v2  ;;  %v5287_v19 = vsel %vm5206_vm2, %v5285_v1, %v5286_v54  ;;  %v5294_v50 = vsel %vm5206_vm2, %v5286_v54, %v5293_v16  ;;  %v5288_v34 = vrot.slane %v5111_v59, 7  ;;  %6348 = vmatpush.bf16.msrb.mxu1 %v8212_v35  ;;  %v12376_v59 = vld [vmem:[#allocation78_spill] sm:$0xff]  ;;  %v3239_v30 = vrot.slane %v2798_v56, 1 }
 0x4c9   : > { %v4399_v37 = vadd.f32 %v4398_v45, %v4310_v60  ;;  %v10985_v7 = vpack.c.bf16 %v5294_v50, %v5287_v19  ;;  %v5296_v48 = vsel %vm5206_vm2, %v5289_v25, %v5295_v42  ;;  %v4646_v45 = vadd.f32 %v4614_v3, %v4582_v0  ;;  %v12377_v42 = vld [vmem:[#allocation81_spill] sm:$0xff] }
 0x4ca   : > { %v4490_v28 = vpop.f32.mrf.mxu1  ;;  %v5290_v44 = vsel %vm5206_vm2, %v5288_v34, %v5289_v25  ;;  %v2475_v16 = vmax.f32 %v12376_v59, 0.0  ;;  %v10996_v60 = vrot.slane %v10718_v9, 1  ;;  %v3246_v25 = vrot.slane %v2798_v56, 2 }
 0x4cb   : > { %12374 = vst [vmem:[#allocation23_spill] sm:$0xff] %v10985_v7  ;;  %v4488_v29 = vadd.f32 %v4487_v40, %v4399_v37  ;;  %4351 = vmatmul.bf16.gmra.mxu3 %v10620_v18  ;;  %4440 = vmatmul.bf16.gmra.mxu0 %v10624_v33  ;;  %v10991_v1 = vpack.c.bf16 %v5296_v48, %v5290_v44  ;;  %v3243_v40 = vrot.slane %v10718_v9, 2  ;;  %v2476_v19 = vmax.f32 %v12377_v42, 0.0 }
 0x4cc   : > { %v5298_v50 = vrot.slane %v4646_v45, 7  ;;  %v5116_v34 = vrot.slane %v4646_v45, 2  ;;  %v3240_v48 = vsel %vm914_vm0, %v10996_v60, %v3239_v30  ;;  %v3301_v56 = vpack.c.bf16 %v10718_v9, %v10718_v9 }
 0x4cd   : > { %12375 = vst [vmem:[#allocation9_spill] sm:$0xff] %v10991_v1  ;;  %4529 = vmatmul.bf16.gmra.mxu1 %v10626_v4  ;;  %v4551_v54 = vmax.f32 %v4488_v29, 0.0  ;;  %v5040_v4 = vrot.slane %v4646_v45, 1  ;;  %v4226_v29 = vadd.f32 %v10622_v12, %v10633_v36 }
 0x4ce   : > { %v4312_v35 = vpop.f32.mrf.mxu3  ;;  %v5299_v45 = vsel %vm5206_vm2, %v10721_v10, %v5298_v50 }
 0x4cf   : > { %v4583_v18 = vadd.f32 %v4551_v54, %v2475_v16  ;;  %v4313_v33 = vadd.f32 %v4312_v35, %v10614_v8  ;;  %v3247_v8 = vsel %vm1027_vm1, %v3243_v40, %v3246_v25 }
 0x4d0   : > { %v4403_v0 = vpop.f32.mrf.mxu0 }
 0x4d1   : > { %v4647_v3 = vadd.f32 %v4615_v32, %v4583_v18  ;;  %v4402_v37 = vadd.f32 %v4401_v51, %v4313_v33  ;;  %v3302_v51 = vpack.c.bf16 %v3240_v48, %v10996_v60  ;;  %v5300_v32 = vrot.slane %v5040_v4, 7 }
 0x4d2   : > { %v4492_v44 = vpop.f32.mrf.mxu1  ;;  %v5303_v18 = vrot.slane %v5116_v34, 7 }
 0x4d3   : > { %v4491_v59 = vadd.f32 %v4490_v28, %v4402_v37  ;;  %v5306_v16 = vrot.slane %v4647_v3, 7  ;;  %v5041_v54 = vrot.slane %v4647_v3, 1  ;;  %v5117_v35 = vrot.slane %v4647_v3, 2 }
 0x4d5   : > { %v4552_v30 = vmax.f32 %v4491_v59, 0.0  ;;  %v5307_v33 = vsel %vm5206_vm2, %v5298_v50, %v5306_v16  ;;  %v5042_v12 = vsel %vm914_vm0, %v5040_v4, %v5041_v54  ;;  %v5308_v36 = vrot.slane %v5041_v54, 7  ;;  %v4616_v54 = vld [vmem:[%s10773_s15 + $0x60] sm:$0xff] }
 0x4d6   : > { %v4314_v9 = vpop.f32.mrf.mxu3  ;;  %v11014_v25 = vpack.c.bf16 %v5307_v33, %v5299_v45  ;;  %v5301_v28 = vrot.slane %v5042_v12, 7  ;;  %v5118_v42 = vsel %vm1027_vm1, %v5116_v34, %v5117_v35  ;;  %v5120_v3 = vsel %vm1027_vm1, %v5117_v35, %v12338_v22 }
 0x4d7   : > { %v4584_v37 = vadd.f32 %v4552_v30, %v2476_v19  ;;  %v4315_v48 = vadd.f32 %v4314_v9, %v4226_v29  ;;  %v5304_v1 = vrot.slane %v5118_v42, 7  ;;  %v5310_v7 = vrot.slane %v5120_v3, 7 }
 0x4d8   : > { %12378 = vst [vmem:[#allocation36_spill] sm:$0xff] %v11014_v25  ;;  %v4406_v59 = vpop.f32.mrf.mxu0  ;;  %6112 = vmatmul.bf16.gmra.mxu2 %v11014_v25  ;;  %v3303_v50 = vpack.c.bf16 %v3247_v8, %v3243_v40  ;;  %v5302_v4 = vsel %vm5206_vm2, %v5300_v32, %v5301_v28  ;;  %v5309_v16 = vsel %vm5206_vm2, %v5301_v28, %v5308_v36  ;;  %v12381_v8 = vld [vmem:[#allocation83_spill] sm:$0xff] }
 0x4d9   : > { %v4404_v45 = vadd.f32 %v4403_v0, %v4315_v48  ;;  %v11023_v34 = vpack.c.bf16 %v5309_v16, %v5302_v4  ;;  %v5305_v35 = vsel %vm5206_vm2, %v5303_v18, %v5304_v1  ;;  %v5311_v19 = vsel %vm5206_vm2, %v5304_v1, %v5310_v7  ;;  %v4617_v36 = vld [vmem:[%s10773_s15 + $0x68] sm:$0xff]  ;;  %v8223_v48 = vld [vmem:[%s11915_s7 + $0x118] sm:$0xff] }
 0x4da   : > { %v4495_v33 = vpop.f32.mrf.mxu1  ;;  %v11027_v30 = vpack.c.bf16 %v5311_v19, %v5305_v35  ;;  %v4648_v40 = vadd.f32 %v4616_v54, %v4584_v37  ;;  %v2477_v32 = vmax.f32 %v12381_v8, 0.0  ;;  %v5210_v0 = vrot.slane %v10996_v60, 7  ;;  %6434 = vmatpush.bf16.msrb.mxu2 %v8223_v48  ;;  %v4618_v48 = vld [vmem:[%s10773_s15 + $0x70] sm:$0xff] }
 0x4db   : > { %12379 = vst [vmem:[#allocation41_spill] sm:$0xff] %v11023_v34  ;;  %v4493_v29 = vadd.f32 %v4492_v44, %v4404_v45  ;;  %4356 = vmatmul.bf16.gmra.mxu3 %v3301_v56  ;;  %4445 = vmatmul.bf16.gmra.mxu0 %v3302_v51  ;;  %v5213_v7 = vrot.slane %v12338_v22, 7  ;;  %v4231_v60 = vadd.f32 %v10641_v46, %v10645_v38 }
 0x4dc   : > { %12380 = vst [vmem:[#allocation17_spill] sm:$0xff] %v11027_v30  ;;  %v5313_v3 = vrot.slane %v4648_v40, 7  ;;  %v5043_v1 = vrot.slane %v4648_v40, 1  ;;  %v5121_v44 = vrot.slane %v4648_v40, 2  ;;  %v11040_v16 = vpack.c.bf16 %v5210_v0, %v5210_v0 }
 0x4dd   : > { %4534 = vmatmul.bf16.gmra.mxu1 %v3303_v50  ;;  %v4553_v12 = vmax.f32 %v4493_v29, 0.0  ;;  %v12382_v50 = vld [vmem:[#allocation84_spill] sm:$0xff]  ;;  %v11044_v19 = vpack.c.bf16 %v5213_v7, %v5213_v7 }
 0x4de   : > { %v4317_v9 = vpop.f32.mrf.mxu3  ;;  %v2478_v4 = vmax.f32 %v12382_v50, 0.0  ;;  %12383 = vst [vmem:[#allocation54_spill] sm:$0xff] %v11040_v16  ;;  %v5315_v29 = vrot.slane %v5043_v1, 7  ;;  %v5318_v40 = vrot.slane %v5121_v44, 7 }
 0x4df   : > { %v4585_v28 = vadd.f32 %v4553_v12, %v2477_v32  ;;  %v4318_v42 = vadd.f32 %v4317_v9, %v10638_v11  ;;  %12384 = vst [vmem:[#allocation55_spill] sm:$0xff] %v11044_v19 }
 0x4e0   : > { %v4408_v18 = vpop.f32.mrf.mxu0 }
 0x4e1   : > { %v4649_v56 = vadd.f32 %v4617_v36, %v4585_v28  ;;  %v4407_v51 = vadd.f32 %v4406_v59, %v4318_v42  ;;  %v5314_v59 = vsel %vm5206_vm2, %v10721_v10, %v5313_v3 }
 0x4e2   : > { %v4497_v37 = vpop.f32.mrf.mxu1 }
 0x4e3   : > { %v4496_v11 = vadd.f32 %v4495_v33, %v4407_v51  ;;  %v5321_v54 = vrot.slane %v4649_v56, 7  ;;  %v5044_v45 = vrot.slane %v4649_v56, 1  ;;  %v5122_v35 = vrot.slane %v4649_v56, 2 }
 0x4e5   : > { %v4554_v8 = vmax.f32 %v4496_v11, 0.0  ;;  %v5322_v32 = vsel %vm5206_vm2, %v5313_v3, %v5321_v54  ;;  %v5045_v46 = vsel %vm914_vm0, %v5043_v1, %v5044_v45  ;;  %v5323_v38 = vrot.slane %v5044_v45, 7 }
 0x4e6   : > { %v4319_v12 = vpop.f32.mrf.mxu3  ;;  %v11048_v33 = vpack.c.bf16 %v5322_v32, %v5314_v59  ;;  %v5316_v36 = vrot.slane %v5045_v46, 7  ;;  %v5123_v9 = vsel %vm1027_vm1, %v5121_v44, %v5122_v35  ;;  %v5125_v0 = vsel %vm1027_vm1, %v5122_v35, %v12338_v22  ;;  %v12388_v59 = vld [vmem:[#allocation85_spill] sm:$0xff] }
 0x4e7   : > { %v4586_v28 = vadd.f32 %v4554_v8, %v2478_v4  ;;  %v4320_v42 = vadd.f32 %v4319_v12, %v4231_v60  ;;  %v5319_v7 = vrot.slane %v5123_v9, 7  ;;  %v5325_v56 = vrot.slane %v5125_v0, 7  ;;  %v4619_v8 = vld [vmem:[%s10773_s15 + $0x78] sm:$0xff]  ;;  %v11069_v9 = vpop.f32.mrf.mxu2 }
 0x4e8   : > { %12385 = vst [vmem:[#allocation24_spill] sm:$0xff] %v11048_v33  ;;  %v4411_v51 = vpop.f32.mrf.mxu0  ;;  %6117 = vmatmul.bf16.gmra.mxu2 %v11048_v33  ;;  %v5317_v3 = vsel %vm5206_vm2, %v5315_v29, %v5316_v36  ;;  %v5324_v1 = vsel %vm5206_vm2, %v5316_v36, %v5323_v38  ;;  %v2479_v29 = vmax.f32 %v12388_v59, 0.0 }
 0x4e9   : > { %v4409_v50 = vadd.f32 %v4408_v18, %v4320_v42  ;;  %v11057_v54 = vpack.c.bf16 %v5324_v1, %v5317_v3  ;;  %v5320_v44 = vsel %vm5206_vm2, %v5318_v40, %v5319_v7  ;;  %v5326_v4 = vsel %vm5206_vm2, %v5319_v7, %v5325_v56 }
 0x4ea   : > { %v4500_v11 = vpop.f32.mrf.mxu1  ;;  %v11063_v45 = vpack.c.bf16 %v5326_v4, %v5320_v44  ;;  %v4650_v35 = vadd.f32 %v4618_v48, %v4586_v28  ;;  %v12389_v28 = vld [vmem:[#allocation8_spill] sm:$0xff] }
 0x4eb   : > { %12386 = vst [vmem:[#allocation48_spill] sm:$0xff] %v11057_v54  ;;  %v4498_v60 = vadd.f32 %v4497_v37, %v4409_v50  ;;  %6171 = vmatmul.bf16.vlgmr.msrb.gmra.mxu3 %v11040_v16  ;;  %6260 = vmatmul.bf16.vlgmr.msrb.gmra.mxu0 %v11044_v19  ;;  %v2480_v56 = vmax.f32 %v12389_v28, 0.0  ;;  %v4236_v50 = vadd.f32 %v10652_v15, %v10659_v49 }
 0x4ec   : > { %12387 = vst [vmem:[#allocation43_spill] sm:$0xff] %v11063_v45  ;;  %v5328_v12 = vrot.slane %v4650_v35, 7  ;;  %v5046_v37 = vrot.slane %v4650_v35, 1  ;;  %v5126_v36 = vrot.slane %v4650_v35, 2 }
 0x4ed   : > { %6349 = vmatmul.bf16.vlgmr.msrb.gmra.mxu1 %v10800_v53  ;;  %v4555_v18 = vmax.f32 %v4498_v60, 0.0 }
 0x4ee   : > { %v4322_v32 = vpop.f32.mrf.mxu3  ;;  %v5330_v44 = vrot.slane %v5046_v37, 7  ;;  %v5333_v4 = vrot.slane %v5126_v36, 7 }
 0x4ef   : > { %v4587_v46 = vadd.f32 %v4555_v18, %v2479_v29  ;;  %v4323_v40 = vadd.f32 %v4322_v32, %v10649_v52  ;;  %v5329_v52 = vsel %vm5206_vm2, %v10721_v10, %v5328_v12  ;;  %v11087_v28 = vpop.f32.mrf.mxu2 }
 0x4f0   : > { %v4413_v38 = vpop.f32.mrf.mxu0 }
 0x4f1   : > { %v4651_v0 = vadd.f32 %v4619_v8, %v4587_v46  ;;  %v4412_v42 = vadd.f32 %v4411_v51, %v4323_v40 }
 0x4f2   : > { %v4502_v7 = vpop.f32.mrf.mxu1 }
 0x4f3   : > { %v4501_v53 = vadd.f32 %v4500_v11, %v4412_v42  ;;  %v5336_v3 = vrot.slane %v4651_v0, 7  ;;  %v5047_v1 = vrot.slane %v4651_v0, 1  ;;  %v5127_v48 = vrot.slane %v4651_v0, 2  ;;  %v4620_v42 = vld [vmem:[%s10773_s15 + $0x80] sm:$0xff] }
 0x4f5   : > { %v4556_v60 = vmax.f32 %v4501_v53, 0.0  ;;  %v5337_v35 = vsel %vm5206_vm2, %v5328_v12, %v5336_v3  ;;  %v5048_v51 = vsel %vm914_vm0, %v5046_v37, %v5047_v1  ;;  %v5338_v59 = vrot.slane %v5047_v1, 7 }
 0x4f6   : > { %v4324_v29 = vpop.f32.mrf.mxu3  ;;  %v11078_v11 = vpack.c.bf16 %v5337_v35, %v5329_v52  ;;  %v5331_v18 = vrot.slane %v5048_v51, 7  ;;  %v5128_v8 = vsel %vm1027_vm1, %v5126_v36, %v5127_v48  ;;  %v5130_v15 = vsel %vm1027_vm1, %v5127_v48, %v12338_v22  ;;  %v4621_v35 = vld [vmem:[%s10773_s15 + $0x88] sm:$0xff] }
 0x4f7   : > { %v4588_v49 = vadd.f32 %v4556_v60, %v2480_v56  ;;  %v4325_v32 = vadd.f32 %v4324_v29, %v4236_v50  ;;  %v5334_v46 = vrot.slane %v5128_v8, 7  ;;  %v5340_v40 = vrot.slane %v5130_v15, 7 }
 0x4f8   : > { %12390 = vst [vmem:[#allocation60_spill] sm:$0xff] %v11078_v11  ;;  %v4416_v0 = vpop.f32.mrf.mxu0  ;;  %6122 = vmatmul.bf16.gmra.mxu2 %v11078_v11  ;;  %v5332_v12 = vsel %vm5206_vm2, %v5330_v44, %v5331_v18  ;;  %v5339_v37 = vsel %vm5206_vm2, %v5331_v18, %v5338_v59  ;;  %v12391_v44 = vld [vmem:[#allocation26_spill] sm:$0xff] }
 0x4f9   : > { %v4414_v53 = vadd.f32 %v4413_v38, %v4325_v32  ;;  %v11089_v3 = vpack.c.bf16 %v5339_v37, %v5332_v12  ;;  %v5335_v56 = vsel %vm5206_vm2, %v5333_v4, %v5334_v46  ;;  %v5341_v1 = vsel %vm5206_vm2, %v5334_v46, %v5340_v40  ;;  %v12392_v40 = vld [vmem:[#allocation27_spill] sm:$0xff]  ;;  %v11105_v37 = vpop.f32.mrf.mxu2 }
 0x4fa   : > { %v4505_v36 = vpop.f32.mrf.mxu1  ;;  %v11095_v50 = vpack.c.bf16 %v5341_v1, %v5335_v56  ;;  %v4652_v52 = vadd.f32 %v4620_v42, %v4588_v49  ;;  %v2481_v60 = vmax.f32 %v12391_v44, 0.0  ;;  %v8222_v49 = vld [vmem:[%s11915_s7 + $0x110] sm:$0xff]  ;;  %v2482_v12 = vmax.f32 %v12392_v40, 0.0 }
 0x4fb   : > { %v4503_v48 = vadd.f32 %v4502_v7, %v4414_v53  ;;  %6176 = vmatmul.bf16.gmra.mxu3 %v10810_v55  ;;  %6265 = vmatmul.bf16.gmra.mxu0 %v10816_v31  ;;  %v4241_v1 = vadd.f32 %v10666_v14, %v10670_v39 }
 0x4fc   : > { %v5343_v18 = vrot.slane %v4652_v52, 7  ;;  %v5049_v7 = vrot.slane %v4652_v52, 1  ;;  %v5131_v8 = vrot.slane %v4652_v52, 2  ;;  %6435 = vmatpush.bf16.msrb.mxu2 %v8222_v49 }
 0x4fd   : > { %6354 = vmatmul.bf16.gmra.mxu1 %v10827_v43  ;;  %v4557_v38 = vmax.f32 %v4503_v48, 0.0 }
 0x4fe   : > { %v4327_v51 = vpop.f32.mrf.mxu3  ;;  %v5345_v48 = vrot.slane %v5049_v7, 7  ;;  %v5348_v52 = vrot.slane %v5131_v8, 7 }
 0x4ff   : > { %v4589_v59 = vadd.f32 %v4557_v38, %v2481_v60  ;;  %v4328_v4 = vadd.f32 %v4327_v51, %v10663_v6 }
 0x500   : > { %v4418_v29 = vpop.f32.mrf.mxu0 }
 0x501   : > { %v4653_v15 = vadd.f32 %v4621_v35, %v4589_v59  ;;  %v4417_v32 = vadd.f32 %v4416_v0, %v4328_v4  ;;  %v5344_v0 = vsel %vm5206_vm2, %v10721_v10, %v5343_v18 }
 0x502   : > { %v4507_v46 = vpop.f32.mrf.mxu1 }
 0x503   : > { %v4506_v42 = vadd.f32 %v4505_v36, %v4417_v32  ;;  %v5351_v53 = vrot.slane %v4653_v15, 7  ;;  %v5050_v56 = vrot.slane %v4653_v15, 1  ;;  %v5132_v6 = vrot.slane %v4653_v15, 2 }
 0x505   : > { %v4558_v44 = vmax.f32 %v4506_v42, 0.0  ;;  %v5352_v60 = vsel %vm5206_vm2, %v5343_v18, %v5351_v53  ;;  %v5051_v38 = vsel %vm914_vm0, %v5049_v7, %v5050_v56  ;;  %v5353_v35 = vrot.slane %v5050_v56, 7  ;;  %v4622_v42 = vld [vmem:[%s10773_s15 + $0x90] sm:$0xff] }
 0x506   : > { %v4329_v36 = vpop.f32.mrf.mxu3  ;;  %v11113_v51 = vpack.c.bf16 %v5352_v60, %v5344_v0  ;;  %v5346_v59 = vrot.slane %v5051_v38, 7  ;;  %v5133_v4 = vsel %vm1027_vm1, %v5131_v8, %v5132_v6  ;;  %v5135_v14 = vsel %vm1027_vm1, %v5132_v6, %v12338_v22 }
 0x507   : > { %v4590_v39 = vadd.f32 %v4558_v44, %v2482_v12  ;;  %v4330_v15 = vadd.f32 %v4329_v36, %v4241_v1  ;;  %v5349_v32 = vrot.slane %v5133_v4, 7  ;;  %v5355_v49 = vrot.slane %v5135_v14, 7 }
 0x508   : > { %12393 = vst [vmem:[#allocation16_spill] sm:$0xff] %v11113_v51  ;;  %v4421_v40 = vpop.f32.mrf.mxu0  ;;  %6127 = vmatmul.bf16.gmra.mxu2 %v11113_v51  ;;  %v5347_v18 = vsel %vm5206_vm2, %v5345_v48, %v5346_v59  ;;  %v5354_v7 = vsel %vm5206_vm2, %v5346_v59, %v5353_v35  ;;  %v4623_v35 = vld [vmem:[%s10773_s15 + $0x98] sm:$0xff] }
 0x509   : > { %v4419_v53 = vadd.f32 %v4418_v29, %v4330_v15  ;;  %v11122_v0 = vpack.c.bf16 %v5354_v7, %v5347_v18  ;;  %v5350_v8 = vsel %vm5206_vm2, %v5348_v52, %v5349_v32  ;;  %v5356_v12 = vsel %vm5206_vm2, %v5349_v32, %v5355_v49  ;;  %v12394_v29 = vld [vmem:[#allocation28_spill] sm:$0xff]  ;;  %v12395_v7 = vld [vmem:[#allocation30_spill] sm:$0xff] }
 0x50a   : > { %v4510_v56 = vpop.f32.mrf.mxu1  ;;  %v11130_v48 = vpack.c.bf16 %v5356_v12, %v5350_v8  ;;  %v4654_v44 = vadd.f32 %v4622_v42, %v4590_v39  ;;  %v2483_v60 = vmax.f32 %v12394_v29, 0.0  ;;  %v4246_v29 = vadd.f32 %v10677_v5, %v10684_v17 }
 0x50b   : > { %v4508_v6 = vadd.f32 %v4507_v46, %v4419_v53  ;;  %v11126_v1 = vpop.f32.mrf.mxu2  ;;  %6181 = vmatmul.bf16.gmra.mxu3 %v10840_v62  ;;  %6270 = vmatmul.bf16.gmra.mxu0 %v10846_v27  ;;  %v2484_v53 = vmax.f32 %v12395_v7, 0.0 }
 0x50c   : > { %v5358_v4 = vrot.slane %v4654_v44, 7  ;;  %v5052_v14 = vrot.slane %v4654_v44, 1  ;;  %v5136_v15 = vrot.slane %v4654_v44, 2 }
 0x50d   : > { %6359 = vmatmul.bf16.gmra.mxu1 %v10866_v24  ;;  %v4559_v38 = vmax.f32 %v4508_v6, 0.0 }
 0x50e   : > { %v4332_v36 = vpop.f32.mrf.mxu3 }
 0x50f   : > { %v4591_v52 = vadd.f32 %v4559_v38, %v2483_v60  ;;  %v4333_v59 = vadd.f32 %v4332_v36, %v10674_v13  ;;  %v5359_v13 = vsel %vm5206_vm2, %v10721_v10, %v5358_v4  ;;  %v5360_v60 = vrot.slane %v5052_v14, 7 }
 0x510   : > { %v4423_v46 = vpop.f32.mrf.mxu0  ;;  %v5363_v38 = vrot.slane %v5136_v15, 7 }
 0x511   : > { %v4655_v32 = vadd.f32 %v4623_v35, %v4591_v52  ;;  %v4422_v49 = vadd.f32 %v4421_v40, %v4333_v59 }
 0x512   : > { %v4512_v18 = vpop.f32.mrf.mxu1 }
 0x513   : > { %v4511_v39 = vadd.f32 %v4510_v56, %v4422_v49  ;;  %v11137_v42 = vpop.f32.mrf.mxu2  ;;  %v5366_v8 = vrot.slane %v4655_v32, 7  ;;  %v5053_v12 = vrot.slane %v4655_v32, 1  ;;  %v5137_v6 = vrot.slane %v4655_v32, 2 }
 0x515   : > { %v4560_v44 = vmax.f32 %v4511_v39, 0.0  ;;  %v5367_v40 = vsel %vm5206_vm2, %v5358_v4, %v5366_v8  ;;  %v5054_v35 = vsel %vm914_vm0, %v5052_v14, %v5053_v12  ;;  %v5368_v56 = vrot.slane %v5053_v12, 7  ;;  %v4624_v8 = vld [vmem:[%s10773_s15 + $0xa0] sm:$0xff] }
 0x516   : > { %v4334_v36 = vpop.f32.mrf.mxu3  ;;  %v11145_v52 = vpack.c.bf16 %v5367_v40, %v5359_v13  ;;  %v5361_v59 = vrot.slane %v5054_v35, 7  ;;  %v5138_v32 = vsel %vm1027_vm1, %v5136_v15, %v5137_v6  ;;  %v5140_v5 = vsel %vm1027_vm1, %v5137_v6, %v12338_v22 }
 0x517   : > { %v4592_v17 = vadd.f32 %v4560_v44, %v2484_v53  ;;  %v4335_v49 = vadd.f32 %v4334_v36, %v4246_v29  ;;  %v5364_v7 = vrot.slane %v5138_v32, 7  ;;  %v5370_v19 = vrot.slane %v5140_v5, 7  ;;  %v4625_v36 = vld [vmem:[%s10773_s15 + $0xa8] sm:$0xff] }
 0x518   : > { %v4426_v39 = vpop.f32.mrf.mxu0  ;;  %6132 = vmatmul.bf16.gmra.mxu2 %v11145_v52  ;;  %v5362_v4 = vsel %vm5206_vm2, %v5360_v60, %v5361_v59  ;;  %v5369_v14 = vsel %vm5206_vm2, %v5361_v59, %v5368_v56 }
 0x519   : > { %v4424_v12 = vadd.f32 %v4423_v46, %v4335_v49  ;;  %v11154_v40 = vpack.c.bf16 %v5369_v14, %v5362_v4  ;;  %v5365_v15 = vsel %vm5206_vm2, %v5363_v38, %v5364_v7  ;;  %v5371_v53 = vsel %vm5206_vm2, %v5364_v7, %v5370_v19  ;;  %v12397_v46 = vld [vmem:[#allocation31_spill] sm:$0xff] }
 0x51a   : > { %v4515_v13 = vpop.f32.mrf.mxu1  ;;  %v11162_v60 = vpack.c.bf16 %v5371_v53, %v5365_v15  ;;  %v4656_v44 = vadd.f32 %v4624_v8, %v4592_v17  ;;  %v2485_v35 = vmax.f32 %v12397_v46, 0.0  ;;  %v8221_v17 = vld [vmem:[%s11915_s7 + $0x108] sm:$0xff]  ;;  %v12398_v8 = vld [vmem:[#allocation29_spill] sm:$0xff] }
 0x51b   : > { %v4513_v6 = vadd.f32 %v4512_v18, %v4424_v12  ;;  %v11158_v29 = vpop.f32.mrf.mxu2  ;;  %6186 = vmatmul.bf16.gmra.mxu3 %v10876_v57  ;;  %6275 = vmatmul.bf16.gmra.mxu0 %v10882_v58  ;;  %v2486_v12 = vmax.f32 %v12398_v8, 0.0 }
 0x51c   : > { %12396 = vst [vmem:[#allocation50_spill] sm:$0xff] %v11162_v60  ;;  %v5373_v32 = vrot.slane %v4656_v44, 7  ;;  %v5055_v5 = vrot.slane %v4656_v44, 1  ;;  %v5141_v49 = vrot.slane %v4656_v44, 2  ;;  %6436 = vmatpush.bf16.msrb.mxu2 %v8221_v17 }
 0x51d   : > { %6364 = vmatmul.bf16.gmra.mxu1 %v10895_v63  ;;  %v4561_v56 = vmax.f32 %v4513_v6, 0.0 }
 0x51e   : > { %v4337_v59 = vpop.f32.mrf.mxu3  ;;  %v5375_v44 = vrot.slane %v5055_v5, 7 }
 0x51f   : > { %v4593_v38 = vadd.f32 %v4561_v56, %v2485_v35  ;;  %v4338_v19 = vadd.f32 %v4337_v59, %v10688_v21  ;;  %v4251_v35 = vadd.f32 %v10691_v20, %v10695_v47  ;;  %v5378_v56 = vrot.slane %v5141_v49, 7 }
 0x520   : > { %v4428_v18 = vpop.f32.mrf.mxu0 }
 0x521   : > { %v4657_v7 = vadd.f32 %v4625_v36, %v4593_v38  ;;  %v4427_v4 = vadd.f32 %v4426_v39, %v4338_v19  ;;  %v5374_v39 = vsel %vm5206_vm2, %v10721_v10, %v5373_v32 }
 0x522   : > { %v4517_v14 = vpop.f32.mrf.mxu1 }
 0x523   : > { %v4516_v15 = vadd.f32 %v4515_v13, %v4427_v4  ;;  %v11172_v53 = vpop.f32.mrf.mxu2  ;;  %v5381_v6 = vrot.slane %v4657_v7, 7  ;;  %v5056_v46 = vrot.slane %v4657_v7, 1  ;;  %v5142_v21 = vrot.slane %v4657_v7, 2 }
 0x525   : > { %v4562_v36 = vmax.f32 %v4516_v15, 0.0  ;;  %v5382_v59 = vsel %vm5206_vm2, %v5373_v32, %v5381_v6  ;;  %v5057_v13 = vsel %vm914_vm0, %v5055_v5, %v5056_v46  ;;  %v5383_v38 = vrot.slane %v5056_v46, 7  ;;  %v4626_v6 = vld [vmem:[%s10773_s15 + $0xb0] sm:$0xff] }
 0x526   : > { %v4339_v19 = vpop.f32.mrf.mxu3  ;;  %v11180_v4 = vpack.c.bf16 %v5382_v59, %v5374_v39  ;;  %v5376_v17 = vrot.slane %v5057_v13, 7  ;;  %v5143_v7 = vsel %vm1027_vm1, %v5141_v49, %v5142_v21  ;;  %v5145_v20 = vsel %vm1027_vm1, %v5142_v21, %v12338_v22 }
 0x527   : > { %v4594_v47 = vadd.f32 %v4562_v36, %v2486_v12  ;;  %v4340_v8 = vadd.f32 %v4339_v19, %v4251_v35  ;;  %v5379_v16 = vrot.slane %v5143_v7, 7  ;;  %v5385_v63 = vrot.slane %v5145_v20, 7  ;;  %v4627_v19 = vld [vmem:[%s10773_s15 + $0xb8] sm:$0xff] }
 0x528   : > { %12399 = vst [vmem:[#allocation46_spill] sm:$0xff] %v11180_v4  ;;  %v4431_v15 = vpop.f32.mrf.mxu0  ;;  %6137 = vmatmul.bf16.gmra.mxu2 %v11180_v4  ;;  %v5377_v32 = vsel %vm5206_vm2, %v5375_v44, %v5376_v17  ;;  %v5384_v5 = vsel %vm5206_vm2, %v5376_v17, %v5383_v38 }
 0x529   : > { %v4429_v46 = vadd.f32 %v4428_v18, %v4340_v8  ;;  %v11189_v59 = vpack.c.bf16 %v5384_v5, %v5377_v32  ;;  %v5380_v49 = vsel %vm5206_vm2, %v5378_v56, %v5379_v16  ;;  %v5386_v12 = vsel %vm5206_vm2, %v5379_v16, %v5385_v63  ;;  %v12401_v18 = vld [vmem:[#allocation32_spill] sm:$0xff] }
 0x52a   : > { %v4520_v39 = vpop.f32.mrf.mxu1  ;;  %v11197_v44 = vpack.c.bf16 %v5386_v12, %v5380_v49  ;;  %v4658_v36 = vadd.f32 %v4626_v6, %v4594_v47  ;;  %v2487_v13 = vmax.f32 %v12401_v18, 0.0 }
 0x52b   : > { %v4518_v21 = vadd.f32 %v4517_v14, %v4429_v46  ;;  %v11193_v35 = vpop.f32.mrf.mxu2  ;;  %6191 = vmatmul.bf16.gmra.mxu3 %v10927_v23  ;;  %6280 = vmatmul.bf16.gmra.mxu0 %v10940_v61  ;;  %v12402_v46 = vld [vmem:[#allocation34_spill] sm:$0xff] }
 0x52c   : > { %12400 = vst [vmem:[#allocation52_spill] sm:$0xff] %v11197_v44  ;;  %v5388_v14 = vrot.slane %v4658_v36, 7  ;;  %v5058_v7 = vrot.slane %v4658_v36, 1  ;;  %v5146_v20 = vrot.slane %v4658_v36, 2  ;;  %v2488_v49 = vmax.f32 %v12402_v46, 0.0 }
 0x52d   : > { %6369 = vmatmul.bf16.gmra.mxu1 %v10967_v2  ;;  %v4563_v38 = vmax.f32 %v4518_v21, 0.0  ;;  %v12403_v2 = vld [vmem:[#allocation15_spill] sm:$0xff] }
 0x52e   : > { %v4342_v17 = vpop.f32.mrf.mxu3 }
 0x52f   : > { %v4595_v56 = vadd.f32 %v4563_v38, %v2487_v13  ;;  %v4343_v63 = vadd.f32 %v4342_v17, %v10699_v26  ;;  %v4256_v13 = vadd.f32 %v12403_v2, %v10709_v41  ;;  %v5389_v26 = vsel %vm5206_vm2, %v10721_v10, %v5388_v14 }
 0x530   : > { %v4433_v16 = vpop.f32.mrf.mxu0  ;;  %v5390_v38 = vrot.slane %v5058_v7, 7  ;;  %v5393_v17 = vrot.slane %v5146_v20, 7 }
 0x531   : > { %v4659_v8 = vadd.f32 %v4627_v19, %v4595_v56  ;;  %v4432_v32 = vadd.f32 %v4431_v15, %v4343_v63 }
 0x532   : > { %v4522_v5 = vpop.f32.mrf.mxu1 }
 0x533   : > { %v4521_v47 = vadd.f32 %v4520_v39, %v4432_v32  ;;  %v11204_v6 = vpop.f32.mrf.mxu2  ;;  %v5396_v12 = vrot.slane %v4659_v8, 7  ;;  %v5059_v18 = vrot.slane %v4659_v8, 1  ;;  %v5147_v21 = vrot.slane %v4659_v8, 2 }
 0x535   : > { %v4564_v36 = vmax.f32 %v4521_v47, 0.0  ;;  %v5397_v15 = vsel %vm5206_vm2, %v5388_v14, %v5396_v12  ;;  %v5060_v19 = vsel %vm914_vm0, %v5058_v7, %v5059_v18  ;;  %v5398_v39 = vrot.slane %v5059_v18, 7  ;;  %v4628_v12 = vld [vmem:[%s10773_s15 + $0xc0] sm:$0xff] }
 0x536   : > { %v4344_v56 = vpop.f32.mrf.mxu3  ;;  %v11212_v63 = vpack.c.bf16 %v5397_v15, %v5389_v26  ;;  %v5391_v32 = vrot.slane %v5060_v19, 7  ;;  %v5148_v8 = vsel %vm1027_vm1, %v5146_v20, %v5147_v21  ;;  %v5150_v2 = vsel %vm1027_vm1, %v5147_v21, %v12338_v22  ;;  %v12406_v19 = vld [vmem:[#allocation9_spill] sm:$0xff] }
 0x537   : > { %v4596_v41 = vadd.f32 %v4564_v36, %v2488_v49  ;;  %v4345_v46 = vadd.f32 %v4344_v56, %v4256_v13  ;;  %v5394_v61 = vrot.slane %v5148_v8, 7  ;;  %v5400_v58 = vrot.slane %v5150_v2, 7  ;;  %v12405_v36 = vld [vmem:[#allocation23_spill] sm:$0xff] }
 0x538   : > { %12404 = vst [vmem:[#allocation4_spill] sm:$0xff] %v11212_v63  ;;  %v4436_v47 = vpop.f32.mrf.mxu0  ;;  %6142 = vmatmul.bf16.gmra.mxu2 %v11212_v63  ;;  %v5392_v14 = vsel %vm5206_vm2, %v5390_v38, %v5391_v32  ;;  %v5399_v7 = vsel %vm5206_vm2, %v5391_v32, %v5398_v39  ;;  %v4629_v8 = vld [vmem:[%s10773_s15 + $0xc8] sm:$0xff] }
 0x539   : > { %v4434_v18 = vadd.f32 %v4433_v16, %v4345_v46  ;;  %v11221_v15 = vpack.c.bf16 %v5399_v7, %v5392_v14  ;;  %v5395_v20 = vsel %vm5206_vm2, %v5393_v17, %v5394_v61  ;;  %v5401_v49 = vsel %vm5206_vm2, %v5394_v61, %v5400_v58  ;;  %v12408_v16 = vld [vmem:[#allocation39_spill] sm:$0xff]  ;;  %v12409_v46 = vld [vmem:[#allocation22_spill] sm:$0xff] }
 0x53a   : > { %v4525_v26 = vpop.f32.mrf.mxu1  ;;  %v11229_v38 = vpack.c.bf16 %v5401_v49, %v5395_v20  ;;  %v4660_v39 = vadd.f32 %v4628_v12, %v4596_v41  ;;  %v2489_v56 = vmax.f32 %v12408_v16, 0.0  ;;  %v8220_v41 = vld [vmem:[%s11915_s7 + $0x100] sm:$0xff]  ;;  %v12410_v12 = vld [vmem:[#allocation33_spill] sm:$0xff] }
 0x53b   : > { %v4523_v21 = vadd.f32 %v4522_v5, %v4434_v18  ;;  %v11225_v13 = vpop.f32.mrf.mxu2  ;;  %6196 = vmatmul.bf16.gmra.mxu3 %v12405_v36  ;;  %6285 = vmatmul.bf16.gmra.mxu0 %v12406_v19  ;;  %v2490_v20 = vmax.f32 %v12410_v12, 0.0 }
 0x53c   : > { %12407 = vst [vmem:[#allocation49_spill] sm:$0xff] %v11229_v38  ;;  %v5403_v5 = vrot.slane %v4660_v39, 7  ;;  %v5061_v14 = vrot.slane %v4660_v39, 1  ;;  %v5151_v7 = vrot.slane %v4660_v39, 2  ;;  %6437 = vmatpush.bf16.msrb.mxu2 %v8220_v41 }
 0x53d   : > { %6374 = vmatmul.bf16.gmra.mxu1 %v11014_v25  ;;  %v4565_v32 = vmax.f32 %v4523_v21, 0.0 }
 0x53e   : > { %v4347_v2 = vpop.f32.mrf.mxu3  ;;  %v5405_v39 = vrot.slane %v5061_v14, 7 }
 0x53f   : > { %v4597_v17 = vadd.f32 %v4565_v32, %v2489_v56  ;;  %v4348_v58 = vadd.f32 %v4347_v2, %v12409_v46  ;;  %v12411_v2 = vld [vmem:[#allocation63_spill] sm:$0xff]  ;;  %v12412_v46 = vld [vmem:[#allocation74_spill] sm:$0xff] }
 0x540   : > { %v4438_v61 = vpop.f32.mrf.mxu0  ;;  %v4261_v25 = vadd.f32 %v12412_v46, %v12411_v2 }
 0x541   : > { %v4661_v18 = vadd.f32 %v4629_v8, %v4597_v17  ;;  %v4437_v24 = vadd.f32 %v4436_v47, %v4348_v58  ;;  %v5404_v47 = vsel %vm5206_vm2, %v10721_v10, %v5403_v5  ;;  %v5408_v8 = vrot.slane %v5151_v7, 7 }
 0x542   : > { %v4527_v19 = vpop.f32.mrf.mxu1 }
 0x543   : > { %v4526_v49 = vadd.f32 %v4525_v26, %v4437_v24  ;;  %v11239_v21 = vpop.f32.mrf.mxu2  ;;  %v5411_v16 = vrot.slane %v4661_v18, 7  ;;  %v5062_v56 = vrot.slane %v4661_v18, 1  ;;  %v5152_v32 = vrot.slane %v4661_v18, 2 }
 0x545   : > { %v4566_v17 = vmax.f32 %v4526_v49, 0.0  ;;  %v5412_v58 = vsel %vm5206_vm2, %v5403_v5, %v5411_v16  ;;  %v5063_v24 = vsel %vm914_vm0, %v5061_v14, %v5062_v56  ;;  %v5413_v26 = vrot.slane %v5062_v56, 7  ;;  %v4630_v16 = vld [vmem:[%s10773_s15 + $0xd0] sm:$0xff] }
 0x546   : > { %v4349_v12 = vpop.f32.mrf.mxu3  ;;  %v11247_v27 = vpack.c.bf16 %v5412_v58, %v5404_v47  ;;  %v5406_v41 = vrot.slane %v5063_v24, 7  ;;  %v5153_v18 = vsel %vm1027_vm1, %v5151_v7, %v5152_v32  ;;  %v5155_v2 = vsel %vm1027_vm1, %v5152_v32, %v12338_v22 }
 0x547   : > { %v4598_v46 = vadd.f32 %v4566_v17, %v2490_v20  ;;  %v4350_v43 = vadd.f32 %v4349_v12, %v4261_v25  ;;  %v5409_v31 = vrot.slane %v5153_v18, 7  ;;  %v5415_v36 = vrot.slane %v5155_v2, 7 }
 0x548   : > { %12413 = vst [vmem:[#allocation66_spill] sm:$0xff] %v11247_v27  ;;  %v4441_v49 = vpop.f32.mrf.mxu0  ;;  %6147 = vmatmul.bf16.gmra.mxu2 %v11247_v27  ;;  %v5407_v5 = vsel %vm5206_vm2, %v5405_v39, %v5406_v41  ;;  %v5414_v14 = vsel %vm5206_vm2, %v5406_v41, %v5413_v26  ;;  %v4631_v26 = vld [vmem:[%s10773_s15 + $0xd8] sm:$0xff]  ;;  %v12417_v41 = vld [vmem:[#allocation71_spill] sm:$0xff] }
 0x549   : > { %v4439_v56 = vadd.f32 %v4438_v61, %v4350_v43  ;;  %v11256_v58 = vpack.c.bf16 %v5414_v14, %v5407_v5  ;;  %v5410_v7 = vsel %vm5206_vm2, %v5408_v8, %v5409_v31  ;;  %v5416_v20 = vsel %vm5206_vm2, %v5409_v31, %v5415_v36  ;;  %v12416_v43 = vld [vmem:[#allocation13_spill] sm:$0xff] }
 0x54a   : > { %v4530_v47 = vpop.f32.mrf.mxu1  ;;  %v11264_v39 = vpack.c.bf16 %v5416_v20, %v5410_v7  ;;  %v4662_v17 = vadd.f32 %v4630_v16, %v4598_v46  ;;  %v2491_v61 = vmax.f32 %v12416_v43, 0.0  ;;  %v8235_v46 = vld [vmem:[%s11915_s7 + $0x178] sm:$0xff]  ;;  %v12418_v16 = vld [vmem:[#allocation18_spill] sm:$0xff] }
 0x54b   : > { %v4528_v25 = vadd.f32 %v4527_v19, %v4439_v56  ;;  %v11260_v32 = vpop.f32.mrf.mxu2  ;;  %6201 = vmatmul.bf16.gmra.mxu3 %v11023_v34  ;;  %6290 = vmatmul.bf16.gmra.mxu0 %v11027_v30  ;;  %v2492_v7 = vmax.f32 %v12418_v16, 0.0 }
 0x54c   : > { %12414 = vst [vmem:[#allocation67_spill] sm:$0xff] %v11260_v32  ;;  %v5418_v19 = vrot.slane %v4662_v17, 7  ;;  %v5064_v18 = vrot.slane %v4662_v17, 1  ;;  %v5156_v2 = vrot.slane %v4662_v17, 2  ;;  %6519 = vmatpush.bf16.msra.mxu3 %v8235_v46 }
 0x54d   : > { %12415 = vst [vmem:[#allocation56_spill] sm:$0xff] %v11264_v39  ;;  %6379 = vmatmul.bf16.gmra.mxu1 %v11048_v33  ;;  %v4567_v24 = vmax.f32 %v4528_v25, 0.0 }
 0x54e   : > { %v4352_v12 = vpop.f32.mrf.mxu3  ;;  %v5420_v17 = vrot.slane %v5064_v18, 7 }
 0x54f   : > { %v4599_v8 = vadd.f32 %v4567_v24, %v2491_v61  ;;  %v4353_v31 = vadd.f32 %v4352_v12, %v12417_v41  ;;  %v12420_v12 = vld [vmem:[#allocation79_spill] sm:$0xff]  ;;  %v12421_v41 = vld [vmem:[#allocation72_spill] sm:$0xff] }
 0x550   : > { %v4443_v36 = vpop.f32.mrf.mxu0  ;;  %v4266_v33 = vadd.f32 %v12421_v41, %v12420_v12 }
 0x551   : > { %v4663_v5 = vadd.f32 %v4631_v26, %v4599_v8  ;;  %v4442_v14 = vadd.f32 %v4441_v49, %v4353_v31  ;;  %v5419_v49 = vsel %vm5206_vm2, %v10721_v10, %v5418_v19  ;;  %v5423_v26 = vrot.slane %v5156_v2, 7 }
 0x552   : > { %v4532_v56 = vpop.f32.mrf.mxu1 }
 0x553   : > { %v4531_v20 = vadd.f32 %v4530_v47, %v4442_v14  ;;  %v11274_v25 = vpop.f32.mrf.mxu2  ;;  %v5426_v43 = vrot.slane %v4663_v5, 7  ;;  %v5065_v61 = vrot.slane %v4663_v5, 1  ;;  %v5157_v24 = vrot.slane %v4663_v5, 2 }
 0x554   : > { %12419 = vst [vmem:[#allocation25_spill] sm:$0xff] %v11274_v25 }
 0x555   : > { %v4568_v8 = vmax.f32 %v4531_v20, 0.0  ;;  %v5427_v31 = vsel %vm5206_vm2, %v5418_v19, %v5426_v43  ;;  %v5066_v47 = vsel %vm914_vm0, %v5064_v18, %v5065_v61  ;;  %v5428_v14 = vrot.slane %v5065_v61, 7  ;;  %v4632_v43 = vld [vmem:[%s10773_s15 + $0xe0] sm:$0xff] }
 0x556   : > { %v4354_v16 = vpop.f32.mrf.mxu3  ;;  %v11282_v30 = vpack.c.bf16 %v5427_v31, %v5419_v49  ;;  %v5421_v46 = vrot.slane %v5066_v47, 7  ;;  %v5158_v5 = vsel %vm1027_vm1, %v5156_v2, %v5157_v24  ;;  %v5160_v12 = vsel %vm1027_vm1, %v5157_v24, %v12338_v22  ;;  %v8259_v2 = vld [vmem:[%s11915_s7 + $0x238] sm:$0xff] }
 0x557   : > { %v4600_v41 = vadd.f32 %v4568_v8, %v2492_v7  ;;  %v4355_v34 = vadd.f32 %v4354_v16, %v4266_v33  ;;  %v5424_v25 = vrot.slane %v5158_v5, 7  ;;  %v5430_v32 = vrot.slane %v5160_v12, 7  ;;  %v8243_v33 = vld [vmem:[%s11915_s7 + $0x1b8] sm:$0xff]  ;;  %6786 = vmatpush.bf16.msra.mxu2 %v8259_v2 }
 0x558   : > { %12422 = vst [vmem:[#allocation58_spill] sm:$0xff] %v11282_v30  ;;  %v4446_v20 = vpop.f32.mrf.mxu0  ;;  %6152 = vmatmul.bf16.gmra.mxu2 %v11282_v30  ;;  %v5422_v19 = vsel %vm5206_vm2, %v5420_v17, %v5421_v46  ;;  %v5429_v18 = vsel %vm5206_vm2, %v5421_v46, %v5428_v14  ;;  %v8251_v47 = vld [vmem:[%s11915_s7 + $0x1f8] sm:$0xff]  ;;  %6608 = vmatpush.bf16.msra.mxu0 %v8243_v33  ;;  %v12425_v46 = vld [vmem:[#allocation14_spill] sm:$0xff] }
 0x559   : > { %v4444_v61 = vadd.f32 %v4443_v36, %v4355_v34  ;;  %v11297_v7 = vpack.c.bf16 %v5429_v18, %v5422_v19  ;;  %v5425_v24 = vsel %vm5206_vm2, %v5423_v26, %v5424_v25  ;;  %v5431_v17 = vsel %vm5206_vm2, %v5424_v25, %v5430_v32  ;;  %v12424_v26 = vld [vmem:[#allocation37_spill] sm:$0xff]  ;;  %6697 = vmatpush.bf16.msra.mxu1 %v8251_v47 }
 0x55a   : > { %v4535_v49 = vpop.f32.mrf.mxu1  ;;  %v11305_v34 = vpack.c.bf16 %v5431_v17, %v5425_v24  ;;  %v4664_v36 = vadd.f32 %v4632_v43, %v4600_v41  ;;  %v2493_v14 = vmax.f32 %v12424_v26, 0.0  ;;  %v12426_v24 = vld [vmem:[#allocation40_spill] sm:$0xff] }
 0x55b   : > { %v4533_v8 = vadd.f32 %v4532_v56, %v4444_v61  ;;  %v11301_v31 = vpop.f32.mrf.mxu2  ;;  %6206 = vmatmul.bf16.gmra.mxu3 %v11057_v54  ;;  %6295 = vmatmul.bf16.gmra.mxu0 %v11063_v45  ;;  %v4633_v56 = vld [vmem:[%s10773_s15 + $0xe8] sm:$0xff]  ;;  %v2494_v17 = vmax.f32 %v12426_v24, 0.0  ;;  %v12428_v54 = vld [vmem:[#allocation6_spill] sm:$0xff] }
 0x55c   : > { %12423 = vst [vmem:[#allocation20_spill] sm:$0xff] %v11305_v34  ;;  %v5433_v19 = vrot.slane %v4664_v36, 7  ;;  %v5067_v41 = vrot.slane %v4664_v36, 1  ;;  %v5161_v18 = vrot.slane %v4664_v36, 2  ;;  %v4271_v47 = vadd.f32 %v11069_v9, %v12428_v54 }
 0x55d   : > { %6384 = vmatmul.bf16.gmra.mxu1 %v11078_v11  ;;  %v4569_v32 = vmax.f32 %v4533_v8, 0.0 }
 0x55e   : > { %v4357_v25 = vpop.f32.mrf.mxu3 }
 0x55f   : > { %v4601_v16 = vadd.f32 %v4569_v32, %v2493_v14  ;;  %v4358_v5 = vadd.f32 %v4357_v25, %v12425_v46  ;;  %v5434_v14 = vsel %vm5206_vm2, %v10721_v10, %v5433_v19  ;;  %v5435_v32 = vrot.slane %v5067_v41, 7 }
 0x560   : > { %v4448_v12 = vpop.f32.mrf.mxu0  ;;  %v5438_v25 = vrot.slane %v5161_v18, 7 }
 0x561   : > { %v4665_v43 = vadd.f32 %v4633_v56, %v4601_v16  ;;  %v4447_v61 = vadd.f32 %v4446_v20, %v4358_v5 }
 0x562   : > { %v4537_v2 = vpop.f32.mrf.mxu1 }
 0x563   : > { %v4536_v11 = vadd.f32 %v4535_v49, %v4447_v61  ;;  %v11315_v45 = vpop.f32.mrf.mxu2  ;;  %v5441_v8 = vrot.slane %v4665_v43, 7  ;;  %v5068_v33 = vrot.slane %v4665_v43, 1  ;;  %v5162_v26 = vrot.slane %v4665_v43, 2 }
 0x564   : > { %12427 = vst [vmem:[#allocation57_spill] sm:$0xff] %v11315_v45 }
 0x565   : > { %v4570_v36 = vmax.f32 %v4536_v11, 0.0  ;;  %v5442_v20 = vsel %vm5206_vm2, %v5433_v19, %v5441_v8  ;;  %v5069_v56 = vsel %vm914_vm0, %v5067_v41, %v5068_v33  ;;  %v5443_v49 = vrot.slane %v5068_v33, 7  ;;  %v11334_v8 = vld [vmem:[%s11916_s8] ss:$0 sm:$0xff] }
 0x566   : > { %v4359_v16 = vpop.f32.mrf.mxu3  ;;  %v11323_v46 = vpack.c.bf16 %v5442_v20, %v5434_v14  ;;  %v5436_v5 = vrot.slane %v5069_v56, 7  ;;  %v5163_v43 = vsel %vm1027_vm1, %v5161_v18, %v5162_v26  ;;  %v5165_v54 = vsel %vm1027_vm1, %v5162_v26, %v12338_v22  ;;  %v4634_v18 = vld [vmem:[%s10773_s15 + $0xf0] sm:$0xff] }
 0x567   : > { %v4602_v9 = vadd.f32 %v4570_v36, %v2494_v17  ;;  %v4360_v61 = vadd.f32 %v4359_v16, %v4271_v47  ;;  %v5439_v24 = vrot.slane %v5163_v43, 7  ;;  %v5445_v45 = vrot.slane %v5165_v54, 7 }
 0x568   : > { %12429 = vst [vmem:[#allocation61_spill] sm:$0xff] %v11323_v46  ;;  %6157 = vmatmul.bf16.gmra.mxu2 %v11323_v46  ;;  %v6261_v11 = vpop.f32.mrf.mxu0  ;;  %v5437_v19 = vsel %vm5206_vm2, %v5435_v32, %v5436_v5  ;;  %v5444_v41 = vsel %vm5206_vm2, %v5436_v5, %v5443_v49  ;;  %v6084_v16 = vadd.f32 %v11334_v8, %v11087_v28  ;;  %v4635_v5 = vld [vmem:[%s10773_s15 + $0xf8] sm:$0xff] }
 0x569   : > { %v4449_v33 = vadd.f32 %v4448_v12, %v4360_v61  ;;  %v11337_v17 = vpack.c.bf16 %v5444_v41, %v5437_v19  ;;  %v5440_v47 = vsel %vm5206_vm2, %v5438_v25, %v5439_v24  ;;  %v5446_v14 = vsel %vm5206_vm2, %v5439_v24, %v5445_v45  ;;  %v12431_v12 = vld [vmem:[#allocation47_spill] sm:$0xff] }
 0x56a   : > { %v6350_v26 = vpop.f32.mrf.mxu1  ;;  %v11345_v32 = vpack.c.bf16 %v5446_v14, %v5440_v47  ;;  %v4666_v56 = vadd.f32 %v4634_v18, %v4602_v9  ;;  %v2495_v49 = vmax.f32 %v12431_v12, 0.0  ;;  %v8234_v9 = vld [vmem:[%s11915_s7 + $0x170] sm:$0xff] }
 0x56b   : > { %v4538_v36 = vadd.f32 %v4537_v2, %v4449_v33  ;;  %v11341_v20 = vpop.f32.mrf.mxu2  ;;  %6211 = vmatmul.bf16.gmra.mxu3 %v11089_v3  ;;  %6300 = vmatmul.bf16.gmra.mxu0 %v11095_v50 }
 0x56c   : > { %12430 = vst [vmem:[#allocation51_spill] sm:$0xff] %v11345_v32  ;;  %v5448_v61 = vrot.slane %v4666_v56, 7  ;;  %v5168_v24 = vrot.slane %v4666_v56, 1  ;;  %v5172_v19 = vrot.slane %v4666_v56, 2  ;;  %6520 = vmatpush.bf16.msra.mxu3 %v8234_v9 }
 0x56d   : > { %6389 = vmatmul.bf16.gmra.mxu1 %v11113_v51  ;;  %v4571_v25 = vmax.f32 %v4538_v36, 0.0 }
 0x56e   : > { %v6172_v45 = vpop.f32.mrf.mxu3  ;;  %v5449_v56 = vsel %vm5206_vm2, %v10721_v10, %v5448_v61 }
 0x56f   : > { %v4603_v2 = vadd.f32 %v4571_v25, %v2495_v49  ;;  %v6173_v43 = vadd.f32 %v6172_v45, %v6084_v16  ;;  %v6086_v49 = vadd.f32 %v11334_v8, %v11105_v37  ;;  %v5453_v16 = vrot.slane %v5172_v19, 7 }
 0x570   : > { %v6263_v54 = vpop.f32.mrf.mxu0 }
 0x571   : > { %v4667_v41 = vadd.f32 %v4635_v5, %v4603_v2  ;;  %v6262_v33 = vadd.f32 %v6261_v11, %v6173_v43  ;;  %v5450_v11 = vrot.slane %v5168_v24, 7 }
 0x572   : > { %v6352_v47 = vpop.f32.mrf.mxu1 }
 0x573   : > { %v11355_v18 = vpop.f32.mrf.mxu2  ;;  %v5456_v28 = vrot.slane %v4667_v41, 7  ;;  %v11357_v14 = vadd.f32 %v6350_v26, %v6262_v33  ;;  %v5169_v36 = vrot.slane %v4667_v41, 1  ;;  %v5173_v12 = vrot.slane %v4667_v41, 2 }
 0x575   : > { %v5457_v25 = vsel %vm5206_vm2, %v5448_v61, %v5456_v28  ;;  %v5170_v5 = vsel %vm914_vm0, %v5168_v24, %v5169_v36  ;;  %v5458_v45 = vrot.slane %v5169_v36, 7  ;;  %v5174_v2 = vsel %vm1027_vm1, %v5172_v19, %v5173_v12 }
 0x576   : > { %v6174_v43 = vpop.f32.mrf.mxu3  ;;  %v11366_v26 = vpack.c.bf16 %v5457_v25, %v5449_v56  ;;  %v5451_v33 = vrot.slane %v5170_v5, 7  ;;  %v5176_v41 = vsel %vm1027_vm1, %v5173_v12, %v12338_v22  ;;  %v5454_v37 = vrot.slane %v5174_v2, 7  ;;  %v8258_v56 = vld [vmem:[%s11915_s7 + $0x230] sm:$0xff] }
 0x577   : > { %v6175_v9 = vadd.f32 %v6174_v43, %v6086_v49  ;;  %v5460_v51 = vrot.slane %v5176_v41, 7  ;;  %v8242_v22 = vld [vmem:[%s11915_s7 + $0x1b0] sm:$0xff]  ;;  %6787 = vmatpush.bf16.msra.mxu2 %v8258_v56  ;;  %v6091_v41 = vadd.f32 %v11334_v8, %v11137_v42  ;;  %v6094_v42 = vadd.f32 %v11334_v8, %v11158_v29 }
 0x578   : > { %12432 = vst [vmem:[#allocation64_spill] sm:$0xff] %v11366_v26  ;;  %v6266_v10 = vpop.f32.mrf.mxu0  ;;  %6438 = vmatmul.bf16.vlgmr.msrb.gmra.mxu2 %v10810_v55  ;;  %v5452_v61 = vsel %vm5206_vm2, %v5450_v11, %v5451_v33  ;;  %v5459_v24 = vsel %vm5206_vm2, %v5451_v33, %v5458_v45  ;;  %v5455_v28 = vsel %vm5206_vm2, %v5453_v16, %v5454_v37  ;;  %v8250_v16 = vld [vmem:[%s11915_s7 + $0x1f0] sm:$0xff] }
 0x579   : > { %v6264_v19 = vadd.f32 %v6263_v54, %v6175_v9  ;;  %v11380_v12 = vpack.c.bf16 %v5459_v24, %v5452_v61  ;;  %v5461_v55 = vsel %vm5206_vm2, %v5454_v37, %v5460_v51  ;;  %v6089_v51 = vadd.f32 %v11334_v8, %v11126_v1  ;;  %6609 = vmatpush.bf16.msra.mxu0 %v8242_v22 }
 0x57a   : > { %v6355_v36 = vpop.f32.mrf.mxu1  ;;  %v11383_v49 = vpack.c.bf16 %v5461_v55, %v5455_v28  ;;  %6698 = vmatpush.bf16.msra.mxu1 %v8250_v16  ;;  %v8233_v16 = vld [vmem:[%s11915_s7 + $0x168] sm:$0xff] }
 0x57b   : > { %v11385_v11 = vpop.f32.mrf.mxu2  ;;  %6216 = vmatmul.bf16.gmra.mxu3 %v11122_v0  ;;  %6305 = vmatmul.bf16.gmra.mxu0 %v11130_v48  ;;  %v11389_v54 = vadd.f32 %v6352_v47, %v6264_v19 }
 0x57c   : > { %12433 = vst [vmem:[#allocation53_spill] sm:$0xff] %v11383_v49  ;;  %6521 = vmatpush.bf16.msra.mxu3 %v8233_v16 }
 0x57d   : > { %6394 = vmatmul.bf16.gmra.mxu1 %v11145_v52 }
 0x57e   : > { %v6177_v25 = vpop.f32.mrf.mxu3 }
 0x57f   : > { %v6178_v5 = vadd.f32 %v6177_v25, %v6089_v51 }
 0x580   : > { %v6268_v45 = vpop.f32.mrf.mxu0 }
 0x581   : > { %v6267_v2 = vadd.f32 %v6266_v10, %v6178_v5  ;;  %v6096_v5 = vadd.f32 %v11334_v8, %v11172_v53 }
 0x582   : > { %v6357_v43 = vpop.f32.mrf.mxu1 }
 0x583   : > { %v11397_v33 = vpop.f32.mrf.mxu2  ;;  %v11399_v47 = vadd.f32 %v6355_v36, %v6267_v2 }
 0x586   : > { %v6179_v37 = vpop.f32.mrf.mxu3 }
 0x587   : > { %v6180_v9 = vadd.f32 %v6179_v37, %v6091_v41  ;;  %v8257_v37 = vld [vmem:[%s11915_s7 + $0x228] sm:$0xff] }
 0x588   : > { %v6271_v61 = vpop.f32.mrf.mxu0  ;;  %6443 = vmatmul.bf16.gmra.mxu2 %v10840_v62 }
 0x589   : > { %v6269_v1 = vadd.f32 %v6268_v45, %v6180_v9  ;;  %v8241_v9 = vld [vmem:[%s11915_s7 + $0x1a8] sm:$0xff]  ;;  %6788 = vmatpush.bf16.msra.mxu2 %v8257_v37 }
 0x58a   : > { %v6360_v24 = vpop.f32.mrf.mxu1  ;;  %6610 = vmatpush.bf16.msra.mxu0 %v8241_v9 }
 0x58b   : > { %v11404_v28 = vpop.f32.mrf.mxu2  ;;  %6221 = vmatmul.bf16.gmra.mxu3 %v11154_v40  ;;  %6310 = vmatmul.bf16.gmra.mxu0 %v11162_v60  ;;  %v11408_v10 = vadd.f32 %v6357_v43, %v6269_v1  ;;  %v8249_v1 = vld [vmem:[%s11915_s7 + $0x1e8] sm:$0xff]  ;;  %v12439_v60 = vld [vmem:[#allocation48_spill] sm:$0xff] }
 0x58c   : > { %6699 = vmatpush.bf16.msra.mxu1 %v8249_v1 }
 0x58d   : > { %6399 = vmatmul.bf16.gmra.mxu1 %v11180_v4 }
 0x58e   : > { %v6182_v19 = vpop.f32.mrf.mxu3 }
 0x58f   : > { %v6183_v36 = vadd.f32 %v6182_v19, %v6094_v42 }
 0x590   : > { %v6273_v56 = vpop.f32.mrf.mxu0 }
 0x591   : > { %v6272_v22 = vadd.f32 %v6271_v61, %v6183_v36 }
 0x592   : > { %v6362_v55 = vpop.f32.mrf.mxu1 }
 0x593   : > { %v11416_v51 = vpop.f32.mrf.mxu2  ;;  %v11418_v25 = vadd.f32 %v6360_v24, %v6272_v22  ;;  %v6099_v24 = vadd.f32 %v11334_v8, %v11193_v35 }
 0x596   : > { %v6184_v45 = vpop.f32.mrf.mxu3 }
 0x597   : > { %v6185_v2 = vadd.f32 %v6184_v45, %v6096_v5  ;;  %v6101_v5 = vadd.f32 %v11334_v8, %v11204_v6  ;;  %v6104_v6 = vadd.f32 %v11334_v8, %v11225_v13 }
 0x598   : > { %v6276_v29 = vpop.f32.mrf.mxu0  ;;  %6448 = vmatmul.bf16.gmra.mxu2 %v10876_v57 }
 0x599   : > { %v6274_v43 = vadd.f32 %v6273_v56, %v6185_v2 }
 0x59a   : > { %v6365_v41 = vpop.f32.mrf.mxu1 }
 0x59b   : > { %v11429_v61 = vpop.f32.mrf.mxu2  ;;  %6226 = vmatmul.bf16.gmra.mxu3 %v11189_v59  ;;  %6315 = vmatmul.bf16.gmra.mxu0 %v11197_v44  ;;  %v11433_v53 = vadd.f32 %v6362_v55, %v6274_v43 }
 0x59d   : > { %6404 = vmatmul.bf16.gmra.mxu1 %v11212_v63 }
 0x59e   : > { %v6187_v42 = vpop.f32.mrf.mxu3 }
 0x59f   : > { %v6188_v19 = vadd.f32 %v6187_v42, %v6099_v24 }
 0x5a0   : > { %v6278_v36 = vpop.f32.mrf.mxu0 }
 0x5a1   : > { %v6277_v56 = vadd.f32 %v6276_v29, %v6188_v19 }
 0x5a2   : > { %v6367_v22 = vpop.f32.mrf.mxu1 }
 0x5a3   : > { %v11441_v16 = vpop.f32.mrf.mxu2  ;;  %v11443_v55 = vadd.f32 %v6365_v41, %v6277_v56 }
 0x5a6   : > { %v6189_v45 = vpop.f32.mrf.mxu3 }
 0x5a7   : > { %v6190_v2 = vadd.f32 %v6189_v45, %v6101_v5 }
 0x5a8   : > { %v6281_v43 = vpop.f32.mrf.mxu0  ;;  %6453 = vmatmul.bf16.gmra.mxu2 %v10927_v23 }
 0x5a9   : > { %v6279_v35 = vadd.f32 %v6278_v36, %v6190_v2  ;;  %v8232_v36 = vld [vmem:[%s11915_s7 + $0x160] sm:$0xff] }
 0x5aa   : > { %v6370_v37 = vpop.f32.mrf.mxu1  ;;  %6522 = vmatpush.bf16.msra.mxu3 %v8232_v36  ;;  %v8239_v36 = vld [vmem:[%s11915_s7 + $0x198] sm:$0xff] }
 0x5ab   : > { %v11448_v9 = vpop.f32.mrf.mxu2  ;;  %6231 = vmatmul.bf16.gmra.mxu3 %v11221_v15  ;;  %6320 = vmatmul.bf16.gmra.mxu0 %v11229_v38  ;;  %v11452_v29 = vadd.f32 %v6367_v22, %v6279_v35  ;;  %v6106_v22 = vadd.f32 %v11334_v8, %v11239_v21  ;;  %v12434_v35 = vld [vmem:[#allocation23_spill] sm:$0xff]  ;;  %v8228_v38 = vld [vmem:[%s11915_s7 + $0x140] sm:$0xff] }
 0x5ad   : > { %6409 = vmatmul.bf16.gmra.mxu1 %v11247_v27 }
 0x5ae   : > { %v6192_v41 = vpop.f32.mrf.mxu3 }
 0x5af   : > { %v6193_v1 = vadd.f32 %v6192_v41, %v6104_v6  ;;  %v8240_v41 = vld [vmem:[%s11915_s7 + $0x1a0] sm:$0xff] }
 0x5b0   : > { %v6283_v24 = vpop.f32.mrf.mxu0  ;;  %6611 = vmatpush.bf16.msra.mxu0 %v8240_v41 }
 0x5b1   : > { %v6282_v42 = vadd.f32 %v6281_v43, %v6193_v1  ;;  %v8248_v1 = vld [vmem:[%s11915_s7 + $0x1e0] sm:$0xff] }
 0x5b2   : > { %v6372_v19 = vpop.f32.mrf.mxu1  ;;  %6700 = vmatpush.bf16.msra.mxu1 %v8248_v1  ;;  %v8238_v1 = vld [vmem:[%s11915_s7 + $0x190] sm:$0xff] }
 0x5b3   : > { %v11460_v56 = vpop.f32.mrf.mxu2  ;;  %v11462_v5 = vadd.f32 %v6370_v37, %v6282_v42  ;;  %v8256_v37 = vld [vmem:[%s11915_s7 + $0x220] sm:$0xff]  ;;  %v8231_v42 = vld [vmem:[%s11915_s7 + $0x158] sm:$0xff] }
 0x5b4   : > { %6789 = vmatpush.bf16.msra.mxu2 %v8256_v37  ;;  %6523 = vmatpush.bf16.msra.mxu3 %v8231_v42  ;;  %v8246_v37 = vld [vmem:[%s11915_s7 + $0x1d0] sm:$0xff] }
 0x5b5   : > { %6612 = vmatpush.bf16.msra.mxu0 %v8239_v36  ;;  %v8237_v36 = vld [vmem:[%s11915_s7 + $0x188] sm:$0xff] }
 0x5b6   : > { %v6194_v45 = vpop.f32.mrf.mxu3 }
 0x5b7   : > { %v6195_v2 = vadd.f32 %v6194_v45, %v6106_v22  ;;  %v12435_v22 = vld [vmem:[#allocation67_spill] sm:$0xff] }
 0x5b8   : > { %v6286_v13 = vpop.f32.mrf.mxu0  ;;  %6458 = vmatmul.bf16.gmra.mxu2 %v12434_v35  ;;  %v6109_v45 = vadd.f32 %v11334_v8, %v12435_v22 }
 0x5b9   : > { %v6284_v6 = vadd.f32 %v6283_v24, %v6195_v2  ;;  %6613 = vmatpush.bf16.msra.mxu0 %v8238_v1 }
 0x5ba   : > { %v6375_v43 = vpop.f32.mrf.mxu1 }
 0x5bb   : > { %v11476_v21 = vpop.f32.mrf.mxu2  ;;  %6236 = vmatmul.bf16.gmra.mxu3 %v11256_v58  ;;  %6325 = vmatmul.bf16.gmra.mxu0 %v11264_v39  ;;  %v11480_v24 = vadd.f32 %v6372_v19, %v6284_v6  ;;  %v8247_v19 = vld [vmem:[%s11915_s7 + $0x1d8] sm:$0xff]  ;;  %v8230_v39 = vld [vmem:[%s11915_s7 + $0x150] sm:$0xff] }
 0x5bc   : > { %6701 = vmatpush.bf16.msra.mxu1 %v8247_v19  ;;  %6524 = vmatpush.bf16.msra.mxu3 %v8230_v39 }
 0x5bd   : > { %6414 = vmatmul.bf16.gmra.mxu1 %v11282_v30  ;;  %6614 = vmatpush.bf16.msra.mxu0 %v8237_v36  ;;  %v6114_v36 = vadd.f32 %v11334_v8, %v11301_v31 }
 0x5be   : > { %v6197_v2 = vpop.f32.mrf.mxu3 }
 0x5bf   : > { %v6198_v6 = vadd.f32 %v6197_v2, %v6109_v45  ;;  %v12436_v45 = vld [vmem:[#allocation25_spill] sm:$0xff]  ;;  %v8245_v2 = vld [vmem:[%s11915_s7 + $0x1c8] sm:$0xff] }
 0x5c0   : > { %v6288_v41 = vpop.f32.mrf.mxu0  ;;  %v6111_v19 = vadd.f32 %v11334_v8, %v12436_v45  ;;  %6702 = vmatpush.bf16.msra.mxu1 %v8246_v37  ;;  %v8236_v37 = vld [vmem:[%s11915_s7 + $0x180] sm:$0xff] }
 0x5c1   : > { %v6287_v49 = vadd.f32 %v6286_v13, %v6198_v6  ;;  %v8229_v13 = vld [vmem:[%s11915_s7 + $0x148] sm:$0xff]  ;;  %v12437_v6 = vld [vmem:[#allocation41_spill] sm:$0xff]  ;;  %v8244_v45 = vld [vmem:[%s11915_s7 + $0x1c0] sm:$0xff]  ;;  %6615 = vmatpush.bf16.msra.mxu0 %v8236_v37 }
 0x5c2   : > { %v6377_v30 = vpop.f32.mrf.mxu1  ;;  %6525 = vmatpush.bf16.msra.mxu3 %v8229_v13 }
 0x5c3   : > { %v11503_v22 = vpop.f32.mrf.mxu2  ;;  %v11505_v42 = vadd.f32 %v6375_v43, %v6287_v49 }
 0x5c4   : > { %6703 = vmatpush.bf16.msra.mxu1 %v8245_v2 }
 0x5c6   : > { %v6199_v39 = vpop.f32.mrf.mxu3  ;;  %6526 = vmatpush.bf16.msra.mxu3 %v8228_v38 }
 0x5c7   : > { %v6200_v49 = vadd.f32 %v6199_v39, %v6111_v19 }
 0x5c8   : > { %v6291_v43 = vpop.f32.mrf.mxu0  ;;  %6463 = vmatmul.bf16.gmra.mxu2 %v12437_v6  ;;  %6704 = vmatpush.bf16.msra.mxu1 %v8244_v45  ;;  %v8255_v45 = vld [vmem:[%s11915_s7 + $0x218] sm:$0xff] }
 0x5c9   : > { %v6289_v1 = vadd.f32 %v6288_v41, %v6200_v49  ;;  %6790 = vmatpush.bf16.msra.mxu2 %v8255_v45 }
 0x5ca   : > { %v6380_v27 = vpop.f32.mrf.mxu1 }
 0x5cb   : > { %v11528_v13 = vpop.f32.mrf.mxu2  ;;  %6241 = vmatmul.bf16.gmra.mxu3 %v11297_v7  ;;  %6330 = vmatmul.bf16.gmra.mxu0 %v11305_v34  ;;  %v11532_v41 = vadd.f32 %v6377_v30, %v6289_v1  ;;  %v12438_v34 = vld [vmem:[#allocation57_spill] sm:$0xff] }
 0x5cc   : > { %v6116_v30 = vadd.f32 %v11334_v8, %v12438_v34  ;;  %v6119_v34 = vadd.f32 %v11334_v8, %v11341_v20 }
 0x5cd   : > { %6419 = vmatmul.bf16.gmra.mxu1 %v11323_v46 }
 0x5ce   : > { %v6202_v19 = vpop.f32.mrf.mxu3 }
 0x5cf   : > { %v6203_v2 = vadd.f32 %v6202_v19, %v6114_v36 }
 0x5d0   : > { %v6293_v39 = vpop.f32.mrf.mxu0 }
 0x5d1   : > { %v6292_v49 = vadd.f32 %v6291_v43, %v6203_v2 }
 0x5d2   : > { %v6382_v63 = vpop.f32.mrf.mxu1 }
 0x5d3   : > { %v11537_v44 = vpop.f32.mrf.mxu2  ;;  %v11539_v4 = vadd.f32 %v6380_v27, %v6292_v49 }
 0x5d6   : > { %v6204_v1 = vpop.f32.mrf.mxu3 }
 0x5d7   : > { %v6205_v46 = vadd.f32 %v6204_v1, %v6116_v30  ;;  %v6121_v1 = vadd.f32 %v11334_v8, %v11355_v18  ;;  %v6124_v18 = vadd.f32 %v11334_v8, %v11385_v11  ;;  %v8254_v11 = vld [vmem:[%s11915_s7 + $0x210] sm:$0xff] }
 0x5d8   : > { %v6296_v38 = vpop.f32.mrf.mxu0  ;;  %6468 = vmatmul.bf16.gmra.mxu2 %v12439_v60 }
 0x5d9   : > { %v6294_v31 = vadd.f32 %v6293_v39, %v6205_v46  ;;  %6791 = vmatpush.bf16.msra.mxu2 %v8254_v11 }
 0x5da   : > { %v6385_v37 = vpop.f32.mrf.mxu1 }
 0x5db   : > { %v11547_v43 = vpop.f32.mrf.mxu2  ;;  %6246 = vmatmul.bf16.gmra.mxu3 %v11337_v17  ;;  %6335 = vmatmul.bf16.gmra.mxu0 %v11345_v32  ;;  %v11551_v27 = vadd.f32 %v6382_v63, %v6294_v31 }
 0x5dd   : > { %6424 = vmatmul.bf16.gmra.mxu1 %v11366_v26 }
 0x5de   : > { %v6207_v46 = vpop.f32.mrf.mxu3 }
 0x5df   : > { %v6208_v36 = vadd.f32 %v6207_v46, %v6119_v34  ;;  %v12440_v34 = vld [vmem:[#allocation11_spill] sm:$0xff] }
 0x5e0   : > { %v6298_v19 = vpop.f32.mrf.mxu0 }
 0x5e1   : > { %v6297_v2 = vadd.f32 %v6296_v38, %v6208_v36  ;;  %v12441_v38 = vld [vmem:[#allocation19_spill] sm:$0xff] }
 0x5e2   : > { %v6387_v39 = vpop.f32.mrf.mxu1 }
 0x5e3   : > { %v11556_v49 = vpop.f32.mrf.mxu2  ;;  %v11558_v30 = vadd.f32 %v6385_v37, %v6297_v2 }
 0x5e6   : > { %v6209_v63 = vpop.f32.mrf.mxu3 }
 0x5e7   : > { %v6210_v31 = vadd.f32 %v6209_v63, %v6121_v1 }
 0x5e8   : > { %v6301_v32 = vpop.f32.mrf.mxu0  ;;  %6473 = vmatmul.bf16.gmra.mxu2 %v11089_v3 }
 0x5e9   : > { %v6299_v45 = vadd.f32 %v6298_v19, %v6210_v31 }
 0x5ea   : > { %v6390_v26 = vpop.f32.mrf.mxu1 }
 0x5eb   : > { %v11563_v20 = vpop.f32.mrf.mxu2  ;;  %6527 = vmatmul.bf16.vlgmr.msra.gmra.mxu3 %v12440_v34  ;;  %6616 = vmatmul.bf16.vlgmr.msra.gmra.mxu0 %v12441_v38  ;;  %v11567_v46 = vadd.f32 %v6387_v39, %v6299_v45  ;;  %v6126_v34 = vadd.f32 %v11334_v8, %v11397_v33 }
 0x5ed   : > { %12442 = vst [vmem:[#allocation76_spill] sm:$0xff] %v11567_v46  ;;  %6705 = vmatmul.bf16.vlgmr.msra.gmra.mxu1 %v10840_v62 }
 0x5ee   : > { %v6212_v37 = vpop.f32.mrf.mxu3 }
 0x5ef   : > { %v6213_v36 = vadd.f32 %v6212_v37, %v6124_v18  ;;  %v12444_v18 = vld [vmem:[#allocation80_spill] sm:$0xff]  ;;  %v12445_v37 = vld [vmem:[#allocation42_spill] sm:$0xff] }
 0x5f0   : > { %v6303_v2 = vpop.f32.mrf.mxu0 }
 0x5f1   : > { %v6302_v1 = vadd.f32 %v6301_v32, %v6213_v36  ;;  %v6129_v36 = vadd.f32 %v11334_v8, %v11404_v28 }
 0x5f2   : > { %v6392_v63 = vpop.f32.mrf.mxu1 }
 0x5f3   : > { %v11572_v19 = vpop.f32.mrf.mxu2  ;;  %v11574_v31 = vadd.f32 %v6390_v26, %v6302_v1 }
 0x5f5   : > { %12443 = vst [vmem:[#allocation77_spill] sm:$0xff] %v11574_v31 }
 0x5f6   : > { %v6214_v38 = vpop.f32.mrf.mxu3 }
 0x5f7   : > { %v6215_v39 = vadd.f32 %v6214_v38, %v6126_v34 }
 0x5f8   : > { %v6306_v45 = vpop.f32.mrf.mxu0  ;;  %6478 = vmatmul.bf16.gmra.mxu2 %v11122_v0 }
 0x5f9   : > { %v6304_v62 = vadd.f32 %v6303_v2, %v6215_v39 }
 0x5fa   : > { %v6395_v46 = vpop.f32.mrf.mxu1 }
 0x5fb   : > { %v6439_v32 = vpop.f32.mrf.mxu2  ;;  %6532 = vmatmul.bf16.gmra.mxu3 %v12444_v18  ;;  %6621 = vmatmul.bf16.gmra.mxu0 %v12445_v37  ;;  %v11584_v26 = vadd.f32 %v6392_v63, %v6304_v62 }
 0x5fc   : > { %v11587_v33 = vadd.f32 %v6439_v32, %v11357_v14  ;;  %v6131_v14 = vadd.f32 %v11334_v8, %v11416_v51  ;;  %v6134_v51 = vadd.f32 %v11334_v8, %v11429_v61 }
 0x5fd   : > { %6710 = vmatmul.bf16.gmra.mxu1 %v10876_v57 }
 0x5fe   : > { %v6217_v2 = vpop.f32.mrf.mxu3 }
 0x5ff   : > { %v6218_v1 = vadd.f32 %v6217_v2, %v6129_v36  ;;  %v12446_v36 = vld [vmem:[#allocation38_spill] sm:$0xff] }
 0x600   : > { %v6308_v34 = vpop.f32.mrf.mxu0 }
 0x601   : > { %v6307_v38 = vadd.f32 %v6306_v45, %v6218_v1  ;;  %v12447_v45 = vld [vmem:[#allocation35_spill] sm:$0xff] }
 0x602   : > { %v6397_v39 = vpop.f32.mrf.mxu1 }
 0x603   : > { %v6441_v31 = vpop.f32.mrf.mxu2  ;;  %v11592_v18 = vadd.f32 %v6395_v46, %v6307_v38 }
 0x604   : > { %v11595_v63 = vadd.f32 %v6441_v31, %v11389_v54 }
 0x606   : > { %v6219_v62 = vpop.f32.mrf.mxu3 }
 0x607   : > { %v6220_v57 = vadd.f32 %v6219_v62, %v6131_v14 }
 0x608   : > { %v6311_v11 = vpop.f32.mrf.mxu0  ;;  %6483 = vmatmul.bf16.gmra.mxu2 %v11154_v40 }
 0x609   : > { %v6309_v28 = vadd.f32 %v6308_v34, %v6220_v57 }
 0x60a   : > { %v6400_v32 = vpop.f32.mrf.mxu1 }
 0x60b   : > { %v6444_v37 = vpop.f32.mrf.mxu2  ;;  %6537 = vmatmul.bf16.gmra.mxu3 %v12446_v36  ;;  %6626 = vmatmul.bf16.gmra.mxu0 %v12447_v45  ;;  %v11602_v46 = vadd.f32 %v6397_v39, %v6309_v28 }
 0x60c   : > { %v11605_v54 = vadd.f32 %v6444_v37, %v11399_v47  ;;  %v6136_v47 = vadd.f32 %v11334_v8, %v11441_v16 }
 0x60d   : > { %6715 = vmatmul.bf16.gmra.mxu1 %v10927_v23 }
 0x60e   : > { %v6222_v31 = vpop.f32.mrf.mxu3 }
 0x60f   : > { %v6223_v2 = vadd.f32 %v6222_v31, %v6134_v51  ;;  %v12449_v51 = vld [vmem:[#allocation45_spill] sm:$0xff]  ;;  %v6139_v31 = vadd.f32 %v11334_v8, %v11448_v9 }
 0x610   : > { %v6313_v1 = vpop.f32.mrf.mxu0 }
 0x611   : > { %v6312_v34 = vadd.f32 %v6311_v11, %v6223_v2  ;;  %v8253_v11 = vld [vmem:[%s11915_s7 + $0x208] sm:$0xff] }
 0x612   : > { %v6402_v38 = vpop.f32.mrf.mxu1  ;;  %6792 = vmatpush.bf16.msra.mxu2 %v8253_v11 }
 0x613   : > { %v6446_v14 = vpop.f32.mrf.mxu2  ;;  %v11610_v62 = vadd.f32 %v6400_v32, %v6312_v34  ;;  %v12448_v32 = vld [vmem:[#allocation44_spill] sm:$0xff] }
 0x614   : > { %v11613_v57 = vadd.f32 %v6446_v14, %v11408_v10 }
 0x616   : > { %v6224_v39 = vpop.f32.mrf.mxu3 }
 0x617   : > { %v6225_v28 = vadd.f32 %v6224_v39, %v6136_v47 }
 0x618   : > { %v6316_v23 = vpop.f32.mrf.mxu0  ;;  %6488 = vmatmul.bf16.gmra.mxu2 %v11189_v59 }
 0x619   : > { %v6314_v61 = vadd.f32 %v6313_v1, %v6225_v28 }
 0x61a   : > { %v6405_v37 = vpop.f32.mrf.mxu1 }
 0x61b   : > { %v6449_v45 = vpop.f32.mrf.mxu2  ;;  %6542 = vmatmul.bf16.gmra.mxu3 %v12448_v32  ;;  %6631 = vmatmul.bf16.gmra.mxu0 %v12449_v51  ;;  %v11623_v10 = vadd.f32 %v6402_v38, %v6314_v61 }
 0x61c   : > { %v11626_v16 = vadd.f32 %v6449_v45, %v11418_v25  ;;  %v6141_v25 = vadd.f32 %v11334_v8, %v11460_v56  ;;  %v6144_v56 = vadd.f32 %v11334_v8, %v11476_v21 }
 0x61d   : > { %6720 = vmatmul.bf16.gmra.mxu1 %v12434_v35 }
 0x61e   : > { %v6227_v2 = vpop.f32.mrf.mxu3 }
 0x61f   : > { %v6228_v1 = vadd.f32 %v6227_v2, %v6139_v31  ;;  %v12450_v31 = vld [vmem:[#allocation9_spill] sm:$0xff] }
 0x620   : > { %v6318_v34 = vpop.f32.mrf.mxu0 }
 0x621   : > { %v6317_v14 = vadd.f32 %v6316_v23, %v6228_v1  ;;  %v12451_v23 = vld [vmem:[#allocation36_spill] sm:$0xff] }
 0x622   : > { %v6407_v47 = vpop.f32.mrf.mxu1 }
 0x623   : > { %v6451_v39 = vpop.f32.mrf.mxu2  ;;  %v11631_v28 = vadd.f32 %v6405_v37, %v6317_v14 }
 0x624   : > { %v11634_v38 = vadd.f32 %v6451_v39, %v11433_v53 }
 0x626   : > { %v6229_v61 = vpop.f32.mrf.mxu3 }
 0x627   : > { %v6230_v35 = vadd.f32 %v6229_v61, %v6141_v25 }
 0x628   : > { %v6321_v11 = vpop.f32.mrf.mxu0  ;;  %6493 = vmatmul.bf16.gmra.mxu2 %v11221_v15 }
 0x629   : > { %v6319_v9 = vadd.f32 %v6318_v34, %v6230_v35 }
 0x62a   : > { %v6410_v45 = vpop.f32.mrf.mxu1 }
 0x62b   : > { %v6454_v51 = vpop.f32.mrf.mxu2  ;;  %6547 = vmatmul.bf16.gmra.mxu3 %v12450_v31  ;;  %6636 = vmatmul.bf16.gmra.mxu0 %v12451_v23  ;;  %v11641_v37 = vadd.f32 %v6407_v47, %v6319_v9 }
 0x62c   : > { %v11644_v53 = vadd.f32 %v6454_v51, %v11443_v55  ;;  %v6146_v55 = vadd.f32 %v11334_v8, %v11503_v22 }
 0x62d   : > { %6725 = vmatmul.bf16.gmra.mxu1 %v12437_v6 }
 0x62e   : > { %v6232_v2 = vpop.f32.mrf.mxu3 }
 0x62f   : > { %v6233_v1 = vadd.f32 %v6232_v2, %v6144_v56  ;;  %v12453_v56 = vld [vmem:[#allocation24_spill] sm:$0xff]  ;;  %v6149_v2 = vadd.f32 %v11334_v8, %v11528_v13 }
 0x630   : > { %v6323_v14 = vpop.f32.mrf.mxu0 }
 0x631   : > { %v6322_v34 = vadd.f32 %v6321_v11, %v6233_v1  ;;  %v8252_v11 = vld [vmem:[%s11915_s7 + $0x200] sm:$0xff] }
 0x632   : > { %v6412_v39 = vpop.f32.mrf.mxu1  ;;  %6793 = vmatpush.bf16.msra.mxu2 %v8252_v11 }
 0x633   : > { %v6456_v25 = vpop.f32.mrf.mxu2  ;;  %v11649_v61 = vadd.f32 %v6410_v45, %v6322_v34  ;;  %v12452_v45 = vld [vmem:[#allocation17_spill] sm:$0xff] }
 0x634   : > { %v11652_v35 = vadd.f32 %v6456_v25, %v11452_v29 }
 0x636   : > { %v6234_v47 = vpop.f32.mrf.mxu3 }
 0x637   : > { %v6235_v9 = vadd.f32 %v6234_v47, %v6146_v55 }
 0x638   : > { %v6326_v6 = vpop.f32.mrf.mxu0  ;;  %6498 = vmatmul.bf16.gmra.mxu2 %v11256_v58 }
 0x639   : > { %v6324_v21 = vadd.f32 %v6323_v14, %v6235_v9 }
 0x63a   : > { %v6415_v51 = vpop.f32.mrf.mxu1 }
 0x63b   : > { %v6459_v23 = vpop.f32.mrf.mxu2  ;;  %6552 = vmatmul.bf16.gmra.mxu3 %v12452_v45  ;;  %6641 = vmatmul.bf16.gmra.mxu0 %v12453_v56  ;;  %v11662_v29 = vadd.f32 %v6412_v39, %v6324_v21 }
 0x63c   : > { %v11665_v22 = vadd.f32 %v6459_v23, %v11462_v5  ;;  %v6151_v5 = vadd.f32 %v11334_v8, %v11537_v44  ;;  %v6154_v44 = vadd.f32 %v11334_v8, %v11547_v43 }
 0x63d   : > { %6730 = vmatmul.bf16.gmra.mxu1 %v12439_v60 }
 0x63e   : > { %v6237_v1 = vpop.f32.mrf.mxu3 }
 0x63f   : > { %v6238_v14 = vadd.f32 %v6237_v1, %v6149_v2  ;;  %v12454_v2 = vld [vmem:[#allocation43_spill] sm:$0xff] }
 0x640   : > { %v6328_v34 = vpop.f32.mrf.mxu0 }
 0x641   : > { %v6327_v25 = vadd.f32 %v6326_v6, %v6238_v14  ;;  %v12455_v6 = vld [vmem:[#allocation60_spill] sm:$0xff] }
 0x642   : > { %v6417_v55 = vpop.f32.mrf.mxu1 }
 0x643   : > { %v6461_v47 = vpop.f32.mrf.mxu2  ;;  %v11670_v9 = vadd.f32 %v6415_v51, %v6327_v25 }
 0x644   : > { %v11673_v39 = vadd.f32 %v6461_v47, %v11480_v24 }
 0x646   : > { %v6239_v21 = vpop.f32.mrf.mxu3 }
 0x647   : > { %v6240_v60 = vadd.f32 %v6239_v21, %v6151_v5 }
 0x648   : > { %v6331_v11 = vpop.f32.mrf.mxu0  ;;  %6503 = vmatmul.bf16.gmra.mxu2 %v11297_v7 }
 0x649   : > { %v6329_v13 = vadd.f32 %v6328_v34, %v6240_v60 }
 0x64a   : > { %v6420_v23 = vpop.f32.mrf.mxu1 }
 0x64b   : > { %v6464_v56 = vpop.f32.mrf.mxu2  ;;  %6557 = vmatmul.bf16.gmra.mxu3 %v12454_v2  ;;  %6646 = vmatmul.bf16.gmra.mxu0 %v12455_v6  ;;  %v11680_v51 = vadd.f32 %v6417_v55, %v6329_v13 }
 0x64c   : > { %v11683_v24 = vadd.f32 %v6464_v56, %v11505_v42  ;;  %v6156_v42 = vadd.f32 %v11334_v8, %v11556_v49  ;;  %v6159_v49 = vadd.f32 %v11334_v8, %v11563_v20 }
 0x64d   : > { %6735 = vmatmul.bf16.gmra.mxu1 %v11089_v3 }
 0x64e   : > { %v6242_v1 = vpop.f32.mrf.mxu3 }
 0x64f   : > { %v6243_v14 = vadd.f32 %v6242_v1, %v6154_v44 }
 0x650   : > { %v6333_v25 = vpop.f32.mrf.mxu0 }
 0x651   : > { %v6332_v34 = vadd.f32 %v6331_v11, %v6243_v14  ;;  %v12456_v11 = vld [vmem:[#allocation16_spill] sm:$0xff] }
 0x652   : > { %v6422_v47 = vpop.f32.mrf.mxu1 }
 0x653   : > { %v6466_v5 = vpop.f32.mrf.mxu2  ;;  %v11688_v21 = vadd.f32 %v6420_v23, %v6332_v34 }
 0x654   : > { %v11691_v60 = vadd.f32 %v6466_v5, %v11532_v41 }
 0x656   : > { %v6244_v55 = vpop.f32.mrf.mxu3 }
 0x657   : > { %v6245_v13 = vadd.f32 %v6244_v55, %v6156_v42 }
 0x658   : > { %v6336_v3 = vpop.f32.mrf.mxu0  ;;  %6508 = vmatmul.bf16.gmra.mxu2 %v11337_v17 }
 0x659   : > { %v6334_v43 = vadd.f32 %v6333_v25, %v6245_v13 }
 0x65a   : > { %v6425_v56 = vpop.f32.mrf.mxu1 }
 0x65b   : > { %v6469_v6 = vpop.f32.mrf.mxu2  ;;  %6562 = vmatmul.bf16.gmra.mxu3 %v11095_v50  ;;  %6651 = vmatmul.bf16.gmra.mxu0 %v12456_v11  ;;  %v11698_v23 = vadd.f32 %v6422_v47, %v6334_v43 }
 0x65c   : > { %v11701_v41 = vadd.f32 %v6469_v6, %v11539_v4  ;;  %v6161_v4 = vadd.f32 %v11334_v8, %v11572_v19 }
 0x65d   : > { %6740 = vmatmul.bf16.gmra.mxu1 %v11122_v0 }
 0x65e   : > { %v6247_v44 = vpop.f32.mrf.mxu3 }
 0x65f   : > { %v6248_v1 = vadd.f32 %v6247_v44, %v6159_v49 }
 0x660   : > { %v6338_v14 = vpop.f32.mrf.mxu0 }
 0x661   : > { %v6337_v25 = vadd.f32 %v6336_v3, %v6248_v1 }
 0x662   : > { %v6427_v34 = vpop.f32.mrf.mxu1 }
 0x663   : > { %v6471_v5 = vpop.f32.mrf.mxu2  ;;  %v11706_v42 = vadd.f32 %v6425_v56, %v6337_v25 }
 0x664   : > { %v11709_v55 = vadd.f32 %v6471_v5, %v11551_v27 }
 0x666   : > { %v6249_v47 = vpop.f32.mrf.mxu3 }
 0x667   : > { %v6250_v13 = vadd.f32 %v6249_v47, %v6161_v4 }
 0x668   : > { %6513 = vmatmul.bf16.gmra.mxu2 %v11380_v12  ;;  %v6617_v0 = vpop.f32.mrf.mxu0 }
 0x669   : > { %v6339_v20 = vadd.f32 %v6338_v14, %v6250_v13  ;;  %v12457_v14 = vld [vmem:[#allocation76_spill] sm:$0xff]  ;;  %v12459_v13 = vld [vmem:[#allocation50_spill] sm:$0xff] }
 0x66a   : > { %v6706_v43 = vpop.f32.mrf.mxu1 }
 0x66b   : > { %v6474_v6 = vpop.f32.mrf.mxu2  ;;  %6567 = vmatmul.bf16.gmra.mxu3 %v11130_v48  ;;  %6656 = vmatmul.bf16.gmra.mxu0 %v11145_v52  ;;  %v11716_v3 = vadd.f32 %v6427_v34, %v6339_v20  ;;  %v12461_v20 = vld [vmem:[#allocation77_spill] sm:$0xff] }
 0x66c   : > { %v11719_v27 = vadd.f32 %v6474_v6, %v11558_v30  ;;  %v12458_v30 = vld [vmem:[#allocation80_spill] sm:$0xff] }
 0x66d   : > { %6745 = vmatmul.bf16.gmra.mxu1 %v11154_v40 }
 0x66e   : > { %v6528_v8 = vpop.f32.mrf.mxu3 }
 0x66f   : > { %v6529_v19 = vadd.f32 %v6528_v8, %v11587_v33  ;;  %v12460_v33 = vld [vmem:[#allocation46_spill] sm:$0xff] }
 0x670   : > { %v6619_v56 = vpop.f32.mrf.mxu0 }
 0x671   : > { %v6618_v11 = vadd.f32 %v6617_v0, %v6529_v19 }
 0x672   : > { %v6708_v49 = vpop.f32.mrf.mxu1 }
 0x673   : > { %v6476_v44 = vpop.f32.mrf.mxu2  ;;  %v11723_v1 = vadd.f32 %v6706_v43, %v6618_v11 }
 0x674   : > { %v11726_v25 = vadd.f32 %v6476_v44, %v12457_v14 }
 0x676   : > { %v6530_v52 = vpop.f32.mrf.mxu3 }
 0x677   : > { %v6531_v34 = vadd.f32 %v6530_v52, %v11595_v63 }
 0x678   : > { %v6622_v5 = vpop.f32.mrf.mxu0  ;;  %6794 = vmatmul.bf16.vlgmr.msra.gmra.mxu2 %v12458_v30 }
 0x679   : > { %v6620_v4 = vadd.f32 %v6619_v56, %v6531_v34 }
 0x67a   : > { %v6711_v40 = vpop.f32.mrf.mxu1 }
 0x67b   : > { %v6479_v47 = vpop.f32.mrf.mxu2  ;;  %6572 = vmatmul.bf16.gmra.mxu3 %v12459_v13  ;;  %6661 = vmatmul.bf16.gmra.mxu0 %v12460_v33  ;;  %v11732_v0 = vadd.f32 %v6708_v49, %v6620_v4  ;;  %v12462_v4 = vld [vmem:[#allocation52_spill] sm:$0xff] }
 0x67c   : > { %v11735_v43 = vadd.f32 %v6479_v47, %v12461_v20 }
 0x67d   : > { %6750 = vmatmul.bf16.gmra.mxu1 %v11189_v59 }
 0x67e   : > { %v6533_v6 = vpop.f32.mrf.mxu3 }
 0x67f   : > { %v6534_v63 = vadd.f32 %v6533_v6, %v11605_v54  ;;  %v12463_v54 = vld [vmem:[#allocation4_spill] sm:$0xff] }
 0x680   : > { %v6624_v8 = vpop.f32.mrf.mxu0 }
 0x681   : > { %v6623_v19 = vadd.f32 %v6622_v5, %v6534_v63 }
 0x682   : > { %v6713_v11 = vpop.f32.mrf.mxu1 }
 0x683   : > { %v6481_v56 = vpop.f32.mrf.mxu2  ;;  %v11739_v44 = vadd.f32 %v6711_v40, %v6623_v19 }
 0x684   : > { %v11742_v14 = vadd.f32 %v6481_v56, %v11584_v26 }
 0x686   : > { %v6535_v52 = vpop.f32.mrf.mxu3 }
 0x687   : > { %v6536_v49 = vadd.f32 %v6535_v52, %v11613_v57  ;;  %v12465_v52 = vld [vmem:[#allocation66_spill] sm:$0xff] }
 0x688   : > { %6799 = vmatmul.bf16.gmra.mxu2 %v12446_v36  ;;  %v6627_v30 = vpop.f32.mrf.mxu0 }
 0x689   : > { %v6625_v34 = vadd.f32 %v6624_v8, %v6536_v49 }
 0x68a   : > { %v6716_v47 = vpop.f32.mrf.mxu1 }
 0x68b   : > { %v6484_v59 = vpop.f32.mrf.mxu2  ;;  %6577 = vmatmul.bf16.gmra.mxu3 %v12462_v4  ;;  %6666 = vmatmul.bf16.gmra.mxu0 %v12463_v54  ;;  %v11748_v5 = vadd.f32 %v6713_v11, %v6625_v34 }
 0x68c   : > { %v11751_v40 = vadd.f32 %v6484_v59, %v11592_v18 }
 0x68d   : > { %6755 = vmatmul.bf16.gmra.mxu1 %v11221_v15  ;;  %v12464_v15 = vld [vmem:[#allocation49_spill] sm:$0xff] }
 0x68e   : > { %v6538_v26 = vpop.f32.mrf.mxu3 }
 0x68f   : > { %v6539_v57 = vadd.f32 %v6538_v26, %v11626_v16 }
 0x690   : > { %v6629_v6 = vpop.f32.mrf.mxu0 }
 0x691   : > { %v6628_v33 = vadd.f32 %v6627_v30, %v6539_v57 }
 0x692   : > { %v6718_v8 = vpop.f32.mrf.mxu1 }
 0x693   : > { %v6486_v36 = vpop.f32.mrf.mxu2  ;;  %v11755_v20 = vadd.f32 %v6716_v47, %v6628_v33 }
 0x694   : > { %v11758_v63 = vadd.f32 %v6486_v36, %v11602_v46 }
 0x696   : > { %v6540_v19 = vpop.f32.mrf.mxu3 }
 0x697   : > { %v6541_v11 = vadd.f32 %v6540_v19, %v11634_v38 }
 0x698   : > { %6804 = vmatmul.bf16.gmra.mxu2 %v12448_v32  ;;  %v6632_v46 = vpop.f32.mrf.mxu0 }
 0x699   : > { %v6630_v18 = vadd.f32 %v6629_v6, %v6541_v11  ;;  %v12466_v6 = vld [vmem:[#allocation56_spill] sm:$0xff] }
 0x69a   : > { %v6721_v38 = vpop.f32.mrf.mxu1  ;;  %v12468_v11 = vld [vmem:[#allocation20_spill] sm:$0xff] }
 0x69b   : > { %v6489_v56 = vpop.f32.mrf.mxu2  ;;  %6582 = vmatmul.bf16.gmra.mxu3 %v12464_v15  ;;  %6671 = vmatmul.bf16.gmra.mxu0 %v12465_v52  ;;  %v11764_v16 = vadd.f32 %v6718_v8, %v6630_v18  ;;  %v12469_v18 = vld [vmem:[#allocation61_spill] sm:$0xff] }
 0x69c   : > { %v11767_v49 = vadd.f32 %v6489_v56, %v11610_v62 }
 0x69d   : > { %6760 = vmatmul.bf16.gmra.mxu1 %v11256_v58 }
 0x69e   : > { %v6543_v34 = vpop.f32.mrf.mxu3 }
 0x69f   : > { %v6544_v30 = vadd.f32 %v6543_v34, %v11644_v53  ;;  %v12467_v53 = vld [vmem:[#allocation58_spill] sm:$0xff] }
 0x6a0   : > { %v6634_v33 = vpop.f32.mrf.mxu0 }
 0x6a1   : > { %v6633_v59 = vadd.f32 %v6632_v46, %v6544_v30 }
 0x6a2   : > { %v6723_v58 = vpop.f32.mrf.mxu1 }
 0x6a3   : > { %v6491_v32 = vpop.f32.mrf.mxu2  ;;  %v11771_v54 = vadd.f32 %v6721_v38, %v6633_v59  ;;  %v12474_v38 = vld [vmem:[#allocation54_spill] sm:$0xff] }
 0x6a4   : > { %v11774_v47 = vadd.f32 %v6491_v32, %v11623_v10 }
 0x6a6   : > { %v6545_v26 = vpop.f32.mrf.mxu3 }
 0x6a7   : > { %v6546_v57 = vadd.f32 %v6545_v26, %v11652_v35 }
 0x6a8   : > { %6809 = vmatmul.bf16.gmra.mxu2 %v12450_v31 }
 0x6a9   : > { %v6635_v62 = vadd.f32 %v6634_v33, %v6546_v57 }
 0x6ab   : > { %v6494_v36 = vpop.f32.mrf.mxu2  ;;  %6587 = vmatmul.bf16.gmra.mxu3 %v12466_v6  ;;  %6676 = vmatmul.bf16.gmra.mxu0 %v12467_v53  ;;  %v11780_v8 = vadd.f32 %v6723_v58, %v6635_v62 }
 0x6ac   : > { %v11783_v19 = vadd.f32 %v6494_v36, %v11631_v28 }
 0x6ad   : > { %6765 = vmatmul.bf16.gmra.mxu1 %v11297_v7 }
 0x6b3   : > { %v6496_v10 = vpop.f32.mrf.mxu2 }
 0x6b4   : > { %v11787_v35 = vadd.f32 %v6496_v10, %v11641_v37  ;;  %v12470_v37 = vld [vmem:[#allocation51_spill] sm:$0xff] }
 0x6b8   : > { %6814 = vmatmul.bf16.gmra.mxu2 %v12452_v45  ;;  %v12471_v45 = vld [vmem:[#allocation64_spill] sm:$0xff] }
 0x6bb   : > { %v6499_v31 = vpop.f32.mrf.mxu2  ;;  %6592 = vmatmul.bf16.gmra.mxu3 %v12468_v11  ;;  %6681 = vmatmul.bf16.gmra.mxu0 %v12469_v18 }
 0x6bc   : > { %v11793_v56 = vadd.f32 %v6499_v31, %v11649_v61 }
 0x6bd   : > { %6770 = vmatmul.bf16.gmra.mxu1 %v11337_v17 }
 0x6c3   : > { %v6501_v28 = vpop.f32.mrf.mxu2 }
 0x6c4   : > { %v11797_v52 = vadd.f32 %v6501_v28, %v11662_v29  ;;  %v12472_v29 = vld [vmem:[#allocation53_spill] sm:$0xff] }
 0x6c8   : > { %6819 = vmatmul.bf16.gmra.mxu2 %v12454_v2  ;;  %v12473_v2 = vld [vmem:[#allocation65_spill] sm:$0xff] }
 0x6cb   : > { %v6504_v7 = vpop.f32.mrf.mxu2  ;;  %6597 = vmatmul.bf16.gmra.mxu3 %v12470_v37  ;;  %6686 = vmatmul.bf16.gmra.mxu0 %v12471_v45 }
 0x6cc   : > { %v11803_v46 = vadd.f32 %v6504_v7, %v11670_v9 }
 0x6cd   : > { %6775 = vmatmul.bf16.gmra.mxu1 %v11380_v12 }
 0x6d3   : > { %v6506_v61 = vpop.f32.mrf.mxu2 }
 0x6d4   : > { %v11807_v34 = vadd.f32 %v6506_v61, %v11680_v51 }
 0x6d8   : > { %6824 = vmatmul.bf16.gmra.mxu2 %v11095_v50 }
 0x6db   : > { %v6509_v17 = vpop.f32.mrf.mxu2  ;;  %6602 = vmatmul.bf16.gmra.mxu3 %v12472_v29  ;;  %6691 = vmatmul.bf16.gmra.mxu0 %v12473_v2 }
 0x6dc   : > { %v11813_v30 = vadd.f32 %v6509_v17, %v11688_v21 }
 0x6dd   : > { %6780 = vmatmul.bf16.gmra.mxu1 %v12474_v38 }
 0x6e3   : > { %v6511_v9 = vpop.f32.mrf.mxu2 }
 0x6e4   : > { %v11817_v12 = vadd.f32 %v6511_v9, %v11698_v23  ;;  %v6548_v23 = vpop.f32.mrf.mxu3 }
 0x6e8   : > { %6829 = vmatmul.bf16.gmra.mxu2 %v11130_v48 }
 0x6eb   : > { %v6514_v51 = vpop.f32.mrf.mxu2 }
 0x6ec   : > { %v11821_v50 = vadd.f32 %v6514_v51, %v11706_v42  ;;  %v6550_v33 = vpop.f32.mrf.mxu3 }
 0x6f3   : > { %v6516_v59 = vpop.f32.mrf.mxu2 }
 0x6f4   : > { %v11824_v32 = vadd.f32 %v6516_v59, %v11716_v3 }
 0x6f8   : > { %6834 = vmatmul.bf16.gmra.mxu2 %v12459_v13  ;;  %v6637_v13 = vpop.f32.mrf.mxu0 }
 0x6fb   : > { %v6795_v21 = vpop.f32.mrf.mxu2 }
 0x6fc   : > { %v6796_v26 = vadd.f32 %v6795_v21, %v11723_v1  ;;  %v6726_v1 = vpop.f32.mrf.mxu1 }
 0x6fe   : > { %v6875_v48 = vmax.f32 %v6796_v26, 0.0 }
 0x700   : > { %6907 = vst [vmem:[%s11833_s17] sm:$0xff] %v6875_v48  ;;  %v6639_v53 = vpop.f32.mrf.mxu0  ;;  %v6549_v48 = vadd.f32 %v6548_v23, %v11665_v22 }
 0x703   : > { %v6797_v42 = vpop.f32.mrf.mxu2 }
 0x704   : > { %v6798_v3 = vadd.f32 %v6797_v42, %v11732_v0  ;;  %v6728_v31 = vpop.f32.mrf.mxu1  ;;  %v6553_v0 = vpop.f32.mrf.mxu3 }
 0x706   : > { %v6876_v57 = vmax.f32 %v6798_v3, 0.0 }
 0x708   : > { %6908 = vst [vmem:[%s11833_s17 + $0x8] sm:$0xff] %v6876_v57  ;;  %6839 = vmatmul.bf16.gmra.mxu2 %v12462_v4  ;;  %v6642_v4 = vpop.f32.mrf.mxu0 }
 0x70b   : > { %v6800_v62 = vpop.f32.mrf.mxu2 }
 0x70c   : > { %v6801_v58 = vadd.f32 %v6800_v62, %v11739_v44  ;;  %v6731_v61 = vpop.f32.mrf.mxu1  ;;  %v6555_v17 = vpop.f32.mrf.mxu3  ;;  %v6638_v62 = vadd.f32 %v6637_v13, %v6549_v48 }
 0x70e   : > { %v6877_v36 = vmax.f32 %v6801_v58, 0.0 }
 0x710   : > { %6909 = vst [vmem:[%s11833_s17 + $0x10] sm:$0xff] %v6877_v36  ;;  %v6644_v9 = vpop.f32.mrf.mxu0  ;;  %v6551_v36 = vadd.f32 %v6550_v33, %v11673_v39 }
 0x712   : > { %v6640_v23 = vadd.f32 %v6639_v53, %v6551_v36 }
 0x713   : > { %v6802_v10 = vpop.f32.mrf.mxu2 }
 0x714   : > { %v6803_v18 = vadd.f32 %v6802_v10, %v11748_v5  ;;  %v6733_v51 = vpop.f32.mrf.mxu1 }
 0x716   : > { %v6878_v28 = vmax.f32 %v6803_v18, 0.0 }
 0x718   : > { %6910 = vst [vmem:[%s11833_s17 + $0x18] sm:$0xff] %v6878_v28  ;;  %6844 = vmatmul.bf16.gmra.mxu2 %v12464_v15  ;;  %v6558_v15 = vpop.f32.mrf.mxu3  ;;  %v6647_v26 = vpop.f32.mrf.mxu0 }
 0x71b   : > { %v6805_v7 = vpop.f32.mrf.mxu2 }
 0x71c   : > { %v6806_v45 = vadd.f32 %v6805_v7, %v11755_v20  ;;  %v6736_v42 = vpop.f32.mrf.mxu1 }
 0x71e   : > { %v6879_v44 = vmax.f32 %v6806_v45, 0.0  ;;  %v6554_v45 = vadd.f32 %v6553_v0, %v11683_v24 }
 0x720   : > { %6911 = vst [vmem:[%s11833_s17 + $0x20] sm:$0xff] %v6879_v44  ;;  %v6560_v3 = vpop.f32.mrf.mxu3 }
 0x723   : > { %v6807_v2 = vpop.f32.mrf.mxu2 }
 0x724   : > { %v6808_v38 = vadd.f32 %v6807_v2, %v11764_v16  ;;  %v6738_v18 = vpop.f32.mrf.mxu1 }
 0x726   : > { %v6880_v5 = vmax.f32 %v6808_v38, 0.0 }
 0x728   : > { %6912 = vst [vmem:[%s11833_s17 + $0x28] sm:$0xff] %v6880_v5  ;;  %6849 = vmatmul.bf16.gmra.mxu2 %v12466_v6  ;;  %v6649_v6 = vpop.f32.mrf.mxu0  ;;  %v6563_v22 = vpop.f32.mrf.mxu3 }
 0x72b   : > { %v6810_v59 = vpop.f32.mrf.mxu2 }
 0x72c   : > { %v6811_v21 = vadd.f32 %v6810_v59, %v11771_v54  ;;  %v6727_v54 = vadd.f32 %v6726_v1, %v6638_v62  ;;  %v6741_v38 = vpop.f32.mrf.mxu1  ;;  %v6556_v1 = vadd.f32 %v6555_v17, %v11691_v60  ;;  %v6561_v60 = vadd.f32 %v6560_v3, %v11709_v55 }
 0x72e   : > { %v6881_v20 = vmax.f32 %v6811_v21, 0.0  ;;  %v6645_v24 = vadd.f32 %v6644_v9, %v6556_v1 }
 0x730   : > { %6913 = vst [vmem:[%s11833_s17 + $0x30] sm:$0xff] %v6881_v20  ;;  %v6652_v13 = vpop.f32.mrf.mxu0  ;;  %v6565_v39 = vpop.f32.mrf.mxu3  ;;  %v6734_v48 = vadd.f32 %v6733_v51, %v6645_v24 }
 0x731   : > { %v6566_v3 = vadd.f32 %v6565_v39, %v11726_v25 }
 0x733   : > { %v6812_v16 = vpop.f32.mrf.mxu2 }
 0x734   : > { %v6813_v57 = vadd.f32 %v6812_v16, %v11780_v8  ;;  %v6729_v8 = vadd.f32 %v6728_v31, %v6640_v23  ;;  %v6743_v0 = vpop.f32.mrf.mxu1 }
 0x736   : > { %v6882_v58 = vmax.f32 %v6813_v57, 0.0 }
 0x738   : > { %6914 = vst [vmem:[%s11833_s17 + $0x38] sm:$0xff] %v6882_v58  ;;  %6854 = vmatmul.bf16.gmra.mxu2 %v12468_v11  ;;  %v6643_v11 = vadd.f32 %v6642_v4, %v6554_v45  ;;  %v6654_v21 = vpop.f32.mrf.mxu0  ;;  %v6568_v20 = vpop.f32.mrf.mxu3  ;;  %v6559_v4 = vadd.f32 %v6558_v15, %v11701_v41  ;;  %v6564_v15 = vadd.f32 %v6563_v22, %v11719_v27 }
 0x73a   : > { %v6732_v33 = vadd.f32 %v6731_v61, %v6643_v11  ;;  %v6648_v62 = vadd.f32 %v6647_v26, %v6559_v4  ;;  %v6653_v45 = vadd.f32 %v6652_v13, %v6564_v15  ;;  %v6655_v11 = vadd.f32 %v6654_v21, %v6566_v3 }
 0x73b   : > { %v6815_v10 = vpop.f32.mrf.mxu2 }
 0x73c   : > { %v6816_v28 = vadd.f32 %v6815_v10, %v6727_v54  ;;  %v6746_v61 = vpop.f32.mrf.mxu1  ;;  %v6737_v17 = vadd.f32 %v6736_v42, %v6648_v62  ;;  %v6650_v10 = vadd.f32 %v6649_v6, %v6561_v60  ;;  %v12475_v42 = vld [vmem:[#allocation55_spill] sm:$0xff]  ;;  %v6744_v1 = vadd.f32 %v6743_v0, %v6655_v11 }
 0x73e   : > { %v6883_v7 = vmax.f32 %v6816_v28, 0.0  ;;  %v6739_v26 = vadd.f32 %v6738_v18, %v6650_v10 }
 0x740   : > { %6915 = vst [vmem:[%s11833_s17 + $0x40] sm:$0xff] %v6883_v7  ;;  %v6657_v58 = vpop.f32.mrf.mxu0  ;;  %v6570_v9 = vpop.f32.mrf.mxu3 }
 0x741   : > { %v6571_v39 = vadd.f32 %v6570_v9, %v11742_v14 }
 0x743   : > { %v6817_v44 = vpop.f32.mrf.mxu2 }
 0x744   : > { %v6818_v2 = vadd.f32 %v6817_v44, %v6729_v8  ;;  %v6748_v23 = vpop.f32.mrf.mxu1  ;;  %v6742_v8 = vadd.f32 %v6741_v38, %v6653_v45 }
 0x746   : > { %v6884_v5 = vmax.f32 %v6818_v2, 0.0 }
 0x748   : > { %6916 = vst [vmem:[%s11833_s17 + $0x48] sm:$0xff] %v6884_v5  ;;  %6859 = vmatmul.bf16.gmra.mxu2 %v12470_v37  ;;  %v6659_v51 = vpop.f32.mrf.mxu0  ;;  %v6569_v5 = vadd.f32 %v6568_v20, %v11735_v43 }
 0x74b   : > { %v6820_v53 = vpop.f32.mrf.mxu2 }
 0x74c   : > { %v6821_v59 = vadd.f32 %v6820_v53, %v6732_v33  ;;  %v6751_v27 = vpop.f32.mrf.mxu1 }
 0x74e   : > { %v6885_v31 = vmax.f32 %v6821_v59, 0.0  ;;  %v6658_v59 = vadd.f32 %v6657_v58, %v6569_v5 }
 0x750   : > { %6917 = vst [vmem:[%s11833_s17 + $0x50] sm:$0xff] %v6885_v31  ;;  %v6662_v6 = vpop.f32.mrf.mxu0  ;;  %v6747_v21 = vadd.f32 %v6746_v61, %v6658_v59 }
 0x753   : > { %v6822_v16 = vpop.f32.mrf.mxu2 }
 0x754   : > { %v6823_v57 = vadd.f32 %v6822_v16, %v6734_v48  ;;  %v6753_v25 = vpop.f32.mrf.mxu1  ;;  %v6660_v48 = vadd.f32 %v6659_v51, %v6571_v39 }
 0x756   : > { %v6886_v37 = vmax.f32 %v6823_v57, 0.0  ;;  %v6749_v20 = vadd.f32 %v6748_v23, %v6660_v48 }
 0x758   : > { %6918 = vst [vmem:[%s11833_s17 + $0x58] sm:$0xff] %v6886_v37  ;;  %6864 = vmatmul.bf16.gmra.mxu2 %v12472_v29  ;;  %v6573_v29 = vpop.f32.mrf.mxu3  ;;  %v6664_v53 = vpop.f32.mrf.mxu0 }
 0x759   : > { %v6574_v43 = vadd.f32 %v6573_v29, %v11751_v40 }
 0x75b   : > { %v6825_v36 = vpop.f32.mrf.mxu2  ;;  %v6663_v60 = vadd.f32 %v6662_v6, %v6574_v43 }
 0x75c   : > { %v6826_v54 = vadd.f32 %v6825_v36, %v6737_v17  ;;  %v6756_v0 = vpop.f32.mrf.mxu1 }
 0x75d   : > { %v6752_v9 = vadd.f32 %v6751_v27, %v6663_v60 }
 0x75e   : > { %v6887_v41 = vmax.f32 %v6826_v54, 0.0 }
 0x760   : > { %6919 = vst [vmem:[%s11833_s17 + $0x60] sm:$0xff] %v6887_v41  ;;  %v6575_v22 = vpop.f32.mrf.mxu3  ;;  %v6667_v57 = vpop.f32.mrf.mxu0 }
 0x761   : > { %v6576_v61 = vadd.f32 %v6575_v22, %v11758_v63 }
 0x763   : > { %v6827_v28 = vpop.f32.mrf.mxu2  ;;  %v6665_v51 = vadd.f32 %v6664_v53, %v6576_v61 }
 0x764   : > { %v6828_v7 = vadd.f32 %v6827_v28, %v6739_v26  ;;  %v6758_v54 = vpop.f32.mrf.mxu1 }
 0x765   : > { %v6754_v26 = vadd.f32 %v6753_v25, %v6665_v51 }
 0x766   : > { %v6888_v55 = vmax.f32 %v6828_v7, 0.0 }
 0x768   : > { %6920 = vst [vmem:[%s11833_s17 + $0x68] sm:$0xff] %v6888_v55  ;;  %6869 = vmatmul.bf16.gmra.mxu2 %v12475_v42  ;;  %v6578_v38 = vpop.f32.mrf.mxu3  ;;  %v6669_v14 = vpop.f32.mrf.mxu0 }
 0x769   : > { %v6579_v15 = vadd.f32 %v6578_v38, %v11767_v49 }
 0x76b   : > { %v6830_v44 = vpop.f32.mrf.mxu2  ;;  %v6668_v29 = vadd.f32 %v6667_v57, %v6579_v15 }
 0x76c   : > { %v6831_v2 = vadd.f32 %v6830_v44, %v6742_v8  ;;  %v6761_v45 = vpop.f32.mrf.mxu1 }
 0x76d   : > { %v6757_v3 = vadd.f32 %v6756_v0, %v6668_v29 }
 0x76e   : > { %v6889_v18 = vmax.f32 %v6831_v2, 0.0 }
 0x770   : > { %6921 = vst [vmem:[%s11833_s17 + $0x70] sm:$0xff] %v6889_v18  ;;  %v6580_v62 = vpop.f32.mrf.mxu3  ;;  %v6672_v28 = vpop.f32.mrf.mxu0 }
 0x771   : > { %v6581_v42 = vadd.f32 %v6580_v62, %v11774_v47 }
 0x773   : > { %v6832_v13 = vpop.f32.mrf.mxu2  ;;  %v6670_v2 = vadd.f32 %v6669_v14, %v6581_v42 }
 0x774   : > { %v6833_v33 = vadd.f32 %v6832_v13, %v6744_v1  ;;  %v6763_v49 = vpop.f32.mrf.mxu1 }
 0x775   : > { %v6759_v22 = vadd.f32 %v6758_v54, %v6670_v2 }
 0x776   : > { %v6890_v24 = vmax.f32 %v6833_v33, 0.0 }
 0x778   : > { %6922 = vst [vmem:[%s11833_s17 + $0x78] sm:$0xff] %v6890_v24  ;;  %v6583_v41 = vpop.f32.mrf.mxu3  ;;  %v6674_v44 = vpop.f32.mrf.mxu0 }
 0x779   : > { %v6584_v18 = vadd.f32 %v6583_v41, %v11783_v19 }
 0x77b   : > { %v6835_v31 = vpop.f32.mrf.mxu2  ;;  %v6673_v13 = vadd.f32 %v6672_v28, %v6584_v18 }
 0x77c   : > { %v6836_v4 = vadd.f32 %v6835_v31, %v6747_v21  ;;  %v6766_v59 = vpop.f32.mrf.mxu1 }
 0x77d   : > { %v6762_v24 = vadd.f32 %v6761_v45, %v6673_v13 }
 0x77e   : > { %v6891_v16 = vmax.f32 %v6836_v4, 0.0 }
 0x780   : > { %6923 = vst [vmem:[%s11833_s17 + $0x80] sm:$0xff] %v6891_v16  ;;  %v6585_v63 = vpop.f32.mrf.mxu3  ;;  %v6677_v53 = vpop.f32.mrf.mxu0 }
 0x781   : > { %v6586_v47 = vadd.f32 %v6585_v63, %v11787_v35 }
 0x783   : > { %v6837_v37 = vpop.f32.mrf.mxu2  ;;  %v6675_v21 = vadd.f32 %v6674_v44, %v6586_v47 }
 0x784   : > { %v6838_v58 = vadd.f32 %v6837_v37, %v6749_v20  ;;  %v6768_v57 = vpop.f32.mrf.mxu1 }
 0x785   : > { %v6764_v48 = vadd.f32 %v6763_v49, %v6675_v21 }
 0x786   : > { %v6892_v17 = vmax.f32 %v6838_v58, 0.0 }
 0x788   : > { %6924 = vst [vmem:[%s11833_s17 + $0x88] sm:$0xff] %v6892_v17  ;;  %v6588_v27 = vpop.f32.mrf.mxu3  ;;  %v6679_v19 = vpop.f32.mrf.mxu0 }
 0x789   : > { %v6589_v4 = vadd.f32 %v6588_v27, %v11793_v56 }
 0x78b   : > { %v6840_v36 = vpop.f32.mrf.mxu2  ;;  %v6678_v20 = vadd.f32 %v6677_v53, %v6589_v4 }
 0x78c   : > { %v6841_v10 = vadd.f32 %v6840_v36, %v6752_v9  ;;  %v6771_v61 = vpop.f32.mrf.mxu1 }
 0x78d   : > { %v6767_v37 = vadd.f32 %v6766_v59, %v6678_v20 }
 0x78e   : > { %v6893_v40 = vmax.f32 %v6841_v10, 0.0 }
 0x790   : > { %6925 = vst [vmem:[%s11833_s17 + $0x90] sm:$0xff] %v6893_v40  ;;  %v6590_v25 = vpop.f32.mrf.mxu3  ;;  %v6682_v58 = vpop.f32.mrf.mxu0 }
 0x791   : > { %v6591_v62 = vadd.f32 %v6590_v25, %v11797_v52 }
 0x793   : > { %v6842_v23 = vpop.f32.mrf.mxu2  ;;  %v6680_v14 = vadd.f32 %v6679_v19, %v6591_v62 }
 0x794   : > { %v6843_v7 = vadd.f32 %v6842_v23, %v6754_v26  ;;  %v6773_v52 = vpop.f32.mrf.mxu1 }
 0x795   : > { %v6769_v54 = vadd.f32 %v6768_v57, %v6680_v14 }
 0x796   : > { %v6894_v55 = vmax.f32 %v6843_v7, 0.0 }
 0x798   : > { %6926 = vst [vmem:[%s11833_s17 + $0x98] sm:$0xff] %v6894_v55  ;;  %v6593_v0 = vpop.f32.mrf.mxu3  ;;  %v6684_v51 = vpop.f32.mrf.mxu0 }
 0x799   : > { %v6594_v36 = vadd.f32 %v6593_v0, %v11803_v46 }
 0x79b   : > { %v6845_v8 = vpop.f32.mrf.mxu2  ;;  %v6683_v40 = vadd.f32 %v6682_v58, %v6594_v36 }
 0x79c   : > { %v6846_v6 = vadd.f32 %v6845_v8, %v6757_v3  ;;  %v6776_v46 = vpop.f32.mrf.mxu1 }
 0x79d   : > { %v6772_v23 = vadd.f32 %v6771_v61, %v6683_v40 }
 0x79e   : > { %v6895_v11 = vmax.f32 %v6846_v6, 0.0 }
 0x7a0   : > { %6927 = vst [vmem:[%s11833_s17 + $0xa0] sm:$0xff] %v6895_v11  ;;  %v6595_v56 = vpop.f32.mrf.mxu3  ;;  %v6687_v63 = vpop.f32.mrf.mxu0 }
 0x7a1   : > { %v6596_v28 = vadd.f32 %v6595_v56, %v11807_v34 }
 0x7a3   : > { %v6847_v5 = vpop.f32.mrf.mxu2  ;;  %v6685_v45 = vadd.f32 %v6684_v51, %v6596_v28 }
 0x7a4   : > { %v6848_v1 = vadd.f32 %v6847_v5, %v6759_v22  ;;  %v6778_v5 = vpop.f32.mrf.mxu1 }
 0x7a5   : > { %v6774_v3 = vadd.f32 %v6773_v52, %v6685_v45 }
 0x7a6   : > { %v6896_v33 = vmax.f32 %v6848_v1, 0.0 }
 0x7a8   : > { %6928 = vst [vmem:[%s11833_s17 + $0xa8] sm:$0xff] %v6896_v33  ;;  %v6598_v26 = vpop.f32.mrf.mxu3  ;;  %v6689_v34 = vpop.f32.mrf.mxu0 }
 0x7a9   : > { %v6599_v42 = vadd.f32 %v6598_v26, %v11813_v30 }
 0x7ab   : > { %v6850_v38 = vpop.f32.mrf.mxu2  ;;  %v6688_v2 = vadd.f32 %v6687_v63, %v6599_v42 }
 0x7ac   : > { %v6851_v39 = vadd.f32 %v6850_v38, %v6762_v24  ;;  %v6781_v25 = vpop.f32.mrf.mxu1 }
 0x7ad   : > { %v6777_v27 = vadd.f32 %v6776_v46, %v6688_v2 }
 0x7ae   : > { %v6897_v31 = vmax.f32 %v6851_v39, 0.0 }
 0x7b0   : > { %6929 = vst [vmem:[%s11833_s17 + $0xb0] sm:$0xff] %v6897_v31  ;;  %v6600_v8 = vpop.f32.mrf.mxu3  ;;  %v6692_v30 = vpop.f32.mrf.mxu0 }
 0x7b1   : > { %v6601_v49 = vadd.f32 %v6600_v8, %v11817_v12 }
 0x7b3   : > { %v6852_v16 = vpop.f32.mrf.mxu2  ;;  %v6690_v13 = vadd.f32 %v6689_v34, %v6601_v49 }
 0x7b4   : > { %v6853_v43 = vadd.f32 %v6852_v16, %v6764_v48 }
 0x7b5   : > { %v6779_v47 = vadd.f32 %v6778_v5, %v6690_v13 }
 0x7b6   : > { %v6898_v35 = vmax.f32 %v6853_v43, 0.0  ;;  %v6783_v43 = vpop.f32.mrf.mxu1 }
 0x7b8   : > { %6930 = vst [vmem:[%s11833_s17 + $0xb8] sm:$0xff] %v6898_v35  ;;  %v6603_v1 = vpop.f32.mrf.mxu3  ;;  %v6694_v19 = vpop.f32.mrf.mxu0 }
 0x7b9   : > { %v6604_v53 = vadd.f32 %v6603_v1, %v11821_v50 }
 0x7bb   : > { %v6855_v60 = vpop.f32.mrf.mxu2  ;;  %v6693_v38 = vadd.f32 %v6692_v30, %v6604_v53 }
 0x7bc   : > { %v6856_v17 = vadd.f32 %v6855_v60, %v6767_v37 }
 0x7bd   : > { %v6782_v21 = vadd.f32 %v6781_v25, %v6693_v38 }
 0x7be   : > { %v6899_v9 = vmax.f32 %v6856_v17, 0.0 }
 0x7c0   : > { %6931 = vst [vmem:[%s11833_s17 + $0xc0] sm:$0xff] %v6899_v9  ;;  %v6605_v12 = vpop.f32.mrf.mxu3 }
 0x7c1   : > { %v6606_v31 = vadd.f32 %v6605_v12, %v11824_v32 }
 0x7c3   : > { %v6857_v10 = vpop.f32.mrf.mxu2  ;;  %v6695_v16 = vadd.f32 %v6694_v19, %v6606_v31 }
 0x7c4   : > { %v6858_v41 = vadd.f32 %v6857_v10, %v6769_v54 }
 0x7c5   : > { %v6784_v50 = vadd.f32 %v6783_v43, %v6695_v16 }
 0x7c6   : > { %v6900_v15 = vmax.f32 %v6858_v41, 0.0 }
 0x7c8   : > { %6932 = vst [vmem:[%s11833_s17 + $0xc8] sm:$0xff] %v6900_v15 }
 0x7cb   : > { %v6860_v7 = vpop.f32.mrf.mxu2 }
 0x7cc   : > { %v6861_v29 = vadd.f32 %v6860_v7, %v6772_v23 }
 0x7ce   : > { %v6901_v55 = vmax.f32 %v6861_v29, 0.0 }
 0x7d0   : > { %6933 = vst [vmem:[%s11833_s17 + $0xd0] sm:$0xff] %v6901_v55 }
 0x7d3   : > { %v6862_v6 = vpop.f32.mrf.mxu2 }
 0x7d4   : > { %v6863_v44 = vadd.f32 %v6862_v6, %v6774_v3 }
 0x7d6   : > { %v6902_v11 = vmax.f32 %v6863_v44, 0.0 }
 0x7d8   : > { %6934 = vst [vmem:[%s11833_s17 + $0xd8] sm:$0xff] %v6902_v11 }
 0x7db   : > { %v6865_v18 = vpop.f32.mrf.mxu2 }
 0x7dc   : > { %v6866_v22 = vadd.f32 %v6865_v18, %v6777_v27 }
 0x7de   : > { %v6903_v33 = vmax.f32 %v6866_v22, 0.0 }
 0x7e0   : > { %6935 = vst [vmem:[%s11833_s17 + $0xe0] sm:$0xff] %v6903_v33 }
 0x7e3   : > { %v6867_v59 = vpop.f32.mrf.mxu2 }
 0x7e4   : > { %v6868_v24 = vadd.f32 %v6867_v59, %v6779_v47 }
 0x7e6   : > { %v6904_v39 = vmax.f32 %v6868_v24, 0.0 }
 0x7e8   : > { %6936 = vst [vmem:[%s11833_s17 + $0xe8] sm:$0xff] %v6904_v39 }
 0x7eb   : > { %v6870_v4 = vpop.f32.mrf.mxu2 }
 0x7ec   : > { %v6871_v48 = vadd.f32 %v6870_v4, %v6782_v21 }
 0x7ee   : > { %v6905_v57 = vmax.f32 %v6871_v48, 0.0 }
 0x7f0   : > { %6937 = vst [vmem:[%s11833_s17 + $0xf0] sm:$0xff] %v6905_v57 }
 0x7f3   : > { %v6872_v0 = vpop.f32.mrf.mxu2 }
 0x7f4   : > { %v6873_v20 = vadd.f32 %v6872_v0, %v6784_v50 }
 0x7f6   : > { %v6906_v35 = vmax.f32 %v6873_v20, 0.0 }
 0x7f8   : > { %6938 = vst [vmem:[%s11833_s17 + $0xf8] sm:$0xff] %v6906_v35 }
 0x7f9 PF: > { %s19_s30 = sadd.s32 1, %s8309_s30  }
 0x7fa   : > { %p16_p4 = scmp.ge.s32.totalorder %s19_s30, 4  }
 0x7fc   :  { %18 = sbr.rel (!%p16_p4) target bundleno = 1 (0x1), region = 120 }

</bundles_post_ra>
